<compile_context>
chip_gen: v7x
topology: tpu7x:2x2x1
jax: 0.10.0
libtpu: 0.0.40
codegen_flags: <defaults>
</compile_context>

<pallas_src>
import functools

import jax
import jax.numpy as jnp
from jax.experimental import pallas as pl
from jax.experimental.pallas import tpu as pltpu


# ----------------------------------------------------------------------------
# 3x3 / stride-1 / pad-1 conv kernel with optional fused input-ReLU and
# optional fused (ReLU + 2x2 max-pool) epilogue emitted as a second output.
# ----------------------------------------------------------------------------
def _conv3x3_kernel(xm_ref, xh_ref, w_ref, b_ref, *outs_and_scratch,
                    apply_input_relu, fuse_pool, fold_dx, tile_h, out_w):
    # xm_ref : (1, TH,  W+2, Cin)  rows [i*TH, i*TH+TH) of the padded input
    # xh_ref : (1, 2,   W+2, Cin)  2-row halo  rows [i*TH+TH, i*TH+TH+2)
    # w_ref  : (3, 3*Cin, Cout) if fold_dx else (3, 3, Cin, Cout)
    # b_ref  : (1, Cout)
    # o_ref  : (1, TH, W, Cout)              pre-activation conv output block
    # p_ref  : (1, TH//2, W//2, Cout)        (only if fuse_pool)
    # acc_ref: VMEM scratch (TH*W, Cout) f32
    if fuse_pool:
        o_ref, p_ref, acc_ref = outs_and_scratch
    else:
        o_ref, acc_ref = outs_and_scratch
        p_ref = None

    th, w = tile_h, out_w
    cin = xm_ref.shape[-1]
    cout = o_ref.shape[-1]

    # Stitch the row block with its 2-row halo: (TH+2, W+2, Cin).
    xt = jnp.concatenate([xm_ref[0], xh_ref[0]], axis=0)
    if apply_input_relu:
        # relu(pad(x)) == pad(relu(x)) because the pad value is 0.
        xt = jnp.maximum(xt, 0.0)

    if fold_dx:
        # Fold the three dx taps into the lane (K) dim once per block, so each
        # dy tap is one contiguous (TH*W, 3*Cin) slab -> 3 matmuls, K = 3*Cin.
        packed = jnp.concatenate(
            [xt[:, 0:w, :], xt[:, 1:w + 1, :], xt[:, 2:w + 2, :]], axis=-1)
        for dy in range(3):
            lhs = packed[dy:dy + th].reshape(th * w, 3 * cin)
            part = jnp.dot(lhs, w_ref[dy], preferred_element_type=jnp.float32)
            if dy == 0:
                acc_ref[...] = part
            else:
                acc_ref[...] += part
    else:
        # Small-Cin path (conv_1, Cin=3): nine taps with K = Cin.
        first = True
        for dy in range(3):
            for dx in range(3):
                lhs = xt[dy:dy + th, dx:dx + w, :].reshape(th * w, cin)
                part = jnp.dot(lhs, w_ref[dy, dx],
                               preferred_element_type=jnp.float32)
                if first:
                    acc_ref[...] = part
                    first = False
                else:
                    acc_ref[...] += part

    acc_ref[...] += b_ref[...]  # (1, Cout) broadcast over the TH*W rows

    o_ref[...] = acc_ref[...].reshape(1, th, w, cout).astype(o_ref.dtype)

    if fuse_pool:
        # Fused ReLU + 2x2 / stride-2 max pool (ReLU and max commute).
        half = (th * w) // 2
        ev = acc_ref[pl.ds(0, half, 2), :]   # even output columns (W is even)
        od = acc_ref[pl.ds(1, half, 2), :]   # odd  output columns
        wmax = jnp.maximum(ev, od)                                # (TH*W/2, C)
        hmax = jnp.max(wmax.reshape(th // 2, 2, w // 2, cout), axis=1)
        p_ref[...] = jnp.maximum(hmax, 0.0).reshape(
            1, th // 2, w // 2, cout).astype(p_ref.dtype)


def _pick_tile_h(h, w, cin, cout, budget_bytes=16 * 1024 * 1024):
    """Largest even row tile that divides H and keeps the VMEM block small."""
    if h % 2 != 0:
        raise ValueError(f"spatial height must be even, got {h}")
    cands = [t for t in (64, 32, 16, 8, 4, 2) if t <= h and h % t == 0]
    for th in cands:
        est = 4 * (2 * (th + 2) * (w + 2) * cin      # main + halo input blocks
                   + (th + 2) * w * 3 * cin          # dx-packed slab
                   + 3 * th * w * cout               # acc + double-buffered out
                   + th * w * cout // 2)             # fused pool output
        if est <= budget_bytes:
            return th
    return cands[-1]


def conv3x3(x, w_packed, b, *, apply_input_relu=False, fuse_pool=False,
            tile_h=None):
    """3x3 / stride-1 / pad-1 conv in NHWC.

    x: (N, H, W, Cin); w_packed: (3, 3*Cin, Cout); b: (Cout,).
    Returns a tuple: (conv_out,) or (conv_out, relu_maxpool2x2(conv_out)).
    """
    n, h, w, cin = x.shape
    cout = w_packed.shape[-1]
    if fuse_pool and (h % 2 or w % 2):
        raise ValueError("fused 2x2 max-pool needs even H and W")
    th = _pick_tile_h(h, w, cin, cout) if tile_h is None else tile_h
    nb = h // th
    wp = w + 2
    fold_dx = (cin % 8 == 0)   # conv_1 (Cin=3) keeps the simple 9-tap path

    # Zero-pad H and W by 1.  allow_input_fusion below lets XLA fuse this pad
    # into the custom call instead of materializing it in HBM.
    xp = jnp.pad(x, ((0, 0), (1, 1), (1, 1), (0, 0)))
    b2 = b.reshape(1, cout)
    if fold_dx:
        w_in = w_packed
        w_spec = pl.BlockSpec((3, 3 * cin, cout), lambda ni, i: (0, 0, 0))
    else:
        w_in = w_packed.reshape(3, 3, cin, cout)
        w_spec = pl.BlockSpec((3, 3, cin, cout), lambda ni, i: (0, 0, 0, 0))

    # Halo rows [i*th+th, i*th+th+2) expressed as a height-2 block index.
    halo_blk = th // 2

    out_shapes = [jax.ShapeDtypeStruct((n, h, w, cout), x.dtype)]
    out_specs = [pl.BlockSpec((1, th, w, cout), lambda ni, i: (ni, i, 0, 0))]
    if fuse_pool:
        out_shapes.append(
            jax.ShapeDtypeStruct((n, h // 2, w // 2, cout), x.dtype))
        out_specs.append(pl.BlockSpec((1, th // 2, w // 2, cout),
                                      lambda ni, i: (ni, i, 0, 0)))

    kernel = functools.partial(
        _conv3x3_kernel, apply_input_relu=apply_input_relu,
        fuse_pool=fuse_pool, fold_dx=fold_dx, tile_h=th, out_w=w)

    return pl.pallas_call(
        kernel,
        out_shape=tuple(out_shapes),
        grid=(n, nb),
        in_specs=[
            pl.BlockSpec((1, th, wp, cin), lambda ni, i: (ni, i, 0, 0)),
            pl.BlockSpec((1, 2, wp, cin),
                         lambda ni, i: (ni, (i + 1) * halo_blk, 0, 0)),
            w_spec,
            pl.BlockSpec((1, cout), lambda ni, i: (0, 0)),
        ],
        out_specs=tuple(out_specs),
        scratch_shapes=[pltpu.VMEM((th * w, cout), jnp.float32)],
        compiler_params=pltpu.CompilerParams(
            dimension_semantics=("parallel", "parallel"),
            allow_input_fusion=[True, True, False, False],
        ),
    )(xp, xp, w_in, b2)


# ----------------------------------------------------------------------------
# VGG19Features: parameters + forward
# ----------------------------------------------------------------------------
def init_vgg19_features_params(key):
    # First five convs of torchvision vgg19.features:
    #   conv_1: 3->64, conv_2: 64->64, conv_3: 64->128,
    #   conv_4: 128->128, conv_5: 128->256   (all 3x3, pad 1)
    # TODO(synk): pretrained torchvision weights cannot be loaded in-script;
    # deterministic synthetic weights are used instead.
    chans = [(3, 64), (64, 64), (64, 128), (128, 128), (128, 256)]
    params = []
    for idx, (cin, cout) in enumerate(chans):
        kw, kb = jax.random.split(jax.random.fold_in(key, idx))
        w_oihw = jax.random.normal(kw, (cout, cin, 3, 3), jnp.float32) * 0.05
        b = jax.random.normal(kb, (cout,), jnp.float32) * 0.05
        w_hwio = jnp.transpose(w_oihw, (2, 3, 1, 0))        # (3, 3, Cin, Cout)
        w_packed = w_hwio.reshape(3, 3 * cin, cout)         # dx folded into K
        params.append((w_packed, b))
    return params


def vgg19_features_forward(x_nchw, params):
    """Returns {'conv_1'..'conv_5': pre-ReLU conv activations} in NCHW."""
    x = jnp.transpose(x_nchw, (0, 2, 3, 1))                 # NCHW -> NHWC
    (w1, b1), (w2, b2), (w3, b3), (w4, b4), (w5, b5) = params

    y1 = conv3x3(x, w1, b1)[0]                                      # conv_1
    y2, p2 = conv3x3(y1, w2, b2, apply_input_relu=True,
                     fuse_pool=True)                  # relu_1+conv_2, relu_2+pool_2 fused
    y3 = conv3x3(p2, w3, b3)[0]                                     # conv_3
    y4, p4 = conv3x3(y3, w4, b4, apply_input_relu=True,
                     fuse_pool=True)                  # relu_3+conv_4, relu_4+pool_4 fused
    y5 = conv3x3(p4, w5, b5)[0]                                     # conv_5
    # TODO(synk): the PyTorch module keeps running vgg layers past conv_5, but
    # they never contribute to the returned dict, so they are skipped here.

    # NOTE: NHWC->NCHW transposes kept only to match the PyTorch layout; a
    # Gram-matrix style consumer could take NHWC directly and skip them.
    to_nchw = lambda t: jnp.transpose(t, (0, 3, 1, 2))
    return {
        'conv_1': to_nchw(y1),
        'conv_2': to_nchw(y2),
        'conv_3': to_nchw(y3),
        'conv_4': to_nchw(y4),
        'conv_5': to_nchw(y5),
    }


# ----------------------------------------------------------------------------
# Pure-XLA reference of the same chain (for in-script validation only).
# ----------------------------------------------------------------------------
def _reference_forward(x_nchw, params):
    x = jnp.transpose(x_nchw, (0, 2, 3, 1))

    def conv(x, w_packed, b):
        cout = w_packed.shape[-1]
        cin = w_packed.shape[1] // 3
        w = w_packed.reshape(3, 3, cin, cout)
        y = jax.lax.conv_general_dilated(
            x, w, window_strides=(1, 1), padding=((1, 1), (1, 1)),
            dimension_numbers=('NHWC', 'HWIO', 'NHWC'),
            precision=jax.lax.Precision.HIGHEST)
        return y + b.reshape(1, 1, 1, -1)

    def pool(x):
        n, h, w, c = x.shape
        return jnp.max(x.reshape(n, h // 2, 2, w // 2, 2, c), axis=(2, 4))

    (w1, b1), (w2, b2), (w3, b3), (w4, b4), (w5, b5) = params
    y1 = conv(x, w1, b1)
    y2 = conv(jax.nn.relu(y1), w2, b2)
    y3 = conv(pool(jax.nn.relu(y2)), w3, b3)
    y4 = conv(jax.nn.relu(y3), w4, b4)
    y5 = conv(pool(jax.nn.relu(y4)), w5, b5)
    to_nchw = lambda t: jnp.transpose(t, (0, 3, 1, 2))
    return {'conv_1': to_nchw(y1), 'conv_2': to_nchw(y2),
            'conv_3': to_nchw(y3), 'conv_4': to_nchw(y4),
            'conv_5': to_nchw(y5)}


if __name__ == "__main__":
    key = jax.random.PRNGKey(0)
    kx, kp = jax.random.split(key)
    # Small NCHW input consistent with the module (3 input channels).
    x = jax.random.normal(kx, (2, 3, 16, 16), jnp.float32)
    params = init_vgg19_features_params(kp)

    outs = jax.jit(vgg19_features_forward)(x, params)
    jax.block_until_ready(outs)

    expected = {'conv_1': (2, 64, 16, 16), 'conv_2': (2, 64, 16, 16),
                'conv_3': (2, 128, 8, 8), 'conv_4': (2, 128, 8, 8),
                'conv_5': (2, 256, 4, 4)}
    for name, shp in expected.items():
        assert outs[name].shape == shp, (name, outs[name].shape)

    ref = _reference_forward(x, params)
    for name in expected:
        err = float(jnp.max(jnp.abs(outs[name] - ref[name])))
        assert err < 2e-2, f"{name}: max abs err {err}"

    print("KERNEL_OK")
</pallas_src>

<mosaic_0001>
module attributes {stable_mosaic.version = 11 : i64} {
  func.func @_conv3x3_kernel(%arg0: i32, %arg1: i32, %arg2: memref<1x16x18x3xf32, #tpu.memory_space<vmem>>, %arg3: memref<1x2x18x3xf32, #tpu.memory_space<vmem>>, %arg4: memref<3x3x3x64xf32, #tpu.memory_space<vmem>>, %arg5: memref<1x64xf32, #tpu.memory_space<vmem>>, %arg6: memref<1x16x16x64xf32, #tpu.memory_space<vmem>>, %arg7: memref<256x64xf32, #tpu.memory_space<vmem>>) attributes {dimension_semantics = [#tpu.dimension_semantics<parallel>, #tpu.dimension_semantics<parallel>], iteration_bounds = array<i64: 2, 1>, scalar_prefetch = 0 : i64, scratch_operands = 1 : i64, tpu.core_type = #tpu.core_type<tc>, window_params = [{transform_indices = @transform_0, window_bounds = array<i64: 1, 16, 18, 3>}, {transform_indices = @transform_1, window_bounds = array<i64: 1, 2, 18, 3>}, {pipeline_mode = #tpu.pipeline_mode<synchronous>, transform_indices = @transform_2, window_bounds = array<i64: 3, 3, 3, 64>}, {pipeline_mode = #tpu.pipeline_mode<synchronous>, transform_indices = @transform_3, window_bounds = array<i64: 1, 64>}, {transform_indices = @transform_4, window_bounds = array<i64: 1, 16, 16, 64>}]} {
    %c0 = arith.constant 0 : index
    %c0_0 = arith.constant 0 : index
    %c0_1 = arith.constant 0 : index
    %c0_2 = arith.constant 0 : index
    %0 = vector.load %arg2[%c0, %c0_0, %c0_1, %c0_2] : memref<1x16x18x3xf32, #tpu.memory_space<vmem>>, vector<1x16x18x3xf32>
    %1 = vector.shape_cast %0 : vector<1x16x18x3xf32> to vector<16x18x3xf32>
    %c0_3 = arith.constant 0 : index
    %c0_4 = arith.constant 0 : index
    %c0_5 = arith.constant 0 : index
    %c0_6 = arith.constant 0 : index
    %2 = vector.load %arg3[%c0_3, %c0_4, %c0_5, %c0_6] : memref<1x2x18x3xf32, #tpu.memory_space<vmem>>, vector<1x2x18x3xf32>
    %3 = vector.shape_cast %2 : vector<1x2x18x3xf32> to vector<2x18x3xf32>
    %4 = tpu.concatenate %1, %3 in 0 : vector<16x18x3xf32>, vector<2x18x3xf32> -> vector<18x18x3xf32>
    %5 = vector.extract_strided_slice %4 {offsets = [0, 0, 0], sizes = [16, 16, 3], strides = [1, 1, 1]} : vector<18x18x3xf32> to vector<16x16x3xf32>
    %6 = vector.shape_cast %5 : vector<16x16x3xf32> to vector<256x3xf32>
    %c0_7 = arith.constant 0 : index
    %c0_8 = arith.constant 0 : index
    %c0_9 = arith.constant 0 : index
    %c0_10 = arith.constant 0 : index
    %7 = vector.load %arg4[%c0_7, %c0_8, %c0_9, %c0_10] : memref<3x3x3x64xf32, #tpu.memory_space<vmem>>, vector<1x1x3x64xf32>
    %8 = vector.shape_cast %7 : vector<1x1x3x64xf32> to vector<3x64xf32>
    %cst = arith.constant dense<0.000000e+00> : vector<256x64xf32>
    %9 = tpu.matmul %6, %8, %cst {dimension_numbers = #tpu.dot_dimension_numbers<[1], [0], [0], [1], [0, 0, 1, 1], [], []>} : vector<256x3xf32>, vector<3x64xf32>, vector<256x64xf32> -> vector<256x64xf32>
    %c0_11 = arith.constant 0 : index
    %c0_12 = arith.constant 0 : index
    %10 = vector.load %arg7[%c0_11, %c0_12] : memref<256x64xf32, #tpu.memory_space<vmem>>, vector<256x64xf32>
    tpu.vector_store %arg7[%c0_11, %c0_12], %9 {strides = array<i32>} : memref<256x64xf32, #tpu.memory_space<vmem>>, vector<256x64xf32>,
    %11 = vector.extract_strided_slice %4 {offsets = [0, 1, 0], sizes = [16, 16, 3], strides = [1, 1, 1]} : vector<18x18x3xf32> to vector<16x16x3xf32>
    %12 = vector.shape_cast %11 : vector<16x16x3xf32> to vector<256x3xf32>
    %c0_13 = arith.constant 0 : index
    %c1 = arith.constant 1 : index
    %c0_14 = arith.constant 0 : index
    %c0_15 = arith.constant 0 : index
    %13 = vector.load %arg4[%c0_13, %c1, %c0_14, %c0_15] : memref<3x3x3x64xf32, #tpu.memory_space<vmem>>, vector<1x1x3x64xf32>
    %14 = vector.shape_cast %13 : vector<1x1x3x64xf32> to vector<3x64xf32>
    %cst_16 = arith.constant dense<0.000000e+00> : vector<256x64xf32>
    %15 = tpu.matmul %12, %14, %cst_16 {dimension_numbers = #tpu.dot_dimension_numbers<[1], [0], [0], [1], [0, 0, 1, 1], [], []>} : vector<256x3xf32>, vector<3x64xf32>, vector<256x64xf32> -> vector<256x64xf32>
    %c0_17 = arith.constant 0 : index
    %c0_18 = arith.constant 0 : index
    %16 = vector.load %arg7[%c0_17, %c0_18] : memref<256x64xf32, #tpu.memory_space<vmem>>, vector<256x64xf32>
    %17 = arith.addf %16, %15 : vector<256x64xf32>
    %c0_19 = arith.constant 0 : index
    %c0_20 = arith.constant 0 : index
    %18 = vector.load %arg7[%c0_19, %c0_20] : memref<256x64xf32, #tpu.memory_space<vmem>>, vector<256x64xf32>
    tpu.vector_store %arg7[%c0_19, %c0_20], %17 {strides = array<i32>} : memref<256x64xf32, #tpu.memory_space<vmem>>, vector<256x64xf32>,
    %19 = vector.extract_strided_slice %4 {offsets = [0, 2, 0], sizes = [16, 16, 3], strides = [1, 1, 1]} : vector<18x18x3xf32> to vector<16x16x3xf32>
    %20 = vector.shape_cast %19 : vector<16x16x3xf32> to vector<256x3xf32>
    %c0_21 = arith.constant 0 : index
    %c2 = arith.constant 2 : index
    %c0_22 = arith.constant 0 : index
    %c0_23 = arith.constant 0 : index
    %21 = vector.load %arg4[%c0_21, %c2, %c0_22, %c0_23] : memref<3x3x3x64xf32, #tpu.memory_space<vmem>>, vector<1x1x3x64xf32>
    %22 = vector.shape_cast %21 : vector<1x1x3x64xf32> to vector<3x64xf32>
    %cst_24 = arith.constant dense<0.000000e+00> : vector<256x64xf32>
    %23 = tpu.matmul %20, %22, %cst_24 {dimension_numbers = #tpu.dot_dimension_numbers<[1], [0], [0], [1], [0, 0, 1, 1], [], []>} : vector<256x3xf32>, vector<3x64xf32>, vector<256x64xf32> -> vector<256x64xf32>
    %c0_25 = arith.constant 0 : index
    %c0_26 = arith.constant 0 : index
    %24 = vector.load %arg7[%c0_25, %c0_26] : memref<256x64xf32, #tpu.memory_space<vmem>>, vector<256x64xf32>
    %25 = arith.addf %24, %23 : vector<256x64xf32>
    %c0_27 = arith.constant 0 : index
    %c0_28 = arith.constant 0 : index
    %26 = vector.load %arg7[%c0_27, %c0_28] : memref<256x64xf32, #tpu.memory_space<vmem>>, vector<256x64xf32>
    tpu.vector_store %arg7[%c0_27, %c0_28], %25 {strides = array<i32>} : memref<256x64xf32, #tpu.memory_space<vmem>>, vector<256x64xf32>,
    %27 = vector.extract_strided_slice %4 {offsets = [1, 0, 0], sizes = [16, 16, 3], strides = [1, 1, 1]} : vector<18x18x3xf32> to vector<16x16x3xf32>
    %28 = vector.shape_cast %27 : vector<16x16x3xf32> to vector<256x3xf32>
    %c1_29 = arith.constant 1 : index
    %c0_30 = arith.constant 0 : index
    %c0_31 = arith.constant 0 : index
    %c0_32 = arith.constant 0 : index
    %29 = vector.load %arg4[%c1_29, %c0_30, %c0_31, %c0_32] : memref<3x3x3x64xf32, #tpu.memory_space<vmem>>, vector<1x1x3x64xf32>
    %30 = vector.shape_cast %29 : vector<1x1x3x64xf32> to vector<3x64xf32>
    %cst_33 = arith.constant dense<0.000000e+00> : vector<256x64xf32>
    %31 = tpu.matmul %28, %30, %cst_33 {dimension_numbers = #tpu.dot_dimension_numbers<[1], [0], [0], [1], [0, 0, 1, 1], [], []>} : vector<256x3xf32>, vector<3x64xf32>, vector<256x64xf32> -> vector<256x64xf32>
    %c0_34 = arith.constant 0 : index
    %c0_35 = arith.constant 0 : index
    %32 = vector.load %arg7[%c0_34, %c0_35] : memref<256x64xf32, #tpu.memory_space<vmem>>, vector<256x64xf32>
    %33 = arith.addf %32, %31 : vector<256x64xf32>
    %c0_36 = arith.constant 0 : index
    %c0_37 = arith.constant 0 : index
    %34 = vector.load %arg7[%c0_36, %c0_37] : memref<256x64xf32, #tpu.memory_space<vmem>>, vector<256x64xf32>
    tpu.vector_store %arg7[%c0_36, %c0_37], %33 {strides = array<i32>} : memref<256x64xf32, #tpu.memory_space<vmem>>, vector<256x64xf32>,
    %35 = vector.extract_strided_slice %4 {offsets = [1, 1, 0], sizes = [16, 16, 3], strides = [1, 1, 1]} : vector<18x18x3xf32> to vector<16x16x3xf32>
    %36 = vector.shape_cast %35 : vector<16x16x3xf32> to vector<256x3xf32>
    %c1_38 = arith.constant 1 : index
    %c1_39 = arith.constant 1 : index
    %c0_40 = arith.constant 0 : index
    %c0_41 = arith.constant 0 : index
    %37 = vector.load %arg4[%c1_38, %c1_39, %c0_40, %c0_41] : memref<3x3x3x64xf32, #tpu.memory_space<vmem>>, vector<1x1x3x64xf32>
    %38 = vector.shape_cast %37 : vector<1x1x3x64xf32> to vector<3x64xf32>
    %cst_42 = arith.constant dense<0.000000e+00> : vector<256x64xf32>
    %39 = tpu.matmul %36, %38, %cst_42 {dimension_numbers = #tpu.dot_dimension_numbers<[1], [0], [0], [1], [0, 0, 1, 1], [], []>} : vector<256x3xf32>, vector<3x64xf32>, vector<256x64xf32> -> vector<256x64xf32>
    %c0_43 = arith.constant 0 : index
    %c0_44 = arith.constant 0 : index
    %40 = vector.load %arg7[%c0_43, %c0_44] : memref<256x64xf32, #tpu.memory_space<vmem>>, vector<256x64xf32>
    %41 = arith.addf %40, %39 : vector<256x64xf32>
    %c0_45 = arith.constant 0 : index
    %c0_46 = arith.constant 0 : index
    %42 = vector.load %arg7[%c0_45, %c0_46] : memref<256x64xf32, #tpu.memory_space<vmem>>, vector<256x64xf32>
    tpu.vector_store %arg7[%c0_45, %c0_46], %41 {strides = array<i32>} : memref<256x64xf32, #tpu.memory_space<vmem>>, vector<256x64xf32>,
    %43 = vector.extract_strided_slice %4 {offsets = [1, 2, 0], sizes = [16, 16, 3], strides = [1, 1, 1]} : vector<18x18x3xf32> to vector<16x16x3xf32>
    %44 = vector.shape_cast %43 : vector<16x16x3xf32> to vector<256x3xf32>
    %c1_47 = arith.constant 1 : index
    %c2_48 = arith.constant 2 : index
    %c0_49 = arith.constant 0 : index
    %c0_50 = arith.constant 0 : index
    %45 = vector.load %arg4[%c1_47, %c2_48, %c0_49, %c0_50] : memref<3x3x3x64xf32, #tpu.memory_space<vmem>>, vector<1x1x3x64xf32>
    %46 = vector.shape_cast %45 : vector<1x1x3x64xf32> to vector<3x64xf32>
    %cst_51 = arith.constant dense<0.000000e+00> : vector<256x64xf32>
    %47 = tpu.matmul %44, %46, %cst_51 {dimension_numbers = #tpu.dot_dimension_numbers<[1], [0], [0], [1], [0, 0, 1, 1], [], []>} : vector<256x3xf32>, vector<3x64xf32>, vector<256x64xf32> -> vector<256x64xf32>
    %c0_52 = arith.constant 0 : index
    %c0_53 = arith.constant 0 : index
    %48 = vector.load %arg7[%c0_52, %c0_53] : memref<256x64xf32, #tpu.memory_space<vmem>>, vector<256x64xf32>
    %49 = arith.addf %48, %47 : vector<256x64xf32>
    %c0_54 = arith.constant 0 : index
    %c0_55 = arith.constant 0 : index
    %50 = vector.load %arg7[%c0_54, %c0_55] : memref<256x64xf32, #tpu.memory_space<vmem>>, vector<256x64xf32>
    tpu.vector_store %arg7[%c0_54, %c0_55], %49 {strides = array<i32>} : memref<256x64xf32, #tpu.memory_space<vmem>>, vector<256x64xf32>,
    %51 = vector.extract_strided_slice %4 {offsets = [2, 0, 0], sizes = [16, 16, 3], strides = [1, 1, 1]} : vector<18x18x3xf32> to vector<16x16x3xf32>
    %52 = vector.shape_cast %51 : vector<16x16x3xf32> to vector<256x3xf32>
    %c2_56 = arith.constant 2 : index
    %c0_57 = arith.constant 0 : index
    %c0_58 = arith.constant 0 : index
    %c0_59 = arith.constant 0 : index
    %53 = vector.load %arg4[%c2_56, %c0_57, %c0_58, %c0_59] : memref<3x3x3x64xf32, #tpu.memory_space<vmem>>, vector<1x1x3x64xf32>
    %54 = vector.shape_cast %53 : vector<1x1x3x64xf32> to vector<3x64xf32>
    %cst_60 = arith.constant dense<0.000000e+00> : vector<256x64xf32>
    %55 = tpu.matmul %52, %54, %cst_60 {dimension_numbers = #tpu.dot_dimension_numbers<[1], [0], [0], [1], [0, 0, 1, 1], [], []>} : vector<256x3xf32>, vector<3x64xf32>, vector<256x64xf32> -> vector<256x64xf32>
    %c0_61 = arith.constant 0 : index
    %c0_62 = arith.constant 0 : index
    %56 = vector.load %arg7[%c0_61, %c0_62] : memref<256x64xf32, #tpu.memory_space<vmem>>, vector<256x64xf32>
    %57 = arith.addf %56, %55 : vector<256x64xf32>
    %c0_63 = arith.constant 0 : index
    %c0_64 = arith.constant 0 : index
    %58 = vector.load %arg7[%c0_63, %c0_64] : memref<256x64xf32, #tpu.memory_space<vmem>>, vector<256x64xf32>
    tpu.vector_store %arg7[%c0_63, %c0_64], %57 {strides = array<i32>} : memref<256x64xf32, #tpu.memory_space<vmem>>, vector<256x64xf32>,
    %59 = vector.extract_strided_slice %4 {offsets = [2, 1, 0], sizes = [16, 16, 3], strides = [1, 1, 1]} : vector<18x18x3xf32> to vector<16x16x3xf32>
    %60 = vector.shape_cast %59 : vector<16x16x3xf32> to vector<256x3xf32>
    %c2_65 = arith.constant 2 : index
    %c1_66 = arith.constant 1 : index
    %c0_67 = arith.constant 0 : index
    %c0_68 = arith.constant 0 : index
    %61 = vector.load %arg4[%c2_65, %c1_66, %c0_67, %c0_68] : memref<3x3x3x64xf32, #tpu.memory_space<vmem>>, vector<1x1x3x64xf32>
    %62 = vector.shape_cast %61 : vector<1x1x3x64xf32> to vector<3x64xf32>
    %cst_69 = arith.constant dense<0.000000e+00> : vector<256x64xf32>
    %63 = tpu.matmul %60, %62, %cst_69 {dimension_numbers = #tpu.dot_dimension_numbers<[1], [0], [0], [1], [0, 0, 1, 1], [], []>} : vector<256x3xf32>, vector<3x64xf32>, vector<256x64xf32> -> vector<256x64xf32>
    %c0_70 = arith.constant 0 : index
    %c0_71 = arith.constant 0 : index
    %64 = vector.load %arg7[%c0_70, %c0_71] : memref<256x64xf32, #tpu.memory_space<vmem>>, vector<256x64xf32>
    %65 = arith.addf %64, %63 : vector<256x64xf32>
    %c0_72 = arith.constant 0 : index
    %c0_73 = arith.constant 0 : index
    %66 = vector.load %arg7[%c0_72, %c0_73] : memref<256x64xf32, #tpu.memory_space<vmem>>, vector<256x64xf32>
    tpu.vector_store %arg7[%c0_72, %c0_73], %65 {strides = array<i32>} : memref<256x64xf32, #tpu.memory_space<vmem>>, vector<256x64xf32>,
    %67 = vector.extract_strided_slice %4 {offsets = [2, 2, 0], sizes = [16, 16, 3], strides = [1, 1, 1]} : vector<18x18x3xf32> to vector<16x16x3xf32>
    %68 = vector.shape_cast %67 : vector<16x16x3xf32> to vector<256x3xf32>
    %c2_74 = arith.constant 2 : index
    %c2_75 = arith.constant 2 : index
    %c0_76 = arith.constant 0 : index
    %c0_77 = arith.constant 0 : index
    %69 = vector.load %arg4[%c2_74, %c2_75, %c0_76, %c0_77] : memref<3x3x3x64xf32, #tpu.memory_space<vmem>>, vector<1x1x3x64xf32>
    %70 = vector.shape_cast %69 : vector<1x1x3x64xf32> to vector<3x64xf32>
    %cst_78 = arith.constant dense<0.000000e+00> : vector<256x64xf32>
    %71 = tpu.matmul %68, %70, %cst_78 {dimension_numbers = #tpu.dot_dimension_numbers<[1], [0], [0], [1], [0, 0, 1, 1], [], []>} : vector<256x3xf32>, vector<3x64xf32>, vector<256x64xf32> -> vector<256x64xf32>
    %c0_79 = arith.constant 0 : index
    %c0_80 = arith.constant 0 : index
    %72 = vector.load %arg7[%c0_79, %c0_80] : memref<256x64xf32, #tpu.memory_space<vmem>>, vector<256x64xf32>
    %73 = arith.addf %72, %71 : vector<256x64xf32>
    %c0_81 = arith.constant 0 : index
    %c0_82 = arith.constant 0 : index
    %74 = vector.load %arg7[%c0_81, %c0_82] : memref<256x64xf32, #tpu.memory_space<vmem>>, vector<256x64xf32>
    tpu.vector_store %arg7[%c0_81, %c0_82], %73 {strides = array<i32>} : memref<256x64xf32, #tpu.memory_space<vmem>>, vector<256x64xf32>,
    %c0_83 = arith.constant 0 : index
    %c0_84 = arith.constant 0 : index
    %75 = vector.load %arg7[%c0_83, %c0_84] : memref<256x64xf32, #tpu.memory_space<vmem>>, vector<256x64xf32>
    %c0_85 = arith.constant 0 : index
    %c0_86 = arith.constant 0 : index
    %76 = vector.load %arg5[%c0_85, %c0_86] : memref<1x64xf32, #tpu.memory_space<vmem>>, vector<1x64xf32>
    %77 = vector.broadcast %76 : vector<1x64xf32> to vector<256x64xf32>
    %78 = arith.addf %75, %77 : vector<256x64xf32>
    %c0_87 = arith.constant 0 : index
    %c0_88 = arith.constant 0 : index
    %79 = vector.load %arg7[%c0_87, %c0_88] : memref<256x64xf32, #tpu.memory_space<vmem>>, vector<256x64xf32>
    tpu.vector_store %arg7[%c0_87, %c0_88], %78 {strides = array<i32>} : memref<256x64xf32, #tpu.memory_space<vmem>>, vector<256x64xf32>,
    %c0_89 = arith.constant 0 : index
    %c0_90 = arith.constant 0 : index
    %80 = vector.load %arg7[%c0_89, %c0_90] : memref<256x64xf32, #tpu.memory_space<vmem>>, vector<256x64xf32>
    %81 = vector.shape_cast %80 : vector<256x64xf32> to vector<1x16x16x64xf32>
    %c0_91 = arith.constant 0 : index
    %c0_92 = arith.constant 0 : index
    %c0_93 = arith.constant 0 : index
    %c0_94 = arith.constant 0 : index
    %82 = vector.load %arg6[%c0_91, %c0_92, %c0_93, %c0_94] : memref<1x16x16x64xf32, #tpu.memory_space<vmem>>, vector<1x16x16x64xf32>
    tpu.vector_store %arg6[%c0_91, %c0_92, %c0_93, %c0_94], %81 {strides = array<i32>} : memref<1x16x16x64xf32, #tpu.memory_space<vmem>>, vector<1x16x16x64xf32>,
    return
  }
  func.func @transform_0(%arg0: i32, %arg1: i32) -> (i32, i32, i32, i32) {
    %c0_i32 = arith.constant 0 : i32
    %c0_i32_0 = arith.constant 0 : i32
    %c0_i32_1 = arith.constant 0 : i32
    return %arg0, %arg1, %c0_i32, %c0_i32_0 : i32, i32, i32, i32
  }
  func.func @transform_1(%arg0: i32, %arg1: i32) -> (i32, i32, i32, i32) {
    %c1_i32 = arith.constant 1 : i32
    %0 = arith.addi %arg1, %c1_i32 : i32
    %c8_i32 = arith.constant 8 : i32
    %1 = arith.muli %0, %c8_i32 : i32
    %c0_i32 = arith.constant 0 : i32
    %c0_i32_0 = arith.constant 0 : i32
    %c0_i32_1 = arith.constant 0 : i32
    return %arg0, %1, %c0_i32, %c0_i32_0 : i32, i32, i32, i32
  }
  func.func @transform_2(%arg0: i32, %arg1: i32) -> (i32, i32, i32, i32) {
    %c0_i32 = arith.constant 0 : i32
    %c0_i32_0 = arith.constant 0 : i32
    %c0_i32_1 = arith.constant 0 : i32
    %c0_i32_2 = arith.constant 0 : i32
    %c0_i32_3 = arith.constant 0 : i32
    return %c0_i32, %c0_i32_0, %c0_i32_1, %c0_i32_2 : i32, i32, i32, i32
  }
  func.func @transform_3(%arg0: i32, %arg1: i32) -> (i32, i32) {
    %c0_i32 = arith.constant 0 : i32
    %c0_i32_0 = arith.constant 0 : i32
    %c0_i32_1 = arith.constant 0 : i32
    return %c0_i32, %c0_i32_0 : i32, i32
  }
  func.func @transform_4(%arg0: i32, %arg1: i32) -> (i32, i32, i32, i32) {
    %c0_i32 = arith.constant 0 : i32
    %c0_i32_0 = arith.constant 0 : i32
    %c0_i32_1 = arith.constant 0 : i32
    return %arg0, %arg1, %c0_i32, %c0_i32_0 : i32, i32, i32, i32
  }
}

module attributes {stable_mosaic.version = 11 : i64} {
  func.func @_conv3x3_kernel(%arg0: i32, %arg1: i32, %arg2: memref<1x16x18x64xf32, #tpu.memory_space<vmem>>, %arg3: memref<1x2x18x64xf32, #tpu.memory_space<vmem>>, %arg4: memref<3x192x64xf32, #tpu.memory_space<vmem>>, %arg5: memref<1x64xf32, #tpu.memory_space<vmem>>, %arg6: memref<1x16x16x64xf32, #tpu.memory_space<vmem>>, %arg7: memref<1x8x8x64xf32, #tpu.memory_space<vmem>>, %arg8: memref<256x64xf32, #tpu.memory_space<vmem>>) attributes {dimension_semantics = [#tpu.dimension_semantics<parallel>, #tpu.dimension_semantics<parallel>], iteration_bounds = array<i64: 2, 1>, scalar_prefetch = 0 : i64, scratch_operands = 1 : i64, tpu.core_type = #tpu.core_type<tc>, window_params = [{transform_indices = @transform_0, window_bounds = array<i64: 1, 16, 18, 64>}, {transform_indices = @transform_1, window_bounds = array<i64: 1, 2, 18, 64>}, {pipeline_mode = #tpu.pipeline_mode<synchronous>, transform_indices = @transform_2, window_bounds = array<i64: 3, 192, 64>}, {pipeline_mode = #tpu.pipeline_mode<synchronous>, transform_indices = @transform_3, window_bounds = array<i64: 1, 64>}, {transform_indices = @transform_4, window_bounds = array<i64: 1, 16, 16, 64>}, {transform_indices = @transform_5, window_bounds = array<i64: 1, 8, 8, 64>}]} {
    %c0 = arith.constant 0 : index
    %c0_0 = arith.constant 0 : index
    %c0_1 = arith.constant 0 : index
    %c0_2 = arith.constant 0 : index
    %0 = vector.load %arg2[%c0, %c0_0, %c0_1, %c0_2] : memref<1x16x18x64xf32, #tpu.memory_space<vmem>>, vector<1x16x18x64xf32>
    %1 = vector.shape_cast %0 : vector<1x16x18x64xf32> to vector<16x18x64xf32>
    %c0_3 = arith.constant 0 : index
    %c0_4 = arith.constant 0 : index
    %c0_5 = arith.constant 0 : index
    %c0_6 = arith.constant 0 : index
    %2 = vector.load %arg3[%c0_3, %c0_4, %c0_5, %c0_6] : memref<1x2x18x64xf32, #tpu.memory_space<vmem>>, vector<1x2x18x64xf32>
    %3 = vector.shape_cast %2 : vector<1x2x18x64xf32> to vector<2x18x64xf32>
    %4 = tpu.concatenate %1, %3 in 0 : vector<16x18x64xf32>, vector<2x18x64xf32> -> vector<18x18x64xf32>
    %cst = arith.constant 0.000000e+00 : f32
    %5 = vector.broadcast %cst : f32 to vector<18x18x64xf32>
    %6 = arith.maximumf %4, %5 : vector<18x18x64xf32>
    %7 = vector.extract_strided_slice %6 {offsets = [0, 0, 0], sizes = [18, 16, 64], strides = [1, 1, 1]} : vector<18x18x64xf32> to vector<18x16x64xf32>
    %8 = vector.extract_strided_slice %6 {offsets = [0, 1, 0], sizes = [18, 16, 64], strides = [1, 1, 1]} : vector<18x18x64xf32> to vector<18x16x64xf32>
    %9 = vector.extract_strided_slice %6 {offsets = [0, 2, 0], sizes = [18, 16, 64], strides = [1, 1, 1]} : vector<18x18x64xf32> to vector<18x16x64xf32>
    %10 = tpu.concatenate %7, %8, %9 in 2 : vector<18x16x64xf32>, vector<18x16x64xf32>, vector<18x16x64xf32> -> vector<18x16x192xf32>
    %11 = vector.extract_strided_slice %10 {offsets = [0, 0, 0], sizes = [16, 16, 192], strides = [1, 1, 1]} : vector<18x16x192xf32> to vector<16x16x192xf32>
    %12 = vector.shape_cast %11 : vector<16x16x192xf32> to vector<256x192xf32>
    %c0_7 = arith.constant 0 : index
    %c0_8 = arith.constant 0 : index
    %c0_9 = arith.constant 0 : index
    %13 = vector.load %arg4[%c0_7, %c0_8, %c0_9] : memref<3x192x64xf32, #tpu.memory_space<vmem>>, vector<1x192x64xf32>
    %14 = vector.shape_cast %13 : vector<1x192x64xf32> to vector<192x64xf32>
    %cst_10 = arith.constant dense<0.000000e+00> : vector<256x64xf32>
    %15 = tpu.matmul %12, %14, %cst_10 {dimension_numbers = #tpu.dot_dimension_numbers<[1], [0], [0], [1], [0, 0, 1, 1], [], []>} : vector<256x192xf32>, vector<192x64xf32>, vector<256x64xf32> -> vector<256x64xf32>
    %c0_11 = arith.constant 0 : index
    %c0_12 = arith.constant 0 : index
    %16 = vector.load %arg8[%c0_11, %c0_12] : memref<256x64xf32, #tpu.memory_space<vmem>>, vector<256x64xf32>
    tpu.vector_store %arg8[%c0_11, %c0_12], %15 {strides = array<i32>} : memref<256x64xf32, #tpu.memory_space<vmem>>, vector<256x64xf32>,
    %17 = vector.extract_strided_slice %10 {offsets = [1, 0, 0], sizes = [16, 16, 192], strides = [1, 1, 1]} : vector<18x16x192xf32> to vector<16x16x192xf32>
    %18 = vector.shape_cast %17 : vector<16x16x192xf32> to vector<256x192xf32>
    %c1 = arith.constant 1 : index
    %c0_13 = arith.constant 0 : index
    %c0_14 = arith.constant 0 : index
    %19 = vector.load %arg4[%c1, %c0_13, %c0_14] : memref<3x192x64xf32, #tpu.memory_space<vmem>>, vector<1x192x64xf32>
    %20 = vector.shape_cast %19 : vector<1x192x64xf32> to vector<192x64xf32>
    %cst_15 = arith.constant dense<0.000000e+00> : vector<256x64xf32>
    %21 = tpu.matmul %18, %20, %cst_15 {dimension_numbers = #tpu.dot_dimension_numbers<[1], [0], [0], [1], [0, 0, 1, 1], [], []>} : vector<256x192xf32>, vector<192x64xf32>, vector<256x64xf32> -> vector<256x64xf32>
    %c0_16 = arith.constant 0 : index
    %c0_17 = arith.constant 0 : index
    %22 = vector.load %arg8[%c0_16, %c0_17] : memref<256x64xf32, #tpu.memory_space<vmem>>, vector<256x64xf32>
    %23 = arith.addf %22, %21 : vector<256x64xf32>
    %c0_18 = arith.constant 0 : index
    %c0_19 = arith.constant 0 : index
    %24 = vector.load %arg8[%c0_18, %c0_19] : memref<256x64xf32, #tpu.memory_space<vmem>>, vector<256x64xf32>
    tpu.vector_store %arg8[%c0_18, %c0_19], %23 {strides = array<i32>} : memref<256x64xf32, #tpu.memory_space<vmem>>, vector<256x64xf32>,
    %25 = vector.extract_strided_slice %10 {offsets = [2, 0, 0], sizes = [16, 16, 192], strides = [1, 1, 1]} : vector<18x16x192xf32> to vector<16x16x192xf32>
    %26 = vector.shape_cast %25 : vector<16x16x192xf32> to vector<256x192xf32>
    %c2 = arith.constant 2 : index
    %c0_20 = arith.constant 0 : index
    %c0_21 = arith.constant 0 : index
    %27 = vector.load %arg4[%c2, %c0_20, %c0_21] : memref<3x192x64xf32, #tpu.memory_space<vmem>>, vector<1x192x64xf32>
    %28 = vector.shape_cast %27 : vector<1x192x64xf32> to vector<192x64xf32>
    %cst_22 = arith.constant dense<0.000000e+00> : vector<256x64xf32>
    %29 = tpu.matmul %26, %28, %cst_22 {dimension_numbers = #tpu.dot_dimension_numbers<[1], [0], [0], [1], [0, 0, 1, 1], [], []>} : vector<256x192xf32>, vector<192x64xf32>, vector<256x64xf32> -> vector<256x64xf32>
    %c0_23 = arith.constant 0 : index
    %c0_24 = arith.constant 0 : index
    %30 = vector.load %arg8[%c0_23, %c0_24] : memref<256x64xf32, #tpu.memory_space<vmem>>, vector<256x64xf32>
    %31 = arith.addf %30, %29 : vector<256x64xf32>
    %c0_25 = arith.constant 0 : index
    %c0_26 = arith.constant 0 : index
    %32 = vector.load %arg8[%c0_25, %c0_26] : memref<256x64xf32, #tpu.memory_space<vmem>>, vector<256x64xf32>
    tpu.vector_store %arg8[%c0_25, %c0_26], %31 {strides = array<i32>} : memref<256x64xf32, #tpu.memory_space<vmem>>, vector<256x64xf32>,
    %c0_27 = arith.constant 0 : index
    %c0_28 = arith.constant 0 : index
    %33 = vector.load %arg8[%c0_27, %c0_28] : memref<256x64xf32, #tpu.memory_space<vmem>>, vector<256x64xf32>
    %c0_29 = arith.constant 0 : index
    %c0_30 = arith.constant 0 : index
    %34 = vector.load %arg5[%c0_29, %c0_30] : memref<1x64xf32, #tpu.memory_space<vmem>>, vector<1x64xf32>
    %35 = vector.broadcast %34 : vector<1x64xf32> to vector<256x64xf32>
    %36 = arith.addf %33, %35 : vector<256x64xf32>
    %c0_31 = arith.constant 0 : index
    %c0_32 = arith.constant 0 : index
    %37 = vector.load %arg8[%c0_31, %c0_32] : memref<256x64xf32, #tpu.memory_space<vmem>>, vector<256x64xf32>
    tpu.vector_store %arg8[%c0_31, %c0_32], %36 {strides = array<i32>} : memref<256x64xf32, #tpu.memory_space<vmem>>, vector<256x64xf32>,
    %c0_33 = arith.constant 0 : index
    %c0_34 = arith.constant 0 : index
    %38 = vector.load %arg8[%c0_33, %c0_34] : memref<256x64xf32, #tpu.memory_space<vmem>>, vector<256x64xf32>
    %39 = vector.shape_cast %38 : vector<256x64xf32> to vector<1x16x16x64xf32>
    %c0_35 = arith.constant 0 : index
    %c0_36 = arith.constant 0 : index
    %c0_37 = arith.constant 0 : index
    %c0_38 = arith.constant 0 : index
    %40 = vector.load %arg6[%c0_35, %c0_36, %c0_37, %c0_38] : memref<1x16x16x64xf32, #tpu.memory_space<vmem>>, vector<1x16x16x64xf32>
    tpu.vector_store %arg6[%c0_35, %c0_36, %c0_37, %c0_38], %39 {strides = array<i32>} : memref<1x16x16x64xf32, #tpu.memory_space<vmem>>, vector<1x16x16x64xf32>,
    %c0_39 = arith.constant 0 : index
    %c0_40 = arith.constant 0 : index
    %41 = tpu.strided_load %arg8[%c0_39, %c0_40] {strides = array<i32: 2, 1>} : memref<256x64xf32, #tpu.memory_space<vmem>>, vector<128x64xf32>
    %c1_41 = arith.constant 1 : index
    %c0_42 = arith.constant 0 : index
    %42 = tpu.strided_load %arg8[%c1_41, %c0_42] {strides = array<i32: 2, 1>} : memref<256x64xf32, #tpu.memory_space<vmem>>, vector<128x64xf32>
    %43 = arith.maximumf %41, %42 : vector<128x64xf32>
    %44 = vector.shape_cast %43 : vector<128x64xf32> to vector<8x2x8x64xf32>
    %cst_43 = arith.constant dense<0xFF800000> : vector<8x8x64xf32>
    %45 = vector.multi_reduction <maximumf>, %44, %cst_43 [1] : vector<8x2x8x64xf32> to vector<8x8x64xf32>
    %cst_44 = arith.constant 0.000000e+00 : f32
    %46 = vector.broadcast %cst_44 : f32 to vector<8x8x64xf32>
    %47 = arith.maximumf %45, %46 : vector<8x8x64xf32>
    %48 = vector.shape_cast %47 : vector<8x8x64xf32> to vector<1x8x8x64xf32>
    %c0_45 = arith.constant 0 : index
    %c0_46 = arith.constant 0 : index
    %c0_47 = arith.constant 0 : index
    %c0_48 = arith.constant 0 : index
    %49 = vector.load %arg7[%c0_45, %c0_46, %c0_47, %c0_48] : memref<1x8x8x64xf32, #tpu.memory_space<vmem>>, vector<1x8x8x64xf32>
    tpu.vector_store %arg7[%c0_45, %c0_46, %c0_47, %c0_48], %48 {strides = array<i32>} : memref<1x8x8x64xf32, #tpu.memory_space<vmem>>, vector<1x8x8x64xf32>,
    return
  }
  func.func @transform_0(%arg0: i32, %arg1: i32) -> (i32, i32, i32, i32) {
    %c0_i32 = arith.constant 0 : i32
    %c0_i32_0 = arith.constant 0 : i32
    %c0_i32_1 = arith.constant 0 : i32
    return %arg0, %arg1, %c0_i32, %c0_i32_0 : i32, i32, i32, i32
  }
  func.func @transform_1(%arg0: i32, %arg1: i32) -> (i32, i32, i32, i32) {
    %c1_i32 = arith.constant 1 : i32
    %0 = arith.addi %arg1, %c1_i32 : i32
    %c8_i32 = arith.constant 8 : i32
    %1 = arith.muli %0, %c8_i32 : i32
    %c0_i32 = arith.constant 0 : i32
    %c0_i32_0 = arith.constant 0 : i32
    %c0_i32_1 = arith.constant 0 : i32
    return %arg0, %1, %c0_i32, %c0_i32_0 : i32, i32, i32, i32
  }
  func.func @transform_2(%arg0: i32, %arg1: i32) -> (i32, i32, i32) {
    %c0_i32 = arith.constant 0 : i32
    %c0_i32_0 = arith.constant 0 : i32
    %c0_i32_1 = arith.constant 0 : i32
    %c0_i32_2 = arith.constant 0 : i32
    return %c0_i32, %c0_i32_0, %c0_i32_1 : i32, i32, i32
  }
  func.func @transform_3(%arg0: i32, %arg1: i32) -> (i32, i32) {
    %c0_i32 = arith.constant 0 : i32
    %c0_i32_0 = arith.constant 0 : i32
    %c0_i32_1 = arith.constant 0 : i32
    return %c0_i32, %c0_i32_0 : i32, i32
  }
  func.func @transform_4(%arg0: i32, %arg1: i32) -> (i32, i32, i32, i32) {
    %c0_i32 = arith.constant 0 : i32
    %c0_i32_0 = arith.constant 0 : i32
    %c0_i32_1 = arith.constant 0 : i32
    return %arg0, %arg1, %c0_i32, %c0_i32_0 : i32, i32, i32, i32
  }
  func.func @transform_5(%arg0: i32, %arg1: i32) -> (i32, i32, i32, i32) {
    %c0_i32 = arith.constant 0 : i32
    %c0_i32_0 = arith.constant 0 : i32
    %c0_i32_1 = arith.constant 0 : i32
    return %arg0, %arg1, %c0_i32, %c0_i32_0 : i32, i32, i32, i32
  }
}

module attributes {stable_mosaic.version = 11 : i64} {
  func.func @_conv3x3_kernel(%arg0: i32, %arg1: i32, %arg2: memref<1x8x10x64xf32, #tpu.memory_space<vmem>>, %arg3: memref<1x2x10x64xf32, #tpu.memory_space<vmem>>, %arg4: memref<3x192x128xf32, #tpu.memory_space<vmem>>, %arg5: memref<1x128xf32, #tpu.memory_space<vmem>>, %arg6: memref<1x8x8x128xf32, #tpu.memory_space<vmem>>, %arg7: memref<64x128xf32, #tpu.memory_space<vmem>>) attributes {dimension_semantics = [#tpu.dimension_semantics<parallel>, #tpu.dimension_semantics<parallel>], iteration_bounds = array<i64: 2, 1>, scalar_prefetch = 0 : i64, scratch_operands = 1 : i64, tpu.core_type = #tpu.core_type<tc>, window_params = [{transform_indices = @transform_0, window_bounds = array<i64: 1, 8, 10, 64>}, {transform_indices = @transform_1, window_bounds = array<i64: 1, 2, 10, 64>}, {pipeline_mode = #tpu.pipeline_mode<synchronous>, transform_indices = @transform_2, window_bounds = array<i64: 3, 192, 128>}, {pipeline_mode = #tpu.pipeline_mode<synchronous>, transform_indices = @transform_3, window_bounds = array<i64: 1, 128>}, {transform_indices = @transform_4, window_bounds = array<i64: 1, 8, 8, 128>}]} {
    %c0 = arith.constant 0 : index
    %c0_0 = arith.constant 0 : index
    %c0_1 = arith.constant 0 : index
    %c0_2 = arith.constant 0 : index
    %0 = vector.load %arg2[%c0, %c0_0, %c0_1, %c0_2] : memref<1x8x10x64xf32, #tpu.memory_space<vmem>>, vector<1x8x10x64xf32>
    %1 = vector.shape_cast %0 : vector<1x8x10x64xf32> to vector<8x10x64xf32>
    %c0_3 = arith.constant 0 : index
    %c0_4 = arith.constant 0 : index
    %c0_5 = arith.constant 0 : index
    %c0_6 = arith.constant 0 : index
    %2 = vector.load %arg3[%c0_3, %c0_4, %c0_5, %c0_6] : memref<1x2x10x64xf32, #tpu.memory_space<vmem>>, vector<1x2x10x64xf32>
    %3 = vector.shape_cast %2 : vector<1x2x10x64xf32> to vector<2x10x64xf32>
    %4 = tpu.concatenate %1, %3 in 0 : vector<8x10x64xf32>, vector<2x10x64xf32> -> vector<10x10x64xf32>
    %5 = vector.extract_strided_slice %4 {offsets = [0, 0, 0], sizes = [10, 8, 64], strides = [1, 1, 1]} : vector<10x10x64xf32> to vector<10x8x64xf32>
    %6 = vector.extract_strided_slice %4 {offsets = [0, 1, 0], sizes = [10, 8, 64], strides = [1, 1, 1]} : vector<10x10x64xf32> to vector<10x8x64xf32>
    %7 = vector.extract_strided_slice %4 {offsets = [0, 2, 0], sizes = [10, 8, 64], strides = [1, 1, 1]} : vector<10x10x64xf32> to vector<10x8x64xf32>
    %8 = tpu.concatenate %5, %6, %7 in 2 : vector<10x8x64xf32>, vector<10x8x64xf32>, vector<10x8x64xf32> -> vector<10x8x192xf32>
    %9 = vector.extract_strided_slice %8 {offsets = [0, 0, 0], sizes = [8, 8, 192], strides = [1, 1, 1]} : vector<10x8x192xf32> to vector<8x8x192xf32>
    %10 = vector.shape_cast %9 : vector<8x8x192xf32> to vector<64x192xf32>
    %c0_7 = arith.constant 0 : index
    %c0_8 = arith.constant 0 : index
    %c0_9 = arith.constant 0 : index
    %11 = vector.load %arg4[%c0_7, %c0_8, %c0_9] : memref<3x192x128xf32, #tpu.memory_space<vmem>>, vector<1x192x128xf32>
    %12 = vector.shape_cast %11 : vector<1x192x128xf32> to vector<192x128xf32>
    %cst = arith.constant dense<0.000000e+00> : vector<64x128xf32>
    %13 = tpu.matmul %10, %12, %cst {dimension_numbers = #tpu.dot_dimension_numbers<[1], [0], [0], [1], [0, 0, 1, 1], [], []>} : vector<64x192xf32>, vector<192x128xf32>, vector<64x128xf32> -> vector<64x128xf32>
    %c0_10 = arith.constant 0 : index
    %c0_11 = arith.constant 0 : index
    %14 = vector.load %arg7[%c0_10, %c0_11] : memref<64x128xf32, #tpu.memory_space<vmem>>, vector<64x128xf32>
    tpu.vector_store %arg7[%c0_10, %c0_11], %13 {strides = array<i32>} : memref<64x128xf32, #tpu.memory_space<vmem>>, vector<64x128xf32>,
    %15 = vector.extract_strided_slice %8 {offsets = [1, 0, 0], sizes = [8, 8, 192], strides = [1, 1, 1]} : vector<10x8x192xf32> to vector<8x8x192xf32>
    %16 = vector.shape_cast %15 : vector<8x8x192xf32> to vector<64x192xf32>
    %c1 = arith.constant 1 : index
    %c0_12 = arith.constant 0 : index
    %c0_13 = arith.constant 0 : index
    %17 = vector.load %arg4[%c1, %c0_12, %c0_13] : memref<3x192x128xf32, #tpu.memory_space<vmem>>, vector<1x192x128xf32>
    %18 = vector.shape_cast %17 : vector<1x192x128xf32> to vector<192x128xf32>
    %cst_14 = arith.constant dense<0.000000e+00> : vector<64x128xf32>
    %19 = tpu.matmul %16, %18, %cst_14 {dimension_numbers = #tpu.dot_dimension_numbers<[1], [0], [0], [1], [0, 0, 1, 1], [], []>} : vector<64x192xf32>, vector<192x128xf32>, vector<64x128xf32> -> vector<64x128xf32>
    %c0_15 = arith.constant 0 : index
    %c0_16 = arith.constant 0 : index
    %20 = vector.load %arg7[%c0_15, %c0_16] : memref<64x128xf32, #tpu.memory_space<vmem>>, vector<64x128xf32>
    %21 = arith.addf %20, %19 : vector<64x128xf32>
    %c0_17 = arith.constant 0 : index
    %c0_18 = arith.constant 0 : index
    %22 = vector.load %arg7[%c0_17, %c0_18] : memref<64x128xf32, #tpu.memory_space<vmem>>, vector<64x128xf32>
    tpu.vector_store %arg7[%c0_17, %c0_18], %21 {strides = array<i32>} : memref<64x128xf32, #tpu.memory_space<vmem>>, vector<64x128xf32>,
    %23 = vector.extract_strided_slice %8 {offsets = [2, 0, 0], sizes = [8, 8, 192], strides = [1, 1, 1]} : vector<10x8x192xf32> to vector<8x8x192xf32>
    %24 = vector.shape_cast %23 : vector<8x8x192xf32> to vector<64x192xf32>
    %c2 = arith.constant 2 : index
    %c0_19 = arith.constant 0 : index
    %c0_20 = arith.constant 0 : index
    %25 = vector.load %arg4[%c2, %c0_19, %c0_20] : memref<3x192x128xf32, #tpu.memory_space<vmem>>, vector<1x192x128xf32>
    %26 = vector.shape_cast %25 : vector<1x192x128xf32> to vector<192x128xf32>
    %cst_21 = arith.constant dense<0.000000e+00> : vector<64x128xf32>
    %27 = tpu.matmul %24, %26, %cst_21 {dimension_numbers = #tpu.dot_dimension_numbers<[1], [0], [0], [1], [0, 0, 1, 1], [], []>} : vector<64x192xf32>, vector<192x128xf32>, vector<64x128xf32> -> vector<64x128xf32>
    %c0_22 = arith.constant 0 : index
    %c0_23 = arith.constant 0 : index
    %28 = vector.load %arg7[%c0_22, %c0_23] : memref<64x128xf32, #tpu.memory_space<vmem>>, vector<64x128xf32>
    %29 = arith.addf %28, %27 : vector<64x128xf32>
    %c0_24 = arith.constant 0 : index
    %c0_25 = arith.constant 0 : index
    %30 = vector.load %arg7[%c0_24, %c0_25] : memref<64x128xf32, #tpu.memory_space<vmem>>, vector<64x128xf32>
    tpu.vector_store %arg7[%c0_24, %c0_25], %29 {strides = array<i32>} : memref<64x128xf32, #tpu.memory_space<vmem>>, vector<64x128xf32>,
    %c0_26 = arith.constant 0 : index
    %c0_27 = arith.constant 0 : index
    %31 = vector.load %arg7[%c0_26, %c0_27] : memref<64x128xf32, #tpu.memory_space<vmem>>, vector<64x128xf32>
    %c0_28 = arith.constant 0 : index
    %c0_29 = arith.constant 0 : index
    %32 = vector.load %arg5[%c0_28, %c0_29] : memref<1x128xf32, #tpu.memory_space<vmem>>, vector<1x128xf32>
    %33 = vector.broadcast %32 : vector<1x128xf32> to vector<64x128xf32>
    %34 = arith.addf %31, %33 : vector<64x128xf32>
    %c0_30 = arith.constant 0 : index
    %c0_31 = arith.constant 0 : index
    %35 = vector.load %arg7[%c0_30, %c0_31] : memref<64x128xf32, #tpu.memory_space<vmem>>, vector<64x128xf32>
    tpu.vector_store %arg7[%c0_30, %c0_31], %34 {strides = array<i32>} : memref<64x128xf32, #tpu.memory_space<vmem>>, vector<64x128xf32>,
    %c0_32 = arith.constant 0 : index
    %c0_33 = arith.constant 0 : index
    %36 = vector.load %arg7[%c0_32, %c0_33] : memref<64x128xf32, #tpu.memory_space<vmem>>, vector<64x128xf32>
    %37 = vector.shape_cast %36 : vector<64x128xf32> to vector<1x8x8x128xf32>
    %c0_34 = arith.constant 0 : index
    %c0_35 = arith.constant 0 : index
    %c0_36 = arith.constant 0 : index
    %c0_37 = arith.constant 0 : index
    %38 = vector.load %arg6[%c0_34, %c0_35, %c0_36, %c0_37] : memref<1x8x8x128xf32, #tpu.memory_space<vmem>>, vector<1x8x8x128xf32>
    tpu.vector_store %arg6[%c0_34, %c0_35, %c0_36, %c0_37], %37 {strides = array<i32>} : memref<1x8x8x128xf32, #tpu.memory_space<vmem>>, vector<1x8x8x128xf32>,
    return
  }
  func.func @transform_0(%arg0: i32, %arg1: i32) -> (i32, i32, i32, i32) {
    %c0_i32 = arith.constant 0 : i32
    %c0_i32_0 = arith.constant 0 : i32
    %c0_i32_1 = arith.constant 0 : i32
    return %arg0, %arg1, %c0_i32, %c0_i32_0 : i32, i32, i32, i32
  }
  func.func @transform_1(%arg0: i32, %arg1: i32) -> (i32, i32, i32, i32) {
    %c1_i32 = arith.constant 1 : i32
    %0 = arith.addi %arg1, %c1_i32 : i32
    %c4_i32 = arith.constant 4 : i32
    %1 = arith.muli %0, %c4_i32 : i32
    %c0_i32 = arith.constant 0 : i32
    %c0_i32_0 = arith.constant 0 : i32
    %c0_i32_1 = arith.constant 0 : i32
    return %arg0, %1, %c0_i32, %c0_i32_0 : i32, i32, i32, i32
  }
  func.func @transform_2(%arg0: i32, %arg1: i32) -> (i32, i32, i32) {
    %c0_i32 = arith.constant 0 : i32
    %c0_i32_0 = arith.constant 0 : i32
    %c0_i32_1 = arith.constant 0 : i32
    %c0_i32_2 = arith.constant 0 : i32
    return %c0_i32, %c0_i32_0, %c0_i32_1 : i32, i32, i32
  }
  func.func @transform_3(%arg0: i32, %arg1: i32) -> (i32, i32) {
    %c0_i32 = arith.constant 0 : i32
    %c0_i32_0 = arith.constant 0 : i32
    %c0_i32_1 = arith.constant 0 : i32
    return %c0_i32, %c0_i32_0 : i32, i32
  }
  func.func @transform_4(%arg0: i32, %arg1: i32) -> (i32, i32, i32, i32) {
    %c0_i32 = arith.constant 0 : i32
    %c0_i32_0 = arith.constant 0 : i32
    %c0_i32_1 = arith.constant 0 : i32
    return %arg0, %arg1, %c0_i32, %c0_i32_0 : i32, i32, i32, i32
  }
}

module attributes {stable_mosaic.version = 11 : i64} {
  func.func @_conv3x3_kernel(%arg0: i32, %arg1: i32, %arg2: memref<1x8x10x128xf32, #tpu.memory_space<vmem>>, %arg3: memref<1x2x10x128xf32, #tpu.memory_space<vmem>>, %arg4: memref<3x384x128xf32, #tpu.memory_space<vmem>>, %arg5: memref<1x128xf32, #tpu.memory_space<vmem>>, %arg6: memref<1x8x8x128xf32, #tpu.memory_space<vmem>>, %arg7: memref<1x4x4x128xf32, #tpu.memory_space<vmem>>, %arg8: memref<64x128xf32, #tpu.memory_space<vmem>>) attributes {dimension_semantics = [#tpu.dimension_semantics<parallel>, #tpu.dimension_semantics<parallel>], iteration_bounds = array<i64: 2, 1>, scalar_prefetch = 0 : i64, scratch_operands = 1 : i64, tpu.core_type = #tpu.core_type<tc>, window_params = [{transform_indices = @transform_0, window_bounds = array<i64: 1, 8, 10, 128>}, {transform_indices = @transform_1, window_bounds = array<i64: 1, 2, 10, 128>}, {pipeline_mode = #tpu.pipeline_mode<synchronous>, transform_indices = @transform_2, window_bounds = array<i64: 3, 384, 128>}, {pipeline_mode = #tpu.pipeline_mode<synchronous>, transform_indices = @transform_3, window_bounds = array<i64: 1, 128>}, {transform_indices = @transform_4, window_bounds = array<i64: 1, 8, 8, 128>}, {transform_indices = @transform_5, window_bounds = array<i64: 1, 4, 4, 128>}]} {
    %c0 = arith.constant 0 : index
    %c0_0 = arith.constant 0 : index
    %c0_1 = arith.constant 0 : index
    %c0_2 = arith.constant 0 : index
    %0 = vector.load %arg2[%c0, %c0_0, %c0_1, %c0_2] : memref<1x8x10x128xf32, #tpu.memory_space<vmem>>, vector<1x8x10x128xf32>
    %1 = vector.shape_cast %0 : vector<1x8x10x128xf32> to vector<8x10x128xf32>
    %c0_3 = arith.constant 0 : index
    %c0_4 = arith.constant 0 : index
    %c0_5 = arith.constant 0 : index
    %c0_6 = arith.constant 0 : index
    %2 = vector.load %arg3[%c0_3, %c0_4, %c0_5, %c0_6] : memref<1x2x10x128xf32, #tpu.memory_space<vmem>>, vector<1x2x10x128xf32>
    %3 = vector.shape_cast %2 : vector<1x2x10x128xf32> to vector<2x10x128xf32>
    %4 = tpu.concatenate %1, %3 in 0 : vector<8x10x128xf32>, vector<2x10x128xf32> -> vector<10x10x128xf32>
    %cst = arith.constant 0.000000e+00 : f32
    %5 = vector.broadcast %cst : f32 to vector<10x10x128xf32>
    %6 = arith.maximumf %4, %5 : vector<10x10x128xf32>
    %7 = vector.extract_strided_slice %6 {offsets = [0, 0, 0], sizes = [10, 8, 128], strides = [1, 1, 1]} : vector<10x10x128xf32> to vector<10x8x128xf32>
    %8 = vector.extract_strided_slice %6 {offsets = [0, 1, 0], sizes = [10, 8, 128], strides = [1, 1, 1]} : vector<10x10x128xf32> to vector<10x8x128xf32>
    %9 = vector.extract_strided_slice %6 {offsets = [0, 2, 0], sizes = [10, 8, 128], strides = [1, 1, 1]} : vector<10x10x128xf32> to vector<10x8x128xf32>
    %10 = tpu.concatenate %7, %8, %9 in 2 : vector<10x8x128xf32>, vector<10x8x128xf32>, vector<10x8x128xf32> -> vector<10x8x384xf32>
    %11 = vector.extract_strided_slice %10 {offsets = [0, 0, 0], sizes = [8, 8, 384], strides = [1, 1, 1]} : vector<10x8x384xf32> to vector<8x8x384xf32>
    %12 = vector.shape_cast %11 : vector<8x8x384xf32> to vector<64x384xf32>
    %c0_7 = arith.constant 0 : index
    %c0_8 = arith.constant 0 : index
    %c0_9 = arith.constant 0 : index
    %13 = vector.load %arg4[%c0_7, %c0_8, %c0_9] : memref<3x384x128xf32, #tpu.memory_space<vmem>>, vector<1x384x128xf32>
    %14 = vector.shape_cast %13 : vector<1x384x128xf32> to vector<384x128xf32>
    %cst_10 = arith.constant dense<0.000000e+00> : vector<64x128xf32>
    %15 = tpu.matmul %12, %14, %cst_10 {dimension_numbers = #tpu.dot_dimension_numbers<[1], [0], [0], [1], [0, 0, 1, 1], [], []>} : vector<64x384xf32>, vector<384x128xf32>, vector<64x128xf32> -> vector<64x128xf32>
    %c0_11 = arith.constant 0 : index
    %c0_12 = arith.constant 0 : index
    %16 = vector.load %arg8[%c0_11, %c0_12] : memref<64x128xf32, #tpu.memory_space<vmem>>, vector<64x128xf32>
    tpu.vector_store %arg8[%c0_11, %c0_12], %15 {strides = array<i32>} : memref<64x128xf32, #tpu.memory_space<vmem>>, vector<64x128xf32>,
    %17 = vector.extract_strided_slice %10 {offsets = [1, 0, 0], sizes = [8, 8, 384], strides = [1, 1, 1]} : vector<10x8x384xf32> to vector<8x8x384xf32>
    %18 = vector.shape_cast %17 : vector<8x8x384xf32> to vector<64x384xf32>
    %c1 = arith.constant 1 : index
    %c0_13 = arith.constant 0 : index
    %c0_14 = arith.constant 0 : index
    %19 = vector.load %arg4[%c1, %c0_13, %c0_14] : memref<3x384x128xf32, #tpu.memory_space<vmem>>, vector<1x384x128xf32>
    %20 = vector.shape_cast %19 : vector<1x384x128xf32> to vector<384x128xf32>
    %cst_15 = arith.constant dense<0.000000e+00> : vector<64x128xf32>
    %21 = tpu.matmul %18, %20, %cst_15 {dimension_numbers = #tpu.dot_dimension_numbers<[1], [0], [0], [1], [0, 0, 1, 1], [], []>} : vector<64x384xf32>, vector<384x128xf32>, vector<64x128xf32> -> vector<64x128xf32>
    %c0_16 = arith.constant 0 : index
    %c0_17 = arith.constant 0 : index
    %22 = vector.load %arg8[%c0_16, %c0_17] : memref<64x128xf32, #tpu.memory_space<vmem>>, vector<64x128xf32>
    %23 = arith.addf %22, %21 : vector<64x128xf32>
    %c0_18 = arith.constant 0 : index
    %c0_19 = arith.constant 0 : index
    %24 = vector.load %arg8[%c0_18, %c0_19] : memref<64x128xf32, #tpu.memory_space<vmem>>, vector<64x128xf32>
    tpu.vector_store %arg8[%c0_18, %c0_19], %23 {strides = array<i32>} : memref<64x128xf32, #tpu.memory_space<vmem>>, vector<64x128xf32>,
    %25 = vector.extract_strided_slice %10 {offsets = [2, 0, 0], sizes = [8, 8, 384], strides = [1, 1, 1]} : vector<10x8x384xf32> to vector<8x8x384xf32>
    %26 = vector.shape_cast %25 : vector<8x8x384xf32> to vector<64x384xf32>
    %c2 = arith.constant 2 : index
    %c0_20 = arith.constant 0 : index
    %c0_21 = arith.constant 0 : index
    %27 = vector.load %arg4[%c2, %c0_20, %c0_21] : memref<3x384x128xf32, #tpu.memory_space<vmem>>, vector<1x384x128xf32>
    %28 = vector.shape_cast %27 : vector<1x384x128xf32> to vector<384x128xf32>
    %cst_22 = arith.constant dense<0.000000e+00> : vector<64x128xf32>
    %29 = tpu.matmul %26, %28, %cst_22 {dimension_numbers = #tpu.dot_dimension_numbers<[1], [0], [0], [1], [0, 0, 1, 1], [], []>} : vector<64x384xf32>, vector<384x128xf32>, vector<64x128xf32> -> vector<64x128xf32>
    %c0_23 = arith.constant 0 : index
    %c0_24 = arith.constant 0 : index
    %30 = vector.load %arg8[%c0_23, %c0_24] : memref<64x128xf32, #tpu.memory_space<vmem>>, vector<64x128xf32>
    %31 = arith.addf %30, %29 : vector<64x128xf32>
    %c0_25 = arith.constant 0 : index
    %c0_26 = arith.constant 0 : index
    %32 = vector.load %arg8[%c0_25, %c0_26] : memref<64x128xf32, #tpu.memory_space<vmem>>, vector<64x128xf32>
    tpu.vector_store %arg8[%c0_25, %c0_26], %31 {strides = array<i32>} : memref<64x128xf32, #tpu.memory_space<vmem>>, vector<64x128xf32>,
    %c0_27 = arith.constant 0 : index
    %c0_28 = arith.constant 0 : index
    %33 = vector.load %arg8[%c0_27, %c0_28] : memref<64x128xf32, #tpu.memory_space<vmem>>, vector<64x128xf32>
    %c0_29 = arith.constant 0 : index
    %c0_30 = arith.constant 0 : index
    %34 = vector.load %arg5[%c0_29, %c0_30] : memref<1x128xf32, #tpu.memory_space<vmem>>, vector<1x128xf32>
    %35 = vector.broadcast %34 : vector<1x128xf32> to vector<64x128xf32>
    %36 = arith.addf %33, %35 : vector<64x128xf32>
    %c0_31 = arith.constant 0 : index
    %c0_32 = arith.constant 0 : index
    %37 = vector.load %arg8[%c0_31, %c0_32] : memref<64x128xf32, #tpu.memory_space<vmem>>, vector<64x128xf32>
    tpu.vector_store %arg8[%c0_31, %c0_32], %36 {strides = array<i32>} : memref<64x128xf32, #tpu.memory_space<vmem>>, vector<64x128xf32>,
    %c0_33 = arith.constant 0 : index
    %c0_34 = arith.constant 0 : index
    %38 = vector.load %arg8[%c0_33, %c0_34] : memref<64x128xf32, #tpu.memory_space<vmem>>, vector<64x128xf32>
    %39 = vector.shape_cast %38 : vector<64x128xf32> to vector<1x8x8x128xf32>
    %c0_35 = arith.constant 0 : index
    %c0_36 = arith.constant 0 : index
    %c0_37 = arith.constant 0 : index
    %c0_38 = arith.constant 0 : index
    %40 = vector.load %arg6[%c0_35, %c0_36, %c0_37, %c0_38] : memref<1x8x8x128xf32, #tpu.memory_space<vmem>>, vector<1x8x8x128xf32>
    tpu.vector_store %arg6[%c0_35, %c0_36, %c0_37, %c0_38], %39 {strides = array<i32>} : memref<1x8x8x128xf32, #tpu.memory_space<vmem>>, vector<1x8x8x128xf32>,
    %c0_39 = arith.constant 0 : index
    %c0_40 = arith.constant 0 : index
    %41 = tpu.strided_load %arg8[%c0_39, %c0_40] {strides = array<i32: 2, 1>} : memref<64x128xf32, #tpu.memory_space<vmem>>, vector<32x128xf32>
    %c1_41 = arith.constant 1 : index
    %c0_42 = arith.constant 0 : index
    %42 = tpu.strided_load %arg8[%c1_41, %c0_42] {strides = array<i32: 2, 1>} : memref<64x128xf32, #tpu.memory_space<vmem>>, vector<32x128xf32>
    %43 = arith.maximumf %41, %42 : vector<32x128xf32>
    %44 = vector.shape_cast %43 : vector<32x128xf32> to vector<4x2x4x128xf32>
    %cst_43 = arith.constant dense<0xFF800000> : vector<4x4x128xf32>
    %45 = vector.multi_reduction <maximumf>, %44, %cst_43 [1] : vector<4x2x4x128xf32> to vector<4x4x128xf32>
    %cst_44 = arith.constant 0.000000e+00 : f32
    %46 = vector.broadcast %cst_44 : f32 to vector<4x4x128xf32>
    %47 = arith.maximumf %45, %46 : vector<4x4x128xf32>
    %48 = vector.shape_cast %47 : vector<4x4x128xf32> to vector<1x4x4x128xf32>
    %c0_45 = arith.constant 0 : index
    %c0_46 = arith.constant 0 : index
    %c0_47 = arith.constant 0 : index
    %c0_48 = arith.constant 0 : index
    %49 = vector.load %arg7[%c0_45, %c0_46, %c0_47, %c0_48] : memref<1x4x4x128xf32, #tpu.memory_space<vmem>>, vector<1x4x4x128xf32>
    tpu.vector_store %arg7[%c0_45, %c0_46, %c0_47, %c0_48], %48 {strides = array<i32>} : memref<1x4x4x128xf32, #tpu.memory_space<vmem>>, vector<1x4x4x128xf32>,
    return
  }
  func.func @transform_0(%arg0: i32, %arg1: i32) -> (i32, i32, i32, i32) {
    %c0_i32 = arith.constant 0 : i32
    %c0_i32_0 = arith.constant 0 : i32
    %c0_i32_1 = arith.constant 0 : i32
    return %arg0, %arg1, %c0_i32, %c0_i32_0 : i32, i32, i32, i32
  }
  func.func @transform_1(%arg0: i32, %arg1: i32) -> (i32, i32, i32, i32) {
    %c1_i32 = arith.constant 1 : i32
    %0 = arith.addi %arg1, %c1_i32 : i32
    %c4_i32 = arith.constant 4 : i32
    %1 = arith.muli %0, %c4_i32 : i32
    %c0_i32 = arith.constant 0 : i32
    %c0_i32_0 = arith.constant 0 : i32
    %c0_i32_1 = arith.constant 0 : i32
    return %arg0, %1, %c0_i32, %c0_i32_0 : i32, i32, i32, i32
  }
  func.func @transform_2(%arg0: i32, %arg1: i32) -> (i32, i32, i32) {
    %c0_i32 = arith.constant 0 : i32
    %c0_i32_0 = arith.constant 0 : i32
    %c0_i32_1 = arith.constant 0 : i32
    %c0_i32_2 = arith.constant 0 : i32
    return %c0_i32, %c0_i32_0, %c0_i32_1 : i32, i32, i32
  }
  func.func @transform_3(%arg0: i32, %arg1: i32) -> (i32, i32) {
    %c0_i32 = arith.constant 0 : i32
    %c0_i32_0 = arith.constant 0 : i32
    %c0_i32_1 = arith.constant 0 : i32
    return %c0_i32, %c0_i32_0 : i32, i32
  }
  func.func @transform_4(%arg0: i32, %arg1: i32) -> (i32, i32, i32, i32) {
    %c0_i32 = arith.constant 0 : i32
    %c0_i32_0 = arith.constant 0 : i32
    %c0_i32_1 = arith.constant 0 : i32
    return %arg0, %arg1, %c0_i32, %c0_i32_0 : i32, i32, i32, i32
  }
  func.func @transform_5(%arg0: i32, %arg1: i32) -> (i32, i32, i32, i32) {
    %c0_i32 = arith.constant 0 : i32
    %c0_i32_0 = arith.constant 0 : i32
    %c0_i32_1 = arith.constant 0 : i32
    return %arg0, %arg1, %c0_i32, %c0_i32_0 : i32, i32, i32, i32
  }
}

module attributes {stable_mosaic.version = 11 : i64} {
  func.func @_conv3x3_kernel(%arg0: i32, %arg1: i32, %arg2: memref<1x4x6x128xf32, #tpu.memory_space<vmem>>, %arg3: memref<1x2x6x128xf32, #tpu.memory_space<vmem>>, %arg4: memref<3x384x256xf32, #tpu.memory_space<vmem>>, %arg5: memref<1x256xf32, #tpu.memory_space<vmem>>, %arg6: memref<1x4x4x256xf32, #tpu.memory_space<vmem>>, %arg7: memref<16x256xf32, #tpu.memory_space<vmem>>) attributes {dimension_semantics = [#tpu.dimension_semantics<parallel>, #tpu.dimension_semantics<parallel>], iteration_bounds = array<i64: 2, 1>, scalar_prefetch = 0 : i64, scratch_operands = 1 : i64, tpu.core_type = #tpu.core_type<tc>, window_params = [{transform_indices = @transform_0, window_bounds = array<i64: 1, 4, 6, 128>}, {transform_indices = @transform_1, window_bounds = array<i64: 1, 2, 6, 128>}, {pipeline_mode = #tpu.pipeline_mode<synchronous>, transform_indices = @transform_2, window_bounds = array<i64: 3, 384, 256>}, {pipeline_mode = #tpu.pipeline_mode<synchronous>, transform_indices = @transform_3, window_bounds = array<i64: 1, 256>}, {transform_indices = @transform_4, window_bounds = array<i64: 1, 4, 4, 256>}]} {
    %c0 = arith.constant 0 : index
    %c0_0 = arith.constant 0 : index
    %c0_1 = arith.constant 0 : index
    %c0_2 = arith.constant 0 : index
    %0 = vector.load %arg2[%c0, %c0_0, %c0_1, %c0_2] : memref<1x4x6x128xf32, #tpu.memory_space<vmem>>, vector<1x4x6x128xf32>
    %1 = vector.shape_cast %0 : vector<1x4x6x128xf32> to vector<4x6x128xf32>
    %c0_3 = arith.constant 0 : index
    %c0_4 = arith.constant 0 : index
    %c0_5 = arith.constant 0 : index
    %c0_6 = arith.constant 0 : index
    %2 = vector.load %arg3[%c0_3, %c0_4, %c0_5, %c0_6] : memref<1x2x6x128xf32, #tpu.memory_space<vmem>>, vector<1x2x6x128xf32>
    %3 = vector.shape_cast %2 : vector<1x2x6x128xf32> to vector<2x6x128xf32>
    %4 = tpu.concatenate %1, %3 in 0 : vector<4x6x128xf32>, vector<2x6x128xf32> -> vector<6x6x128xf32>
    %5 = vector.extract_strided_slice %4 {offsets = [0, 0, 0], sizes = [6, 4, 128], strides = [1, 1, 1]} : vector<6x6x128xf32> to vector<6x4x128xf32>
    %6 = vector.extract_strided_slice %4 {offsets = [0, 1, 0], sizes = [6, 4, 128], strides = [1, 1, 1]} : vector<6x6x128xf32> to vector<6x4x128xf32>
    %7 = vector.extract_strided_slice %4 {offsets = [0, 2, 0], sizes = [6, 4, 128], strides = [1, 1, 1]} : vector<6x6x128xf32> to vector<6x4x128xf32>
    %8 = tpu.concatenate %5, %6, %7 in 2 : vector<6x4x128xf32>, vector<6x4x128xf32>, vector<6x4x128xf32> -> vector<6x4x384xf32>
    %9 = vector.extract_strided_slice %8 {offsets = [0, 0, 0], sizes = [4, 4, 384], strides = [1, 1, 1]} : vector<6x4x384xf32> to vector<4x4x384xf32>
    %10 = vector.shape_cast %9 : vector<4x4x384xf32> to vector<16x384xf32>
    %c0_7 = arith.constant 0 : index
    %c0_8 = arith.constant 0 : index
    %c0_9 = arith.constant 0 : index
    %11 = vector.load %arg4[%c0_7, %c0_8, %c0_9] : memref<3x384x256xf32, #tpu.memory_space<vmem>>, vector<1x384x256xf32>
    %12 = vector.shape_cast %11 : vector<1x384x256xf32> to vector<384x256xf32>
    %cst = arith.constant dense<0.000000e+00> : vector<16x256xf32>
    %13 = tpu.matmul %10, %12, %cst {dimension_numbers = #tpu.dot_dimension_numbers<[1], [0], [0], [1], [0, 0, 1, 1], [], []>} : vector<16x384xf32>, vector<384x256xf32>, vector<16x256xf32> -> vector<16x256xf32>
    %c0_10 = arith.constant 0 : index
    %c0_11 = arith.constant 0 : index
    %14 = vector.load %arg7[%c0_10, %c0_11] : memref<16x256xf32, #tpu.memory_space<vmem>>, vector<16x256xf32>
    tpu.vector_store %arg7[%c0_10, %c0_11], %13 {strides = array<i32>} : memref<16x256xf32, #tpu.memory_space<vmem>>, vector<16x256xf32>,
    %15 = vector.extract_strided_slice %8 {offsets = [1, 0, 0], sizes = [4, 4, 384], strides = [1, 1, 1]} : vector<6x4x384xf32> to vector<4x4x384xf32>
    %16 = vector.shape_cast %15 : vector<4x4x384xf32> to vector<16x384xf32>
    %c1 = arith.constant 1 : index
    %c0_12 = arith.constant 0 : index
    %c0_13 = arith.constant 0 : index
    %17 = vector.load %arg4[%c1, %c0_12, %c0_13] : memref<3x384x256xf32, #tpu.memory_space<vmem>>, vector<1x384x256xf32>
    %18 = vector.shape_cast %17 : vector<1x384x256xf32> to vector<384x256xf32>
    %cst_14 = arith.constant dense<0.000000e+00> : vector<16x256xf32>
    %19 = tpu.matmul %16, %18, %cst_14 {dimension_numbers = #tpu.dot_dimension_numbers<[1], [0], [0], [1], [0, 0, 1, 1], [], []>} : vector<16x384xf32>, vector<384x256xf32>, vector<16x256xf32> -> vector<16x256xf32>
    %c0_15 = arith.constant 0 : index
    %c0_16 = arith.constant 0 : index
    %20 = vector.load %arg7[%c0_15, %c0_16] : memref<16x256xf32, #tpu.memory_space<vmem>>, vector<16x256xf32>
    %21 = arith.addf %20, %19 : vector<16x256xf32>
    %c0_17 = arith.constant 0 : index
    %c0_18 = arith.constant 0 : index
    %22 = vector.load %arg7[%c0_17, %c0_18] : memref<16x256xf32, #tpu.memory_space<vmem>>, vector<16x256xf32>
    tpu.vector_store %arg7[%c0_17, %c0_18], %21 {strides = array<i32>} : memref<16x256xf32, #tpu.memory_space<vmem>>, vector<16x256xf32>,
    %23 = vector.extract_strided_slice %8 {offsets = [2, 0, 0], sizes = [4, 4, 384], strides = [1, 1, 1]} : vector<6x4x384xf32> to vector<4x4x384xf32>
    %24 = vector.shape_cast %23 : vector<4x4x384xf32> to vector<16x384xf32>
    %c2 = arith.constant 2 : index
    %c0_19 = arith.constant 0 : index
    %c0_20 = arith.constant 0 : index
    %25 = vector.load %arg4[%c2, %c0_19, %c0_20] : memref<3x384x256xf32, #tpu.memory_space<vmem>>, vector<1x384x256xf32>
    %26 = vector.shape_cast %25 : vector<1x384x256xf32> to vector<384x256xf32>
    %cst_21 = arith.constant dense<0.000000e+00> : vector<16x256xf32>
    %27 = tpu.matmul %24, %26, %cst_21 {dimension_numbers = #tpu.dot_dimension_numbers<[1], [0], [0], [1], [0, 0, 1, 1], [], []>} : vector<16x384xf32>, vector<384x256xf32>, vector<16x256xf32> -> vector<16x256xf32>
    %c0_22 = arith.constant 0 : index
    %c0_23 = arith.constant 0 : index
    %28 = vector.load %arg7[%c0_22, %c0_23] : memref<16x256xf32, #tpu.memory_space<vmem>>, vector<16x256xf32>
    %29 = arith.addf %28, %27 : vector<16x256xf32>
    %c0_24 = arith.constant 0 : index
    %c0_25 = arith.constant 0 : index
    %30 = vector.load %arg7[%c0_24, %c0_25] : memref<16x256xf32, #tpu.memory_space<vmem>>, vector<16x256xf32>
    tpu.vector_store %arg7[%c0_24, %c0_25], %29 {strides = array<i32>} : memref<16x256xf32, #tpu.memory_space<vmem>>, vector<16x256xf32>,
    %c0_26 = arith.constant 0 : index
    %c0_27 = arith.constant 0 : index
    %31 = vector.load %arg7[%c0_26, %c0_27] : memref<16x256xf32, #tpu.memory_space<vmem>>, vector<16x256xf32>
    %c0_28 = arith.constant 0 : index
    %c0_29 = arith.constant 0 : index
    %32 = vector.load %arg5[%c0_28, %c0_29] : memref<1x256xf32, #tpu.memory_space<vmem>>, vector<1x256xf32>
    %33 = vector.broadcast %32 : vector<1x256xf32> to vector<16x256xf32>
    %34 = arith.addf %31, %33 : vector<16x256xf32>
    %c0_30 = arith.constant 0 : index
    %c0_31 = arith.constant 0 : index
    %35 = vector.load %arg7[%c0_30, %c0_31] : memref<16x256xf32, #tpu.memory_space<vmem>>, vector<16x256xf32>
    tpu.vector_store %arg7[%c0_30, %c0_31], %34 {strides = array<i32>} : memref<16x256xf32, #tpu.memory_space<vmem>>, vector<16x256xf32>,
    %c0_32 = arith.constant 0 : index
    %c0_33 = arith.constant 0 : index
    %36 = vector.load %arg7[%c0_32, %c0_33] : memref<16x256xf32, #tpu.memory_space<vmem>>, vector<16x256xf32>
    %37 = vector.shape_cast %36 : vector<16x256xf32> to vector<1x4x4x256xf32>
    %c0_34 = arith.constant 0 : index
    %c0_35 = arith.constant 0 : index
    %c0_36 = arith.constant 0 : index
    %c0_37 = arith.constant 0 : index
    %38 = vector.load %arg6[%c0_34, %c0_35, %c0_36, %c0_37] : memref<1x4x4x256xf32, #tpu.memory_space<vmem>>, vector<1x4x4x256xf32>
    tpu.vector_store %arg6[%c0_34, %c0_35, %c0_36, %c0_37], %37 {strides = array<i32>} : memref<1x4x4x256xf32, #tpu.memory_space<vmem>>, vector<1x4x4x256xf32>,
    return
  }
  func.func @transform_0(%arg0: i32, %arg1: i32) -> (i32, i32, i32, i32) {
    %c0_i32 = arith.constant 0 : i32
    %c0_i32_0 = arith.constant 0 : i32
    %c0_i32_1 = arith.constant 0 : i32
    return %arg0, %arg1, %c0_i32, %c0_i32_0 : i32, i32, i32, i32
  }
  func.func @transform_1(%arg0: i32, %arg1: i32) -> (i32, i32, i32, i32) {
    %c1_i32 = arith.constant 1 : i32
    %0 = arith.addi %arg1, %c1_i32 : i32
    %c2_i32 = arith.constant 2 : i32
    %1 = arith.muli %0, %c2_i32 : i32
    %c0_i32 = arith.constant 0 : i32
    %c0_i32_0 = arith.constant 0 : i32
    %c0_i32_1 = arith.constant 0 : i32
    return %arg0, %1, %c0_i32, %c0_i32_0 : i32, i32, i32, i32
  }
  func.func @transform_2(%arg0: i32, %arg1: i32) -> (i32, i32, i32) {
    %c0_i32 = arith.constant 0 : i32
    %c0_i32_0 = arith.constant 0 : i32
    %c0_i32_1 = arith.constant 0 : i32
    %c0_i32_2 = arith.constant 0 : i32
    return %c0_i32, %c0_i32_0, %c0_i32_1 : i32, i32, i32
  }
  func.func @transform_3(%arg0: i32, %arg1: i32) -> (i32, i32) {
    %c0_i32 = arith.constant 0 : i32
    %c0_i32_0 = arith.constant 0 : i32
    %c0_i32_1 = arith.constant 0 : i32
    return %c0_i32, %c0_i32_0 : i32, i32
  }
  func.func @transform_4(%arg0: i32, %arg1: i32) -> (i32, i32, i32, i32) {
    %c0_i32 = arith.constant 0 : i32
    %c0_i32_0 = arith.constant 0 : i32
    %c0_i32_1 = arith.constant 0 : i32
    return %arg0, %arg1, %c0_i32, %c0_i32_0 : i32, i32, i32, i32
  }
}

</mosaic_0001>

<bundles_post_ra>
// kernel: vgg19_features_forward.13
= control target key start
LH: loop header
LB: loop body
LE: loop exit
PB: predicated region body
PF: predicated region fallthrough
CT: control target
= control target key end

     0   :  { %s1951_s17 = smov 0   ;;  %s1953_s18 = smov 0   ;;  %s2587_s0 = inlined_call_operand.vmem [shape: f32[3,192,128], index: 0, kind: input, shape index: {}]   ;;  %s2588_s1 = inlined_call_operand.vmem [shape: f32[1,128], index: 1, kind: input, shape index: {}]   ;;  %s2589_s2 = inlined_call_operand.vmem [shape: f32[2,8,8,64], index: 2, kind: input, shape index: {}]   ;;  %s2590_s3 = inlined_call_operand.<no memory space> [shape: f32[], index: 3, kind: input, shape index: {}]   ;;  %s2591_s4 = inlined_call_operand.vmem [shape: f32[2,8,8,128], index: 4, kind: output, shape index: {}]  }
   0x1   :  { %v1949_v0 = vstv %s2590_s3  ;;  %s1955_s19 = smov 0  }
   0x2 LB: > { %s28_s3 = sadd.s32 1, %s1913_s18  ;;  %p1639_p0 = scmp.ge.s32.totalorder %s1917_s19, 1  ;;  %s1917_s19 = sphi %s1955_s19, %s16_s19   ;;  %s1913_s18 = sphi %s1953_s18, %s2593_s18   ;;  %s1909_s17 = sphi %s1951_s17, %s2592_s17  }
   0x3   : > { %p30_p1 = scmp.ge.s32.totalorder %s28_s3, 2  ;;  %p270_p2 = scmp.lt.s32.totalorder %s1917_s19, 3 }
   0x5   : > { %s2595_s3 = smov (%p30_p1, %s28_s3), 0  ;;  %p271_p3 = pnand %p1639_p0, %p270_p2 }
   0x7   : > { %274 = sbr.rel (%p271_p3) target bundleno = 434 (0x1b2), region = 36 }
   0xe   : > { %p357_p4 = scmp.lt.s32.totalorder %s1909_s17, 1  ;;  %v1970_v1 = vrot.slane %v1949_v0, 7  ;;  %v491_v2 = vlaneseq  ;;  %v1012_v3 = vld [vmem:[%s2587_s0] sm:$0xff]  ;;  %v1919_v4 = vmov 0.0|0.0   ;;  %v1013_v5 = vld [vmem:[%s2587_s0 + $0x8] sm:$0xff]  ;;  %v1014_v11 = vld [vmem:[%s2587_s0 + $0x10] sm:$0xff] }
   0xf   : > { %1732 = vmatprep.subr.bf16.mxu0 %v1919_v4  ;;  %1768 = vmatprep.subr.bf16.mxu1 %v1919_v4  ;;  %v1661_v6 = vld [vmem:[%s2587_s0 + $0xc0] sm:$0xff]  ;;  %v1662_v7 = vld [vmem:[%s2587_s0 + $0xc8] sm:$0xff]  ;;  %v1733_v9 = vpack.c.bf16 %v1013_v5, %v1012_v3  ;;  %v1015_v12 = vld [vmem:[%s2587_s0 + $0x18] sm:$0xff]  ;;  %vm496_vm1 = vcmask 1046528   ;;  %s1920_s28 = smov 64   ;;  %vm970_vm2 = vcmask 1045504  }
  0x10   : > { %s2597_s17 = smov (!%p357_p4, %s1909_s17), 1  ;;  %468 = vst [vmem:[#allocation13 + $0x8] sm:$0xff] %v1970_v1  ;;  %v1989_v8 = vand.u32 127, %v491_v2  ;;  %868 = vst [vmem:[#allocation14 + $0x18] sm:$0xff] %v1970_v1  ;;  %v1769_v10 = vpack.c.bf16 %v1662_v7, %v1661_v6  ;;  %v1663_v13 = vld [vmem:[%s2587_s0 + $0xd0] sm:$0xff]  ;;  %v1664_v14 = vld [vmem:[%s2587_s0 + $0xd8] sm:$0xff]  ;;  %v1736_v15 = vpack.c.bf16 %v1015_v12, %v1014_v11 }
  0x11   : > { %s1640_s10 = sshll.u32 %s2597_s17, 3  ;;  %s1731_s11 = sshll.u32 %s2597_s17, 6  ;;  %1734 = vmatpush1.bf16.msra.mxu0 %v1733_v9  ;;  %v1772_v16 = vpack.c.bf16 %v1664_v14, %v1663_v13  ;;  %v1016_v17 = vld [vmem:[%s2587_s0 + $0x20] sm:$0xff]  ;;  %v1017_v18 = vld [vmem:[%s2587_s0 + $0x28] sm:$0xff]  ;;  %v2025_v21 = vld [vmem:[%s2587_s0 + $0x30] sm:$0xff]  ;;  %v910_v28 = vrot.slane %v1970_v1, 1 }
  0x12   : > { %1770 = vmatpush1.bf16.msra.mxu1 %v1769_v10  ;;  %v1665_v19 = vld [vmem:[%s2587_s0 + $0xe0] sm:$0xff]  ;;  %s366_s21 = sadd.s32 4294967295, %s1640_s10  ;;  %s1729_s22 = sadd.s32 56, %s1731_s11  ;;  %1735 = vmatprep.subr.bf16.mxu0 %v1919_v4  ;;  %v1666_v20 = vld [vmem:[%s2587_s0 + $0xe8] sm:$0xff]  ;;  %v2030_v22 = vld [vmem:[%s2587_s0 + $0x38] sm:$0xff]  ;;  %vm494_vm0 = vcmp.lt.s32.totalorder %v1989_v8, 64  ;;  %v1739_v31 = vpack.c.bf16 %v1017_v18, %v1016_v17 }
  0x13   : > { %1771 = vmatprep.subr.bf16.mxu1 %v1919_v4  ;;  %s1641_s29 = sshll.u32 %s366_s21, 3  ;;  %s406_s6 = scalar_lea.vmem %s2589_s2, %s1729_s22  ;;  %v2039_v23 = vld [vmem:[%s2587_s0 + $0xf0] sm:$0xff]  ;;  %v2044_v24 = vld [vmem:[%s2587_s0 + $0xf8] sm:$0xff]  ;;  %v2054_v25 = vld [vmem:[%s2587_s0 + $0x40] sm:$0xff]  ;;  %v1775_v32 = vpack.c.bf16 %v1666_v20, %v1665_v19  ;;  %v1742_v33 = vpack.c.bf16 %v2030_v22, %v2025_v21  ;;  %vm1001_vm3 = vcmask 523264  }
  0x14   : > { %s2049_s14 = scalar_lea.vmem %s2589_s2, %s1641_s29  ;;  %v2059_v26 = vld [vmem:[%s2587_s0 + $0x48] sm:$0xff]  ;;  %v791_v37 = vld [vmem:[%s406_s6] sm:$0xff]  ;;  %v1778_v38 = vpack.c.bf16 %v2044_v24, %v2039_v23  ;;  %v1022_v20 = vld [vmem:[%s2587_s0 + $0x50] sm:$0xff]  ;;  %s2568_s25 = scalar_lea.vmem %s2591_s4, %s1731_s11 }
  0x15   : > { %v1646_v27 = vld [vmem:[%s2049_s14 + $0x8] sm:$0xff]  ;;  %v1647_v29 = vld [vmem:[%s2049_s14 + $0x10] sm:$0xff]  ;;  %v1648_v30 = vld [vmem:[%s2049_s14 + $0x18] sm:$0xff]  ;;  %1737 = vmatpush1.bf16.msra.mxu0 %v1736_v15  ;;  %v1745_v43 = vpack.c.bf16 %v2059_v26, %v2054_v25  ;;  %v808_v57 = vsel %vm494_vm0, %v791_v37, %v1949_v0 }
  0x16   : > { %1773 = vmatpush1.bf16.msra.mxu1 %v1772_v16  ;;  %v495_v34 = vsel %vm494_vm0, %v1646_v27, %v1949_v0  ;;  %v540_v35 = vsel %vm494_vm0, %v1647_v29, %v1949_v0  ;;  %v585_v36 = vsel %vm494_vm0, %v1648_v30, %v1949_v0  ;;  %1738 = vmatprep.subr.bf16.mxu0 %v1919_v4  ;;  %v2093_v44 = vld [vmem:[%s2587_s0 + $0x100] sm:$0xff]  ;;  %v1670_v45 = vld [vmem:[%s2587_s0 + $0x108] sm:$0xff]  ;;  %v1651_v52 = vld [vmem:[%s2049_s14 + $0x30] sm:$0xff] }
  0x17   : > { %v497_v39 = vsel %vm496_vm1, %v495_v34, %v1949_v0  ;;  %v509_v40 = vsel %vm496_vm1, %v1949_v0, %v495_v34  ;;  %v2083_v41 = vld [vmem:[#allocation13 + $0x8] sm:$0x3]  ;;  %v542_v42 = vsel %vm496_vm1, %v540_v35, %v1949_v0  ;;  %1774 = vmatprep.subr.bf16.mxu1 %v1919_v4  ;;  %v554_v49 = vsel %vm496_vm1, %v1949_v0, %v540_v35  ;;  %v1649_v50 = vld [vmem:[%s2049_s14 + $0x20] sm:$0xff]  ;;  %v1652_v56 = vld [vmem:[%s2049_s14 + $0x38] sm:$0xff] }
  0x18   : > { %v2098_v46 = vrot.slane %v497_v39, 7  ;;  %v510_v47 = vrot.slane %v509_v40, 7  ;;  %v2100_v48 = vrot.slane %v542_v42, 7  ;;  %v1650_v51 = vld [vmem:[%s2049_s14 + $0x28] sm:$0xff]  ;;  %v555_v53 = vrot.slane %v554_v49, 7  ;;  %v1023_v21 = vld [vmem:[%s2587_s0 + $0x58] sm:$0xff] }
  0x19   : > { %v587_v54 = vsel %vm496_vm1, %v585_v36, %v1949_v0  ;;  %v599_v55 = vsel %vm496_vm1, %v1949_v0, %v585_v36  ;;  %1740 = vmatpush1.bf16.msra.mxu0 %v1739_v31  ;;  %v810_v60 = vsel %vm496_vm1, %v808_v57, %v1949_v0  ;;  %v1781_v61 = vpack.c.bf16 %v1670_v45, %v2093_v44  ;;  %v1671_v26 = vld [vmem:[%s2587_s0 + $0x110] sm:$0xff]  ;;  %v1672_v27 = vld [vmem:[%s2587_s0 + $0x118] sm:$0xff]  ;;  %v1673_v39 = vld [vmem:[%s2587_s0 + $0x120] sm:$0xff] }
  0x1a   : > { %1776 = vmatpush1.bf16.msra.mxu1 %v1775_v32  ;;  %513 = vst [vmem:[#allocation13 + $0x18] sm:$0xff] %v510_v47  ;;  %v2115_v58 = vrot.slane %v587_v54, 7  ;;  %v600_v59 = vrot.slane %v599_v55, 7  ;;  %1741 = vmatprep.subr.bf16.mxu0 %v1919_v4  ;;  %v911_v62 = vrot.slane %v2083_v41, 1  ;;  %558 = vst [vmem:[#allocation13 + $0x28] sm:$0xff] %v555_v53  ;;  %v630_v63 = vsel %vm494_vm0, %v1649_v50, %v1949_v0  ;;  %v1024_v32 = vld [vmem:[%s2587_s0 + $0x60] sm:$0xff] }
  0x1b   : > { %1777 = vmatprep.subr.bf16.mxu1 %v1919_v4  ;;  %v675_v2 = vsel %vm494_vm0, %v1650_v51, %v1949_v0  ;;  %v720_v3 = vsel %vm494_vm0, %v1651_v52, %v1949_v0  ;;  %v632_v5 = vsel %vm496_vm1, %v630_v63, %v1949_v0  ;;  %v644_v6 = vsel %vm496_vm1, %v1949_v0, %v630_v63  ;;  %v1674_v40 = vld [vmem:[%s2587_s0 + $0x128] sm:$0xff]  ;;  %v1026_v54 = vld [vmem:[%s2587_s0 + $0x70] sm:$0xff]  ;;  %v1027_v55 = vld [vmem:[%s2587_s0 + $0x78] sm:$0xff] }
  0x1c   : > { %603 = vst [vmem:[#allocation13 + $0x38] sm:$0xff] %v600_v59  ;;  %v677_v7 = vsel %vm496_vm1, %v675_v2, %v1949_v0  ;;  %v765_v9 = vsel %vm494_vm0, %v1652_v56, %v1949_v0  ;;  %v2141_v10 = vrot.slane %v632_v5, 7  ;;  %v645_v11 = vrot.slane %v644_v6, 7  ;;  %v1675_v56 = vld [vmem:[%s2587_s0 + $0x130] sm:$0xff]  ;;  %v1676_v63 = vld [vmem:[%s2587_s0 + $0x138] sm:$0xff] }
  0x1d   : > { %v2143_v12 = vrot.slane %v677_v7, 7  ;;  %v689_v13 = vsel %vm496_vm1, %v1949_v0, %v675_v2  ;;  %1743 = vmatpush1.bf16.msra.mxu0 %v1742_v33  ;;  %v722_v15 = vsel %vm496_vm1, %v720_v3, %v1949_v0  ;;  %v734_v16 = vsel %vm496_vm1, %v1949_v0, %v720_v3  ;;  %v1025_v33 = vld [vmem:[%s2587_s0 + $0x68] sm:$0xff] }
  0x1e   : > { %1779 = vmatpush1.bf16.msra.mxu1 %v1778_v38  ;;  %v690_v14 = vrot.slane %v689_v13, 7  ;;  %v767_v8 = vsel %vm496_vm1, %v765_v9, %v1949_v0  ;;  %1744 = vmatprep.subr.bf16.mxu0 %v1919_v4  ;;  %v913_v17 = vrot.slane %v2098_v46, 1  ;;  %648 = vst [vmem:[#allocation13 + $0x48] sm:$0xff] %v645_v11  ;;  %v2156_v18 = vrot.slane %v722_v15, 7  ;;  %v1028_v15 = vld [vmem:[%s2587_s0 + $0x80] sm:$0xff] }
  0x1f   : > { %1780 = vmatprep.subr.bf16.mxu1 %v1919_v4  ;;  %v735_v19 = vrot.slane %v734_v16, 7  ;;  %v2164_v22 = vrot.slane %v767_v8, 7  ;;  %v779_v23 = vsel %vm496_vm1, %v1949_v0, %v765_v9  ;;  %v2168_v24 = vrot.slane %v810_v60, 7 }
  0x20   : > { %693 = vst [vmem:[#allocation13 + $0x58] sm:$0xff] %v690_v14  ;;  %v819_v25 = vsel %vm496_vm1, %v1949_v0, %v808_v57  ;;  %v780_v30 = vrot.slane %v779_v23, 7  ;;  %v912_v34 = vsel %vm496_vm1, %v910_v28, %v911_v62  ;;  %v919_v37 = vrot.slane %v2115_v58, 1 }
  0x21   : > { %v2178_v29 = vld [vmem:[#allocation13 + $0x18] sm:$0x3]  ;;  %738 = vst [vmem:[#allocation13 + $0x68] sm:$0xff] %v735_v19  ;;  %v820_v31 = vrot.slane %v819_v25, 7  ;;  %1746 = vmatpush1.bf16.msra.mxu0 %v1745_v43  ;;  %v2190_v36 = vld [vmem:[#allocation13 + $0x28] sm:$0x3]  ;;  %v1748_v38 = vpack.c.bf16 %v1023_v21, %v1022_v20  ;;  %v1784_v43 = vpack.c.bf16 %v1672_v27, %v1671_v26  ;;  %v1751_v52 = vpack.c.bf16 %v1025_v33, %v1024_v32 }
  0x22   : > { %1782 = vmatpush1.bf16.msra.mxu1 %v1781_v61  ;;  %v914_v35 = vrot.slane %v2178_v29, 1  ;;  %1747 = vmatprep.subr.bf16.mxu0 %v1919_v4  ;;  %783 = vst [vmem:[#allocation13 + $0x78] sm:$0xff] %v780_v30  ;;  %v916_v45 = vrot.slane %v2100_v48, 1  ;;  %v917_v47 = vrot.slane %v2190_v36, 1  ;;  %v922_v51 = vrot.slane %v2141_v10, 1  ;;  %v1029_v19 = vld [vmem:[%s2587_s0 + $0x88] sm:$0xff] }
  0x23   : > { %1783 = vmatprep.subr.bf16.mxu1 %v1919_v4  ;;  %v2201_v42 = vld [vmem:[#allocation13 + $0x38] sm:$0x3]  ;;  %823 = vst [vmem:[#allocation14 + $0x8] sm:$0xff] %v820_v31  ;;  %v1787_v53 = vpack.c.bf16 %v1674_v40, %v1673_v39  ;;  %v925_v60 = vrot.slane %v2143_v12, 1  ;;  %v928_v61 = vrot.slane %v2156_v18, 1  ;;  %v931_v62 = vrot.slane %v2164_v22, 1 }
  0x24   : > { %v915_v44 = vsel %vm496_vm1, %v913_v17, %v914_v35  ;;  %v920_v49 = vrot.slane %v2201_v42, 1  ;;  %v981_v2 = vrot.slane %v2201_v42, 2  ;;  %v934_v6 = vrot.slane %v2168_v24, 1  ;;  %v1677_v20 = vld [vmem:[%s2587_s0 + $0x140] sm:$0xff]  ;;  %v1678_v21 = vld [vmem:[%s2587_s0 + $0x148] sm:$0xff]  ;;  %v1030_v42 = vld [vmem:[%s2587_s0 + $0x90] sm:$0xff] }
  0x25   : > { %v1890_v50 = vpack.i.bf16 %v915_v44, %v912_v34  ;;  %1749 = vmatpush1.bf16.msra.mxu0 %v1748_v38  ;;  %v2218_v59 = vld [vmem:[#allocation13 + $0x48] sm:$0x3]  ;;  %v971_v7 = vrot.slane %v1970_v1, 2  ;;  %v918_v9 = vsel %vm496_vm1, %v916_v45, %v917_v47  ;;  %v1754_v14 = vpack.c.bf16 %v1027_v55, %v1026_v54  ;;  %v2275_v38 = vld [vmem:[#allocation14 + $0x18] sm:$0x3]  ;;  %v1032_v55 = vld [vmem:[%s2587_s0 + $0xa0] sm:$0xff] }
  0x26   : > { %1785 = vmatpush1.bf16.msra.mxu1 %v1784_v43  ;;  %v921_v57 = vsel %vm496_vm1, %v919_v37, %v920_v49  ;;  %1750 = vmatprep.subr.bf16.mxu0 %v1919_v4  ;;  %v923_v3 = vrot.slane %v2218_v59, 1  ;;  %v1790_v17 = vpack.c.bf16 %v1676_v63, %v1675_v56  ;;  %v972_v23 = vrot.slane %v2083_v41, 2  ;;  %v1680_v44 = vld [vmem:[%s2587_s0 + $0x158] sm:$0xff] }
  0x27   : > { %1786 = vmatprep.subr.bf16.mxu1 %v1919_v4  ;;  %1891 = vrot.lane.b32.xlu0 %v1890_v50, %s1920_s28  ;;  %v2232_v5 = vld [vmem:[#allocation13 + $0x58] sm:$0x3]  ;;  %v974_v27 = vrot.slane %v2098_v46, 2  ;;  %v975_v34 = vrot.slane %v2178_v29, 2  ;;  %v977_v35 = vrot.slane %v2100_v48, 2  ;;  %v978_v37 = vrot.slane %v2190_v36, 2 }
  0x28   : > { %946 = vrot.lane.b32.xlu1 %v921_v57, %s1920_s28  ;;  %v926_v11 = vrot.slane %v2232_v5, 1  ;;  %v2238_v13 = vld [vmem:[#allocation13 + $0x68] sm:$0x3]  ;;  %v924_v16 = vsel %vm496_vm1, %v922_v51, %v923_v3  ;;  %v973_v32 = vsel %vm970_vm2, %v971_v7, %v972_v23  ;;  %v1757_v39 = vpack.c.bf16 %v1029_v19, %v1028_v15  ;;  %v1031_v29 = vld [vmem:[%s2587_s0 + $0x98] sm:$0xff]  ;;  %v1679_v36 = vld [vmem:[%s2587_s0 + $0x150] sm:$0xff] }
  0x29   : > { %v929_v8 = vrot.slane %v2238_v13, 1  ;;  %1752 = vmatpush1.bf16.msra.mxu0 %v1751_v52  ;;  %v2255_v25 = vld [vmem:[#allocation13 + $0x78] sm:$0x3]  ;;  %1653 = vmatprep.mubr.msk.f32.mxu0 %vm1001_vm3, %v973_v32  ;;  %v1793_v40 = vpack.c.bf16 %v1678_v21, %v1677_v20  ;;  %v980_v43 = vrot.slane %v2115_v58, 2  ;;  %v2293_v45 = vsel %vm970_vm2, %v974_v27, %v975_v34  ;;  %v1693_v32 = vld [vmem:[%s2587_s0 + $0x180] sm:$0xff] }
  0x2a   : > { %1788 = vmatpush1.bf16.msra.mxu1 %v1787_v53  ;;  %v2257_v26 = vld [vmem:[#allocation14 + $0x8] sm:$0x3]  ;;  %1753 = vmatprep.subr.bf16.mxu0 %v1919_v4  ;;  %v927_v30 = vsel %vm496_vm1, %v925_v60, %v926_v11  ;;  %v932_v41 = vrot.slane %v2255_v25, 1  ;;  %v2296_v47 = vsel %vm970_vm2, %v977_v35, %v978_v37  ;;  %v938_v52 = vrot.slane %v2275_v38, 1  ;;  %v1684_v15 = vld [vmem:[%s2587_s0 + $0x178] sm:$0xff] }
  0x2b   : > { %1789 = vmatprep.subr.bf16.mxu1 %v1919_v4  ;;  %944 = vrot.lane.b32.xlu0 %v918_v9, %s1920_s28  ;;  %v930_v31 = vsel %vm496_vm1, %v928_v61, %v929_v8  ;;  %v935_v33 = vrot.slane %v2257_v26, 1  ;;  %v2301_v49 = vsel %vm970_vm2, %v980_v43, %v981_v2  ;;  %v1760_v53 = vpack.c.bf16 %v1031_v29, %v1030_v42  ;;  %v1033_v60 = vld [vmem:[%s2587_s0 + $0xa8] sm:$0xff]  ;;  %v1681_v61 = vld [vmem:[%s2587_s0 + $0x160] sm:$0xff] }
  0x2c   : > { %948 = vrot.lane.b32.xlu1 %v924_v16, %s1920_s28  ;;  %v933_v50 = vsel %vm496_vm1, %v931_v62, %v932_v41  ;;  %1685 = vmatprep.mubr.msk.f32.mxu1 %vm1001_vm3, %v2293_v45  ;;  %v1796_v54 = vpack.c.bf16 %v1680_v44, %v1679_v36  ;;  %v983_v56 = vrot.slane %v2141_v10, 2  ;;  %v984_v57 = vrot.slane %v2218_v59, 2  ;;  %v1682_v62 = vld [vmem:[%s2587_s0 + $0x168] sm:$0xff] }
  0x2d   : > { %1755 = vmatpush1.bf16.msra.mxu0 %v1754_v14  ;;  %v936_v51 = vsel %vm496_vm1, %v934_v6, %v935_v33  ;;  %v939_v63 = vsel %vm496_vm1, %v910_v28, %v938_v52  ;;  %v1763_v2 = vpack.c.bf16 %v1033_v60, %v1032_v55  ;;  %v1799_v3 = vpack.c.bf16 %v1682_v62, %v1681_v61  ;;  %v1034_v6 = vld [vmem:[%s2587_s0 + $0xb0] sm:$0xff]  ;;  %v1035_v28 = vld [vmem:[%s2587_s0 + $0xb8] sm:$0xff]  ;;  %v1694_v33 = vld [vmem:[%s2587_s0 + $0x188] sm:$0xff] }
  0x2e   : > { %1791 = vmatpush1.bf16.msra.mxu1 %v1790_v17  ;;  %1756 = vmatprep.subr.bf16.mxu0 %v1919_v4  ;;  %v2327_v59 = vsel %vm970_vm2, %v983_v56, %v984_v57  ;;  %v986_v9 = vrot.slane %v2143_v12, 2  ;;  %v987_v11 = vrot.slane %v2232_v5, 2  ;;  %v1683_v14 = vld [vmem:[%s2587_s0 + $0x170] sm:$0xff]  ;;  %v1766_v16 = vpack.c.bf16 %v1035_v28, %v1034_v6  ;;  %v1698_v44 = vld [vmem:[%s2587_s0 + $0x1a8] sm:$0xff]  ;;  %v1704_v61 = vld [vmem:[%s2587_s0 + $0x1d8] sm:$0xff] }
  0x2f   : > { %1792 = vmatprep.subr.bf16.mxu1 %v1919_v4  ;;  %950 = vrot.lane.b32.xlu0 %v927_v30, %s1920_s28  ;;  %v1802_v8 = vpack.c.bf16 %v1684_v15, %v1683_v14  ;;  %v989_v17 = vrot.slane %v2156_v18, 2  ;;  %v990_v19 = vrot.slane %v2238_v13, 2  ;;  %v992_v21 = vrot.slane %v2164_v22, 2  ;;  %v1702_v55 = vld [vmem:[%s2587_s0 + $0x1c8] sm:$0xff]  ;;  %v1703_v60 = vld [vmem:[%s2587_s0 + $0x1d0] sm:$0xff]  ;;  %v1708_v28 = vld [vmem:[%s2587_s0 + $0x1f8] sm:$0xff] }
  0x30   : > { %952 = vrot.lane.b32.xlu1 %v930_v31, %s1920_s28  ;;  %v2350_v5 = vsel %vm970_vm2, %v986_v9, %v987_v11  ;;  %v993_v23 = vrot.slane %v2255_v25, 2  ;;  %v995_v13 = vrot.slane %v2168_v24, 2  ;;  %v996_v30 = vrot.slane %v2257_v26, 2  ;;  %v1707_v11 = vld [vmem:[%s2587_s0 + $0x1f0] sm:$0xff] }
  0x31   : > { %1758 = vmatpush1.bf16.msra.mxu0 %v1757_v39  ;;  %v2357_v20 = vsel %vm970_vm2, %v989_v17, %v990_v19  ;;  %v999_v41 = vrot.slane %v2275_v38, 2  ;;  %v1805_v37 = vpack.c.bf16 %v1694_v33, %v1693_v32  ;;  %v1695_v38 = vld [vmem:[%s2587_s0 + $0x190] sm:$0xff]  ;;  %v1712_v19 = vld [vmem:[%s2587_s0 + $0x218] sm:$0xff] }
  0x32   : > { %1794 = vmatpush1.bf16.msra.mxu1 %v1793_v40  ;;  %1759 = vmatprep.subr.bf16.mxu0 %v1919_v4  ;;  %v2364_v27 = vsel %vm970_vm2, %v992_v21, %v993_v23  ;;  %v2369_v31 = vsel %vm970_vm2, %v995_v13, %v996_v30  ;;  %v1711_v17 = vld [vmem:[%s2587_s0 + $0x210] sm:$0xff]  ;;  %v1713_v23 = vld [vmem:[%s2587_s0 + $0x220] sm:$0xff]  ;;  %v1714_v13 = vld [vmem:[%s2587_s0 + $0x228] sm:$0xff] }
  0x33   : > { %1795 = vmatprep.subr.bf16.mxu1 %v1919_v4  ;;  %954 = vrot.lane.b32.xlu0 %v933_v50, %s1920_s28  ;;  %v2375_v25 = vsel %vm970_vm2, %v971_v7, %v999_v41  ;;  %v1696_v7 = vld [vmem:[%s2587_s0 + $0x198] sm:$0xff]  ;;  %v1699_v50 = vld [vmem:[%s2587_s0 + $0x1b0] sm:$0xff]  ;;  %v1832_v21 = vpack.c.bf16 %v1712_v19, %v1711_v17 }
  0x34   : > { %956 = vrot.lane.b32.xlu1 %v936_v51, %s1920_s28  ;;  %v1808_v36 = vpack.c.bf16 %v1696_v7, %v1695_v38  ;;  %v1700_v51 = vld [vmem:[%s2587_s0 + $0x1b8] sm:$0xff] }
  0x35   : > { %1761 = vmatpush1.bf16.msra.mxu0 %v1760_v53  ;;  %v1716_v30 = vld [vmem:[%s2587_s0 + $0x238] sm:$0xff] }
  0x36   : > { %1797 = vmatpush1.bf16.msra.mxu1 %v1796_v54  ;;  %1762 = vmatprep.subr.bf16.mxu0 %v1919_v4  ;;  %v1701_v54 = vld [vmem:[%s2587_s0 + $0x1c0] sm:$0xff] }
  0x37   : > { %1798 = vmatprep.subr.bf16.mxu1 %v1919_v4  ;;  %958 = vrot.lane.b32.xlu0 %v939_v63, %s1920_s28 }
  0x39   : > { %1764 = vmatpush1.bf16.msra.mxu0 %v1763_v2  ;;  %v1705_v2 = vld [vmem:[%s2587_s0 + $0x1e0] sm:$0xff] }
  0x3a   : > { %1800 = vmatpush1.bf16.msra.mxu1 %v1799_v3  ;;  %1765 = vmatprep.subr.bf16.mxu0 %v1919_v4  ;;  %v1706_v3 = vld [vmem:[%s2587_s0 + $0x1e8] sm:$0xff] }
  0x3b   : > { %1801 = vmatprep.subr.bf16.mxu1 %v1919_v4 }
  0x3d   : > { %1767 = vmatpush1.bf16.msra.mxu0 %v1766_v16  ;;  %v1709_v16 = vld [vmem:[%s2587_s0 + $0x200] sm:$0xff] }
  0x3e   : > { %1803 = vmatpush1.bf16.msra.mxu1 %v1802_v8  ;;  %1804 = vmatprep.subr.bf16.mxu0 %v1919_v4  ;;  %v1710_v8 = vld [vmem:[%s2587_s0 + $0x208] sm:$0xff] }
  0x3f   : > { %1840 = vmatprep.subr.bf16.mxu1 %v1919_v4 }
  0x99   : > { %v1892_v34 = vpop.permute.xlu0 %1891 }
  0x9a   : > { %v1894_v26 = vunpack.i.h.bf16 %v1892_v34  ;;  %v1893_v35 = vunpack.i.l.bf16 %v1892_v34  ;;  %v947_v43 = vpop.permute.xlu1 %946 }
  0x9c   : > { %v1002_v39 = vsel %vm1001_vm3, %v1970_v1, %v1893_v35  ;;  %v1003_v40 = vsel %vm1001_vm3, %v2098_v46, %v1894_v26  ;;  %v1697_v46 = vld [vmem:[%s2587_s0 + $0x1a0] sm:$0xff] }
  0x9d   : > { %1117 = vmatmul.mubr.f32.vlgmr.msra.gmra.mrb[0].mxu0 %v1002_v39  ;;  %1257 = vmatmul.mubr.f32.vlgmr.msra.gmra.mrb[0].mxu1 %v1003_v40  ;;  %v945_v42 = vpop.permute.xlu0 %944 }
  0x9e   : > { %1806 = vmatpush1.bf16.msra.mxu0 %v1805_v37  ;;  %1852 = vmatpush1.bf16.msra.mxu1 %v1805_v37  ;;  %v2395_v29 = vsel %vm1001_vm3, %v2100_v48, %v945_v42  ;;  %v1811_v48 = vpack.c.bf16 %v1698_v44, %v1697_v46  ;;  %v949_v52 = vpop.permute.xlu1 %948 }
  0x9f   : > { %1654 = vmatprep.mubr.msk.f32.mxu0 %vm1001_vm3, %v2293_v45  ;;  %1686 = vmatprep.mubr.msk.f32.mxu1 %vm1001_vm3, %v2296_v47  ;;  %v2412_v45 = vsel %vm1001_vm3, %v2115_v58, %v947_v43  ;;  %v1814_v58 = vpack.c.bf16 %v1700_v51, %v1699_v50  ;;  %v2430_v53 = vsel %vm1001_vm3, %v2141_v10, %v949_v52 }
  0xa0   : > { %1807 = vmatprep.subr.bf16.mxu0 %v1919_v4  ;;  %1841 = vmatprep.subr.bf16.mxu1 %v1919_v4  ;;  %v1817_v10 = vpack.c.bf16 %v1702_v55, %v1701_v54 }
  0xa1   : > { %1122 = vmatmul.mubr.f32.gmra.mrb[2].mxu0 %v1003_v40  ;;  %1262 = vmatmul.mubr.f32.gmra.mrb[2].mxu1 %v2395_v29  ;;  %v951_v56 = vpop.permute.xlu0 %950 }
  0xa2   : > { %1809 = vmatpush1.bf16.msra.mxu0 %v1808_v36  ;;  %1853 = vmatpush1.bf16.msra.mxu1 %v1808_v36  ;;  %v2448_v57 = vsel %vm1001_vm3, %v2143_v12, %v951_v56  ;;  %v953_v62 = vpop.permute.xlu1 %952  ;;  %v1820_v12 = vpack.c.bf16 %v1704_v61, %v1703_v60 }
  0xa3   : > { %1810 = vmatprep.subr.bf16.mxu0 %v1919_v4  ;;  %1842 = vmatprep.subr.bf16.mxu1 %v1919_v4  ;;  %v2466_v63 = vsel %vm1001_vm3, %v2156_v18, %v953_v62  ;;  %v1823_v18 = vpack.c.bf16 %v1706_v3, %v1705_v2 }
  0xa4   : > { %1655 = vmatprep.mubr.msk.f32.mxu0 %vm1001_vm3, %v2296_v47  ;;  %1687 = vmatprep.mubr.msk.f32.mxu1 %vm1001_vm3, %v2301_v49 }
  0xa5   : > { %1127 = vmatmul.mubr.f32.gmra.mrb[4].mxu0 %v2395_v29  ;;  %1267 = vmatmul.mubr.f32.gmra.mrb[4].mxu1 %v2412_v45  ;;  %v955_v6 = vpop.permute.xlu0 %954 }
  0xa6   : > { %1812 = vmatpush1.bf16.msra.mxu0 %v1811_v48  ;;  %1854 = vmatpush1.bf16.msra.mxu1 %v1811_v48  ;;  %v1009_v9 = vsel %vm1001_vm3, %v2164_v22, %v955_v6  ;;  %v957_v14 = vpop.permute.xlu1 %956  ;;  %v1826_v22 = vpack.c.bf16 %v1708_v28, %v1707_v11  ;;  %v1725_v6 = vld [vmem:[%s2588_s1] ss:$0 sm:$0xff] }
  0xa7   : > { %1813 = vmatprep.subr.bf16.mxu0 %v1919_v4  ;;  %1843 = vmatprep.subr.bf16.mxu1 %v1919_v4  ;;  %v1010_v15 = vsel %vm1001_vm3, %v2168_v24, %v957_v14  ;;  %v1829_v24 = vpack.c.bf16 %v1710_v8, %v1709_v16 }
  0xa8   : > { %1656 = vmatprep.mubr.msk.f32.mxu0 %vm1001_vm3, %v2301_v49  ;;  %1688 = vmatprep.mubr.msk.f32.mxu1 %vm1001_vm3, %v2327_v59 }
  0xa9   : > { %1132 = vmatmul.mubr.f32.gmra.mrb[6].mxu0 %v2412_v45  ;;  %1272 = vmatmul.mubr.f32.gmra.mrb[6].mxu1 %v2430_v53 }
  0xaa   : > { %1815 = vmatpush1.bf16.msra.mxu0 %v1814_v58  ;;  %1855 = vmatpush1.bf16.msra.mxu1 %v1814_v58 }
  0xab   : > { %1816 = vmatprep.subr.bf16.mxu0 %v1919_v4  ;;  %1844 = vmatprep.subr.bf16.mxu1 %v1919_v4 }
  0xac   : > { %1657 = vmatprep.mubr.msk.f32.mxu0 %vm1001_vm3, %v2327_v59  ;;  %1689 = vmatprep.mubr.msk.f32.mxu1 %vm1001_vm3, %v2350_v5 }
  0xad   : > { %1137 = vmatmul.mubr.f32.gmra.mrb[8].mxu0 %v2430_v53  ;;  %1277 = vmatmul.mubr.f32.gmra.mrb[8].mxu1 %v2448_v57 }
  0xae   : > { %1818 = vmatpush1.bf16.msra.mxu0 %v1817_v10  ;;  %1856 = vmatpush1.bf16.msra.mxu1 %v1817_v10 }
  0xaf   : > { %1819 = vmatprep.subr.bf16.mxu0 %v1919_v4  ;;  %1845 = vmatprep.subr.bf16.mxu1 %v1919_v4 }
  0xb0   : > { %1658 = vmatprep.mubr.msk.f32.mxu0 %vm1001_vm3, %v2350_v5  ;;  %1690 = vmatprep.mubr.msk.f32.mxu1 %vm1001_vm3, %v2357_v20 }
  0xb1   : > { %1142 = vmatmul.mubr.f32.gmra.mrb[10].mxu0 %v2448_v57  ;;  %1282 = vmatmul.mubr.f32.gmra.mrb[10].mxu1 %v2466_v63 }
  0xb2   : > { %1821 = vmatpush1.bf16.msra.mxu0 %v1820_v12  ;;  %1857 = vmatpush1.bf16.msra.mxu1 %v1820_v12 }
  0xb3   : > { %1822 = vmatprep.subr.bf16.mxu0 %v1919_v4  ;;  %1846 = vmatprep.subr.bf16.mxu1 %v1919_v4 }
  0xb4   : > { %1659 = vmatprep.mubr.msk.f32.mxu0 %vm1001_vm3, %v2357_v20  ;;  %1691 = vmatprep.mubr.msk.f32.mxu1 %vm1001_vm3, %v2364_v27 }
  0xb5   : > { %1147 = vmatmul.mubr.f32.gmra.mrb[12].mxu0 %v2466_v63  ;;  %1287 = vmatmul.mubr.f32.gmra.mrb[12].mxu1 %v1009_v9 }
  0xb6   : > { %1824 = vmatpush1.bf16.msra.mxu0 %v1823_v18  ;;  %1858 = vmatpush1.bf16.msra.mxu1 %v1823_v18 }
  0xb7   : > { %1825 = vmatprep.subr.bf16.mxu0 %v1919_v4  ;;  %1847 = vmatprep.subr.bf16.mxu1 %v1919_v4 }
  0xb8   : > { %1660 = vmatprep.mubr.msk.f32.mxu0 %vm1001_vm3, %v2364_v27  ;;  %1692 = vmatprep.mubr.msk.f32.mxu1 %vm1001_vm3, %v2369_v31 }
  0xb9   : > { %1152 = vmatmul.mubr.f32.gmra.mrb[14].mxu0 %v1009_v9  ;;  %1292 = vmatmul.mubr.f32.gmra.mrb[14].mxu1 %v1010_v15 }
  0xba   : > { %1827 = vmatpush1.bf16.msra.mxu0 %v1826_v22  ;;  %1859 = vmatpush1.bf16.msra.mxu1 %v1826_v22 }
  0xbb   : > { %1828 = vmatprep.subr.bf16.mxu0 %v1919_v4  ;;  %1848 = vmatprep.subr.bf16.mxu1 %v1919_v4 }
  0xbc   : > { %1717 = vmatprep.mubr.msk.f32.mxu0 %vm1001_vm3, %v2296_v47  ;;  %1721 = vmatprep.mubr.msk.f32.mxu1 %vm1001_vm3, %v2357_v20  ;;  %v1835_v47 = vpack.c.bf16 %v1714_v13, %v1713_v23  ;;  %v1715_v20 = vld [vmem:[%s2587_s0 + $0x230] sm:$0xff] }
  0xbd   : > { %v1838_v41 = vpack.c.bf16 %v1716_v30, %v1715_v20 }
  0xbe   : > { %1830 = vmatpush1.bf16.msra.mxu0 %v1829_v24  ;;  %1860 = vmatpush1.bf16.msra.mxu1 %v1829_v24 }
  0xbf   : > { %1831 = vmatprep.subr.bf16.mxu0 %v1919_v4  ;;  %1849 = vmatprep.subr.bf16.mxu1 %v1919_v4 }
  0xc2   : > { %1833 = vmatpush1.bf16.msra.mxu0 %v1832_v21  ;;  %1861 = vmatpush1.bf16.msra.mxu1 %v1832_v21 }
  0xc3   : > { %1834 = vmatprep.subr.bf16.mxu0 %v1919_v4  ;;  %1850 = vmatprep.subr.bf16.mxu1 %v1919_v4 }
  0xc6   : > { %1836 = vmatpush1.bf16.msra.mxu0 %v1835_v47  ;;  %1862 = vmatpush1.bf16.msra.mxu1 %v1835_v47 }
  0xc7   : > { %1837 = vmatprep.subr.bf16.mxu0 %v1919_v4  ;;  %1851 = vmatprep.subr.bf16.mxu1 %v1919_v4  ;;  %v959_v4 = vpop.permute.xlu0 %958 }
  0xca   : > { %1839 = vmatpush1.bf16.msra.mxu0 %v1838_v41  ;;  %1863 = vmatpush1.bf16.msra.mxu1 %v1838_v41 }
  0xcd   : > { %1413 = vmatmul.mubr.f32.vlgmr.msra.gmra.mrb[16].mxu0 %v2395_v29  ;;  %1433 = vmatmul.mubr.f32.vlgmr.msra.gmra.mrb[16].mxu1 %v2466_v63 }
  0xce   : > { %1718 = vmatprep.mubr.msk.f32.mxu0 %vm1001_vm3, %v2301_v49  ;;  %1722 = vmatprep.mubr.msk.f32.mxu1 %vm1001_vm3, %v2364_v27  ;;  %v1011_v49 = vsel %vm1001_vm3, %v1970_v1, %v959_v4 }
  0xd1   : > { %1418 = vmatmul.mubr.f32.gmra.mrb[18].mxu0 %v2412_v45  ;;  %1438 = vmatmul.mubr.f32.gmra.mrb[18].mxu1 %v1009_v9 }
  0xd2   : > { %1719 = vmatprep.mubr.msk.f32.mxu0 %vm1001_vm3, %v2327_v59  ;;  %1723 = vmatprep.mubr.msk.f32.mxu1 %vm1001_vm3, %v2369_v31 }
  0xd5   : > { %1423 = vmatmul.mubr.f32.gmra.mrb[20].mxu0 %v2430_v53  ;;  %1443 = vmatmul.mubr.f32.gmra.mrb[20].mxu1 %v1010_v15 }
  0xd6   : > { %1720 = vmatprep.mubr.msk.f32.mxu0 %vm1001_vm3, %v2350_v5  ;;  %1724 = vmatprep.mubr.msk.f32.mxu1 %vm1001_vm3, %v2375_v25 }
  0xd9   : > { %1428 = vmatmul.mubr.f32.gmra.mrb[22].mxu0 %v2448_v57  ;;  %1448 = vmatmul.mubr.f32.gmra.mrb[22].mxu1 %v1011_v49 }
 0x170   : > { %v1118_v59 = vpop.f32.mrb[0].mxu0  ;;  %v1258_v27 = vpop.f32.mrb[0].mxu1 }
 0x171   : > { %v1305_v32 = vadd.f32 %v1258_v27, %v1118_v59  ;;  %v1120_v31 = vpop.f32.mrb[1].mxu0  ;;  %v1260_v33 = vpop.f32.mrb[1].mxu1 }
 0x174   : > { %v1123_v34 = vpop.f32.mrb[2].mxu0  ;;  %v1263_v26 = vpop.f32.mrb[2].mxu1 }
 0x175   : > { %v1306_v35 = vadd.f32 %v1263_v26, %v1123_v34  ;;  %v1125_v37 = vpop.f32.mrb[3].mxu0  ;;  %v1265_v38 = vpop.f32.mrb[3].mxu1 }
 0x178   : > { %v1128_v5 = vpop.f32.mrb[4].mxu0  ;;  %v1268_v7 = vpop.f32.mrb[4].mxu1 }
 0x179   : > { %v1130_v39 = vpop.f32.mrb[5].mxu0  ;;  %v1307_v25 = vadd.f32 %v1268_v7, %v1128_v5  ;;  %v1270_v40 = vpop.f32.mrb[5].mxu1 }
 0x17c   : > { %v1133_v42 = vpop.f32.mrb[6].mxu0  ;;  %v1273_v1 = vpop.f32.mrb[6].mxu1 }
 0x17d   : > { %v1135_v43 = vpop.f32.mrb[7].mxu0  ;;  %v1308_v29 = vadd.f32 %v1273_v1, %v1133_v42  ;;  %v1275_v36 = vpop.f32.mrb[7].mxu1 }
 0x180   : > { %v1138_v46 = vpop.f32.mrb[8].mxu0  ;;  %v1278_v44 = vpop.f32.mrb[8].mxu1 }
 0x181   : > { %v1140_v48 = vpop.f32.mrb[9].mxu0  ;;  %v1309_v45 = vadd.f32 %v1278_v44, %v1138_v46  ;;  %v1280_v50 = vpop.f32.mrb[9].mxu1 }
 0x184   : > { %v1143_v51 = vpop.f32.mrb[10].mxu0  ;;  %v1283_v52 = vpop.f32.mrb[10].mxu1 }
 0x185   : > { %v1145_v58 = vpop.f32.mrb[11].mxu0  ;;  %v1310_v53 = vadd.f32 %v1283_v52, %v1143_v51  ;;  %v1285_v54 = vpop.f32.mrb[11].mxu1 }
 0x188   : > { %v1148_v55 = vpop.f32.mrb[12].mxu0  ;;  %v1288_v56 = vpop.f32.mrb[12].mxu1 }
 0x189   : > { %v1150_v10 = vpop.f32.mrb[13].mxu0  ;;  %v1311_v57 = vadd.f32 %v1288_v56, %v1148_v55  ;;  %v1290_v60 = vpop.f32.mrb[13].mxu1 }
 0x18c   : > { %v1153_v61 = vpop.f32.mrb[14].mxu0  ;;  %v1293_v62 = vpop.f32.mrb[14].mxu1 }
 0x18d   : > { %v1155_v12 = vpop.f32.mrb[15].mxu0  ;;  %v1312_v63 = vadd.f32 %v1293_v62, %v1153_v61  ;;  %v1295_v2 = vpop.f32.mrb[15].mxu1 }
 0x1a0   : > { %v1414_v3 = vpop.f32.mrb[16].mxu0  ;;  %v1434_v18 = vpop.f32.mrb[16].mxu1 }
 0x1a1   : > { %v1461_v9 = vadd.f32 %v1414_v3, %v1305_v32  ;;  %v1465_v11 = vadd.f32 %v1434_v18, %v1309_v45  ;;  %v1416_v28 = vpop.f32.mrb[17].mxu0  ;;  %v1436_v14 = vpop.f32.mrb[17].mxu1 }
 0x1a3   : > { %v1492_v22 = vadd.f32 %v1725_v6, %v1461_v9  ;;  %v1496_v15 = vadd.f32 %v1725_v6, %v1465_v11 }
 0x1a4   : > { %v1419_v16 = vpop.f32.mrb[18].mxu0  ;;  %v1439_v8 = vpop.f32.mrb[18].mxu1 }
 0x1a5   : > { %1516 = vst [vmem:[%s2568_s25] sm:$0xff] %v1492_v22  ;;  %1520 = vst [vmem:[%s2568_s25 + $0x20] sm:$0xff] %v1496_v15  ;;  %v1462_v24 = vadd.f32 %v1419_v16, %v1306_v35  ;;  %v1466_v17 = vadd.f32 %v1439_v8, %v1310_v53  ;;  %v1421_v19 = vpop.f32.mrb[19].mxu0  ;;  %v1441_v21 = vpop.f32.mrb[19].mxu1 }
 0x1a7   : > { %v1493_v23 = vadd.f32 %v1725_v6, %v1462_v24  ;;  %v1497_v13 = vadd.f32 %v1725_v6, %v1466_v17 }
 0x1a8   : > { %v1424_v47 = vpop.f32.mrb[20].mxu0  ;;  %v1444_v20 = vpop.f32.mrb[20].mxu1 }
 0x1a9   : > { %1517 = vst [vmem:[%s2568_s25 + $0x8] sm:$0xff] %v1493_v23  ;;  %1521 = vst [vmem:[%s2568_s25 + $0x28] sm:$0xff] %v1497_v13  ;;  %v1463_v30 = vadd.f32 %v1424_v47, %v1307_v25  ;;  %v1467_v41 = vadd.f32 %v1444_v20, %v1311_v57  ;;  %v1426_v4 = vpop.f32.mrb[21].mxu0  ;;  %v1446_v49 = vpop.f32.mrb[21].mxu1 }
 0x1ab   : > { %v1494_v59 = vadd.f32 %v1725_v6, %v1463_v30  ;;  %v1498_v27 = vadd.f32 %v1725_v6, %v1467_v41 }
 0x1ac   : > { %v1429_v32 = vpop.f32.mrb[22].mxu0  ;;  %v1449_v31 = vpop.f32.mrb[22].mxu1 }
 0x1ad   : > { %1518 = vst [vmem:[%s2568_s25 + $0x10] sm:$0xff] %v1494_v59  ;;  %1522 = vst [vmem:[%s2568_s25 + $0x30] sm:$0xff] %v1498_v27  ;;  %v1464_v33 = vadd.f32 %v1429_v32, %v1308_v29  ;;  %v1468_v34 = vadd.f32 %v1449_v31, %v1312_v63  ;;  %v1431_v26 = vpop.f32.mrb[23].mxu0  ;;  %v1451_v35 = vpop.f32.mrb[23].mxu1 }
 0x1af   : > { %v1495_v37 = vadd.f32 %v1725_v6, %v1464_v33  ;;  %v1499_v38 = vadd.f32 %v1725_v6, %v1468_v34 }
 0x1b1   : > { %1519 = vst [vmem:[%s2568_s25 + $0x18] sm:$0xff] %v1495_v37  ;;  %1523 = vst [vmem:[%s2568_s25 + $0x38] sm:$0xff] %v1499_v38 }
 0x1b2 PF: > { %s16_s19 = sadd.s32 1, %s1917_s19   ;;  %s2592_s17 = smov %s1913_s18 }
 0x1b3   : > { %p13_p5 = scmp.ge.s32.totalorder %s16_s19, 4   ;;  %s2593_s18 = smov %s2595_s3 }
 0x1b5   :  { %15 = sbr.rel (!%p13_p5) target bundleno = 2 (0x2), region = 113 }

// kernel: vgg19_features_forward.12
= control target key start
LH: loop header
LB: loop body
LE: loop exit
PB: predicated region body
PF: predicated region fallthrough
CT: control target
= control target key end

     0   :  { %s3946_s0 = inlined_call_operand.vmem [shape: f32[3,384,128], index: 0, kind: input, shape index: {}]   ;;  %s3947_s1 = inlined_call_operand.vmem [shape: f32[1,128], index: 1, kind: input, shape index: {}]   ;;  %s3948_s2 = inlined_call_operand.vmem [shape: f32[2,8,8,128], index: 2, kind: input, shape index: {}]   ;;  %s3949_s3 = inlined_call_operand.<no memory space> [shape: f32[], index: 3, kind: input, shape index: {}]   ;;  %s3950_s4 = inlined_call_operand.hbm [shape: f32[2,8,8,128], index: 4, kind: output, shape index: {0}]   ;;  %s3951_s5 = inlined_call_operand.vmem [shape: f32[2,4,4,128], index: 5, kind: output, shape index: {1}]  }
   0x1   :  { %v3053_v0 = vstv %s3949_s3 }
   0x2   :  { %13 = vsyncpa [#allocation14], 0 }
   0x3   :  { %15 = vsyncpa [#allocation14 + $0x1], 0  ;;  %s3055_s20 = smov 0   ;;  %s3057_s21 = smov 0  }
   0x4   :  { %s3059_s22 = smov 0   ;;  %s3061_s23 = smov 0  }
   0x5   :  { %s3063_s24 = smov 0   ;;  %s3065_s25 = smov 0  }
   0x6 LB: > { %s2102_s3 = sadd.s32 4294967295, %s3015_s25   ;;  %s2103_s26 = sadd.s32 4294967294, %s3015_s25   ;;  %s3015_s25 = sphi %s3065_s25, %s21_s25   ;;  %s3011_s24 = sphi %s3063_s24, %s3958_s24   ;;  %s3007_s23 = sphi %s3061_s23, %s3957_s23   ;;  %s3003_s22 = sphi %s3059_s22, %s3956_s22   ;;  %s2999_s21 = sphi %s3057_s21, %s3955_s21   ;;  %s2995_s20 = sphi %s3055_s20, %s3954_s20  }
   0x7   : > { %s33_s27 = sadd.s32 1, %s3011_s24  ;;  %s152_s28 = sadd.s32 1, %s3003_s22 }
   0x8   : > { %p35_p0 = scmp.ge.s32.totalorder %s33_s27, 2  ;;  %p162_p1 = scmp.ne.s32.totalorder %s3003_s22, %s2999_s21 }
   0x9   : > { %p163_p2 = scmp.eq.s32.totalorder %s2102_s3, 1  ;;  %p168_p3 = scmp.ne.s32.totalorder %s2999_s21, %s2995_s20 }
   0xa   : > { %s3960_s27 = smov (%p35_p0, %s33_s27), 0  ;;  %p169_p5 = scmp.eq.s32.totalorder %s2103_s26, 1 }
   0xb   : > { %p3095_p4 = por %p163_p2, %p162_p1  ;;  %s147_s30 = ssub.s32 %s3011_s24, %s3960_s27 }
   0xc   : > { %p2106_p6 = scmp.ge.s32.totalorder %s3015_s25, 1  ;;  %p150_p7 = scmp.eq.s32.totalorder %s147_s30, 0 }
   0xd   : > { %p3102_p8 = por %p169_p5, %p168_p3  ;;  %p303_p9 = scmp.lt.s32.totalorder %s3015_s25, 3 }
   0xe   : > { %s3108_s7 = scalar_select %p150_p7, %s3003_s22, %s152_s28  }
   0xf   : > { %p304_p10 = pnand %p2106_p6, %p303_p9 }
  0x11   : > { %307 = sbr.rel (%p304_p10) target bundleno = 399 (0x18f), region = 36 }
  0x18   : > { %v1018_v1 = vld [vmem:[%s3946_s0 + $0x80] sm:$0xff]  ;;  %v1019_v2 = vld [vmem:[%s3946_s0 + $0x88] sm:$0xff]  ;;  %v492_v4 = vrot.slane %v3053_v0, 7  ;;  %p397_p11 = scmp.lt.s32.totalorder %s3007_s23, 1  ;;  %v1020_v11 = vld [vmem:[%s3946_s0 + $0x90] sm:$0xff]  ;;  %vm527_vm0 = vcmask 1046528  }
  0x19   : > { %v1034_v3 = vld [vmem:[%s3946_s0 + $0x100] sm:$0xff]  ;;  %v2600_v5 = vpack.c.bf16 %v1019_v2, %v1018_v1  ;;  %v1035_v6 = vld [vmem:[%s3946_s0 + $0x108] sm:$0xff]  ;;  %v1021_v12 = vld [vmem:[%s3946_s0 + $0x98] sm:$0xff]  ;;  %vm961_vm1 = vcmask 1045504   ;;  %s371_s11 = sand.u32 1, %s2999_s21   ;;  %vm1912_vm2 = vcmask 1043456  }
  0x1a   : > { %v1002_v7 = vld [vmem:[%s3946_s0] sm:$0xff]  ;;  %v1003_v8 = vld [vmem:[%s3946_s0 + $0x8] sm:$0xff]  ;;  %v2632_v9 = vpack.c.bf16 %v1035_v6, %v1034_v3  ;;  %v1036_v13 = vld [vmem:[%s3946_s0 + $0x110] sm:$0xff]  ;;  %504 = vst [vmem:[#allocation15 + $0x8] sm:$0xff] %v492_v4  ;;  %v2604_v14 = vpack.c.bf16 %v1021_v12, %v1020_v11  ;;  %s3149_s16 = scalar_select %p397_p11, %s3007_s23, 1  ;;  %v3206_v45 = vmax.f32 %v492_v4, 0.0 }
  0x1b   : > { %v2602_v10 = vpack.c.bf16 %v1003_v8, %v1002_v7  ;;  %859 = vst [vmem:[#allocation16 + $0x18] sm:$0xff] %v492_v4  ;;  %2601 = vmatprep.subr.bf16.mxu0 %v2600_v5  ;;  %v1037_v15 = vld [vmem:[%s3946_s0 + $0x118] sm:$0xff]  ;;  %v1004_v16 = vld [vmem:[%s3946_s0 + $0x10] sm:$0xff]  ;;  %v1022_v20 = vld [vmem:[%s3946_s0 + $0xa0] sm:$0xff]  ;;  %s2107_s12 = sshll.u32 %s371_s11, 6  ;;  %s3017_s10 = smov [#allocation13]  }
  0x1c   : > { %v1005_v17 = vld [vmem:[%s3946_s0 + $0x18] sm:$0xff]  ;;  %2633 = vmatprep.subr.bf16.mxu1 %v2632_v9  ;;  %v2636_v18 = vpack.c.bf16 %v1037_v15, %v1036_v13  ;;  %v1023_v21 = vld [vmem:[%s3946_s0 + $0xa8] sm:$0xff]  ;;  %v1038_v22 = vld [vmem:[%s3946_s0 + $0x120] sm:$0xff]  ;;  %s2108_s13 = sshll.u32 %s3149_s16, 3  ;;  %v921_v57 = vrot.slane %v3206_v45, 1  ;;  %v962_v58 = vrot.slane %v3206_v45, 2 }
  0x1d   : > { %2603 = vmatpush3.bf16.msra.mxu0 %v2602_v10  ;;  %v2606_v19 = vpack.c.bf16 %v1005_v17, %v1004_v16  ;;  %2635 = vmatpush3.bf16.msra.mxu1 %v2632_v9  ;;  %v2608_v23 = vpack.c.bf16 %v1023_v21, %v1022_v20  ;;  %v1039_v24 = vld [vmem:[%s3946_s0 + $0x128] sm:$0xff]  ;;  %v1006_v25 = vld [vmem:[%s3946_s0 + $0x20] sm:$0xff]  ;;  %v1024_v28 = vld [vmem:[%s3946_s0 + $0xb0] sm:$0xff]  ;;  %s406_s30 = sadd.s32 4294967295, %s2108_s13  ;;  %s2227_s8 = sshll.u32 %s3149_s16, 6 }
  0x1e   : > { %2605 = vmatprep.subr.bf16.mxu0 %v2604_v14  ;;  %v1007_v26 = vld [vmem:[%s3946_s0 + $0x28] sm:$0xff]  ;;  %2637 = vmatprep.subr.bf16.mxu1 %v2636_v18  ;;  %v2640_v27 = vpack.c.bf16 %v1039_v24, %v1038_v22  ;;  %v1025_v29 = vld [vmem:[%s3946_s0 + $0xb8] sm:$0xff]  ;;  %v1040_v30 = vld [vmem:[%s3946_s0 + $0x130] sm:$0xff]  ;;  %s2109_s26 = sshll.u32 %s406_s30, 3  ;;  %s3529_s19 = sadd.s32 56, %s2227_s8 }
  0x1f   : > { %v1041_v31 = vld [vmem:[%s3946_s0 + $0x138] sm:$0xff]  ;;  %v2610_v32 = vpack.c.bf16 %v1007_v26, %v1006_v25  ;;  %v2612_v33 = vpack.c.bf16 %v1025_v29, %v1024_v28  ;;  %v1008_v34 = vld [vmem:[%s3946_s0 + $0x30] sm:$0xff]  ;;  %v1026_v37 = vld [vmem:[%s3946_s0 + $0xc0] sm:$0xff]  ;;  %s3217_s13 = scalar_lea.vmem %s3948_s2, %s2109_s26  ;;  %s446_s14 = scalar_lea.vmem %s3948_s2, %s3529_s19 }
  0x20   : > { %v1009_v35 = vld [vmem:[%s3946_s0 + $0x38] sm:$0xff]  ;;  %v2644_v36 = vpack.c.bf16 %v1041_v31, %v1040_v30  ;;  %v1027_v38 = vld [vmem:[%s3946_s0 + $0xc8] sm:$0xff]  ;;  %v1042_v39 = vld [vmem:[%s3946_s0 + $0x140] sm:$0xff]  ;;  %s3848_s15 = scalar_lea.vmem [#allocation13], %s2107_s12  ;;  %s2225_s17 = sshll.u32 %s3149_s16, 4 }
  0x21   : > { %2607 = vmatpush3.bf16.msra.mxu0 %v2606_v19  ;;  %2639 = vmatpush3.bf16.msra.mxu1 %v2636_v18  ;;  %v1043_v40 = vld [vmem:[%s3946_s0 + $0x148] sm:$0xff]  ;;  %v2614_v41 = vpack.c.bf16 %v1009_v35, %v1008_v34  ;;  %v2616_v42 = vpack.c.bf16 %v1027_v38, %v1026_v37  ;;  %v1010_v43 = vld [vmem:[%s3946_s0 + $0x40] sm:$0xff]  ;;  %v1028_v47 = vld [vmem:[%s3946_s0 + $0xd0] sm:$0xff]  ;;  %s3868_s19 = scalar_lea.vmem %s3951_s5, %s2225_s17  ;;  %s2226_s16 = sshll.u32 %s3007_s23, 10 }
  0x22   : > { %2609 = vmatprep.subr.bf16.mxu0 %v2608_v23  ;;  %2641 = vmatprep.subr.bf16.mxu1 %v2640_v27  ;;  %v1011_v44 = vld [vmem:[%s3946_s0 + $0x48] sm:$0xff]  ;;  %v2648_v46 = vpack.c.bf16 %v1043_v40, %v1042_v39  ;;  %v1029_v48 = vld [vmem:[%s3946_s0 + $0xd8] sm:$0xff]  ;;  %v1044_v49 = vld [vmem:[%s3946_s0 + $0x150] sm:$0xff]  ;;  %s1958_s3 = sshll.u32 %s3848_s15, 4  ;;  %s3885_s9 = scalar_lea.hbm %s3950_s4, %s2226_s16  ;;  %s3887_s3 = int_to_ptr.vmem [resolvable:$true] %s1958_s3 }
  0x23   : > { %v1045_v50 = vld [vmem:[%s3946_s0 + $0x158] sm:$0xff]  ;;  %v2618_v51 = vpack.c.bf16 %v1011_v44, %v1010_v43  ;;  %v861_v52 = vld [vmem:[#allocation15 + $0x8] sm:$0x3]  ;;  %v2620_v53 = vpack.c.bf16 %v1029_v48, %v1028_v47  ;;  %v1012_v54 = vld [vmem:[%s3946_s0 + $0x50] sm:$0xff]  ;;  %s3894_s23 = scalar_lea.sflag [#allocation14], %s371_s11  ;;  %s2937_s26 = scalar_lea.vmem %s3887_s3, 1024 }
  0x24   : > { %v1013_v55 = vld [vmem:[%s3946_s0 + $0x58] sm:$0xff]  ;;  %v881_v56 = vmax.f32 %v861_v52, 0.0  ;;  %v2114_v59 = vld [vmem:[%s3217_s13 + $0x8] sm:$0xff]  ;;  %v2652_v60 = vpack.c.bf16 %v1045_v50, %v1044_v49  ;;  %v1030_v61 = vld [vmem:[%s3946_s0 + $0xe0] sm:$0xff]  ;;  %p2938_p12 = scmp.ne.s32.totalorder %s3887_s3, %s2937_s26  ;;  %s2941_s12 = sshll.u32 %s3017_s10, 4  ;;  %s2942_s12 = int_to_ptr.vmem [resolvable:$false] %s2941_s12 }
  0x25   : > { %2611 = vmatpush3.bf16.msra.mxu0 %v2610_v32  ;;  %2643 = vmatpush3.bf16.msra.mxu1 %v2640_v27  ;;  %v1031_v62 = vld [vmem:[%s3946_s0 + $0xe8] sm:$0xff]  ;;  %v528_v63 = vsel %vm527_vm0, %v2114_v59, %v3053_v0  ;;  %v540_v1 = vsel %vm527_vm0, %v3053_v0, %v2114_v59  ;;  %v1046_v2 = vld [vmem:[%s3946_s0 + $0x160] sm:$0xff]  ;;  %v2622_v8 = vpack.c.bf16 %v1013_v55, %v1012_v54  ;;  %v2115_v14 = vld [vmem:[%s3217_s13 + $0x10] sm:$0xff]  ;;  %s2943_s30 = scalar_lea.vmem %s2942_s12, 2048  ;;  %p2944_p1 = scmp.lt.s32.totalorder %s3887_s3, %s2942_s12 }
  0x26   : > { %2613 = vmatprep.subr.bf16.mxu0 %v2612_v33  ;;  %2645 = vmatprep.subr.bf16.mxu1 %v2644_v36  ;;  %v1047_v3 = vld [vmem:[%s3946_s0 + $0x168] sm:$0xff]  ;;  %v922_v4 = vrot.slane %v881_v56, 1  ;;  %v963_v5 = vrot.slane %v881_v56, 2  ;;  %v529_v6 = vrot.slane %v528_v63, 7  ;;  %v541_v7 = vrot.slane %v540_v1, 7  ;;  %v1014_v10 = vld [vmem:[%s3946_s0 + $0x60] sm:$0xff]  ;;  %p2939_p13 = pnand %p2938_p12, %p3095_p4  ;;  %p2945_p2 = scmp.lt.s32.totalorder %s2943_s30, %s2937_s26 }
  0x27   : > { %v2624_v9 = vpack.c.bf16 %v1031_v62, %v1030_v61  ;;  %v1015_v11 = vld [vmem:[%s3946_s0 + $0x68] sm:$0xff]  ;;  %v2656_v15 = vpack.c.bf16 %v1047_v3, %v1046_v2  ;;  %v1032_v16 = vld [vmem:[%s3946_s0 + $0xf0] sm:$0xff]  ;;  %v1033_v17 = vld [vmem:[%s3946_s0 + $0xf8] sm:$0xff]  ;;  %v568_v19 = vsel %vm527_vm0, %v2115_v14, %v3053_v0  ;;  %v580_v20 = vsel %vm527_vm0, %v3053_v0, %v2115_v14 }
  0x28   : > { %v923_v12 = vsel %vm527_vm0, %v921_v57, %v922_v4  ;;  %v964_v13 = vsel %vm961_vm1, %v962_v58, %v963_v5  ;;  %544 = vst [vmem:[#allocation15 + $0x18] sm:$0xff] %v541_v7  ;;  %v1048_v18 = vld [vmem:[%s3946_s0 + $0x170] sm:$0xff]  ;;  %v1049_v21 = vld [vmem:[%s3946_s0 + $0x178] sm:$0xff]  ;;  %v569_v23 = vrot.slane %v568_v19, 7  ;;  %v581_v24 = vrot.slane %v580_v20, 7  ;;  %v2137_v28 = vld [vmem:[%s3946_s0 + $0x200] sm:$0xff]  ;;  %p2940_p0 = pneg %p2939_p13  ;;  %p2946_p3 = por %p2945_p2, %p2944_p1 }
  0x29   : > { %2615 = vmatpush3.bf16.msra.mxu0 %v2614_v41  ;;  %2647 = vmatpush3.bf16.msra.mxu1 %v2644_v36  ;;  %v1016_v22 = vld [vmem:[%s3946_s0 + $0x70] sm:$0xff]  ;;  %v2116_v25 = vld [vmem:[%s3217_s13 + $0x18] sm:$0xff]  ;;  %v2626_v26 = vpack.c.bf16 %v1015_v11, %v1014_v10  ;;  %v2138_v29 = vld [vmem:[%s3946_s0 + $0x208] sm:$0xff]  ;;  %v2628_v31 = vpack.c.bf16 %v1033_v17, %v1032_v16  ;;  %v3300_v34 = vmax.f32 %v529_v6, 0.0  ;;  %v2660_v38 = vpack.c.bf16 %v1049_v21, %v1048_v18 }
  0x2a   : > { %2617 = vmatprep.subr.bf16.mxu0 %v2616_v42  ;;  %2649 = vmatprep.subr.bf16.mxu1 %v2648_v46  ;;  %v1017_v27 = vld [vmem:[%s3946_s0 + $0x78] sm:$0xff]  ;;  %v608_v30 = vsel %vm527_vm0, %v2116_v25, %v3053_v0  ;;  %v2153_v32 = vld [vmem:[%s3946_s0 + $0x280] sm:$0xff]  ;;  %v2154_v33 = vld [vmem:[%s3946_s0 + $0x288] sm:$0xff]  ;;  %584 = vst [vmem:[#allocation15 + $0x28] sm:$0xff] %v581_v24  ;;  %v620_v37 = vsel %vm527_vm0, %v3053_v0, %v2116_v25  ;;  %v3349_v62 = vmax.f32 %v569_v23, 0.0  ;;  %p2947_p5 = pnand %p2946_p3, %p2940_p0 }
  0x2b   : > { %1114 = vmatprep.mubr.f32.mxu0 %v923_v12  ;;  %2500 = vmatprep.mubr.f32.mxu1 %v964_v13  ;;  %v3305_v35 = vld [vmem:[%s3946_s0 + $0x180] sm:$0xff]  ;;  %v609_v36 = vrot.slane %v608_v30, 7  ;;  %v3312_v39 = vld [vmem:[%s3946_s0 + $0x188] sm:$0xff]  ;;  %v3317_v40 = vld [vmem:[%s3946_s0 + $0x210] sm:$0xff]  ;;  %v621_v41 = vrot.slane %v620_v37, 7  ;;  %v2630_v43 = vpack.c.bf16 %v1017_v27, %v1016_v22  ;;  %v2664_v50 = vpack.c.bf16 %v2138_v29, %v2137_v28 }
  0x2c   : > { %v2117_v42 = vld [vmem:[%s3217_s13 + $0x20] sm:$0xff]  ;;  %v3323_v44 = vld [vmem:[%s3946_s0 + $0x218] sm:$0xff]  ;;  %v2118_v56 = vld [vmem:[%s3217_s13 + $0x28] sm:$0xff]  ;;  %v2666_v3 = vpack.c.bf16 %v3312_v39, %v3305_v35  ;;  %v924_v4 = vrot.slane %v3300_v34, 1  ;;  %v927_v19 = vrot.slane %v3349_v62, 1  ;;  %v968_v22 = vrot.slane %v3349_v62, 2 }
  0x2d   : > { %2619 = vmatpush3.bf16.msra.mxu0 %v2618_v51  ;;  %2651 = vmatpush3.bf16.msra.mxu1 %v2648_v46  ;;  %v2155_v46 = vld [vmem:[%s3946_s0 + $0x290] sm:$0xff]  ;;  %v2156_v47 = vld [vmem:[%s3946_s0 + $0x298] sm:$0xff]  ;;  %v648_v48 = vsel %vm527_vm0, %v2117_v42, %v3053_v0  ;;  %v660_v49 = vsel %vm527_vm0, %v3053_v0, %v2117_v42  ;;  %v3335_v51 = vpack.c.bf16 %v2154_v33, %v2153_v32  ;;  %v3354_v63 = vld [vmem:[%s3946_s0 + $0x220] sm:$0xff]  ;;  %v3377_v16 = vmax.f32 %v609_v36, 0.0 }
  0x2e   : > { %2621 = vmatprep.subr.bf16.mxu0 %v2620_v53  ;;  %2653 = vmatprep.subr.bf16.mxu1 %v2652_v60  ;;  %v3340_v53 = vld [vmem:[%s3946_s0 + $0x190] sm:$0xff]  ;;  %624 = vst [vmem:[#allocation15 + $0x38] sm:$0xff] %v621_v41  ;;  %v649_v54 = vrot.slane %v648_v48, 7  ;;  %v661_v55 = vrot.slane %v660_v49, 7  ;;  %v3347_v61 = vld [vmem:[%s3946_s0 + $0x198] sm:$0xff]  ;;  %v3359_v1 = vld [vmem:[%s3946_s0 + $0x228] sm:$0xff]  ;;  %v688_v2 = vsel %vm527_vm0, %v2118_v56, %v3053_v0  ;;  %v700_v6 = vsel %vm527_vm0, %v3053_v0, %v2118_v56 }
  0x2f   : > { %v863_v52 = vld [vmem:[#allocation15 + $0x18] sm:$0x3]  ;;  %v689_v5 = vrot.slane %v688_v2, 7  ;;  %v701_v10 = vrot.slane %v700_v6, 7  ;;  %v2119_v11 = vld [vmem:[%s3217_s13 + $0x30] sm:$0xff]  ;;  %v3371_v12 = vpack.c.bf16 %v2156_v47, %v2155_v46  ;;  %v2670_v13 = vpack.c.bf16 %v3347_v61, %v3340_v53  ;;  %v2157_v20 = vld [vmem:[%s3946_s0 + $0x2a0] sm:$0xff] }
  0x30   : > { %v883_v59 = vmax.f32 %v863_v52, 0.0  ;;  %664 = vst [vmem:[#allocation15 + $0x48] sm:$0xff] %v661_v55  ;;  %v2158_v21 = vld [vmem:[%s3946_s0 + $0x2a8] sm:$0xff]  ;;  %v3397_v24 = vld [vmem:[%s3946_s0 + $0x1a0] sm:$0xff]  ;;  %v728_v27 = vsel %vm527_vm0, %v2119_v11, %v3053_v0  ;;  %v740_v28 = vsel %vm527_vm0, %v3053_v0, %v2119_v11  ;;  %v930_v37 = vrot.slane %v3377_v16, 1  ;;  %v3423_v39 = vld [vmem:[%s3946_s0 + $0x238] sm:$0xff] }
  0x31   : > { %2623 = vmatpush3.bf16.msra.mxu0 %v2622_v8  ;;  %2655 = vmatpush3.bf16.msra.mxu1 %v2652_v60  ;;  %v965_v60 = vrot.slane %v3300_v34, 2  ;;  %v865_v14 = vld [vmem:[#allocation15 + $0x28] sm:$0x3]  ;;  %704 = vst [vmem:[#allocation15 + $0x58] sm:$0xff] %v701_v10  ;;  %v729_v32 = vrot.slane %v728_v27, 7  ;;  %v741_v33 = vrot.slane %v740_v28, 7  ;;  %v3412_v35 = vpack.c.bf16 %v2158_v21, %v2157_v20 }
  0x32   : > { %2625 = vmatprep.subr.bf16.mxu0 %v2624_v9  ;;  %2657 = vmatprep.subr.bf16.mxu1 %v2656_v15  ;;  %v966_v7 = vrot.slane %v883_v59, 2  ;;  %v925_v8 = vrot.slane %v883_v59, 1  ;;  %v2668_v9 = vpack.c.bf16 %v3323_v44, %v3317_v40  ;;  %v885_v18 = vmax.f32 %v865_v14, 0.0  ;;  %v3402_v25 = vld [vmem:[%s3946_s0 + $0x1a8] sm:$0xff]  ;;  %v2120_v41 = vld [vmem:[%s3217_s13 + $0x38] sm:$0xff]  ;;  %v2161_v14 = vld [vmem:[%s3946_s0 + $0x2c0] sm:$0xff] }
  0x33   : > { %v971_v40 = vrot.slane %v3377_v16, 2  ;;  %v3432_v44 = vmax.f32 %v689_v5, 0.0  ;;  %744 = vst [vmem:[#allocation15 + $0x68] sm:$0xff] %v741_v33  ;;  %v2674_v52 = vpack.c.bf16 %v3402_v25, %v3397_v24  ;;  %v2160_v55 = vld [vmem:[%s3946_s0 + $0x2b8] sm:$0xff]  ;;  %v780_v59 = vsel %vm527_vm0, %v3053_v0, %v2120_v41  ;;  %v2146_v10 = vld [vmem:[%s3946_s0 + $0x248] sm:$0xff]  ;;  %v2129_v21 = vld [vmem:[%s3946_s0 + $0x1c0] sm:$0xff] }
  0x34   : > { %v3380_v17 = vsel %vm961_vm1, %v965_v60, %v966_v7  ;;  %v3392_v23 = vsel %vm527_vm0, %v924_v4, %v925_v8  ;;  %v928_v29 = vrot.slane %v885_v18, 1  ;;  %v2127_v60 = vld [vmem:[%s3946_s0 + $0x1b0] sm:$0xff]  ;;  %v2128_v7 = vld [vmem:[%s3946_s0 + $0x1b8] sm:$0xff]  ;;  %v2130_v28 = vld [vmem:[%s3946_s0 + $0x1c8] sm:$0xff] }
  0x35   : > { %2627 = vmatpush3.bf16.msra.mxu0 %v2626_v26  ;;  %2659 = vmatpush3.bf16.msra.mxu1 %v2656_v15  ;;  %v2672_v15 = vpack.c.bf16 %v3359_v1, %v3354_v63  ;;  %v3404_v26 = vmax.f32 %v649_v54, 0.0  ;;  %v867_v30 = vld [vmem:[#allocation15 + $0x38] sm:$0x3]  ;;  %v2159_v54 = vld [vmem:[%s3946_s0 + $0x2b0] sm:$0xff]  ;;  %v977_v5 = vrot.slane %v3432_v44, 2  ;;  %v3485_v1 = vmax.f32 %v729_v32, 0.0 }
  0x36   : > { %2629 = vmatprep.subr.bf16.mxu0 %v2628_v31  ;;  %2661 = vmatprep.subr.bf16.mxu1 %v2660_v38  ;;  %v969_v31 = vrot.slane %v885_v18, 2  ;;  %v887_v36 = vmax.f32 %v867_v30, 0.0  ;;  %v3430_v42 = vsel %vm527_vm0, %v927_v19, %v928_v29  ;;  %v2708_v63 = vpack.c.bf16 %v2160_v55, %v2159_v54  ;;  %v2147_v30 = vld [vmem:[%s3946_s0 + $0x250] sm:$0xff] }
  0x37   : > { %v974_v47 = vrot.slane %v3404_v26, 2  ;;  %v933_v61 = vrot.slane %v3404_v26, 1  ;;  %v2678_v19 = vpack.c.bf16 %v2128_v7, %v2127_v60  ;;  %v980_v25 = vrot.slane %v3485_v1, 2  ;;  %v2133_v7 = vld [vmem:[%s3946_s0 + $0x1e0] sm:$0xff] }
  0x38   : > { %v3435_v46 = vsel %vm961_vm1, %v968_v22, %v969_v31  ;;  %v931_v48 = vrot.slane %v887_v36, 1  ;;  %v871_v2 = vld [vmem:[#allocation15 + $0x58] sm:$0x3]  ;;  %v936_v22 = vrot.slane %v3432_v44, 1 }
  0x39   : > { %2631 = vmatpush3.bf16.msra.mxu0 %v2630_v43  ;;  %2663 = vmatpush3.bf16.msra.mxu1 %v2660_v38  ;;  %v3418_v38 = vld [vmem:[%s3946_s0 + $0x230] sm:$0xff]  ;;  %v869_v43 = vld [vmem:[#allocation15 + $0x48] sm:$0x3]  ;;  %v891_v11 = vmax.f32 %v871_v2, 0.0  ;;  %v2148_v31 = vld [vmem:[%s3946_s0 + $0x258] sm:$0xff] }
  0x3a   : > { %2665 = vmatprep.subr.bf16.mxu0 %v2664_v50  ;;  %2697 = vmatprep.subr.bf16.mxu1 %v3335_v51  ;;  %v889_v49 = vmax.f32 %v869_v43, 0.0  ;;  %v972_v50 = vrot.slane %v887_v36, 2  ;;  %v2676_v53 = vpack.c.bf16 %v3423_v39, %v3418_v38  ;;  %v3472_v6 = vsel %vm527_vm0, %v930_v37, %v931_v48  ;;  %v873_v24 = vld [vmem:[#allocation15 + $0x68] sm:$0x3]  ;;  %v2163_v36 = vld [vmem:[%s3946_s0 + $0x2d0] sm:$0xff]  ;;  %v2164_v37 = vld [vmem:[%s3946_s0 + $0x2d8] sm:$0xff] }
  0x3b   : > { %v978_v18 = vrot.slane %v891_v11, 2  ;;  %v937_v29 = vrot.slane %v891_v11, 1  ;;  %v893_v32 = vmax.f32 %v873_v24, 0.0  ;;  %v2682_v39 = vpack.c.bf16 %v2130_v28, %v2129_v21  ;;  %v2132_v48 = vld [vmem:[%s3946_s0 + $0x1d8] sm:$0xff] }
  0x3c   : > { %1115 = vmatmul.mubr.f32.vlgmr.msra.gmra.mrb[0].mxu0 %v3206_v45  ;;  %2501 = vmatmul.mubr.f32.vlgmr.msra.gmra.mrb[0].mxu1 %v3380_v17  ;;  %v975_v4 = vrot.slane %v889_v49, 2  ;;  %v934_v8 = vrot.slane %v889_v49, 1  ;;  %v939_v43 = vrot.slane %v3485_v1, 1  ;;  %v2716_v55 = vpack.c.bf16 %v2164_v37, %v2163_v36  ;;  %v2168_v21 = vld [vmem:[%s3946_s0 + $0x2f8] sm:$0xff] }
  0x3d   : > { %2667 = vmatpush3.bf16.msra.mxu0 %v2666_v3  ;;  %2699 = vmatpush3.bf16.msra.mxu1 %v3335_v51  ;;  %v3441_v51 = vsel %vm527_vm0, %v2120_v41, %v3053_v0  ;;  %v3464_v3 = vsel %vm961_vm1, %v971_v40, %v972_v50  ;;  %v3519_v33 = vsel %vm961_vm1, %v977_v5, %v978_v18  ;;  %v981_v38 = vrot.slane %v893_v32, 2  ;;  %v2131_v41 = vld [vmem:[%s3946_s0 + $0x1d0] sm:$0xff]  ;;  %v2149_v50 = vld [vmem:[%s3946_s0 + $0x260] sm:$0xff]  ;;  %v879_v28 = vld [vmem:[#allocation16 + $0x18] sm:$0x3] }
  0x3e   : > { %1119 = vmatprep.mubr.f32.mxu0 %v3392_v23  ;;  %2669 = vmatprep.subr.bf16.mxu0 %v2668_v9  ;;  %v769_v56 = vrot.slane %v3441_v51, 7  ;;  %v2145_v9 = vld [vmem:[%s3946_s0 + $0x240] sm:$0xff]  ;;  %v3507_v27 = vsel %vm527_vm0, %v933_v61, %v934_v8  ;;  %v2684_v40 = vpack.c.bf16 %v2148_v31, %v2147_v30  ;;  %v940_v49 = vrot.slane %v893_v32, 1  ;;  %v2134_v8 = vld [vmem:[%s3946_s0 + $0x1e8] sm:$0xff]  ;;  %v2136_v36 = vld [vmem:[%s3946_s0 + $0x1f8] sm:$0xff] }
  0x3f   : > { %2701 = vmatprep.subr.bf16.mxu1 %v3371_v12  ;;  %2503 = vmatprep.mubr.f32.mxu1 %v3435_v46  ;;  %v2680_v20 = vpack.c.bf16 %v2146_v10, %v2145_v9  ;;  %v3553_v54 = vsel %vm961_vm1, %v980_v25, %v981_v38  ;;  %v2165_v51 = vld [vmem:[%s3946_s0 + $0x2e0] sm:$0xff]  ;;  %v2686_v2 = vpack.c.bf16 %v2132_v48, %v2131_v41  ;;  %v899_v30 = vmax.f32 %v879_v28, 0.0  ;;  %v2202_v48 = vld [vmem:[%s3946_s0 + $0x408] sm:$0xff]  ;;  %v2208_v28 = vld [vmem:[%s3946_s0 + $0x438] sm:$0xff] }
  0x40   : > { %1120 = vmatmul.mubr.f32.gmra.mrb[2].mxu0 %v3300_v34  ;;  %2504 = vmatmul.mubr.f32.gmra.mrb[2].mxu1 %v3464_v3  ;;  %v3570_v5 = vsel %vm527_vm0, %v939_v43, %v940_v49  ;;  %v2185_v38 = vld [vmem:[%s3946_s0 + $0x380] sm:$0xff] }
  0x41   : > { %2671 = vmatpush3.bf16.msra.mxu0 %v2670_v13  ;;  %1124 = vmatprep.mubr.f32.mxu0 %v3430_v42  ;;  %v3488_v13 = vsel %vm961_vm1, %v974_v47, %v975_v4  ;;  %v3537_v47 = vsel %vm527_vm0, %v936_v22, %v937_v29  ;;  %v2690_v29 = vpack.c.bf16 %v2134_v8, %v2133_v7  ;;  %v949_v41 = vrot.slane %v899_v30, 1  ;;  %v2201_v43 = vld [vmem:[%s3946_s0 + $0x400] sm:$0xff] }
  0x42   : > { %2703 = vmatpush3.bf16.msra.mxu1 %v3371_v12  ;;  %2673 = vmatprep.subr.bf16.mxu0 %v2672_v15  ;;  %v781_v12 = vrot.slane %v780_v59, 7  ;;  %v2162_v15 = vld [vmem:[%s3946_s0 + $0x2c8] sm:$0xff] }
  0x43   : > { %2705 = vmatprep.subr.bf16.mxu1 %v3412_v35  ;;  %2506 = vmatprep.mubr.f32.mxu1 %v3488_v13 }
  0x44   : > { %1125 = vmatmul.mubr.f32.gmra.mrb[4].mxu0 %v3349_v62  ;;  %784 = vst [vmem:[#allocation15 + $0x78] sm:$0xff] %v781_v12  ;;  %2507 = vmatmul.mubr.f32.gmra.mrb[4].mxu1 %v3519_v33  ;;  %v792_v12 = vld [vmem:[%s446_s14] sm:$0xff] }
  0x45   : > { %2675 = vmatpush3.bf16.msra.mxu0 %v2674_v52  ;;  %1129 = vmatprep.mubr.f32.mxu0 %v3472_v6  ;;  %v2150_v52 = vld [vmem:[%s3946_s0 + $0x268] sm:$0xff]  ;;  %v3587_v18 = vsel %vm527_vm0, %v792_v12, %v3053_v0 }
  0x46   : > { %2707 = vmatpush3.bf16.msra.mxu1 %v3412_v35  ;;  %2677 = vmatprep.subr.bf16.mxu0 %v2676_v53  ;;  %v2712_v35 = vpack.c.bf16 %v2162_v15, %v2161_v14  ;;  %v3550_v53 = vmax.f32 %v769_v56, 0.0  ;;  %v2166_v56 = vld [vmem:[%s3946_s0 + $0x2e8] sm:$0xff]  ;;  %v2688_v4 = vpack.c.bf16 %v2150_v52, %v2149_v50  ;;  %v2151_v14 = vld [vmem:[%s3946_s0 + $0x270] sm:$0xff]  ;;  %v2152_v15 = vld [vmem:[%s3946_s0 + $0x278] sm:$0xff]  ;;  %v807_v24 = vrot.slane %v3587_v18, 7 }
  0x47   : > { %2709 = vmatprep.subr.bf16.mxu1 %v2708_v63  ;;  %2509 = vmatprep.mubr.f32.mxu1 %v3553_v54  ;;  %v2692_v32 = vpack.c.bf16 %v2152_v15, %v2151_v14  ;;  %v2174_v15 = vld [vmem:[%s3946_s0 + $0x328] sm:$0xff] }
  0x48   : > { %1130 = vmatmul.mubr.f32.gmra.mrb[6].mxu0 %v3377_v16  ;;  %v983_v61 = vrot.slane %v3550_v53, 2  ;;  %v942_v9 = vrot.slane %v3550_v53, 1 }
  0x49   : > { %2679 = vmatpush3.bf16.msra.mxu0 %v2678_v19  ;;  %1134 = vmatprep.mubr.f32.mxu0 %v3507_v27  ;;  %v815_v19 = vsel %vm527_vm0, %v3053_v0, %v792_v12 }
  0x4a   : > { %2711 = vmatpush3.bf16.msra.mxu1 %v2708_v63  ;;  %2681 = vmatprep.subr.bf16.mxu0 %v2680_v20  ;;  %v2720_v63 = vpack.c.bf16 %v2166_v56, %v2165_v51  ;;  %v2167_v20 = vld [vmem:[%s3946_s0 + $0x2f0] sm:$0xff]  ;;  %v816_v25 = vrot.slane %v815_v19, 7  ;;  %v2760_v51 = vpack.c.bf16 %v2202_v48, %v2201_v43 }
  0x4b   : > { %2713 = vmatprep.subr.bf16.mxu1 %v2712_v35  ;;  %v875_v59 = vld [vmem:[#allocation15 + $0x78] sm:$0x3]  ;;  %v2724_v37 = vpack.c.bf16 %v2168_v21, %v2167_v20  ;;  %v2203_v56 = vld [vmem:[%s3946_s0 + $0x410] sm:$0xff] }
  0x4c   : > { %1135 = vmatmul.mubr.f32.gmra.mrb[8].mxu0 %v3404_v26  ;;  %v895_v60 = vmax.f32 %v875_v59, 0.0  ;;  %819 = vst [vmem:[#allocation16 + $0x8] sm:$0xff] %v816_v25  ;;  %v2170_v59 = vld [vmem:[%s3946_s0 + $0x308] sm:$0xff]  ;;  %v2191_v20 = vld [vmem:[%s3946_s0 + $0x3b0] sm:$0xff]  ;;  %v2192_v21 = vld [vmem:[%s3946_s0 + $0x3b8] sm:$0xff] }
  0x4d   : > { %2683 = vmatpush3.bf16.msra.mxu0 %v2682_v39  ;;  %1139 = vmatprep.mubr.f32.mxu0 %v3537_v47  ;;  %v2186_v39 = vld [vmem:[%s3946_s0 + $0x388] sm:$0xff]  ;;  %v2207_v25 = vld [vmem:[%s3946_s0 + $0x430] sm:$0xff] }
  0x4e   : > { %2715 = vmatpush3.bf16.msra.mxu1 %v2712_v35  ;;  %2685 = vmatprep.subr.bf16.mxu0 %v2684_v40  ;;  %v943_v10 = vrot.slane %v895_v60, 1  ;;  %v984_v11 = vrot.slane %v895_v60, 2  ;;  %v2135_v35 = vld [vmem:[%s3946_s0 + $0x1f0] sm:$0xff]  ;;  %v990_v40 = vrot.slane %v899_v30, 2  ;;  %v2728_v52 = vpack.c.bf16 %v2186_v39, %v2185_v38  ;;  %v2204_v60 = vld [vmem:[%s3946_s0 + $0x418] sm:$0xff]  ;;  %v2194_v38 = vld [vmem:[%s3946_s0 + $0x3c8] sm:$0xff] }
  0x4f   : > { %2717 = vmatprep.subr.bf16.mxu1 %v2716_v55  ;;  %v2694_v49 = vpack.c.bf16 %v2136_v36, %v2135_v35  ;;  %v2764_v8 = vpack.c.bf16 %v2204_v60, %v2203_v56  ;;  %v2740_v35 = vpack.c.bf16 %v2192_v21, %v2191_v20  ;;  %v2175_v36 = vld [vmem:[%s3946_s0 + $0x330] sm:$0xff]  ;;  %v2772_v18 = vpack.c.bf16 %v2208_v28, %v2207_v25  ;;  %v2209_v39 = vld [vmem:[%s3946_s0 + $0x440] sm:$0xff]  ;;  %v2212_v56 = vld [vmem:[%s3946_s0 + $0x458] sm:$0xff] }
  0x50   : > { %1140 = vmatmul.mubr.f32.gmra.mrb[10].mxu0 %v3432_v44  ;;  %v3599_v22 = vsel %vm961_vm1, %v983_v61, %v984_v11  ;;  %v3604_v31 = vsel %vm527_vm0, %v942_v9, %v943_v10  ;;  %v3631_v50 = vsel %vm961_vm1, %v962_v58, %v990_v40  ;;  %v2187_v58 = vld [vmem:[%s3946_s0 + $0x390] sm:$0xff]  ;;  %v2189_v9 = vld [vmem:[%s3946_s0 + $0x3a0] sm:$0xff]  ;;  %v2206_v11 = vld [vmem:[%s3946_s0 + $0x428] sm:$0xff] }
  0x51   : > { %2687 = vmatpush3.bf16.msra.mxu0 %v2686_v2  ;;  %1144 = vmatprep.mubr.f32.mxu0 %v3570_v5  ;;  %v2171_v2 = vld [vmem:[%s3946_s0 + $0x310] sm:$0xff]  ;;  %v2205_v10 = vld [vmem:[%s3946_s0 + $0x420] sm:$0xff]  ;;  %v2210_v40 = vld [vmem:[%s3946_s0 + $0x448] sm:$0xff] }
  0x52   : > { %2719 = vmatpush3.bf16.msra.mxu1 %v2716_v55  ;;  %2689 = vmatprep.subr.bf16.mxu0 %v2688_v4  ;;  %v2169_v55 = vld [vmem:[%s3946_s0 + $0x300] sm:$0xff]  ;;  %v2172_v4 = vld [vmem:[%s3946_s0 + $0x318] sm:$0xff]  ;;  %v2768_v19 = vpack.c.bf16 %v2206_v11, %v2205_v10  ;;  %v2214_v11 = vld [vmem:[%s3946_s0 + $0x468] sm:$0xff] }
  0x53   : > { %2721 = vmatprep.subr.bf16.mxu1 %v2720_v63  ;;  %2510 = vmatmul.mubr.f32.gmra.mrb[6].mxu1 %v3599_v22  ;;  %v2730_v61 = vpack.c.bf16 %v2170_v59, %v2169_v55  ;;  %v2734_v12 = vpack.c.bf16 %v2172_v4, %v2171_v2  ;;  %v2178_v55 = vld [vmem:[%s3946_s0 + $0x348] sm:$0xff]  ;;  %v2776_v59 = vpack.c.bf16 %v2210_v40, %v2209_v39  ;;  %v2179_v4 = vld [vmem:[%s3946_s0 + $0x350] sm:$0xff]  ;;  %v2213_v10 = vld [vmem:[%s3946_s0 + $0x460] sm:$0xff] }
  0x54   : > { %1145 = vmatmul.mubr.f32.gmra.mrb[12].mxu0 %v3485_v1  ;;  %2544 = vmatprep.mubr.f32.mxu1 %v3380_v17  ;;  %v3636_v17 = vsel %vm527_vm0, %v921_v57, %v949_v41  ;;  %v2188_v57 = vld [vmem:[%s3946_s0 + $0x398] sm:$0xff]  ;;  %v2784_v20 = vpack.c.bf16 %v2214_v11, %v2213_v10  ;;  %v2199_v21 = vld [vmem:[%s3946_s0 + $0x3f0] sm:$0xff] }
  0x55   : > { %2691 = vmatpush3.bf16.msra.mxu0 %v2690_v29  ;;  %1149 = vmatprep.mubr.f32.mxu0 %v3604_v31  ;;  %v2732_v7 = vpack.c.bf16 %v2188_v57, %v2187_v58  ;;  %v3703_v29 = vmax.f32 %v807_v24, 0.0  ;;  %v2193_v24 = vld [vmem:[%s3946_s0 + $0x3c0] sm:$0xff]  ;;  %v2196_v58 = vld [vmem:[%s3946_s0 + $0x3d8] sm:$0xff]  ;;  %v2211_v57 = vld [vmem:[%s3946_s0 + $0x450] sm:$0xff] }
  0x56   : > { %2723 = vmatpush3.bf16.msra.mxu1 %v2720_v63  ;;  %2693 = vmatprep.subr.bf16.mxu0 %v2692_v32  ;;  %v3678_v63 = vld [vmem:[#allocation16 + $0x8] sm:$0x3]  ;;  %v2200_v25 = vld [vmem:[%s3946_s0 + $0x3f8] sm:$0xff]  ;;  %v2215_v28 = vld [vmem:[%s3946_s0 + $0x470] sm:$0xff] }
  0x57   : > { %2725 = vmatprep.subr.bf16.mxu1 %v2724_v37  ;;  %v897_v30 = vmax.f32 %v3678_v63, 0.0  ;;  %v986_v41 = vrot.slane %v3703_v29, 2  ;;  %v2216_v63 = vld [vmem:[%s3946_s0 + $0x478] sm:$0xff] }
  0x58   : > { %1150 = vmatmul.mubr.f32.gmra.mrb[14].mxu0 %v3550_v53 }
  0x59   : > { %2695 = vmatpush3.bf16.msra.mxu0 %v2694_v49  ;;  %1381 = vmatprep.mubr.f32.mxu0 %v3392_v23  ;;  %v2190_v23 = vld [vmem:[%s3946_s0 + $0x3a8] sm:$0xff]  ;;  %v987_v43 = vrot.slane %v897_v30, 2  ;;  %v2744_v49 = vpack.c.bf16 %v2194_v38, %v2193_v24 }
  0x5a   : > { %2727 = vmatpush3.bf16.msra.mxu1 %v2724_v37  ;;  %2729 = vmatprep.subr.bf16.mxu0 %v2728_v52  ;;  %v2736_v14 = vpack.c.bf16 %v2190_v23, %v2189_v9  ;;  %v2176_v37 = vld [vmem:[%s3946_s0 + $0x338] sm:$0xff]  ;;  %v2177_v52 = vld [vmem:[%s3946_s0 + $0x340] sm:$0xff]  ;;  %v2198_v23 = vld [vmem:[%s3946_s0 + $0x3e8] sm:$0xff] }
  0x5b   : > { %2761 = vmatprep.subr.bf16.mxu1 %v2760_v51  ;;  %v2742_v48 = vpack.c.bf16 %v2176_v37, %v2175_v36  ;;  %v3754_v60 = vsel %vm961_vm1, %v986_v41, %v987_v43  ;;  %v2197_v9 = vld [vmem:[%s3946_s0 + $0x3e0] sm:$0xff]  ;;  %v2183_v36 = vld [vmem:[%s3946_s0 + $0x370] sm:$0xff]  ;;  %v2184_v37 = vld [vmem:[%s3946_s0 + $0x378] sm:$0xff] }
  0x5c   : > { %1382 = vmatmul.mubr.f32.vlgmr.msra.gmra.mrb[16].mxu0 %v3300_v34  ;;  %v2173_v34 = vld [vmem:[%s3946_s0 + $0x320] sm:$0xff]  ;;  %v2758_v24 = vpack.c.bf16 %v2184_v37, %v2183_v36 }
  0x5d   : > { %2545 = vmatmul.mubr.f32.vlgmr.msra.gmra.mrb[0].mxu1 %v3435_v46  ;;  %2731 = vmatpush3.bf16.msra.mxu0 %v2730_v61  ;;  %v2738_v32 = vpack.c.bf16 %v2174_v15, %v2173_v34  ;;  %v2746_v61 = vpack.c.bf16 %v2178_v55, %v2177_v52  ;;  %v2181_v34 = vld [vmem:[%s3946_s0 + $0x360] sm:$0xff]  ;;  %v2182_v15 = vld [vmem:[%s3946_s0 + $0x368] sm:$0xff] }
  0x5e   : > { %2763 = vmatpush3.bf16.msra.mxu1 %v2760_v51  ;;  %1386 = vmatprep.mubr.f32.mxu0 %v3430_v42  ;;  %v2195_v51 = vld [vmem:[%s3946_s0 + $0x3d0] sm:$0xff] }
  0x5f   : > { %2733 = vmatprep.subr.bf16.mxu0 %v2732_v7  ;;  %2765 = vmatprep.subr.bf16.mxu1 %v2764_v8  ;;  %v2748_v2 = vpack.c.bf16 %v2196_v58, %v2195_v51  ;;  %v2180_v7 = vld [vmem:[%s3946_s0 + $0x358] sm:$0xff] }
  0x60   : > { %1387 = vmatmul.mubr.f32.gmra.mrb[18].mxu0 %v3349_v62  ;;  %2547 = vmatprep.mubr.f32.mxu1 %v3464_v3 }
  0x61   : > { %2735 = vmatpush3.bf16.msra.mxu0 %v2734_v12  ;;  %1391 = vmatprep.mubr.f32.mxu0 %v3472_v6  ;;  %v2750_v12 = vpack.c.bf16 %v2180_v7, %v2179_v4 }
  0x62   : > { %2767 = vmatpush3.bf16.msra.mxu1 %v2764_v8  ;;  %2737 = vmatprep.subr.bf16.mxu0 %v2736_v14  ;;  %v2780_v8 = vpack.c.bf16 %v2212_v56, %v2211_v57  ;;  %v2752_v14 = vpack.c.bf16 %v2198_v23, %v2197_v9 }
  0x63   : > { %2769 = vmatprep.subr.bf16.mxu1 %v2768_v19  ;;  %2548 = vmatmul.mubr.f32.gmra.mrb[2].mxu1 %v3488_v13 }
  0x64   : > { %1392 = vmatmul.mubr.f32.gmra.mrb[20].mxu0 %v3377_v16  ;;  %2550 = vmatprep.mubr.f32.mxu1 %v3519_v33 }
  0x65   : > { %2739 = vmatpush3.bf16.msra.mxu0 %v2738_v32  ;;  %1396 = vmatprep.mubr.f32.mxu0 %v3507_v27 }
  0x66   : > { %2771 = vmatpush3.bf16.msra.mxu1 %v2768_v19  ;;  %2741 = vmatprep.subr.bf16.mxu0 %v2740_v35  ;;  %v945_v19 = vrot.slane %v3703_v29, 1  ;;  %v2756_v35 = vpack.c.bf16 %v2200_v25, %v2199_v21 }
  0x67   : > { %2773 = vmatprep.subr.bf16.mxu1 %v2772_v18  ;;  %2551 = vmatmul.mubr.f32.gmra.mrb[4].mxu1 %v3553_v54 }
  0x68   : > { %1397 = vmatmul.mubr.f32.gmra.mrb[22].mxu0 %v3404_v26  ;;  %2553 = vmatprep.mubr.f32.mxu1 %v3599_v22 }
  0x69   : > { %2743 = vmatpush3.bf16.msra.mxu0 %v2742_v48  ;;  %1401 = vmatprep.mubr.f32.mxu0 %v3537_v47 }
  0x6a   : > { %2775 = vmatpush3.bf16.msra.mxu1 %v2772_v18  ;;  %2745 = vmatprep.subr.bf16.mxu0 %v2744_v49  ;;  %v2788_v18 = vpack.c.bf16 %v2216_v63, %v2215_v28 }
  0x6b   : > { %2777 = vmatprep.subr.bf16.mxu1 %v2776_v59  ;;  %2554 = vmatmul.mubr.f32.gmra.mrb[6].mxu1 %v3754_v60 }
  0x6c   : > { %1402 = vmatmul.mubr.f32.gmra.mrb[24].mxu0 %v3432_v44  ;;  %2588 = vmatprep.mubr.f32.mxu1 %v3435_v46  ;;  %v946_v46 = vrot.slane %v897_v30, 1  ;;  %v2754_v30 = vpack.c.bf16 %v2182_v15, %v2181_v34 }
  0x6d   : > { %2747 = vmatpush3.bf16.msra.mxu0 %v2746_v61  ;;  %1406 = vmatprep.mubr.f32.mxu0 %v3570_v5 }
  0x6e   : > { %2779 = vmatpush3.bf16.msra.mxu1 %v2776_v59  ;;  %2749 = vmatprep.subr.bf16.mxu0 %v2748_v2  ;;  %v947_v32 = vsel %vm527_vm0, %v945_v19, %v946_v46 }
  0x6f   : > { %2781 = vmatprep.subr.bf16.mxu1 %v2780_v8 }
  0x70   : > { %1407 = vmatmul.mubr.f32.gmra.mrb[26].mxu0 %v3485_v1 }
  0x71   : > { %2751 = vmatpush3.bf16.msra.mxu0 %v2750_v12  ;;  %1411 = vmatprep.mubr.f32.mxu0 %v3604_v31 }
  0x72   : > { %2783 = vmatpush3.bf16.msra.mxu1 %v2780_v8  ;;  %2753 = vmatprep.subr.bf16.mxu0 %v2752_v14 }
  0x73   : > { %2785 = vmatprep.subr.bf16.mxu1 %v2784_v20 }
  0x74   : > { %1412 = vmatmul.mubr.f32.gmra.mrb[28].mxu0 %v3550_v53 }
  0x75   : > { %2755 = vmatpush3.bf16.msra.mxu0 %v2754_v30  ;;  %1416 = vmatprep.mubr.f32.mxu0 %v947_v32 }
  0x76   : > { %2787 = vmatpush3.bf16.msra.mxu1 %v2784_v20  ;;  %2757 = vmatprep.subr.bf16.mxu0 %v2756_v35 }
  0x77   : > { %2789 = vmatprep.subr.bf16.mxu1 %v2788_v18 }
  0x78   : > { %1417 = vmatmul.mubr.f32.gmra.mrb[30].mxu0 %v3703_v29 }
  0x79   : > { %2759 = vmatpush3.bf16.msra.mxu0 %v2758_v24  ;;  %1664 = vmatprep.mubr.f32.mxu0 %v3430_v42 }
  0x7a   : > { %2791 = vmatpush3.bf16.msra.mxu1 %v2788_v18 }
  0x7c   : > { %1665 = vmatmul.mubr.f32.vlgmr.msra.gmra.mrb[32].mxu0 %v3349_v62 }
  0x7d   : > { %2589 = vmatmul.mubr.f32.vlgmr.msra.gmra.mrb[0].mxu1 %v3464_v3  ;;  %1669 = vmatprep.mubr.f32.mxu0 %v3472_v6 }
  0x7e   : > { %2591 = vmatprep.mubr.f32.mxu1 %v3488_v13 }
  0x80   : > { %1670 = vmatmul.mubr.f32.gmra.mrb[34].mxu0 %v3377_v16 }
  0x81   : > { %2592 = vmatmul.mubr.f32.gmra.mrb[2].mxu1 %v3519_v33  ;;  %1674 = vmatprep.mubr.f32.mxu0 %v3507_v27 }
  0x82   : > { %2594 = vmatprep.mubr.f32.mxu1 %v3553_v54 }
  0x84   : > { %1675 = vmatmul.mubr.f32.gmra.mrb[36].mxu0 %v3404_v26 }
  0x85   : > { %2595 = vmatmul.mubr.f32.gmra.mrb[4].mxu1 %v3599_v22  ;;  %1679 = vmatprep.mubr.f32.mxu0 %v3537_v47 }
  0x86   : > { %2597 = vmatprep.mubr.f32.mxu1 %v3754_v60 }
  0x88   : > { %1680 = vmatmul.mubr.f32.gmra.mrb[38].mxu0 %v3432_v44 }
  0x89   : > { %2598 = vmatmul.mubr.f32.gmra.mrb[6].mxu1 %v3631_v50  ;;  %1684 = vmatprep.mubr.f32.mxu0 %v3570_v5 }
  0x8c   : > { %1685 = vmatmul.mubr.f32.gmra.mrb[40].mxu0 %v3485_v1 }
  0x8d   : > { %1689 = vmatprep.mubr.f32.mxu0 %v3604_v31 }
  0x90   : > { %1690 = vmatmul.mubr.f32.gmra.mrb[42].mxu0 %v3550_v53 }
  0x91   : > { %1694 = vmatprep.mubr.f32.mxu0 %v947_v32 }
  0x94   : > { %1695 = vmatmul.mubr.f32.gmra.mrb[44].mxu0 %v3703_v29 }
  0x95   : > { %1699 = vmatprep.mubr.f32.mxu0 %v3636_v17 }
  0x98   : > { %1700 = vmatmul.mubr.f32.gmra.mrb[46].mxu0 %v3206_v45 }
 0x10f   : > { %v2260_v62 = vpop.f32.mrb[0].mxu0 }
 0x110   : > { %v2261_v16 = vpop.f32.mrb[1].mxu0 }
 0x111   : > { %v2262_v26 = vadd.f32 %v2261_v16, %v2260_v62  ;;  %v3845_v62 = vld [vmem:[%s3947_s1] ss:$0 sm:$0xff] }
 0x113   : > { %v2263_v42 = vpop.f32.mrb[2].mxu0 }
 0x114   : > { %v2264_v44 = vpop.f32.mrb[3].mxu0 }
 0x115   : > { %v2265_v3 = vadd.f32 %v2264_v44, %v2263_v42 }
 0x117   : > { %v2266_v6 = vpop.f32.mrb[4].mxu0 }
 0x118   : > { %v2267_v13 = vpop.f32.mrb[5].mxu0 }
 0x119   : > { %v2268_v1 = vadd.f32 %v2267_v13, %v2266_v6 }
 0x11b   : > { %v2269_v27 = vpop.f32.mrb[6].mxu0 }
 0x11c   : > { %v2270_v33 = vpop.f32.mrb[7].mxu0 }
 0x11d   : > { %v2271_v47 = vadd.f32 %v2270_v33, %v2269_v27 }
 0x11f   : > { %v2272_v53 = vpop.f32.mrb[8].mxu0 }
 0x120   : > { %v2273_v54 = vpop.f32.mrb[9].mxu0 }
 0x121   : > { %v2274_v5 = vadd.f32 %v2273_v54, %v2272_v53 }
 0x123   : > { %v2275_v22 = vpop.f32.mrb[10].mxu0 }
 0x124   : > { %v2276_v31 = vpop.f32.mrb[11].mxu0 }
 0x125   : > { %v2277_v50 = vadd.f32 %v2276_v31, %v2275_v22 }
 0x127   : > { %v2278_v17 = vpop.f32.mrb[12].mxu0 }
 0x128   : > { %v2279_v45 = vpop.f32.mrb[13].mxu0 }
 0x129   : > { %v2280_v29 = vadd.f32 %v2279_v45, %v2278_v17 }
 0x12b   : > { %v2281_v38 = vpop.f32.mrb[14].mxu0 }
 0x12c   : > { %v2282_v39 = vpop.f32.mrb[15].mxu0 }
 0x12d   : > { %v2283_v40 = vadd.f32 %v2282_v39, %v2281_v38 }
 0x12f   : > { %v2340_v41 = vpop.f32.mrb[16].mxu0 }
 0x130   : > { %v2341_v43 = vpop.f32.mrb[17].mxu0 }
 0x131   : > { %v2342_v48 = vadd.f32 %v2341_v43, %v2340_v41 }
 0x133   : > { %v2803_v49 = vadd.f32 %v2342_v48, %v2262_v26  ;;  %v2343_v52 = vpop.f32.mrb[18].mxu0 }
 0x134   : > { %v2344_v55 = vpop.f32.mrb[19].mxu0 }
 0x135   : > { %v2345_v59 = vadd.f32 %v2344_v55, %v2343_v52 }
 0x137   : > { %v2794_v51 = vadd.f32 %v2345_v59, %v2265_v3  ;;  %v2346_v58 = vpop.f32.mrb[20].mxu0 }
 0x138   : > { %v2347_v57 = vpop.f32.mrb[21].mxu0 }
 0x139   : > { %v2348_v56 = vadd.f32 %v2347_v57, %v2346_v58 }
 0x13b   : > { %v2821_v60 = vadd.f32 %v2348_v56, %v2268_v1  ;;  %v2349_v61 = vpop.f32.mrb[22].mxu0 }
 0x13c   : > { %v2350_v2 = vpop.f32.mrb[23].mxu0 }
 0x13d   : > { %v2351_v4 = vadd.f32 %v2350_v2, %v2349_v61 }
 0x13f   : > { %v2812_v7 = vadd.f32 %v2351_v4, %v2271_v47  ;;  %v2352_v8 = vpop.f32.mrb[24].mxu0 }
 0x140   : > { %v2353_v9 = vpop.f32.mrb[25].mxu0 }
 0x141   : > { %v2354_v23 = vadd.f32 %v2353_v9, %v2352_v8 }
 0x143   : > { %v2839_v10 = vadd.f32 %v2354_v23, %v2274_v5  ;;  %v2355_v11 = vpop.f32.mrb[26].mxu0 }
 0x144   : > { %v2356_v12 = vpop.f32.mrb[27].mxu0 }
 0x145   : > { %v2357_v14 = vadd.f32 %v2356_v12, %v2355_v11 }
 0x147   : > { %v3833_v34 = vadd.f32 %v2357_v14, %v2277_v50  ;;  %v2358_v15 = vpop.f32.mrb[28].mxu0 }
 0x148   : > { %v2359_v19 = vpop.f32.mrb[29].mxu0 }
 0x149   : > { %v2360_v46 = vadd.f32 %v2359_v19, %v2358_v15 }
 0x14b   : > { %v3835_v20 = vadd.f32 %v2360_v46, %v2280_v29  ;;  %v2361_v21 = vpop.f32.mrb[30].mxu0 }
 0x14c   : > { %v2362_v25 = vpop.f32.mrb[31].mxu0 }
 0x14d   : > { %v2363_v28 = vadd.f32 %v2362_v25, %v2361_v21 }
 0x14f   : > { %v3837_v63 = vadd.f32 %v2363_v28, %v2283_v40  ;;  %v2420_v30 = vpop.f32.mrb[32].mxu0 }
 0x150   : > { %v2590_v32 = vpop.f32.mrb[0].mxu1  ;;  %v2421_v35 = vpop.f32.mrb[33].mxu0 }
 0x151   : > { %v2422_v36 = vadd.f32 %v2421_v35, %v2420_v30  ;;  %v1771_v37 = vpop.f32.mrb[1].mxu1 }
 0x153   : > { %v2806_v18 = vadd.f32 %v2803_v49, %v2422_v36  ;;  %v2423_v24 = vpop.f32.mrb[34].mxu0 }
 0x154   : > { %v2593_v16 = vpop.f32.mrb[2].mxu1  ;;  %v2424_v26 = vpop.f32.mrb[35].mxu0 }
 0x155   : > { %v2809_v42 = vadd.f32 %v2806_v18, %v1771_v37  ;;  %v2425_v44 = vadd.f32 %v2424_v26, %v2423_v24  ;;  %v1781_v3 = vpop.f32.mrb[3].mxu1 }
 0x157   : > { %v1849_v6 = vadd.f32 %v2809_v42, %v3845_v62  ;;  %v2797_v13 = vadd.f32 %v2794_v51, %v2425_v44  ;;  %v2426_v1 = vpop.f32.mrb[36].mxu0 }
 0x158   : > { %v2596_v27 = vpop.f32.mrb[4].mxu1  ;;  %v2427_v33 = vpop.f32.mrb[37].mxu0 }
 0x159   : > { %1857 = vst [vmem:[#allocation2] sm:$0xff] %v1849_v6  ;;  %1873 = vst [vmem:[%s3848_s15] sm:$0xff] %v1849_v6  ;;  %v2800_v47 = vadd.f32 %v2797_v13, %v2590_v32  ;;  %v2428_v53 = vadd.f32 %v2427_v33, %v2426_v1  ;;  %v1791_v54 = vpop.f32.mrb[5].mxu1 }
 0x15b   : > { %v1850_v5 = vadd.f32 %v2800_v47, %v3845_v62  ;;  %v2824_v22 = vadd.f32 %v2821_v60, %v2428_v53  ;;  %v2429_v31 = vpop.f32.mrb[38].mxu0 }
 0x15c   : > { %v3852_v50 = vpop.f32.mrb[6].mxu1  ;;  %v2430_v17 = vpop.f32.mrb[39].mxu0 }
 0x15d   : > { %1858 = vst [vmem:[#allocation2 + $0x8] sm:$0xff] %v1850_v5  ;;  %1874 = vst [vmem:[%s3848_s15 + $0x8] sm:$0xff] %v1850_v5  ;;  %v2827_v45 = vadd.f32 %v2824_v22, %v1781_v3  ;;  %v2431_v29 = vadd.f32 %v2430_v17, %v2429_v31  ;;  %v1801_v38 = vpop.f32.mrb[7].mxu1 }
 0x15f   : > { %v1851_v39 = vadd.f32 %v2827_v45, %v3845_v62  ;;  %v2815_v40 = vadd.f32 %v2812_v7, %v2431_v29  ;;  %v2432_v41 = vpop.f32.mrb[40].mxu0 }
 0x160   : > { %v2433_v43 = vpop.f32.mrb[41].mxu0 }
 0x161   : > { %1859 = vst [vmem:[#allocation2 + $0x10] sm:$0xff] %v1851_v39  ;;  %1875 = vst [vmem:[%s3848_s15 + $0x10] sm:$0xff] %v1851_v39  ;;  %v2818_v48 = vadd.f32 %v2815_v40, %v2593_v16  ;;  %v2434_v49 = vadd.f32 %v2433_v43, %v2432_v41 }
 0x163   : > { %v1852_v52 = vadd.f32 %v2818_v48, %v3845_v62  ;;  %v2842_v55 = vadd.f32 %v2839_v10, %v2434_v49  ;;  %v2435_v59 = vpop.f32.mrb[42].mxu0 }
 0x164   : > { %v1881_v51 = vld [vmem:[#allocation2] ss:$2 sm:$0xff]  ;;  %v1889_v58 = vld [vmem:[#allocation2 + $0x1] ss:$2 sm:$0xff]  ;;  %v2436_v57 = vpop.f32.mrb[43].mxu0 }
 0x165   : > { %v1896_v56 = vmax.f32 %v1881_v51, %v1889_v58  ;;  %1860 = vst [vmem:[#allocation2 + $0x18] sm:$0xff] %v1852_v52  ;;  %1876 = vst [vmem:[%s3848_s15 + $0x18] sm:$0xff] %v1852_v52  ;;  %v2845_v60 = vadd.f32 %v2842_v55, %v1791_v54  ;;  %v2437_v61 = vadd.f32 %v2436_v57, %v2435_v59 }
 0x167   : > { %v1904_v2 = vcombine.high %v1896_v56, %v1896_v56  ;;  %v1853_v4 = vadd.f32 %v2845_v60, %v3845_v62  ;;  %v2833_v7 = vadd.f32 %v3833_v34, %v2437_v61  ;;  %v2438_v8 = vpop.f32.mrb[44].mxu0  ;;  %v1913_v23 = vsel %vm1912_vm2, %v1896_v56, -inf }
 0x168   : > { %v2439_v9 = vpop.f32.mrb[45].mxu0 }
 0x169   : > { %v1914_v10 = vsel %vm1912_vm2, %v1904_v2, -inf  ;;  %1861 = vst [vmem:[#allocation2 + $0x20] sm:$0xff] %v1853_v4  ;;  %1877 = vst [vmem:[%s3848_s15 + $0x20] sm:$0xff] %v1853_v4  ;;  %v2836_v11 = vadd.f32 %v2833_v7, %v2596_v27  ;;  %v2440_v12 = vadd.f32 %v2439_v9, %v2438_v8 }
 0x16a   : > { %v1915_v14 = vmax.f32 %v1913_v23, %v1914_v10 }
 0x16b   : > { %v1854_v34 = vadd.f32 %v2836_v11, %v3845_v62  ;;  %v2860_v15 = vadd.f32 %v3835_v20, %v2440_v12  ;;  %v2441_v19 = vpop.f32.mrb[46].mxu0 }
 0x16c   : > { %v1925_v46 = vmax.f32 %v1915_v14, 0.0  ;;  %v1883_v21 = vld [vmem:[#allocation2 + $0x10] ss:$2 sm:$0xff]  ;;  %v1891_v25 = vld [vmem:[#allocation2 + $0x11] ss:$2 sm:$0xff]  ;;  %v2442_v28 = vpop.f32.mrb[47].mxu0 }
 0x16d   : > { %v1897_v30 = vmax.f32 %v1883_v21, %v1891_v25  ;;  %1862 = vst [vmem:[#allocation2 + $0x28] sm:$0xff] %v1854_v34  ;;  %1878 = vst [vmem:[%s3848_s15 + $0x28] sm:$0xff] %v1854_v34  ;;  %v2863_v32 = vadd.f32 %v2860_v15, %v1801_v38  ;;  %v2443_v35 = vadd.f32 %v2442_v28, %v2441_v19 }
 0x16e   : > { %1929 = vst [vmem:[%s3868_s19] sm:$0xf] %v1925_v46 }
 0x16f   : > { %v1905_v36 = vcombine.high %v1897_v30, %v1897_v30  ;;  %v1855_v37 = vadd.f32 %v2863_v32, %v3845_v62  ;;  %v2851_v18 = vadd.f32 %v3837_v63, %v2443_v35  ;;  %v1916_v20 = vsel %vm1912_vm2, %v1897_v30, -inf }
 0x171   : > { %v1917_v24 = vsel %vm1912_vm2, %v1905_v36, -inf  ;;  %1863 = vst [vmem:[#allocation2 + $0x30] sm:$0xff] %v1855_v37  ;;  %1879 = vst [vmem:[%s3848_s15 + $0x30] sm:$0xff] %v1855_v37  ;;  %v2854_v16 = vadd.f32 %v2851_v18, %v3852_v50 }
 0x172   : > { %v1918_v26 = vmax.f32 %v1916_v20, %v1917_v24 }
 0x173   : > { %v1856_v63 = vadd.f32 %v2854_v16, %v3845_v62 }
 0x174   : > { %v1926_v42 = vmax.f32 %v1918_v26, 0.0  ;;  %v1885_v44 = vld [vmem:[#allocation2 + $0x20] ss:$2 sm:$0xff]  ;;  %v1893_v3 = vld [vmem:[#allocation2 + $0x21] ss:$2 sm:$0xff] }
 0x175   : > { %v1898_v6 = vmax.f32 %v1885_v44, %v1893_v3  ;;  %1864 = vst [vmem:[#allocation2 + $0x38] sm:$0xff] %v1856_v63  ;;  %1880 = vst [vmem:[%s3848_s15 + $0x38] sm:$0xff] %v1856_v63 }
 0x176   : > { %1930 = vst [vmem:[%s3868_s19 + $0x4] sm:$0xf] %v1926_v42 }
 0x177   : > { %2950 = shalt.err (!%p2947_p5)
}
 0x178   : > { %s2951_s11 = scalar_lea.hbm %s3885_s9, 1024  ;;  %s2955_s17 = scalar_lea.hbm %s3950_s4, 2048 }
 0x179   : > { %p2952_p6 = scmp.ne.s32.totalorder %s3885_s9, %s2951_s11  ;;  %p2956_p10 = scmp.lt.u32.totalorder %s3885_s9, %s3950_s4 }
 0x17a   : > { %p2957_p11 = scmp.lt.u32.totalorder %s2955_s17, %s2951_s11  ;;  %p2959_p13 = scmp.lt.u32.totalorder %s2951_s11, %s3885_s9 }
 0x17b   : > { %p2953_p7 = pnand %p2952_p6, %p3095_p4 }
 0x17c   : > { %p2958_p12 = por %p2957_p11, %p2956_p10 }
 0x17d   : > { %p2954_p9 = pneg %p2953_p7 }
 0x17e   : > { %p2960_p0 = por %p2959_p13, %p2958_p12 }
 0x180   : > { %p2961_p1 = pnand %p2960_p0, %p2954_p9 }
 0x182   : > { %2964 = shalt.err (!%p2961_p1)
}
 0x183   : > { %s3018_s16 = smov 128   ;;  %s3019_s28 = smov 8   ;;  %v1906_v62 = vcombine.high %v1898_v6, %v1898_v6  ;;  %v1919_v13 = vsel %vm1912_vm2, %v1898_v6, -inf  ;;  %v1887_v47 = vld [vmem:[#allocation2 + $0x30] ss:$2 sm:$0xff] }
 0x184   : > { %2880 = dma.vmem_to_hbm [thread:$0]  (%p3095_p4), %s3887_s3, 1024, %s3885_s9, %s3894_s23, %s3018_s16, %s3018_s16, %s3019_s28   ;;  %v1895_v53 = vld [vmem:[#allocation2 + $0x31] ss:$2 sm:$0xff] }
 0x185   : > { %v1920_v1 = vsel %vm1912_vm2, %v1906_v62, -inf  ;;  %v1899_v54 = vmax.f32 %v1887_v47, %v1895_v53 }
 0x186   : > { %v1921_v27 = vmax.f32 %v1919_v13, %v1920_v1 }
 0x187   : > { %v1907_v5 = vcombine.high %v1899_v54, %v1899_v54  ;;  %v1922_v22 = vsel %vm1912_vm2, %v1899_v54, -inf }
 0x188   : > { %v1927_v33 = vmax.f32 %v1921_v27, 0.0 }
 0x189   : > { %v1923_v31 = vsel %vm1912_vm2, %v1907_v5, -inf }
 0x18a   : > { %1931 = vst [vmem:[%s3868_s19 + $0x8] sm:$0xf] %v1927_v33  ;;  %v1924_v50 = vmax.f32 %v1922_v22, %v1923_v31 }
 0x18c   : > { %v1928_v17 = vmax.f32 %v1924_v50, 0.0 }
 0x18e   : > { %1932 = vst [vmem:[%s3868_s19 + $0xc] sm:$0xf] %v1928_v17 }
 0x18f PF: > { %p2886_p4 = scmp.ge.s32.totalorder %s3015_s25, 2  ;;  %s1977_s29 = sand.u32 1, %s2995_s20  }
 0x190   : > { %s1978_s3 = scalar_lea.sflag [#allocation14], %s1977_s29 }
 0x191   : > { %p2883_p2 = pnand %p2886_p4, %p3102_p8 }
 0x193   : > { %2990 = dma.done.wait (!%p2883_p2), %s1978_s3, 1024  }
 0x194   : > { %2992 = vsyncadd (!%p2883_p2), %s1978_s3, 4294966272  ;;  %s21_s25 = sadd.s32 1, %s3015_s25   ;;  %s3954_s20 = smov %s2999_s21 }
 0x195   : > { %p18_p3 = scmp.ge.s32.totalorder %s21_s25, 4   ;;  %s3955_s21 = smov %s3003_s22 }
 0x196   : > { %s3956_s22 = smov %s3108_s7  ;;  %s3957_s23 = smov %s3011_s24 }
 0x197   : > { %s3958_s24 = smov %s3960_s27  ;;  %20 = sbr.rel (!%p18_p3) target bundleno = 6 (0x6), region = 137 }
 0x19e   :  { %1995 = vsyncpa [#allocation14], 1 }
 0x19f   :  { %1997 = vsyncpa [#allocation14 + $0x1], 1 }

// kernel: vgg19_features_forward.10
= control target key start
LH: loop header
LB: loop body
LE: loop exit
PB: predicated region body
PF: predicated region fallthrough
CT: control target
= control target key end

     0   :  { %s6027_s0 = inlined_call_operand.vmem [shape: f32[3,192,64], index: 0, kind: input, shape index: {}]   ;;  %s6028_s1 = inlined_call_operand.vmem [shape: f32[1,64], index: 1, kind: input, shape index: {}]   ;;  %s6029_s2 = inlined_call_operand.vmem [shape: f32[2,16,16,64], index: 2, kind: input, shape index: {}]   ;;  %s6030_s3 = inlined_call_operand.<no memory space> [shape: f32[], index: 3, kind: input, shape index: {}]   ;;  %s6031_s4 = inlined_call_operand.hbm [shape: f32[2,16,16,64], index: 4, kind: output, shape index: {0}]   ;;  %s6032_s5 = inlined_call_operand.vmem [shape: f32[2,8,8,64], index: 5, kind: output, shape index: {1}]  }
   0x1   :  { %v4257_v0 = vstv %s6030_s3 }
   0x2   :  { %6083 = vst [vmem:[#allocation18_spill] sm:$0xff] %v4257_v0 }
   0x3   :  { %13 = vsyncpa [#allocation14], 0 }
   0x4   :  { %15 = vsyncpa [#allocation14 + $0x1], 0  ;;  %s4259_s20 = smov 0   ;;  %s4261_s21 = smov 0  }
   0x5   :  { %s4263_s22 = smov 0   ;;  %s4265_s23 = smov 0  }
   0x6   :  { %s4267_s24 = smov 0   ;;  %s4269_s25 = smov 0  }
   0x7 LB: > { %s3746_s3 = sadd.s32 4294967295, %s4217_s25   ;;  %s3747_s26 = sadd.s32 4294967294, %s4217_s25   ;;  %s4197_s20 = sphi %s4259_s20, %s6137_s20   ;;  %s4217_s25 = sphi %s4269_s25, %s21_s25   ;;  %s4213_s24 = sphi %s4267_s24, %s6141_s24   ;;  %s4209_s23 = sphi %s4265_s23, %s6140_s23   ;;  %s4205_s22 = sphi %s4263_s22, %s6139_s22   ;;  %s4201_s21 = sphi %s4261_s21, %s6138_s21  }
   0x8   : > { %s33_s27 = sadd.s32 1, %s4213_s24  ;;  %s144_s28 = sadd.s32 1, %s4205_s22 }
   0x9   : > { %v6084_v0 = vld [vmem:[#allocation18_spill] sm:$0xff]  ;;  %p35_p0 = scmp.ge.s32.totalorder %s33_s27, 2  ;;  %p154_p1 = scmp.ne.s32.totalorder %s4205_s22, %s4201_s21 }
   0xa   : > { %p155_p2 = scmp.eq.s32.totalorder %s3746_s3, 1  ;;  %p160_p3 = scmp.ne.s32.totalorder %s4201_s21, %s4197_s20 }
   0xb   : > { %s6143_s27 = smov (%p35_p0, %s33_s27), 0  ;;  %p161_p5 = scmp.eq.s32.totalorder %s3747_s26, 1 }
   0xc   : > { %p4299_p4 = por %p155_p2, %p154_p1  ;;  %s139_s30 = ssub.s32 %s4213_s24, %s6143_s27 }
   0xd   : > { %p3750_p6 = scmp.ge.s32.totalorder %s4217_s25, 1  ;;  %p142_p7 = scmp.eq.s32.totalorder %s139_s30, 0 }
   0xe   : > { %p4306_p8 = por %p161_p5, %p160_p3  ;;  %p285_p9 = scmp.lt.s32.totalorder %s4217_s25, 3 }
   0xf   : > { %s4312_s7 = scalar_select %p142_p7, %s4205_s22, %s144_s28  }
  0x10   : > { %p286_p10 = pnand %p3750_p6, %p285_p9 }
  0x12   : > { %289 = sbr.rel (%p286_p10) target bundleno = 616 (0x268), region = 36 }
  0x19   : > { %p371_p11 = scmp.lt.s32.totalorder %s4209_s23, 1  ;;  %v527_v1 = vlaneseq  ;;  %v466_v2 = vrot.slane %v6084_v0, 7  ;;  %v2189_v3 = vld [vmem:[%s6027_s0] sm:$0xff]  ;;  %v6043_v4 = vmov 0.0|0.0   ;;  %v2190_v5 = vld [vmem:[%s6027_s0 + $0x8] sm:$0xff]  ;;  %v2191_v6 = vld [vmem:[%s6027_s0 + $0x10] sm:$0xff] }
  0x1a   : > { %4055 = vmatprep.subr.bf16.mxu1 %v6043_v4  ;;  %3947 = vmatprep.subr.bf16.mxu0 %v6043_v4  ;;  %v2192_v7 = vld [vmem:[%s6027_s0 + $0x18] sm:$0xff]  ;;  %v3948_v9 = vpack.c.bf16 %v2190_v5, %v2189_v3  ;;  %v2193_v10 = vld [vmem:[%s6027_s0 + $0x20] sm:$0xff]  ;;  %v2194_v11 = vld [vmem:[%s6027_s0 + $0x28] sm:$0xff]  ;;  %vm532_vm0 = vcmask 1046528   ;;  %s4220_s9 = smov 64   ;;  %vm2061_vm2 = vcmask 1045504  }
  0x1b   : > { %s4331_s16 = scalar_select %p371_p11, %s4209_s23, 1  ;;  %v4333_v8 = vmax.f32 %v466_v2, 0.0  ;;  %500 = vst [vmem:[#allocation15 + $0x10] sm:$0xff] %v466_v2  ;;  %1665 = vst [vmem:[#allocation16 + $0x18] sm:$0xff] %v466_v2  ;;  %v2195_v12 = vld [vmem:[%s6027_s0 + $0x30] sm:$0xff]  ;;  %v4344_v13 = vand.u32 127, %v527_v1  ;;  %v3951_v18 = vpack.c.bf16 %v2192_v7, %v2191_v6  ;;  %v3954_v25 = vpack.c.bf16 %v2194_v11, %v2193_v10 }
  0x1c   : > { %1693 = vst [vmem:[#allocation16 + $0x20] sm:$0xff] %v466_v2  ;;  %1699 = vst [vmem:[#allocation16 + $0x28] sm:$0xff] %v466_v2  ;;  %v2196_v14 = vld [vmem:[%s6027_s0 + $0x38] sm:$0xff]  ;;  %v2197_v15 = vld [vmem:[%s6027_s0 + $0x40] sm:$0xff]  ;;  %4067 = vmatpush1.bf16.msra.mxu1 %v3948_v9  ;;  %3949 = vmatpush1.bf16.msra.mxu0 %v3948_v9  ;;  %vm2152_vm3 = vcmask 523264   ;;  %s3945_s10 = sshll.u32 %s4209_s23, 12 }
  0x1d   : > { %v2198_v16 = vld [vmem:[%s6027_s0 + $0x48] sm:$0xff]  ;;  %s3752_s13 = sshll.u32 %s4331_s16, 5  ;;  %v1863_v17 = vrot.slane %v4333_v8, 1  ;;  %v2199_v19 = vld [vmem:[%s6027_s0 + $0x50] sm:$0xff]  ;;  %v2200_v20 = vld [vmem:[%s6027_s0 + $0x58] sm:$0xff]  ;;  %4056 = vmatprep.subr.bf16.mxu1 %v6043_v4  ;;  %3950 = vmatprep.subr.bf16.mxu0 %v6043_v4  ;;  %vm530_vm1 = vcmp.lt.s32.totalorder %v4344_v13, 64  ;;  %v3957_v26 = vpack.c.bf16 %v2196_v14, %v2195_v12  ;;  %s5969_s14 = scalar_lea.hbm %s6031_s4, %s3945_s10 }
  0x1e   : > { %v2201_v21 = vld [vmem:[%s6027_s0 + $0x60] sm:$0xff]  ;;  %s3619_s26 = sadd.s32 4294967294, %s3752_s13  ;;  %v2202_v22 = vld [vmem:[%s6027_s0 + $0x68] sm:$0xff]  ;;  %v2203_v23 = vld [vmem:[%s6027_s0 + $0x70] sm:$0xff]  ;;  %v4383_v27 = vpack.c.bf16 %v2198_v16, %v2197_v15  ;;  %v4385_v28 = vpack.c.bf16 %v2200_v20, %v2199_v19  ;;  %s3946_s19 = sshll.u32 %s4331_s16, 8 }
  0x1f   : > { %v2204_v24 = vld [vmem:[%s6027_s0 + $0x78] sm:$0xff]  ;;  %s3753_s12 = sshll.u32 %s3619_s26, 3  ;;  %v4390_v32 = vpack.c.bf16 %v2202_v22, %v2201_v21  ;;  %v2205_v48 = vld [vmem:[%s6027_s0 + $0x80] sm:$0xff]  ;;  %v2206_v49 = vld [vmem:[%s6027_s0 + $0x88] sm:$0xff]  ;;  %s3943_s3 = sadd.s32 240, %s3946_s19 }
  0x20   : > { %s4380_s15 = scalar_lea.vmem %s6029_s2, %s3753_s12  ;;  %4068 = vmatpush1.bf16.msra.mxu1 %v3951_v18  ;;  %3952 = vmatpush1.bf16.msra.mxu0 %v3951_v18  ;;  %v4392_v33 = vpack.c.bf16 %v2204_v24, %v2203_v23  ;;  %v4445_v1 = vpack.c.bf16 %v2206_v49, %v2205_v48  ;;  %v2207_v7 = vld [vmem:[%s6027_s0 + $0x90] sm:$0xff]  ;;  %v2208_v9 = vld [vmem:[%s6027_s0 + $0x98] sm:$0xff]  ;;  %s3627_s30 = scalar_lea.vmem %s6029_s2, %s3943_s3 }
  0x21   : > { %v3775_v29 = vld [vmem:[%s4380_s15 + $0x90] sm:$0xff]  ;;  %v3776_v30 = vld [vmem:[%s4380_s15 + $0x98] sm:$0xff]  ;;  %v3773_v31 = vld [vmem:[%s4380_s15 + $0x80] sm:$0xff]  ;;  %4057 = vmatprep.subr.bf16.mxu1 %v6043_v4  ;;  %3953 = vmatprep.subr.bf16.mxu0 %v6043_v4  ;;  %s3944_s3 = sshll.u32 %s4331_s16, 6  ;;  %s4221_s17 = smov [#allocation13]  }
  0x22   : > { %v1099_v34 = vsel %vm530_vm1, %v3775_v29, %v6084_v0  ;;  %v1127_v35 = vsel %vm530_vm1, %v3776_v30, %v6084_v0  ;;  %v1028_v36 = vsel %vm530_vm1, %v3773_v31, %v6084_v0  ;;  %v3774_v37 = vld [vmem:[%s4380_s15 + $0x88] sm:$0xff]  ;;  %v4404_v38 = vld [vmem:[#allocation15 + $0x10] sm:$0x3]  ;;  %v3777_v47 = vld [vmem:[%s4380_s15 + $0xa0] sm:$0xff]  ;;  %s5785_s28 = scalar_lea.vmem %s6032_s5, %s3944_s3 }
  0x23   : > { %v1101_v39 = vsel %vm532_vm0, %v1099_v34, %v6084_v0  ;;  %v1129_v40 = vsel %vm532_vm0, %v1127_v35, %v1099_v34  ;;  %v1030_v41 = vsel %vm532_vm0, %v1028_v36, %v6084_v0  ;;  %v1056_v42 = vsel %vm530_vm1, %v3774_v37, %v6084_v0  ;;  %v3778_v58 = vld [vmem:[%s4380_s15 + $0xa8] sm:$0xff]  ;;  %v3759_v62 = vld [vmem:[%s4380_s15 + $0x10] sm:$0xff]  ;;  %v3760_v63 = vld [vmem:[%s4380_s15 + $0x18] sm:$0xff] }
  0x24   : > { %v1102_v43 = vrot.slane %v1101_v39, 7  ;;  %v1130_v44 = vrot.slane %v1129_v40, 7  ;;  %v1031_v45 = vrot.slane %v1030_v41, 7  ;;  %v1058_v46 = vsel %vm532_vm0, %v1056_v42, %v1028_v36  ;;  %4069 = vmatpush1.bf16.msra.mxu1 %v3954_v25  ;;  %3955 = vmatpush1.bf16.msra.mxu0 %v3954_v25  ;;  %v3779_v23 = vld [vmem:[%s4380_s15 + $0xb0] sm:$0xff]  ;;  %v3780_v24 = vld [vmem:[%s4380_s15 + $0xb8] sm:$0xff]  ;;  %v3762_v48 = vld [vmem:[%s4380_s15 + $0x28] sm:$0xff] }
  0x25   : > { %v1059_v50 = vrot.slane %v1058_v46, 7  ;;  %v1064_v51 = vsel %vm532_vm0, %v6084_v0, %v1056_v42  ;;  %v6041_v52 = vmax.f32 %v4404_v38, 0.0  ;;  %v1135_v53 = vsel %vm532_vm0, %v6084_v0, %v1127_v35  ;;  %4058 = vmatprep.subr.bf16.mxu1 %v6043_v4  ;;  %3956 = vmatprep.subr.bf16.mxu0 %v6043_v4 }
  0x26   : > { %v4429_v54 = vmax.f32 %v1102_v43, 0.0  ;;  %v4431_v55 = vmax.f32 %v1130_v44, 0.0  ;;  %v4433_v56 = vmax.f32 %v1031_v45, 0.0  ;;  %v1065_v57 = vrot.slane %v1064_v51, 7  ;;  %v3761_v43 = vld [vmem:[%s4380_s15 + $0x20] sm:$0xff] }
  0x27   : > { %v4438_v59 = vmax.f32 %v1059_v50, 0.0  ;;  %v1136_v60 = vrot.slane %v1135_v53, 7  ;;  %v1170_v61 = vsel %vm530_vm1, %v3777_v47, %v6084_v0  ;;  %v1866_v11 = vrot.slane %v6041_v52, 1 }
  0x28   : > { %v1908_v2 = vrot.slane %v4429_v54, 1  ;;  %v1909_v3 = vrot.slane %v4431_v55, 1  ;;  %v1903_v5 = vrot.slane %v4433_v56, 1  ;;  %1068 = vst [vmem:[#allocation15 + $0xd0] sm:$0xff] %v1065_v57  ;;  %v1172_v6 = vsel %vm532_vm0, %v1170_v61, %v6084_v0  ;;  %4070 = vmatpush1.bf16.msra.mxu1 %v3957_v26  ;;  %3958 = vmatpush1.bf16.msra.mxu0 %v3957_v26 }
  0x29   : > { %v1904_v10 = vrot.slane %v4438_v59, 1  ;;  %1139 = vst [vmem:[#allocation15 + $0xe8] sm:$0xff] %v1136_v60  ;;  %v1173_v12 = vrot.slane %v1172_v6, 7  ;;  %v1198_v14 = vsel %vm530_vm1, %v3778_v58, %v6084_v0  ;;  %v531_v18 = vsel %vm530_vm1, %v3759_v62, %v6084_v0  ;;  %4059 = vmatprep.subr.bf16.mxu1 %v6043_v4  ;;  %3959 = vmatprep.subr.bf16.mxu0 %v6043_v4 }
  0x2a   : > { %v1910_v15 = vsel %vm532_vm0, %v1908_v2, %v1909_v3  ;;  %v1200_v16 = vsel %vm532_vm0, %v1198_v14, %v1170_v61  ;;  %v559_v19 = vsel %vm530_vm1, %v3760_v63, %v6084_v0  ;;  %v533_v22 = vsel %vm532_vm0, %v531_v18, %v6084_v0 }
  0x2b   : > { %1989 = vrot.lane.b32.xlu1 %v1910_v15, %s4220_s9  ;;  %v1905_v20 = vsel %vm532_vm0, %v1903_v5, %v1904_v10  ;;  %v1201_v21 = vrot.slane %v1200_v16, 7  ;;  %v4484_v25 = vpack.c.bf16 %v2208_v9, %v2207_v7  ;;  %v534_v26 = vrot.slane %v533_v22, 7  ;;  %v3782_v22 = vld [vmem:[%s4380_s15 + $0xc8] sm:$0xff] }
  0x2c   : > { %1985 = vrot.lane.b32.xlu0 %v1905_v20, %s4220_s9  ;;  %v561_v29 = vsel %vm532_vm0, %v559_v19, %v531_v18  ;;  %v1206_v30 = vsel %vm532_vm0, %v6084_v0, %v1198_v14  ;;  %v567_v31 = vsel %vm532_vm0, %v6084_v0, %v559_v19  ;;  %v1867_v34 = vsel %vm532_vm0, %v1863_v17, %v1866_v11  ;;  %v3781_v11 = vld [vmem:[%s4380_s15 + $0xc0] sm:$0xff] }
  0x2d   : > { %v4495_v35 = vmax.f32 %v1173_v12, 0.0  ;;  %v562_v36 = vrot.slane %v561_v29, 7  ;;  %v1207_v37 = vrot.slane %v1206_v30, 7  ;;  %4071 = vmatpush1.bf16.msra.mxu1 %v4383_v27  ;;  %3961 = vmatpush1.bf16.msra.mxu0 %v4383_v27  ;;  %v4499_v39 = vmax.f32 %v534_v26, 0.0 }
  0x2e   : > { %v568_v40 = vrot.slane %v567_v31, 7  ;;  %v1241_v41 = vsel %vm530_vm1, %v3779_v23, %v6084_v0  ;;  %v1269_v42 = vsel %vm530_vm1, %v3780_v24, %v6084_v0  ;;  %4060 = vmatprep.subr.bf16.mxu1 %v6043_v4  ;;  %3962 = vmatprep.subr.bf16.mxu0 %v6043_v4  ;;  %v4515_v44 = vmax.f32 %v1201_v21, 0.0 }
  0x2f   : > { %1953 = vrot.lane.b32.xlu1 %v1863_v17, %s4220_s9  ;;  %v4513_v27 = vld [vmem:[#allocation15 + $0xd0] sm:$0x3]  ;;  %v4517_v45 = vmax.f32 %v562_v36, 0.0  ;;  %1210 = vst [vmem:[#allocation15 + $0x100] sm:$0xff] %v1207_v37  ;;  %v1243_v46 = vsel %vm532_vm0, %v1241_v41, %v6084_v0  ;;  %v1271_v47 = vsel %vm532_vm0, %v1269_v42, %v1241_v41  ;;  %v1868_v51 = vrot.slane %v4499_v39, 1 }
  0x30   : > { %v6046_v49 = vmax.f32 %v4513_v27, 0.0  ;;  %v4524_v50 = vld [vmem:[#allocation15 + $0xe8] sm:$0x3]  ;;  %571 = vst [vmem:[#allocation15 + $0x28] sm:$0xff] %v568_v40  ;;  %v1244_v17 = vrot.slane %v1243_v46, 7  ;;  %v1272_v53 = vrot.slane %v1271_v47, 7  ;;  %v602_v61 = vsel %vm530_vm1, %v3761_v43, %v6084_v0 }
  0x31   : > { %v6038_v57 = vmax.f32 %v4524_v50, 0.0  ;;  %v1913_v58 = vrot.slane %v4495_v35, 1  ;;  %v1869_v60 = vrot.slane %v4517_v45, 1  ;;  %4072 = vmatpush1.bf16.msra.mxu1 %v4385_v28  ;;  %3964 = vmatpush1.bf16.msra.mxu0 %v4385_v28  ;;  %v604_v5 = vsel %vm532_vm0, %v602_v61, %v6084_v0  ;;  %v3764_v43 = vld [vmem:[%s4380_s15 + $0x38] sm:$0xff]  ;;  %v2209_v46 = vld [vmem:[%s6027_s0 + $0xa0] sm:$0xff]  ;;  %v2210_v47 = vld [vmem:[%s6027_s0 + $0xa8] sm:$0xff] }
  0x32   : > { %v1906_v62 = vrot.slane %v6046_v49, 1  ;;  %v4537_v63 = vmax.f32 %v1244_v17, 0.0  ;;  %v4539_v2 = vmax.f32 %v1272_v53, 0.0  ;;  %4061 = vmatprep.subr.bf16.mxu1 %v6043_v4  ;;  %3965 = vmatprep.subr.bf16.mxu0 %v6043_v4  ;;  %v1914_v6 = vrot.slane %v4515_v44, 1 }
  0x33   : > { %1955 = vrot.lane.b32.xlu1 %v1867_v34, %s4220_s9  ;;  %v1911_v28 = vrot.slane %v6038_v57, 1  ;;  %v605_v7 = vrot.slane %v604_v5, 7  ;;  %v630_v9 = vsel %vm530_vm1, %v3762_v48, %v6084_v0  ;;  %v1870_v14 = vsel %vm532_vm0, %v1868_v51, %v1869_v60 }
  0x34   : > { %v1907_v12 = vsel %vm532_vm0, %v1904_v10, %v1906_v62  ;;  %v1918_v15 = vrot.slane %v4537_v63, 1  ;;  %v632_v16 = vsel %vm532_vm0, %v630_v9, %v602_v61  ;;  %v1919_v18 = vrot.slane %v4539_v2, 1  ;;  %v3763_v10 = vld [vmem:[%s4380_s15 + $0x30] sm:$0xff] }
  0x35   : > { %1987 = vrot.lane.b32.xlu0 %v1907_v12, %s4220_s9  ;;  %v633_v19 = vrot.slane %v632_v16, 7  ;;  %v4563_v20 = vmax.f32 %v605_v7, 0.0  ;;  %v1277_v21 = vsel %vm532_vm0, %v6084_v0, %v1269_v42  ;;  %4073 = vmatpush1.bf16.msra.mxu1 %v4390_v32  ;;  %v1912_v23 = vsel %vm532_vm0, %v1909_v3, %v1911_v28 }
  0x36   : > { %v4573_v24 = vld [vmem:[#allocation15 + $0x100] sm:$0x3]  ;;  %v1278_v26 = vrot.slane %v1277_v21, 7  ;;  %v638_v29 = vsel %vm532_vm0, %v6084_v0, %v630_v9  ;;  %v1312_v30 = vsel %vm530_vm1, %v3781_v11, %v6084_v0  ;;  %4062 = vmatprep.subr.bf16.mxu1 %v6043_v4  ;;  %3967 = vmatpush1.bf16.msra.mxu0 %v4390_v32  ;;  %v1340_v32 = vsel %vm530_vm1, %v3782_v22, %v6084_v0  ;;  %v3783_v11 = vld [vmem:[%s4380_s15 + $0xd0] sm:$0xff] }
  0x37   : > { %1957 = vrot.lane.b32.xlu1 %v1870_v14, %s4220_s9  ;;  %v6037_v31 = vmax.f32 %v4573_v24, 0.0  ;;  %v4584_v3 = vld [vmem:[#allocation15 + $0x28] sm:$0x3]  ;;  %v4586_v34 = vmax.f32 %v633_v19, 0.0  ;;  %v1873_v36 = vrot.slane %v4563_v20, 1  ;;  %v639_v37 = vrot.slane %v638_v29, 7  ;;  %3968 = vmatprep.subr.bf16.mxu0 %v6043_v4 }
  0x38   : > { %v6039_v40 = vmax.f32 %v4584_v3, 0.0  ;;  %1281 = vst [vmem:[#allocation15 + $0x118] sm:$0xff] %v1278_v26  ;;  %v1314_v41 = vsel %vm532_vm0, %v1312_v30, %v6084_v0  ;;  %v673_v42 = vsel %vm530_vm1, %v3763_v10, %v6084_v0  ;;  %v1342_v53 = vsel %vm532_vm0, %v1340_v32, %v1312_v30  ;;  %v3784_v19 = vld [vmem:[%s4380_s15 + $0xd8] sm:$0xff]  ;;  %v3765_v30 = vld [vmem:[%s4380_s15 + $0x40] sm:$0xff] }
  0x39   : > { %1991 = vrot.lane.b32.xlu0 %v1912_v23, %s4220_s9  ;;  %v1916_v48 = vrot.slane %v6037_v31, 1  ;;  %v1874_v51 = vrot.slane %v4586_v34, 1  ;;  %642 = vst [vmem:[#allocation15 + $0x40] sm:$0xff] %v639_v37  ;;  %v1315_v17 = vrot.slane %v1314_v41, 7  ;;  %4074 = vmatpush1.bf16.msra.mxu1 %v4392_v33  ;;  %v1915_v61 = vsel %vm532_vm0, %v1913_v58, %v1914_v6 }
  0x3a   : > { %v1871_v62 = vrot.slane %v6039_v40, 1  ;;  %v1343_v5 = vrot.slane %v1342_v53, 7  ;;  %v675_v28 = vsel %vm532_vm0, %v673_v42, %v6084_v0  ;;  %4063 = vmatprep.subr.bf16.mxu1 %v6043_v4  ;;  %3970 = vmatpush1.bf16.msra.mxu0 %v4392_v33  ;;  %v4622_v7 = vsel %vm532_vm0, %v1918_v15, %v1919_v18  ;;  %v3771_v40 = vld [vmem:[%s4380_s15 + $0x70] sm:$0xff] }
  0x3b   : > { %v676_v9 = vrot.slane %v675_v28, 7  ;;  %v701_v58 = vsel %vm530_vm1, %v3764_v43, %v6084_v0  ;;  %3971 = vmatprep.subr.bf16.mxu0 %v6043_v4  ;;  %v4629_v12 = vpack.c.bf16 %v2210_v47, %v2209_v46  ;;  %v1917_v14 = vsel %vm532_vm0, %v1914_v6, %v1916_v48 }
  0x3c   : > { %v1872_v33 = vsel %vm532_vm0, %v1869_v60, %v1871_v62  ;;  %v703_v15 = vsel %vm532_vm0, %v701_v58, %v673_v42  ;;  %v1348_v16 = vsel %vm532_vm0, %v6084_v0, %v1340_v32  ;;  %v1875_v21 = vsel %vm532_vm0, %v1873_v36, %v1874_v51 }
  0x3d   : > { %1993 = vrot.lane.b32.xlu0 %v1915_v61, %s4220_s9  ;;  %1959 = vrot.lane.b32.xlu1 %v1872_v33, %s4220_s9  ;;  %v704_v22 = vrot.slane %v703_v15, 7  ;;  %v4644_v6 = vmax.f32 %v676_v9, 0.0  ;;  %v1349_v10 = vrot.slane %v1348_v16, 7  ;;  %v4646_v23 = vmax.f32 %v1315_v17, 0.0  ;;  %v3766_v17 = vld [vmem:[%s4380_s15 + $0x48] sm:$0xff] }
  0x3e   : > { %v4648_v60 = vmax.f32 %v1343_v5, 0.0  ;;  %v709_v26 = vsel %vm532_vm0, %v6084_v0, %v701_v58  ;;  %v1383_v29 = vsel %vm530_vm1, %v3783_v11, %v6084_v0  ;;  %4075 = vmatpush1.bf16.msra.mxu1 %v4445_v1  ;;  %3973 = vmatpush1.bf16.msra.mxu0 %v4445_v1  ;;  %v1411_v42 = vsel %vm530_vm1, %v3784_v19, %v6084_v0  ;;  %v3785_v19 = vld [vmem:[%s4380_s15 + $0xe0] sm:$0xff] }
  0x3f   : > { %v4658_v36 = vld [vmem:[#allocation15 + $0x118] sm:$0x3]  ;;  %v4660_v37 = vmax.f32 %v704_v22, 0.0  ;;  %1352 = vst [vmem:[#allocation15 + $0x130] sm:$0xff] %v1349_v10  ;;  %v710_v41 = vrot.slane %v709_v26, 7  ;;  %v1385_v32 = vsel %vm532_vm0, %v1383_v29, %v6084_v0  ;;  %4064 = vmatprep.subr.bf16.mxu1 %v6043_v4  ;;  %3974 = vmatprep.subr.bf16.mxu0 %v6043_v4  ;;  %v1878_v46 = vrot.slane %v4644_v6, 1 }
  0x40   : > { %v6035_v43 = vmax.f32 %v4658_v36, 0.0  ;;  %v4670_v1 = vld [vmem:[#allocation15 + $0x40] sm:$0x3]  ;;  %v1386_v47 = vrot.slane %v1385_v32, 7  ;;  %v1413_v48 = vsel %vm532_vm0, %v1411_v42, %v1383_v29  ;;  %v744_v5 = vsel %vm530_vm1, %v3765_v30, %v6084_v0 }
  0x41   : > { %1995 = vrot.lane.b32.xlu0 %v1917_v14, %s4220_s9  ;;  %1961 = vrot.lane.b32.xlu1 %v1875_v21, %s4220_s9  ;;  %v6036_v53 = vmax.f32 %v4670_v1, 0.0  ;;  %v1879_v61 = vrot.slane %v4660_v37, 1  ;;  %713 = vst [vmem:[#allocation15 + $0x58] sm:$0xff] %v710_v41  ;;  %v1414_v62 = vrot.slane %v1413_v48, 7  ;;  %v1923_v9 = vrot.slane %v4646_v23, 1  ;;  %v3786_v26 = vld [vmem:[%s4380_s15 + $0xe8] sm:$0xff] }
  0x42   : > { %v1921_v28 = vrot.slane %v6035_v43, 1  ;;  %v4685_v58 = vmax.f32 %v1386_v47, 0.0  ;;  %v746_v11 = vsel %vm532_vm0, %v744_v5, %v6084_v0  ;;  %4076 = vmatpush1.bf16.msra.mxu1 %v4484_v25  ;;  %3976 = vmatpush1.bf16.msra.mxu0 %v4484_v25  ;;  %v772_v16 = vsel %vm530_vm1, %v3766_v17, %v6084_v0 }
  0x43   : > { %v1876_v14 = vrot.slane %v6036_v53, 1  ;;  %v4693_v33 = vmax.f32 %v1414_v62, 0.0  ;;  %v747_v15 = vrot.slane %v746_v11, 7  ;;  %4065 = vmatprep.subr.bf16.mxu1 %v6043_v4  ;;  %3977 = vmatprep.subr.bf16.mxu0 %v6043_v4  ;;  %v1924_v21 = vrot.slane %v4648_v60, 1 }
  0x44   : > { %v1880_v25 = vsel %vm532_vm0, %v1878_v46, %v1879_v61  ;;  %v774_v22 = vsel %vm532_vm0, %v772_v16, %v744_v5  ;;  %v1419_v10 = vsel %vm532_vm0, %v6084_v0, %v1411_v42  ;;  %v1922_v29 = vsel %vm532_vm0, %v1919_v18, %v1921_v28  ;;  %v3767_v46 = vld [vmem:[%s4380_s15 + $0x50] sm:$0xff]  ;;  %v3768_v28 = vld [vmem:[%s4380_s15 + $0x58] sm:$0xff] }
  0x45   : > { %1997 = vrot.lane.b32.xlu0 %v4622_v7, %s4220_s9  ;;  %v1877_v30 = vsel %vm532_vm0, %v1874_v51, %v1876_v14  ;;  %v1928_v41 = vrot.slane %v4685_v58, 1  ;;  %v775_v32 = vrot.slane %v774_v22, 7  ;;  %v1929_v47 = vrot.slane %v4693_v33, 1 }
  0x46   : > { %1963 = vrot.lane.b32.xlu1 %v1877_v30, %s4220_s9  ;;  %v4720_v42 = vld [vmem:[#allocation15 + $0x130] sm:$0x3]  ;;  %v1420_v7 = vrot.slane %v1419_v10, 7  ;;  %v780_v48 = vsel %vm532_vm0, %v6084_v0, %v772_v16  ;;  %v1454_v18 = vsel %vm530_vm1, %v3785_v19, %v6084_v0  ;;  %4077 = vmatpush1.bf16.msra.mxu1 %v4629_v12  ;;  %v4730_v17 = vmax.f32 %v747_v15, 0.0 }
  0x47   : > { %v6033_v51 = vmax.f32 %v4720_v42, 0.0  ;;  %v4732_v62 = vmax.f32 %v775_v32, 0.0  ;;  %v1482_v5 = vsel %vm530_vm1, %v3786_v26, %v6084_v0  ;;  %4066 = vmatprep.subr.bf16.mxu1 %v6043_v4  ;;  %3979 = vmatpush1.bf16.msra.mxu0 %v4629_v12  ;;  %v781_v14 = vrot.slane %v780_v48, 7 }
  0x48   : > { %v4740_v11 = vld [vmem:[#allocation15 + $0x58] sm:$0x3]  ;;  %1423 = vst [vmem:[#allocation15 + $0x148] sm:$0xff] %v1420_v7  ;;  %v1456_v16 = vsel %vm532_vm0, %v1454_v18, %v6084_v0  ;;  %v1484_v15 = vsel %vm532_vm0, %v1482_v5, %v1454_v18  ;;  %v815_v19 = vsel %vm530_vm1, %v3767_v46, %v6084_v0  ;;  %3980 = vmatprep.subr.bf16.mxu0 %v6043_v4  ;;  %v1883_v7 = vrot.slane %v4730_v17, 1  ;;  %v3787_v18 = vld [vmem:[%s4380_s15 + $0xf0] sm:$0xff] }
  0x49   : > { %1999 = vrot.lane.b32.xlu0 %v1922_v29, %s4220_s9  ;;  %v1925_v12 = vsel %vm532_vm0, %v1923_v9, %v1924_v21  ;;  %v1926_v22 = vrot.slane %v6033_v51, 1  ;;  %v6034_v10 = vmax.f32 %v4740_v11, 0.0  ;;  %v1457_v26 = vrot.slane %v1456_v16, 7  ;;  %784 = vst [vmem:[#allocation15 + $0x70] sm:$0xff] %v781_v14 }
  0x4a   : > { %1965 = vrot.lane.b32.xlu1 %v1880_v25, %s4220_s9  ;;  %v1485_v30 = vrot.slane %v1484_v15, 7  ;;  %v817_v32 = vsel %vm532_vm0, %v815_v19, %v6084_v0  ;;  %v843_v29 = vsel %vm530_vm1, %v3768_v28, %v6084_v0  ;;  %v1490_v9 = vsel %vm532_vm0, %v6084_v0, %v1482_v5  ;;  %v3769_v5 = vld [vmem:[%s4380_s15 + $0x60] sm:$0xff] }
  0x4b   : > { %v1881_v46 = vrot.slane %v6034_v10, 1  ;;  %v1930_v25 = vsel %vm532_vm0, %v1928_v41, %v1929_v47  ;;  %v1884_v48 = vrot.slane %v4732_v62, 1  ;;  %v4770_v14 = vmax.f32 %v1457_v26, 0.0  ;;  %v3788_v26 = vld [vmem:[%s4380_s15 + $0xf8] sm:$0xff] }
  0x4c   : > { %v818_v16 = vrot.slane %v817_v32, 7  ;;  %v845_v28 = vsel %vm532_vm0, %v843_v29, %v815_v19  ;;  %v1491_v15 = vrot.slane %v1490_v9, 7  ;;  %v4778_v41 = vmax.f32 %v1485_v30, 0.0 }
  0x4d   : > { %2001 = vrot.lane.b32.xlu0 %v1925_v12, %s4220_s9  ;;  %v1882_v51 = vsel %vm532_vm0, %v1879_v61, %v1881_v46  ;;  %v846_v10 = vrot.slane %v845_v28, 7  ;;  %v851_v43 = vsel %vm532_vm0, %v6084_v0, %v843_v29  ;;  %v1927_v32 = vsel %vm532_vm0, %v1924_v21, %v1926_v22 }
  0x4e   : > { %1967 = vrot.lane.b32.xlu1 %v1882_v51, %s4220_s9  ;;  %v4785_v19 = vmax.f32 %v818_v16, 0.0  ;;  %1494 = vst [vmem:[#allocation15 + $0x160] sm:$0xff] %v1491_v15  ;;  %v852_v12 = vrot.slane %v851_v43, 7  ;;  %v1525_v61 = vsel %vm530_vm1, %v3787_v18, %v6084_v0  ;;  %v1885_v30 = vsel %vm532_vm0, %v1883_v7, %v1884_v48  ;;  %v3770_v51 = vld [vmem:[%s4380_s15 + $0x68] sm:$0xff] }
  0x4f   : > { %v4791_v9 = vld [vmem:[#allocation15 + $0x148] sm:$0x3]  ;;  %v4793_v46 = vmax.f32 %v846_v10, 0.0  ;;  %v1527_v29 = vsel %vm532_vm0, %v1525_v61, %v6084_v0  ;;  %v886_v21 = vsel %vm530_vm1, %v3769_v5, %v6084_v0  ;;  %v1933_v22 = vrot.slane %v4770_v14, 1 }
  0x50   : > { %v6040_v43 = vmax.f32 %v4791_v9, 0.0  ;;  %855 = vst [vmem:[#allocation15 + $0x88] sm:$0xff] %v852_v12  ;;  %v1528_v18 = vrot.slane %v1527_v29, 7  ;;  %v1553_v7 = vsel %vm530_vm1, %v3788_v26, %v6084_v0  ;;  %v4807_v10 = vld [vmem:[#allocation15 + $0x70] sm:$0x3]  ;;  %v6045_v16 = vrot.slane %v4778_v41, 1 }
  0x51   : > { %2003 = vrot.lane.b32.xlu0 %v1927_v32, %s4220_s9  ;;  %v1888_v28 = vrot.slane %v4785_v19, 1  ;;  %v1555_v15 = vsel %vm532_vm0, %v1553_v7, %v1525_v61  ;;  %v888_v5 = vsel %vm532_vm0, %v886_v21, %v6084_v0  ;;  %v6042_v32 = vmax.f32 %v4807_v10, 0.0 }
  0x52   : > { %1969 = vrot.lane.b32.xlu1 %v1885_v30, %s4220_s9  ;;  %v1931_v26 = vrot.slane %v6040_v43, 1  ;;  %v1556_v12 = vrot.slane %v1555_v15, 7  ;;  %v914_v29 = vsel %vm530_vm1, %v3770_v51, %v6084_v0  ;;  %v1889_v53 = vrot.slane %v4793_v46, 1  ;;  %v3772_v43 = vld [vmem:[%s4380_s15 + $0x78] sm:$0xff] }
  0x53   : > { %v889_v31 = vrot.slane %v888_v5, 7  ;;  %v916_v61 = vsel %vm532_vm0, %v914_v29, %v886_v21  ;;  %v1561_v57 = vsel %vm532_vm0, %v6084_v0, %v1553_v7  ;;  %v1886_v30 = vrot.slane %v6042_v32, 1 }
  0x54   : > { %v1935_v15 = vsel %vm532_vm0, %v1933_v22, %v6045_v16  ;;  %v917_v52 = vrot.slane %v916_v61, 7  ;;  %v1562_v5 = vrot.slane %v1561_v57, 7  ;;  %v922_v21 = vsel %vm532_vm0, %v6084_v0, %v914_v29 }
  0x55   : > { %2005 = vrot.lane.b32.xlu0 %v1930_v25, %s4220_s9  ;;  %v4833_v51 = vld [vmem:[#allocation15 + $0x160] sm:$0x3]  ;;  %v1932_v7 = vsel %vm532_vm0, %v1929_v47, %v1931_v26  ;;  %v1887_v32 = vsel %vm532_vm0, %v1884_v48, %v1886_v30  ;;  %v923_v25 = vrot.slane %v922_v21, 7  ;;  %v1890_v22 = vsel %vm532_vm0, %v1888_v28, %v1889_v53  ;;  %v2211_v28 = vld [vmem:[%s6027_s0 + $0xb0] sm:$0xff] }
  0x56   : > { %v6047_v4 = vmax.f32 %v4833_v51, 0.0  ;;  %1971 = vrot.lane.b32.xlu1 %v1887_v32, %s4220_s9  ;;  %v4846_v61 = vmax.f32 %v1528_v18, 0.0  ;;  %1565 = vst [vmem:[#allocation15 + $0x178] sm:$0xff] %v1562_v5  ;;  %v957_v57 = vsel %vm530_vm1, %v3771_v40, %v6084_v0  ;;  %v985_v47 = vsel %vm530_vm1, %v3772_v43, %v6084_v0  ;;  %v2212_v40 = vld [vmem:[%s6027_s0 + $0xb8] sm:$0xff] }
  0x57   : > { %v4844_v16 = vld [vmem:[#allocation15 + $0x88] sm:$0x3]  ;;  %v4855_v26 = vmax.f32 %v889_v31, 0.0  ;;  %v4857_v32 = vmax.f32 %v917_v52, 0.0  ;;  %926 = vst [vmem:[#allocation15 + $0xa0] sm:$0xff] %v923_v25  ;;  %v959_v18 = vsel %vm532_vm0, %v957_v57, %v6084_v0  ;;  %v4868_v43 = vmax.f32 %v1556_v12, 0.0 }
  0x58   : > { %v6048_v48 = vmax.f32 %v4844_v16, 0.0  ;;  %v960_v31 = vrot.slane %v959_v18, 7  ;;  %v987_v52 = vsel %vm532_vm0, %v985_v47, %v957_v57  ;;  %v993_v29 = vsel %vm532_vm0, %v6084_v0, %v985_v47 }
  0x59   : > { %2007 = vrot.lane.b32.xlu0 %v1932_v7, %s4220_s9  ;;  %6087 = vst [vmem:[#allocation19_spill] sm:$0xff] %v4868_v43  ;;  %v1936_v30 = vrot.slane %v6047_v4, 1  ;;  %v988_v21 = vrot.slane %v987_v52, 7  ;;  %v994_v25 = vrot.slane %v993_v29, 7  ;;  %v3981_v49 = vpack.c.bf16 %v2212_v40, %v2211_v28 }
  0x5a   : > { %v1891_v5 = vrot.slane %v6048_v48, 1  ;;  %1973 = vrot.lane.b32.xlu1 %v1890_v22, %s4220_s9  ;;  %v2102_v12 = vrot.slane %v4433_v56, 2  ;;  %v1893_v57 = vrot.slane %v4855_v26, 1  ;;  %v1894_v47 = vrot.slane %v4857_v32, 1 }
  0x5b   : > { %997 = vst [vmem:[#allocation15 + $0xb8] sm:$0xff] %v994_v25  ;;  %v2103_v18 = vrot.slane %v4438_v59, 2  ;;  %v1938_v52 = vrot.slane %v4846_v61, 1  ;;  %v1939_v22 = vrot.slane %v4868_v43, 1  ;;  %4078 = vmatpush1.bf16.msra.mxu1 %v3981_v49  ;;  %v2062_v28 = vrot.slane %v4333_v8, 2  ;;  %3982 = vmatpush1.bf16.msra.mxu0 %v3981_v49 }
  0x5c   : > { %v1892_v7 = vsel %vm532_vm0, %v1889_v53, %v1891_v5  ;;  %v6088_v40 = vmax.f32 %v4513_v27, 0.0  ;;  %v6089_v53 = vrot.slane %v4778_v41, 1  ;;  %v6092_v48 = vmax.f32 %v4404_v38, 0.0 }
  0x5d   : > { %2009 = vrot.lane.b32.xlu0 %v1935_v15, %s4220_s9  ;;  %v4892_v4 = vld [vmem:[#allocation15 + $0x178] sm:$0x3]  ;;  %v4895_v25 = vsel %vm2061_vm2, %v2102_v12, %v2103_v18  ;;  %v6091_v15 = vmov 0.0|0.0   ;;  %v1895_v12 = vsel %vm532_vm0, %v1893_v57, %v1894_v47  ;;  %3792 = vmatprep.mubr.msk.f32.mxu0 %vm2152_vm3, %v2062_v28  ;;  %v1940_v49 = vsel %vm532_vm0, %v1938_v52, %v1939_v22 }
  0x5e   : > { %v2105_v29 = vrot.slane %v6088_v40, 2  ;;  %v1937_v5 = vsel %vm532_vm0, %v6089_v53, %v1936_v30  ;;  %6090 = vst [vmem:[#allocation20_spill] sm:$0xff] %v4895_v25  ;;  %3983 = vmatprep.subr.bf16.mxu1 %v6091_v15  ;;  %v2065_v43 = vrot.slane %v6092_v48, 2  ;;  %1975 = vrot.lane.b32.xlu1 %v1892_v7, %s4220_s9  ;;  %v6052_v27 = vmax.f32 %v4892_v4, 0.0  ;;  %v4902_v40 = vld [vmem:[#allocation15 + $0xa0] sm:$0x3] }
  0x5f   : > { %3808 = vmatprep.mubr.msk.f32.mxu1 %vm2152_vm3, %v4895_v25  ;;  %v6053_v53 = vmax.f32 %v4902_v40, 0.0  ;;  %4019 = vmatprep.subr.bf16.mxu0 %v6091_v15  ;;  %v4922_v57 = vmax.f32 %v960_v31, 0.0 }
  0x60   : > { %v4907_v30 = vsel %vm2061_vm2, %v2103_v18, %v2105_v29  ;;  %v4913_v38 = vsel %vm2061_vm2, %v2062_v28, %v2065_v43  ;;  %v1941_v48 = vrot.slane %v6052_v27, 1  ;;  %v4924_v18 = vmax.f32 %v988_v21, 0.0 }
  0x61   : > { %6093 = vst [vmem:[#allocation21_spill] sm:$0xff] %v4907_v30  ;;  %2011 = vrot.lane.b32.xlu0 %v1937_v5, %s4220_s9  ;;  %v1896_v7 = vrot.slane %v6053_v53, 1  ;;  %v1898_v5 = vrot.slane %v4922_v57, 1 }
  0x62   : > { %1977 = vrot.lane.b32.xlu1 %v1895_v12, %s4220_s9  ;;  %v4927_v43 = vld [vmem:[#allocation15 + $0xb8] sm:$0x3]  ;;  %v1942_v52 = vsel %vm532_vm0, %v1939_v22, %v1941_v48  ;;  %v1899_v31 = vrot.slane %v4924_v18, 1 }
  0x63   : > { %v1897_v28 = vsel %vm532_vm0, %v1894_v47, %v1896_v7  ;;  %v6051_v29 = vmax.f32 %v4927_v43, 0.0  ;;  %v3790_v22 = vld [vmem:[%s3627_s30] sm:$0xff] }
  0x64   : > { %v1900_v47 = vsel %vm532_vm0, %v1898_v5, %v1899_v31  ;;  %v1591_v48 = vsel %vm530_vm1, %v3790_v22, %v6084_v0  ;;  %v1751_v7 = vld [vmem:[#allocation16 + $0x18] sm:$0xff] }
  0x65   : > { %2013 = vrot.lane.b32.xlu0 %v1940_v49, %s4220_s9  ;;  %v1901_v21 = vrot.slane %v6051_v29, 1  ;;  %v3791_v49 = vld [vmem:[%s3627_s30 + $0x8] sm:$0xff]  ;;  %v4958_v27 = vmax.f32 %v1751_v7, 0.0 }
  0x66   : > { %1979 = vrot.lane.b32.xlu1 %v1897_v28, %s4220_s9  ;;  %v1752_v28 = vld [vmem:[#allocation16 + $0x20] sm:$0xff]  ;;  %v1616_v5 = vsel %vm530_vm1, %v3791_v49, %v6084_v0 }
  0x67   : > { %v1902_v12 = vsel %vm532_vm0, %v1899_v31, %v1901_v21  ;;  %v1618_v21 = vsel %vm532_vm0, %v1616_v5, %v1591_v48  ;;  %6094 = vst [vmem:[#allocation22_spill] sm:$0xff] %v4958_v27  ;;  %v4960_v22 = vmax.f32 %v1752_v28, 0.0 }
  0x69   : > { %2015 = vrot.lane.b32.xlu0 %v1942_v52, %s4220_s9  ;;  %v1593_v52 = vsel %vm532_vm0, %v1591_v48, %v6084_v0  ;;  %6095 = vst [vmem:[#allocation23_spill] sm:$0xff] %v4960_v22  ;;  %v1948_v48 = vrot.slane %v4958_v27, 1  ;;  %v3882_v27 = vld [vmem:[%s6027_s0 + $0x190] sm:$0xff] }
  0x6a   : > { %1983 = vrot.lane.b32.xlu1 %v1902_v12, %s4220_s9  ;;  %v1594_v31 = vrot.slane %v1593_v52, 7  ;;  %v1624_v12 = vsel %vm532_vm0, %v6084_v0, %v1616_v5  ;;  %v1949_v52 = vrot.slane %v4960_v22, 1  ;;  %v4970_v5 = vld [vmem:[#allocation16 + $0x28] sm:$0x3]  ;;  %v2068_v22 = vrot.slane %v4517_v45, 2 }
  0x6b   : > { %v1625_v29 = vrot.slane %v1624_v12, 7  ;;  %6098 = vst [vmem:[#allocation26_spill] sm:$0xff] %v4970_v5 }
  0x6c   : > { %v4962_v53 = vmax.f32 %v1594_v31, 0.0  ;;  %v1950_v28 = vsel %vm532_vm0, %v1948_v48, %v1949_v52  ;;  %v6058_v31 = vmax.f32 %v4970_v5, 0.0  ;;  %v2067_v5 = vrot.slane %v4499_v39, 2 }
  0x6d   : > { %1981 = vrot.lane.b32.xlu0 %v1900_v47, %s4220_s9  ;;  %v1619_v47 = vrot.slane %v1618_v21, 7  ;;  %1628 = vst [vmem:[#allocation16 + $0x10] sm:$0xff] %v1625_v29 }
  0x6e   : > { %6096 = vst [vmem:[#allocation24_spill] sm:$0xff] %v4962_v53  ;;  %v1943_v13 = vrot.slane %v4962_v53, 1  ;;  %v3884_v53 = vld [vmem:[%s6027_s0 + $0x1a0] sm:$0xff] }
  0x6f   : > { %v4964_v25 = vmax.f32 %v1619_v47, 0.0  ;;  %v1951_v47 = vrot.slane %v6058_v31, 1 }
  0x71   : > { %6097 = vst [vmem:[#allocation25_spill] sm:$0xff] %v4964_v25  ;;  %v1944_v49 = vrot.slane %v4964_v25, 1  ;;  %v1952_v48 = vsel %vm532_vm0, %v1949_v52, %v1951_v47  ;;  %v3881_v52 = vld [vmem:[%s6027_s0 + $0x188] sm:$0xff]  ;;  %v3826_v47 = vld [vmem:[%s6027_s0 + $0xd0] sm:$0xff] }
  0x73   : > { %v1945_v7 = vsel %vm532_vm0, %v1943_v13, %v1944_v49 }
  0x74   : > { %2017 = vrot.lane.b32.xlu0 %v1945_v7, %s4220_s9  ;;  %v4976_v21 = vld [vmem:[#allocation16 + $0x10] sm:$0x3]  ;;  %v3824_v7 = vld [vmem:[%s6027_s0 + $0xc0] sm:$0xff] }
  0x75   : > { %6099 = vst [vmem:[#allocation27_spill] sm:$0xff] %v4976_v21  ;;  %v6056_v29 = vmax.f32 %v4976_v21, 0.0  ;;  %v6100_v21 = vmax.f32 %v4584_v3, 0.0 }
  0x77   : > { %v1946_v12 = vrot.slane %v6056_v29, 1  ;;  %v2070_v25 = vrot.slane %v6100_v21, 2  ;;  %v6102_v21 = vmax.f32 %v4524_v50, 0.0 }
  0x78   : > { %2021 = vrot.lane.b32.xlu0 %v1950_v28, %s4220_s9  ;;  %v3825_v28 = vld [vmem:[%s6027_s0 + $0xc8] sm:$0xff] }
  0x79   : > { %v1947_v13 = vsel %vm532_vm0, %v1944_v49, %v1946_v12  ;;  %v3984_v0 = vpack.c.bf16 %v3825_v28, %v3824_v7  ;;  %v3880_v49 = vld [vmem:[%s6027_s0 + $0x180] sm:$0xff] }
  0x7a   : > { %2019 = vrot.lane.b32.xlu1 %v1947_v13, %s4220_s9  ;;  %v3827_v13 = vld [vmem:[%s6027_s0 + $0xd8] sm:$0xff]  ;;  %v4020_v7 = vpack.c.bf16 %v3881_v52, %v3880_v49  ;;  %v2107_v49 = vrot.slane %v4429_v54, 2  ;;  %v2108_v52 = vrot.slane %v4431_v55, 2 }
  0x7b   : > { %v3987_v31 = vpack.c.bf16 %v3827_v13, %v3826_v47  ;;  %v3829_v47 = vld [vmem:[%s6027_s0 + $0xe8] sm:$0xff] }
  0x7c   : > { %v5052_v3 = vsel %vm2061_vm2, %v2107_v49, %v2108_v52 }
  0x7d   : > { %6101 = vst [vmem:[#allocation28_spill] sm:$0xff] %v5052_v3 }
  0x7e   : > { %2023 = vrot.lane.b32.xlu1 %v1952_v48, %s4220_s9  ;;  %s347_s9 = sand.u32 1, %s4201_s21  }
  0x7f   : > { %s3751_s18 = sshll.u32 %s347_s9, 8  ;;  %s5977_s23 = scalar_lea.sflag [#allocation14], %s347_s9 }
  0x80   : > { %s5753_s19 = scalar_lea.vmem [#allocation13], %s3751_s18  ;;  %s4143_s18 = sshll.u32 %s4221_s17, 4  ;;  %s4144_s18 = int_to_ptr.vmem [resolvable:$false] %s4143_s18 }
  0x81   : > { %s3546_s11 = sshll.u32 %s5753_s19, 4  ;;  %s4145_s3 = scalar_lea.vmem %s4144_s18, 8192  ;;  %s5971_s11 = int_to_ptr.vmem [resolvable:$true] %s3546_s11 }
  0x82   : > { %s4139_s15 = scalar_lea.vmem %s5971_s11, 4096  ;;  %p4146_p1 = scmp.lt.s32.totalorder %s5971_s11, %s4144_s18 }
  0x83   : > { %p4140_p12 = scmp.ne.s32.totalorder %s5971_s11, %s4139_s15  ;;  %p4147_p2 = scmp.lt.s32.totalorder %s4145_s3, %s4139_s15 }
  0x85   : > { %p4141_p13 = pnand %p4140_p12, %p4299_p4  ;;  %p4148_p3 = por %p4147_p2, %p4146_p1 }
  0x87   : > { %p4142_p0 = pneg %p4141_p13 }
  0x89   : > { %p4149_p5 = pnand %p4148_p3, %p4142_p0 }
  0x9d   : > { %v4994_v29 = vpop.permute.xlu1 %1989 }
  0x9e   : > { %v1986_v12 = vpop.permute.xlu0 %1985 }
  0x9f   : > { %v5010_v48 = vsel %vm2152_vm3, %v4433_v56, %v1986_v12  ;;  %v3883_v56 = vld [vmem:[%s6027_s0 + $0x198] sm:$0xff]  ;;  %v3828_v12 = vld [vmem:[%s6027_s0 + $0xe0] sm:$0xff] }
  0xa0   : > { %2422 = vmatmul.mubr.f32.vlgmr.msra.gmra.mrb[0].mxu1 %v5010_v48  ;;  %v4023_v13 = vpack.c.bf16 %v3883_v56, %v3882_v27  ;;  %v3830_v56 = vld [vmem:[%s6027_s0 + $0xf0] sm:$0xff] }
  0xa1   : > { %3985 = vmatpush1.bf16.msra.mxu1 %v3984_v0  ;;  %v1954_v28 = vpop.permute.xlu1 %1953  ;;  %3809 = vmatprep.mubr.msk.f32.mxu1 %vm2152_vm3, %v4907_v30  ;;  %v3831_v30 = vld [vmem:[%s6027_s0 + $0xf8] sm:$0xff] }
  0xa2   : > { %v2153_v0 = vsel %vm2152_vm3, %v4333_v8, %v1954_v28  ;;  %3986 = vmatprep.subr.bf16.mxu1 %v6091_v15 }
  0xa3   : > { %2342 = vmatmul.mubr.f32.vlgmr.msra.gmra.mrb[0].mxu0 %v2153_v0  ;;  %v5037_v0 = vsel %vm2061_vm2, %v2067_v5, %v2068_v22  ;;  %v3990_v5 = vpack.c.bf16 %v3829_v47, %v3828_v12  ;;  %v5070_v12 = vsel %vm2061_vm2, %v2068_v22, %v2070_v25  ;;  %v3886_v47 = vld [vmem:[%s6027_s0 + $0x1b0] sm:$0xff]  ;;  %v2112_v25 = vrot.slane %v4495_v35, 2 }
  0xa4   : > { %3793 = vmatprep.mubr.msk.f32.mxu0 %vm2152_vm3, %v4913_v38  ;;  %4021 = vmatpush1.bf16.msra.mxu0 %v4020_v7  ;;  %v3885_v38 = vld [vmem:[%s6027_s0 + $0x1a8] sm:$0xff]  ;;  %v2110_v7 = vrot.slane %v6102_v21, 2  ;;  %v2113_v22 = vrot.slane %v4515_v44, 2 }
  0xa5   : > { %v1956_v28 = vpop.permute.xlu1 %1955  ;;  %3988 = vmatpush1.bf16.msra.mxu1 %v3987_v31  ;;  %4022 = vmatprep.subr.bf16.mxu0 %v6091_v15  ;;  %v4026_v49 = vpack.c.bf16 %v3885_v38, %v3884_v53 }
  0xa6   : > { %v2154_v27 = vsel %vm2152_vm3, %v4333_v8, %v1956_v28  ;;  %3989 = vmatprep.subr.bf16.mxu1 %v6091_v15  ;;  %v5088_v38 = vsel %vm2061_vm2, %v2108_v52, %v2110_v7  ;;  %v3833_v52 = vld [vmem:[%s6027_s0 + $0x108] sm:$0xff]  ;;  %v5122_v7 = vsel %vm2061_vm2, %v2112_v25, %v2113_v22  ;;  %v3834_v25 = vld [vmem:[%s6027_s0 + $0x110] sm:$0xff] }
  0xa7   : > { %v1988_v31 = vpop.permute.xlu0 %1987  ;;  %2347 = vmatmul.mubr.f32.gmra.mrb[2].mxu0 %v2154_v27  ;;  %6103 = vst [vmem:[#allocation29_spill] sm:$0xff] %v5088_v38  ;;  %v2072_v27 = vrot.slane %v4563_v20, 2 }
  0xa8   : > { %v5064_v8 = vsel %vm2152_vm3, %v4438_v59, %v1988_v31  ;;  %3794 = vmatprep.mubr.msk.f32.mxu0 %vm2152_vm3, %v5037_v0  ;;  %4024 = vmatpush1.bf16.msra.mxu0 %v4023_v13  ;;  %v3887_v59 = vld [vmem:[%s6027_s0 + $0x1b8] sm:$0xff]  ;;  %v3993_v13 = vpack.c.bf16 %v3831_v30, %v3830_v56  ;;  %v3832_v30 = vld [vmem:[%s6027_s0 + $0x100] sm:$0xff] }
  0xa9   : > { %2427 = vmatmul.mubr.f32.gmra.mrb[2].mxu1 %v5064_v8  ;;  %v1958_v50 = vpop.permute.xlu1 %1957  ;;  %4025 = vmatprep.subr.bf16.mxu0 %v6091_v15  ;;  %v4029_v31 = vpack.c.bf16 %v3887_v59, %v3886_v47  ;;  %v6105_v47 = vmax.f32 %v4573_v24, 0.0  ;;  %v3835_v24 = vld [vmem:[%s6027_s0 + $0x118] sm:$0xff] }
  0xaa   : > { %3810 = vmatprep.mubr.msk.f32.mxu1 %vm2152_vm3, %v5052_v3  ;;  %3991 = vmatpush1.bf16.msra.mxu1 %v3990_v5  ;;  %v5083_v53 = vsel %vm2152_vm3, %v4499_v39, %v1958_v50  ;;  %v2073_v5 = vrot.slane %v4586_v34, 2  ;;  %v5097_v39 = vsel %vm2152_vm3, %v4429_v54, %v4994_v29  ;;  %v3888_v54 = vld [vmem:[%s6027_s0 + $0x1c0] sm:$0xff]  ;;  %v3889_v29 = vld [vmem:[%s6027_s0 + $0x1c8] sm:$0xff] }
  0xab   : > { %v1992_v28 = vpop.permute.xlu0 %1991  ;;  %2352 = vmatmul.mubr.f32.gmra.mrb[4].mxu0 %v5083_v53  ;;  %3992 = vmatprep.subr.bf16.mxu1 %v6091_v15  ;;  %6104 = vst [vmem:[#allocation30_spill] sm:$0xff] %v5097_v39  ;;  %v2115_v59 = vrot.slane %v6105_v47, 2 }
  0xac   : > { %3795 = vmatprep.mubr.msk.f32.mxu0 %vm2152_vm3, %v5070_v12  ;;  %4027 = vmatpush1.bf16.msra.mxu0 %v4026_v49  ;;  %v5119_v21 = vsel %vm2152_vm3, %v4431_v55, %v1992_v28  ;;  %v5125_v50 = vsel %vm2061_vm2, %v2072_v27, %v2073_v5 }
  0xad   : > { %2432 = vmatmul.mubr.f32.gmra.mrb[4].mxu1 %v5097_v39  ;;  %4028 = vmatprep.subr.bf16.mxu0 %v6091_v15  ;;  %v3996_v39 = vpack.c.bf16 %v3833_v52, %v3832_v30  ;;  %v5160_v52 = vsel %vm2061_vm2, %v2113_v22, %v2115_v59  ;;  %v2078_v22 = vrot.slane %v4660_v37, 2 }
  0xae   : > { %3811 = vmatprep.mubr.msk.f32.mxu1 %vm2152_vm3, %v5088_v38  ;;  %3994 = vmatpush1.bf16.msra.mxu1 %v3993_v13  ;;  %v6106_v38 = vmax.f32 %v4670_v1, 0.0  ;;  %v4032_v13 = vpack.c.bf16 %v3889_v29, %v3888_v54  ;;  %v3890_v1 = vld [vmem:[%s6027_s0 + $0x1d0] sm:$0xff]  ;;  %v2118_v54 = vrot.slane %v4539_v2, 2  ;;  %v3999_v29 = vpack.c.bf16 %v3835_v24, %v3834_v25 }
  0xaf   : > { %v1994_v56 = vpop.permute.xlu0 %1993  ;;  %v1960_v49 = vpop.permute.xlu1 %1959  ;;  %3995 = vmatprep.subr.bf16.mxu1 %v6091_v15  ;;  %v6108_v24 = vmax.f32 %v4658_v36, 0.0  ;;  %v3839_v36 = vld [vmem:[%s6027_s0 + $0x138] sm:$0xff] }
  0xb0   : > { %v2075_v3 = vrot.slane %v6106_v38, 2  ;;  %v5134_v55 = vsel %vm2152_vm3, %v4517_v45, %v1960_v49  ;;  %4030 = vmatpush1.bf16.msra.mxu0 %v4029_v31  ;;  %v3891_v45 = vld [vmem:[%s6027_s0 + $0x1d8] sm:$0xff]  ;;  %v5154_v28 = vsel %vm2152_vm3, %v4495_v35, %v1994_v56  ;;  %v2117_v38 = vrot.slane %v4537_v63, 2  ;;  %v3893_v49 = vld [vmem:[%s6027_s0 + $0x1e8] sm:$0xff] }
  0xb1   : > { %2437 = vmatmul.mubr.f32.gmra.mrb[6].mxu1 %v5119_v21  ;;  %2357 = vmatmul.mubr.f32.gmra.mrb[6].mxu0 %v5134_v55  ;;  %v2077_v56 = vrot.slane %v4644_v6, 2 }
  0xb2   : > { %3812 = vmatprep.mubr.msk.f32.mxu1 %vm2152_vm3, %v5122_v7  ;;  %3796 = vmatprep.mubr.msk.f32.mxu0 %vm2152_vm3, %v5125_v50  ;;  %v5163_v31 = vsel %vm2061_vm2, %v2073_v5, %v2075_v3  ;;  %v3836_v3 = vld [vmem:[%s6027_s0 + $0x120] sm:$0xff]  ;;  %v3837_v5 = vld [vmem:[%s6027_s0 + $0x128] sm:$0xff]  ;;  %v5197_v25 = vsel %vm2061_vm2, %v2117_v38, %v2118_v54  ;;  %v3838_v38 = vld [vmem:[%s6027_s0 + $0x130] sm:$0xff] }
  0xb3   : > { %v1996_v27 = vpop.permute.xlu0 %1995  ;;  %v1962_v30 = vpop.permute.xlu1 %1961  ;;  %3997 = vmatpush1.bf16.msra.mxu1 %v3996_v39  ;;  %4031 = vmatprep.subr.bf16.mxu0 %v6091_v15  ;;  %v4035_v39 = vpack.c.bf16 %v3891_v45, %v3890_v1  ;;  %6107 = vst [vmem:[#allocation31_spill] sm:$0xff] %v5197_v25  ;;  %v4002_v1 = vpack.c.bf16 %v3837_v5, %v3836_v3  ;;  %v3895_v3 = vld [vmem:[%s6027_s0 + $0x1f8] sm:$0xff] }
  0xb4   : > { %v5169_v35 = vsel %vm2152_vm3, %v4563_v20, %v1962_v30  ;;  %3998 = vmatprep.subr.bf16.mxu1 %v6091_v15  ;;  %4033 = vmatpush1.bf16.msra.mxu0 %v4032_v13  ;;  %v3892_v20 = vld [vmem:[%s6027_s0 + $0x1e0] sm:$0xff]  ;;  %v5192_v47 = vsel %vm2152_vm3, %v4515_v44, %v1996_v27  ;;  %v2120_v13 = vrot.slane %v6108_v24, 2  ;;  %v5203_v30 = vsel %vm2061_vm2, %v2077_v56, %v2078_v22 }
  0xb5   : > { %2442 = vmatmul.mubr.f32.gmra.mrb[8].mxu1 %v5154_v28  ;;  %2362 = vmatmul.mubr.f32.gmra.mrb[8].mxu0 %v5169_v35  ;;  %v6109_v44 = vmax.f32 %v4740_v11, 0.0  ;;  %v3894_v11 = vld [vmem:[%s6027_s0 + $0x1f0] sm:$0xff]  ;;  %v4005_v24 = vpack.c.bf16 %v3839_v36, %v3838_v38  ;;  %v3897_v38 = vld [vmem:[%s6027_s0 + $0x208] sm:$0xff] }
  0xb6   : > { %3813 = vmatprep.mubr.msk.f32.mxu1 %vm2152_vm3, %v5160_v52  ;;  %3797 = vmatprep.mubr.msk.f32.mxu0 %vm2152_vm3, %v5163_v31 }
  0xb7   : > { %v1998_v59 = vpop.permute.xlu0 %1997  ;;  %4000 = vmatpush1.bf16.msra.mxu1 %v3999_v29  ;;  %4034 = vmatprep.subr.bf16.mxu0 %v6091_v15  ;;  %v2080_v27 = vrot.slane %v6109_v44, 2  ;;  %v4038_v29 = vpack.c.bf16 %v3893_v49, %v3892_v20  ;;  %v2122_v20 = vrot.slane %v4646_v23, 2  ;;  %v2123_v49 = vrot.slane %v4648_v60, 2 }
  0xb8   : > { %v1964_v45 = vpop.permute.xlu1 %1963  ;;  %4001 = vmatprep.subr.bf16.mxu1 %v6091_v15  ;;  %4036 = vmatpush1.bf16.msra.mxu0 %v4035_v39  ;;  %v5231_v5 = vsel %vm2152_vm3, %v4537_v63, %v1998_v59  ;;  %v5236_v39 = vsel %vm2061_vm2, %v2118_v54, %v2120_v13  ;;  %v2082_v63 = vrot.slane %v4730_v17, 2  ;;  %v2083_v59 = vrot.slane %v4732_v62, 2  ;;  %v3840_v54 = vld [vmem:[%s6027_s0 + $0x140] sm:$0xff]  ;;  %v3841_v13 = vld [vmem:[%s6027_s0 + $0x148] sm:$0xff] }
  0xb9   : > { %2447 = vmatmul.mubr.f32.gmra.mrb[10].mxu1 %v5192_v47  ;;  %v5217_v56 = vsel %vm2152_vm3, %v4586_v34, %v1964_v45  ;;  %4037 = vmatprep.subr.bf16.mxu0 %v6091_v15  ;;  %6110 = vst [vmem:[#allocation32_spill] sm:$0xff] %v5231_v5  ;;  %6111 = vst [vmem:[#allocation33_spill] sm:$0xff] %v5236_v39  ;;  %v5241_v44 = vsel %vm2061_vm2, %v2078_v22, %v2080_v27  ;;  %v3896_v27 = vld [vmem:[%s6027_s0 + $0x200] sm:$0xff] }
  0xba   : > { %3814 = vmatprep.mubr.msk.f32.mxu1 %vm2152_vm3, %v5197_v25  ;;  %2367 = vmatmul.mubr.f32.gmra.mrb[10].mxu0 %v5217_v56  ;;  %v6113_v25 = vmax.f32 %v4807_v10, 0.0  ;;  %v3898_v10 = vld [vmem:[%s6027_s0 + $0x210] sm:$0xff] }
  0xbb   : > { %v2000_v34 = vpop.permute.xlu0 %1999  ;;  %3798 = vmatprep.mubr.msk.f32.mxu0 %vm2152_vm3, %v5203_v30  ;;  %4003 = vmatpush1.bf16.msra.mxu1 %v4002_v1  ;;  %v4041_v1 = vpack.c.bf16 %v3895_v3, %v3894_v11  ;;  %v6112_v11 = vmax.f32 %v4720_v42, 0.0  ;;  %v3843_v42 = vld [vmem:[%s6027_s0 + $0x158] sm:$0xff] }
  0xbc   : > { %v1966_v45 = vpop.permute.xlu1 %1965  ;;  %4004 = vmatprep.subr.bf16.mxu1 %v6091_v15  ;;  %4039 = vmatpush1.bf16.msra.mxu0 %v4038_v29  ;;  %v5269_v36 = vsel %vm2152_vm3, %v4539_v2, %v2000_v34  ;;  %v5274_v29 = vsel %vm2061_vm2, %v2122_v20, %v2123_v49  ;;  %v2085_v2 = vrot.slane %v6113_v25, 2  ;;  %v3842_v34 = vld [vmem:[%s6027_s0 + $0x150] sm:$0xff]  ;;  %v4044_v20 = vpack.c.bf16 %v3897_v38, %v3896_v27  ;;  %v3899_v25 = vld [vmem:[%s6027_s0 + $0x218] sm:$0xff] }
  0xbd   : > { %2452 = vmatmul.mubr.f32.gmra.mrb[12].mxu1 %v5231_v5  ;;  %v5255_v22 = vsel %vm2152_vm3, %v4644_v6, %v1966_v45  ;;  %4040 = vmatprep.subr.bf16.mxu0 %v6091_v15  ;;  %v2125_v3 = vrot.slane %v6112_v11, 2  ;;  %v4008_v45 = vpack.c.bf16 %v3841_v13, %v3840_v54  ;;  %v2127_v54 = vrot.slane %v4685_v58, 2 }
  0xbe   : > { %3815 = vmatprep.mubr.msk.f32.mxu1 %vm2152_vm3, %v5236_v39  ;;  %2372 = vmatmul.mubr.f32.gmra.mrb[12].mxu0 %v5255_v22  ;;  %v5279_v39 = vsel %vm2061_vm2, %v2082_v63, %v2083_v59  ;;  %v2128_v13 = vrot.slane %v4693_v33, 2  ;;  %v5317_v38 = vsel %vm2061_vm2, %v2083_v59, %v2085_v2  ;;  %v2087_v59 = vrot.slane %v4785_v19, 2  ;;  %v3901_v2 = vld [vmem:[%s6027_s0 + $0x228] sm:$0xff] }
  0xbf   : > { %v2002_v6 = vpop.permute.xlu0 %2001  ;;  %3799 = vmatprep.mubr.msk.f32.mxu0 %vm2152_vm3, %v5241_v44  ;;  %4006 = vmatpush1.bf16.msra.mxu1 %v4005_v24 }
  0xc0   : > { %v1968_v5 = vpop.permute.xlu1 %1967  ;;  %4007 = vmatprep.subr.bf16.mxu1 %v6091_v15  ;;  %4042 = vmatpush1.bf16.msra.mxu0 %v4041_v1  ;;  %v5307_v63 = vsel %vm2152_vm3, %v4646_v23, %v2002_v6  ;;  %v4011_v1 = vpack.c.bf16 %v3843_v42, %v3842_v34  ;;  %v3844_v23 = vld [vmem:[%s6027_s0 + $0x160] sm:$0xff]  ;;  %v4047_v6 = vpack.c.bf16 %v3899_v25, %v3898_v10  ;;  %v3846_v25 = vld [vmem:[%s6027_s0 + $0x170] sm:$0xff] }
  0xc1   : > { %2457 = vmatmul.mubr.f32.gmra.mrb[14].mxu1 %v5269_v36  ;;  %v5293_v24 = vsel %vm2152_vm3, %v4660_v37, %v1968_v5  ;;  %4043 = vmatprep.subr.bf16.mxu0 %v6091_v15  ;;  %v5312_v5 = vsel %vm2061_vm2, %v2123_v49, %v2125_v3  ;;  %v3845_v49 = vld [vmem:[%s6027_s0 + $0x168] sm:$0xff]  ;;  %v2088_v3 = vrot.slane %v4793_v46, 2  ;;  %v5350_v42 = vsel %vm2061_vm2, %v2127_v54, %v2128_v13 }
  0xc2   : > { %3816 = vmatprep.mubr.msk.f32.mxu1 %vm2152_vm3, %v5274_v29  ;;  %2377 = vmatmul.mubr.f32.gmra.mrb[14].mxu0 %v5293_v24 }
  0xc3   : > { %v2004_v37 = vpop.permute.xlu0 %2003  ;;  %3800 = vmatprep.mubr.msk.f32.mxu0 %vm2152_vm3, %v5279_v39  ;;  %4009 = vmatpush1.bf16.msra.mxu1 %v4008_v45 }
  0xc4   : > { %v1970_v27 = vpop.permute.xlu1 %1969  ;;  %4010 = vmatprep.subr.bf16.mxu1 %v6091_v15  ;;  %4045 = vmatpush1.bf16.msra.mxu0 %v4044_v20  ;;  %v5339_v45 = vsel %vm2152_vm3, %v4648_v60, %v2004_v37  ;;  %v6114_v20 = vmax.f32 %v4791_v9, 0.0  ;;  %v4014_v60 = vpack.c.bf16 %v3845_v49, %v3844_v23  ;;  %v3847_v37 = vld [vmem:[%s6027_s0 + $0x178] sm:$0xff]  ;;  %v6115_v9 = vmax.f32 %v4844_v16, 0.0 }
  0xc5   : > { %2462 = vmatmul.mubr.f32.gmra.mrb[16].mxu1 %v5307_v63  ;;  %v5329_v11 = vsel %vm2152_vm3, %v4730_v17, %v1970_v27  ;;  %4046 = vmatprep.subr.bf16.mxu0 %v6091_v15  ;;  %v3900_v17 = vld [vmem:[%s6027_s0 + $0x220] sm:$0xff]  ;;  %v5363_v27 = vsel %vm2061_vm2, %v2087_v59, %v2088_v3  ;;  %v3902_v59 = vld [vmem:[%s6027_s0 + $0x230] sm:$0xff]  ;;  %v3903_v16 = vld [vmem:[%s6027_s0 + $0x238] sm:$0xff] }
  0xc6   : > { %3817 = vmatprep.mubr.msk.f32.mxu1 %vm2152_vm3, %v5312_v5  ;;  %2382 = vmatmul.mubr.f32.gmra.mrb[16].mxu0 %v5329_v11  ;;  %v2130_v10 = vrot.slane %v6114_v20, 2  ;;  %v4050_v23 = vpack.c.bf16 %v3901_v2, %v3900_v17  ;;  %v2133_v20 = vrot.slane %v4778_v41, 2 }
  0xc7   : > { %v2006_v34 = vpop.permute.xlu0 %2005  ;;  %3801 = vmatprep.mubr.msk.f32.mxu0 %vm2152_vm3, %v5317_v38  ;;  %4012 = vmatpush1.bf16.msra.mxu1 %v4011_v1  ;;  %v2090_v1 = vrot.slane %v6115_v9, 2  ;;  %v4053_v9 = vpack.c.bf16 %v3903_v16, %v3902_v59 }
  0xc8   : > { %4013 = vmatprep.subr.bf16.mxu1 %v6091_v15  ;;  %4048 = vmatpush1.bf16.msra.mxu0 %v4047_v6  ;;  %v1972_v54 = vpop.permute.xlu1 %1971  ;;  %v5376_v6 = vsel %vm2152_vm3, %v4685_v58, %v2006_v34  ;;  %v5386_v2 = vsel %vm2061_vm2, %v2128_v13, %v2130_v10  ;;  %v4017_v58 = vpack.c.bf16 %v3847_v37, %v3846_v25  ;;  %v2092_v13 = vrot.slane %v4855_v26, 2 }
  0xc9   : > { %2467 = vmatmul.mubr.f32.gmra.mrb[18].mxu1 %v5339_v45  ;;  %4049 = vmatprep.subr.bf16.mxu0 %v6091_v15  ;;  %v5372_v49 = vsel %vm2152_vm3, %v4732_v62, %v1972_v54  ;;  %v2132_v62 = vrot.slane %v4770_v14, 2  ;;  %v5395_v54 = vsel %vm2061_vm2, %v2088_v3, %v2090_v1  ;;  %v2093_v10 = vrot.slane %v4857_v32, 2 }
  0xca   : > { %3818 = vmatprep.mubr.msk.f32.mxu1 %vm2152_vm3, %v5350_v42  ;;  %2387 = vmatmul.mubr.f32.gmra.mrb[18].mxu0 %v5372_v49  ;;  %v6116_v1 = vmax.f32 %v4833_v51, 0.0 }
  0xcb   : > { %v2008_v17 = vpop.permute.xlu0 %2007  ;;  %4015 = vmatpush1.bf16.msra.mxu1 %v4014_v60  ;;  %3802 = vmatprep.mubr.msk.f32.mxu0 %vm2152_vm3, %v5363_v27  ;;  %v5412_v37 = vsel %vm2061_vm2, %v2132_v62, %v2133_v20 }
  0xcc   : > { %4016 = vmatprep.subr.bf16.mxu1 %v6091_v15  ;;  %v1974_v34 = vpop.permute.xlu1 %1973  ;;  %4051 = vmatpush1.bf16.msra.mxu0 %v4050_v23  ;;  %v5407_v25 = vsel %vm2152_vm3, %v4693_v33, %v2008_v17  ;;  %v2135_v23 = vrot.slane %v6116_v1, 2  ;;  %v5420_v33 = vsel %vm2061_vm2, %v2092_v13, %v2093_v10 }
  0xcd   : > { %2472 = vmatmul.mubr.f32.gmra.mrb[20].mxu1 %v5376_v6  ;;  %v5403_v60 = vsel %vm2152_vm3, %v4785_v19, %v1974_v34  ;;  %4052 = vmatprep.subr.bf16.mxu0 %v6091_v15  ;;  %v6117_v15 = vmax.f32 %v4902_v40, 0.0  ;;  %v2137_v40 = vrot.slane %v4846_v61, 2 }
  0xce   : > { %3819 = vmatprep.mubr.msk.f32.mxu1 %vm2152_vm3, %v5386_v2  ;;  %2392 = vmatmul.mubr.f32.gmra.mrb[20].mxu0 %v5403_v60  ;;  %v5436_v62 = vsel %vm2061_vm2, %v2133_v20, %v2135_v23  ;;  %v6119_v23 = vmax.f32 %v4892_v4, 0.0 }
  0xcf   : > { %v2010_v3 = vpop.permute.xlu0 %2009  ;;  %4018 = vmatpush1.bf16.msra.mxu1 %v4017_v58  ;;  %3803 = vmatprep.mubr.msk.f32.mxu0 %vm2152_vm3, %v5395_v54  ;;  %v2095_v59 = vrot.slane %v6117_v15, 2  ;;  %v6118_v58 = vld [vmem:[#allocation19_spill] sm:$0xff] }
  0xd0   : > { %v1976_v19 = vpop.permute.xlu1 %1975  ;;  %4054 = vmatpush1.bf16.msra.mxu0 %v4053_v9  ;;  %v5432_v16 = vsel %vm2152_vm3, %v4770_v14, %v2010_v3  ;;  %v2138_v34 = vrot.slane %v6118_v58, 2  ;;  %v2097_v14 = vrot.slane %v4922_v57, 2  ;;  %v2098_v9 = vrot.slane %v4924_v18, 2 }
  0xd1   : > { %2477 = vmatmul.mubr.f32.gmra.mrb[22].mxu1 %v5407_v25  ;;  %v5428_v51 = vsel %vm2152_vm3, %v4793_v46, %v1976_v19  ;;  %v5444_v13 = vsel %vm2061_vm2, %v2093_v10, %v2095_v59  ;;  %v2140_v19 = vrot.slane %v6119_v23, 2 }
  0xd2   : > { %3820 = vmatprep.mubr.msk.f32.mxu1 %vm2152_vm3, %v5412_v37  ;;  %2397 = vmatmul.mubr.f32.gmra.mrb[22].mxu0 %v5428_v51  ;;  %v5460_v10 = vsel %vm2061_vm2, %v2137_v40, %v2138_v34  ;;  %v5468_v15 = vsel %vm2061_vm2, %v2097_v14, %v2098_v9  ;;  %v6120_v40 = vmax.f32 %v4927_v43, 0.0 }
  0xd3   : > { %v2012_v17 = vpop.permute.xlu0 %2011  ;;  %3804 = vmatprep.mubr.msk.f32.mxu0 %vm2152_vm3, %v5420_v33 }
  0xd4   : > { %v1978_v46 = vpop.permute.xlu1 %1977  ;;  %v5456_v3 = vsel %vm2152_vm3, %v4778_v41, %v2012_v17  ;;  %v5482_v17 = vsel %vm2061_vm2, %v2138_v34, %v2140_v19 }
  0xd5   : > { %2482 = vmatmul.mubr.f32.gmra.mrb[24].mxu1 %v5432_v16  ;;  %v5452_v20 = vsel %vm2152_vm3, %v4855_v26, %v1978_v46  ;;  %v2100_v46 = vrot.slane %v6120_v40, 2 }
  0xd6   : > { %3821 = vmatprep.mubr.msk.f32.mxu1 %vm2152_vm3, %v5436_v62  ;;  %2402 = vmatmul.mubr.f32.gmra.mrb[24].mxu0 %v5452_v20 }
  0xd7   : > { %v2014_v1 = vpop.permute.xlu0 %2013  ;;  %3805 = vmatprep.mubr.msk.f32.mxu0 %vm2152_vm3, %v5444_v13  ;;  %v2101_v34 = vsel %vm2061_vm2, %v2098_v9, %v2100_v46 }
  0xd8   : > { %v1980_v26 = vpop.permute.xlu1 %1979  ;;  %v5478_v4 = vsel %vm2152_vm3, %v4846_v61, %v2014_v1 }
  0xd9   : > { %2487 = vmatmul.mubr.f32.gmra.mrb[26].mxu1 %v5456_v3  ;;  %v5474_v41 = vsel %vm2152_vm3, %v4857_v32, %v1980_v26 }
  0xda   : > { %3822 = vmatprep.mubr.msk.f32.mxu1 %vm2152_vm3, %v5460_v10  ;;  %2407 = vmatmul.mubr.f32.gmra.mrb[26].mxu0 %v5474_v41 }
  0xdb   : > { %v2016_v59 = vpop.permute.xlu0 %2015  ;;  %3806 = vmatprep.mubr.msk.f32.mxu0 %vm2152_vm3, %v5468_v15 }
  0xdc   : > { %v5493_v61 = vsel %vm2152_vm3, %v6118_v58, %v2016_v59  ;;  %v1984_v14 = vpop.permute.xlu1 %1983 }
  0xdd   : > { %2492 = vmatmul.mubr.f32.gmra.mrb[28].mxu1 %v5478_v4  ;;  %v2168_v1 = vsel %vm2152_vm3, %v4924_v18, %v1984_v14  ;;  %v6122_v18 = vld [vmem:[#allocation21_spill] sm:$0xff] }
  0xde   : > { %3823 = vmatprep.mubr.msk.f32.mxu1 %vm2152_vm3, %v5482_v17 }
  0xdf   : > { %v1982_v32 = vpop.permute.xlu0 %1981 }
  0xe0   : > { %v2167_v43 = vsel %vm2152_vm3, %v4922_v57, %v1982_v32  ;;  %v6121_v57 = vld [vmem:[#allocation20_spill] sm:$0xff] }
  0xe1   : > { %2412 = vmatmul.mubr.f32.gmra.mrb[28].mxu0 %v2167_v43  ;;  %2497 = vmatmul.mubr.f32.gmra.mrb[30].mxu1 %v5493_v61 }
  0xe2   : > { %3807 = vmatprep.mubr.msk.f32.mxu0 %vm2152_vm3, %v2101_v34  ;;  %3848 = vmatprep.mubr.msk.f32.mxu1 %vm2152_vm3, %v5037_v0  ;;  %v6123_v0 = vld [vmem:[#allocation28_spill] sm:$0xff] }
  0xe5   : > { %2417 = vmatmul.mubr.f32.gmra.mrb[30].mxu0 %v2168_v1  ;;  %2628 = vmatmul.mubr.f32.vlgmr.msra.gmra.mrb[32].mxu1 %v5083_v53  ;;  %v6125_v53 = vld [vmem:[#allocation29_spill] sm:$0xff] }
  0xe6   : > { %3849 = vmatprep.mubr.msk.f32.mxu1 %vm2152_vm3, %v5070_v12  ;;  %3904 = vmatprep.mubr.msk.f32.mxu0 %vm2152_vm3, %v5125_v50  ;;  %v6124_v12 = vld [vmem:[#allocation30_spill] sm:$0xff] }
  0xe9   : > { %2633 = vmatmul.mubr.f32.gmra.mrb[34].mxu1 %v5134_v55  ;;  %2978 = vmatmul.mubr.f32.vlgmr.msra.gmra.mrb[32].mxu0 %v5169_v35  ;;  %v6130_v55 = vld [vmem:[#allocation25_spill] sm:$0xff] }
  0xea   : > { %3850 = vmatprep.mubr.msk.f32.mxu1 %vm2152_vm3, %v5125_v50  ;;  %3905 = vmatprep.mubr.msk.f32.mxu0 %vm2152_vm3, %v5163_v31 }
  0xed   : > { %2638 = vmatmul.mubr.f32.gmra.mrb[36].mxu1 %v5169_v35  ;;  %2983 = vmatmul.mubr.f32.gmra.mrb[34].mxu0 %v5217_v56  ;;  %v6131_v35 = vld [vmem:[#allocation27_spill] sm:$0xff] }
  0xee   : > { %3851 = vmatprep.mubr.msk.f32.mxu1 %vm2152_vm3, %v5163_v31  ;;  %3906 = vmatprep.mubr.msk.f32.mxu0 %vm2152_vm3, %v5203_v30 }
  0xf1   : > { %2643 = vmatmul.mubr.f32.gmra.mrb[38].mxu1 %v5217_v56  ;;  %2988 = vmatmul.mubr.f32.gmra.mrb[36].mxu0 %v5255_v22 }
  0xf2   : > { %3852 = vmatprep.mubr.msk.f32.mxu1 %vm2152_vm3, %v5203_v30  ;;  %3907 = vmatprep.mubr.msk.f32.mxu0 %vm2152_vm3, %v5241_v44 }
  0xf5   : > { %2648 = vmatmul.mubr.f32.gmra.mrb[40].mxu1 %v5255_v22  ;;  %2993 = vmatmul.mubr.f32.gmra.mrb[38].mxu0 %v5293_v24  ;;  %v6133_v22 = vld [vmem:[#allocation22_spill] sm:$0xff] }
  0xf6   : > { %3853 = vmatprep.mubr.msk.f32.mxu1 %vm2152_vm3, %v5241_v44  ;;  %3908 = vmatprep.mubr.msk.f32.mxu0 %vm2152_vm3, %v5279_v39 }
  0xf9   : > { %2653 = vmatmul.mubr.f32.gmra.mrb[42].mxu1 %v5293_v24  ;;  %2998 = vmatmul.mubr.f32.gmra.mrb[40].mxu0 %v5329_v11 }
  0xfa   : > { %3854 = vmatprep.mubr.msk.f32.mxu1 %vm2152_vm3, %v5279_v39  ;;  %3909 = vmatprep.mubr.msk.f32.mxu0 %vm2152_vm3, %v5317_v38  ;;  %v2020_v39 = vpop.permute.xlu1 %2019 }
  0xfd   : > { %2658 = vmatmul.mubr.f32.gmra.mrb[44].mxu1 %v5329_v11  ;;  %3003 = vmatmul.mubr.f32.gmra.mrb[42].mxu0 %v5372_v49  ;;  %v6135_v11 = vld [vmem:[#allocation26_spill] sm:$0xff] }
  0xfe   : > { %3855 = vmatprep.mubr.msk.f32.mxu1 %vm2152_vm3, %v5317_v38  ;;  %3910 = vmatprep.mubr.msk.f32.mxu0 %vm2152_vm3, %v5363_v27 }
 0x101   : > { %2663 = vmatmul.mubr.f32.gmra.mrb[46].mxu1 %v5372_v49  ;;  %3008 = vmatmul.mubr.f32.gmra.mrb[44].mxu0 %v5403_v60  ;;  %v2024_v49 = vpop.permute.xlu1 %2023 }
 0x102   : > { %3856 = vmatprep.mubr.msk.f32.mxu1 %vm2152_vm3, %v5363_v27  ;;  %3911 = vmatprep.mubr.msk.f32.mxu0 %vm2152_vm3, %v5395_v54 }
 0x105   : > { %2668 = vmatmul.mubr.f32.gmra.mrb[48].mxu1 %v5403_v60  ;;  %3013 = vmatmul.mubr.f32.gmra.mrb[46].mxu0 %v5428_v51 }
 0x106   : > { %3857 = vmatprep.mubr.msk.f32.mxu1 %vm2152_vm3, %v5395_v54  ;;  %3912 = vmatprep.mubr.msk.f32.mxu0 %vm2152_vm3, %v5420_v33 }
 0x109   : > { %2673 = vmatmul.mubr.f32.gmra.mrb[50].mxu1 %v5428_v51  ;;  %3018 = vmatmul.mubr.f32.gmra.mrb[48].mxu0 %v5452_v20 }
 0x10a   : > { %3858 = vmatprep.mubr.msk.f32.mxu1 %vm2152_vm3, %v5420_v33  ;;  %3913 = vmatprep.mubr.msk.f32.mxu0 %vm2152_vm3, %v5444_v13 }
 0x10d   : > { %2678 = vmatmul.mubr.f32.gmra.mrb[52].mxu1 %v5452_v20  ;;  %3023 = vmatmul.mubr.f32.gmra.mrb[50].mxu0 %v5474_v41 }
 0x10e   : > { %3859 = vmatprep.mubr.msk.f32.mxu1 %vm2152_vm3, %v5444_v13  ;;  %3914 = vmatprep.mubr.msk.f32.mxu0 %vm2152_vm3, %v5468_v15 }
 0x111   : > { %2683 = vmatmul.mubr.f32.gmra.mrb[54].mxu1 %v5474_v41  ;;  %3028 = vmatmul.mubr.f32.gmra.mrb[52].mxu0 %v2167_v43 }
 0x112   : > { %3860 = vmatprep.mubr.msk.f32.mxu1 %vm2152_vm3, %v5468_v15  ;;  %3915 = vmatprep.mubr.msk.f32.mxu0 %vm2152_vm3, %v2101_v34 }
 0x115   : > { %2688 = vmatmul.mubr.f32.gmra.mrb[56].mxu1 %v2167_v43  ;;  %3033 = vmatmul.mubr.f32.gmra.mrb[54].mxu0 %v2168_v1 }
 0x116   : > { %3861 = vmatprep.mubr.msk.f32.mxu1 %vm2152_vm3, %v2101_v34  ;;  %3916 = vmatprep.mubr.msk.f32.mxu0 %vm2152_vm3, %v6121_v57 }
 0x119   : > { %2693 = vmatmul.mubr.f32.gmra.mrb[58].mxu1 %v2168_v1  ;;  %3038 = vmatmul.mubr.f32.gmra.mrb[56].mxu0 %v5010_v48 }
 0x11a   : > { %3862 = vmatprep.mubr.msk.f32.mxu1 %vm2152_vm3, %v6121_v57  ;;  %3917 = vmatprep.mubr.msk.f32.mxu0 %vm2152_vm3, %v6122_v18 }
 0x11d   : > { %2698 = vmatmul.mubr.f32.gmra.mrb[60].mxu1 %v5010_v48  ;;  %3043 = vmatmul.mubr.f32.gmra.mrb[58].mxu0 %v5064_v8  ;;  %v6126_v48 = vld [vmem:[#allocation31_spill] sm:$0xff] }
 0x11e   : > { %3863 = vmatprep.mubr.msk.f32.mxu1 %vm2152_vm3, %v6122_v18  ;;  %3918 = vmatprep.mubr.msk.f32.mxu0 %vm2152_vm3, %v6123_v0 }
 0x121   : > { %2703 = vmatmul.mubr.f32.gmra.mrb[62].mxu1 %v5064_v8  ;;  %3048 = vmatmul.mubr.f32.gmra.mrb[60].mxu0 %v6124_v12  ;;  %v6127_v8 = vld [vmem:[#allocation32_spill] sm:$0xff] }
 0x122   : > { %3864 = vmatprep.mubr.msk.f32.mxu1 %vm2152_vm3, %v6123_v0  ;;  %3919 = vmatprep.mubr.msk.f32.mxu0 %vm2152_vm3, %v6125_v53 }
 0x125   : > { %2708 = vmatmul.mubr.f32.gmra.mrb[64].mxu1 %v6124_v12  ;;  %3053 = vmatmul.mubr.f32.gmra.mrb[62].mxu0 %v5119_v21 }
 0x126   : > { %3865 = vmatprep.mubr.msk.f32.mxu1 %vm2152_vm3, %v6125_v53  ;;  %3920 = vmatprep.mubr.msk.f32.mxu0 %vm2152_vm3, %v5122_v7 }
 0x129   : > { %2713 = vmatmul.mubr.f32.gmra.mrb[66].mxu1 %v5119_v21  ;;  %3058 = vmatmul.mubr.f32.gmra.mrb[64].mxu0 %v5154_v28  ;;  %v6128_v21 = vld [vmem:[#allocation33_spill] sm:$0xff] }
 0x12a   : > { %3866 = vmatprep.mubr.msk.f32.mxu1 %vm2152_vm3, %v5122_v7  ;;  %3921 = vmatprep.mubr.msk.f32.mxu0 %vm2152_vm3, %v5160_v52  ;;  %v6129_v7 = vld [vmem:[#allocation24_spill] sm:$0xff] }
 0x12b   : > { %v2142_v50 = vrot.slane %v6129_v7, 2 }
 0x12d   : > { %2718 = vmatmul.mubr.f32.gmra.mrb[68].mxu1 %v5154_v28  ;;  %3063 = vmatmul.mubr.f32.gmra.mrb[66].mxu0 %v5192_v47  ;;  %v2143_v28 = vrot.slane %v6130_v55, 2 }
 0x12e   : > { %3867 = vmatprep.mubr.msk.f32.mxu1 %vm2152_vm3, %v5160_v52  ;;  %3922 = vmatprep.mubr.msk.f32.mxu0 %vm2152_vm3, %v6126_v48  ;;  %v2018_v52 = vpop.permute.xlu0 %2017 }
 0x12f   : > { %v2144_v31 = vsel %vm2061_vm2, %v2142_v50, %v2143_v28  ;;  %v2185_v56 = vsel %vm2152_vm3, %v6129_v7, %v2018_v52 }
 0x131   : > { %2723 = vmatmul.mubr.f32.gmra.mrb[70].mxu1 %v5192_v47  ;;  %3068 = vmatmul.mubr.f32.gmra.mrb[68].mxu0 %v6127_v8  ;;  %v6132_v47 = vmax.f32 %v6131_v35, 0.0 }
 0x132   : > { %3868 = vmatprep.mubr.msk.f32.mxu1 %vm2152_vm3, %v6126_v48  ;;  %3923 = vmatprep.mubr.msk.f32.mxu0 %vm2152_vm3, %v6128_v21 }
 0x133   : > { %v2145_v30 = vrot.slane %v6132_v47, 2 }
 0x135   : > { %2728 = vmatmul.mubr.f32.gmra.mrb[72].mxu1 %v6127_v8  ;;  %3073 = vmatmul.mubr.f32.gmra.mrb[70].mxu0 %v5269_v36  ;;  %v2146_v44 = vsel %vm2061_vm2, %v2143_v28, %v2145_v30 }
 0x136   : > { %3869 = vmatprep.mubr.msk.f32.mxu1 %vm2152_vm3, %v6128_v21  ;;  %3924 = vmatprep.mubr.msk.f32.mxu0 %vm2152_vm3, %v5274_v29 }
 0x139   : > { %2733 = vmatmul.mubr.f32.gmra.mrb[74].mxu1 %v5269_v36  ;;  %3078 = vmatmul.mubr.f32.gmra.mrb[72].mxu0 %v5307_v63  ;;  %v2147_v36 = vrot.slane %v6133_v22, 2 }
 0x13a   : > { %3870 = vmatprep.mubr.msk.f32.mxu1 %vm2152_vm3, %v5274_v29  ;;  %3925 = vmatprep.mubr.msk.f32.mxu0 %vm2152_vm3, %v5312_v5  ;;  %v6134_v29 = vld [vmem:[#allocation23_spill] sm:$0xff] }
 0x13b   : > { %v2148_v24 = vrot.slane %v6134_v29, 2 }
 0x13d   : > { %2738 = vmatmul.mubr.f32.gmra.mrb[76].mxu1 %v5307_v63  ;;  %3083 = vmatmul.mubr.f32.gmra.mrb[74].mxu0 %v5339_v45  ;;  %v2186_v63 = vsel %vm2152_vm3, %v6130_v55, %v2020_v39  ;;  %v2149_v38 = vsel %vm2061_vm2, %v2147_v36, %v2148_v24 }
 0x13e   : > { %3871 = vmatprep.mubr.msk.f32.mxu1 %vm2152_vm3, %v5312_v5  ;;  %3926 = vmatprep.mubr.msk.f32.mxu0 %vm2152_vm3, %v5350_v42  ;;  %v2022_v5 = vpop.permute.xlu0 %2021 }
 0x13f   : > { %v2187_v27 = vsel %vm2152_vm3, %v6133_v22, %v2022_v5 }
 0x141   : > { %2743 = vmatmul.mubr.f32.gmra.mrb[78].mxu1 %v5339_v45  ;;  %3088 = vmatmul.mubr.f32.gmra.mrb[76].mxu0 %v5376_v6  ;;  %v6136_v45 = vmax.f32 %v6135_v11, 0.0 }
 0x142   : > { %3872 = vmatprep.mubr.msk.f32.mxu1 %vm2152_vm3, %v5350_v42  ;;  %3927 = vmatprep.mubr.msk.f32.mxu0 %vm2152_vm3, %v5386_v2 }
 0x143   : > { %v2150_v42 = vrot.slane %v6136_v45, 2 }
 0x145   : > { %2748 = vmatmul.mubr.f32.gmra.mrb[80].mxu1 %v5376_v6  ;;  %3093 = vmatmul.mubr.f32.gmra.mrb[78].mxu0 %v5407_v25  ;;  %v2151_v6 = vsel %vm2061_vm2, %v2148_v24, %v2150_v42 }
 0x146   : > { %3873 = vmatprep.mubr.msk.f32.mxu1 %vm2152_vm3, %v5386_v2  ;;  %3928 = vmatprep.mubr.msk.f32.mxu0 %vm2152_vm3, %v5412_v37  ;;  %v2188_v2 = vsel %vm2152_vm3, %v6134_v29, %v2024_v49 }
 0x149   : > { %2753 = vmatmul.mubr.f32.gmra.mrb[82].mxu1 %v5407_v25  ;;  %3098 = vmatmul.mubr.f32.gmra.mrb[80].mxu0 %v5432_v16 }
 0x14a   : > { %3874 = vmatprep.mubr.msk.f32.mxu1 %vm2152_vm3, %v5412_v37  ;;  %3929 = vmatprep.mubr.msk.f32.mxu0 %vm2152_vm3, %v5436_v62 }
 0x14d   : > { %2758 = vmatmul.mubr.f32.gmra.mrb[84].mxu1 %v5432_v16  ;;  %3103 = vmatmul.mubr.f32.gmra.mrb[82].mxu0 %v5456_v3 }
 0x14e   : > { %3875 = vmatprep.mubr.msk.f32.mxu1 %vm2152_vm3, %v5436_v62  ;;  %3930 = vmatprep.mubr.msk.f32.mxu0 %vm2152_vm3, %v5460_v10 }
 0x151   : > { %2763 = vmatmul.mubr.f32.gmra.mrb[86].mxu1 %v5456_v3  ;;  %3108 = vmatmul.mubr.f32.gmra.mrb[84].mxu0 %v5478_v4 }
 0x152   : > { %3876 = vmatprep.mubr.msk.f32.mxu1 %vm2152_vm3, %v5460_v10  ;;  %3931 = vmatprep.mubr.msk.f32.mxu0 %vm2152_vm3, %v5482_v17 }
 0x155   : > { %2768 = vmatmul.mubr.f32.gmra.mrb[88].mxu1 %v5478_v4  ;;  %3113 = vmatmul.mubr.f32.gmra.mrb[86].mxu0 %v5493_v61 }
 0x156   : > { %3877 = vmatprep.mubr.msk.f32.mxu1 %vm2152_vm3, %v5482_v17  ;;  %3932 = vmatprep.mubr.msk.f32.mxu0 %vm2152_vm3, %v2144_v31 }
 0x159   : > { %2773 = vmatmul.mubr.f32.gmra.mrb[90].mxu1 %v5493_v61  ;;  %3118 = vmatmul.mubr.f32.gmra.mrb[88].mxu0 %v2185_v56 }
 0x15a   : > { %3878 = vmatprep.mubr.msk.f32.mxu1 %vm2152_vm3, %v2144_v31  ;;  %3933 = vmatprep.mubr.msk.f32.mxu0 %vm2152_vm3, %v2146_v44 }
 0x15d   : > { %2778 = vmatmul.mubr.f32.gmra.mrb[92].mxu1 %v2185_v56  ;;  %3123 = vmatmul.mubr.f32.gmra.mrb[90].mxu0 %v2186_v63 }
 0x15e   : > { %3879 = vmatprep.mubr.msk.f32.mxu1 %vm2152_vm3, %v2146_v44  ;;  %3934 = vmatprep.mubr.msk.f32.mxu0 %vm2152_vm3, %v2149_v38 }
 0x161   : > { %2783 = vmatmul.mubr.f32.gmra.mrb[94].mxu1 %v2186_v63  ;;  %3128 = vmatmul.mubr.f32.gmra.mrb[92].mxu0 %v2187_v27 }
 0x162   : > { %3935 = vmatprep.mubr.msk.f32.mxu0 %vm2152_vm3, %v2151_v6 }
 0x165   : > { %3133 = vmatmul.mubr.f32.gmra.mrb[94].mxu0 %v2188_v2 }
 0x173   : > { %v2423_v54 = vpop.f32.mrb[0].mxu1 }
 0x174   : > { %2518 = vst.msk [vmem:[#allocation2 + $0x80] sm:$0xff] %vm2152_vm3, %v2423_v54  ;;  %v2425_v60 = vpop.f32.mrb[1].mxu1 }
 0x176   : > { %v2343_v25 = vpop.f32.mrb[0].mxu0 }
 0x177   : > { %2502 = vst.msk [vmem:[#allocation2] sm:$0xff] %vm2152_vm3, %v2343_v25  ;;  %v2345_v37 = vpop.f32.mrb[1].mxu0 }
 0x17a   : > { %v2348_v33 = vpop.f32.mrb[2].mxu0 }
 0x17b   : > { %2503 = vst.msk [vmem:[#allocation2 + $0x8] sm:$0xff] %vm2152_vm3, %v2348_v33  ;;  %v2350_v51 = vpop.f32.mrb[3].mxu0 }
 0x17c   : > { %v2428_v16 = vpop.f32.mrb[2].mxu1 }
 0x17d   : > { %2519 = vst.msk [vmem:[#allocation2 + $0x88] sm:$0xff] %vm2152_vm3, %v2428_v16  ;;  %v2430_v62 = vpop.f32.mrb[3].mxu1 }
 0x17e   : > { %v2353_v58 = vpop.f32.mrb[4].mxu0  ;;  %v2788_v2 = vld [vmem:[#allocation2] sm:$0xff] }
 0x17f   : > { %2504 = vst.msk [vmem:[#allocation2 + $0x10] sm:$0xff] %vm2152_vm3, %v2353_v58  ;;  %v2355_v13 = vpop.f32.mrb[5].mxu0 }
 0x180   : > { %v2433_v9 = vpop.f32.mrb[4].mxu1 }
 0x181   : > { %2520 = vst.msk [vmem:[#allocation2 + $0x90] sm:$0xff] %vm2152_vm3, %v2433_v9  ;;  %v2435_v20 = vpop.f32.mrb[5].mxu1 }
 0x182   : > { %v2789_v51 = vld [vmem:[#allocation2 + $0x8] sm:$0xff] }
 0x184   : > { %v2438_v3 = vpop.f32.mrb[6].mxu1  ;;  %v2358_v10 = vpop.f32.mrb[6].mxu0 }
 0x185   : > { %2521 = vst.msk [vmem:[#allocation2 + $0x98] sm:$0xff] %vm2152_vm3, %v2438_v3  ;;  %v2440_v23 = vpop.f32.mrb[7].mxu1  ;;  %2505 = vst.msk [vmem:[#allocation2 + $0x18] sm:$0xff] %vm2152_vm3, %v2358_v10  ;;  %v2360_v19 = vpop.f32.mrb[7].mxu0 }
 0x186   : > { %v2790_v20 = vld [vmem:[#allocation2 + $0x10] sm:$0xff] }
 0x188   : > { %v2443_v26 = vpop.f32.mrb[8].mxu1  ;;  %v2363_v15 = vpop.f32.mrb[8].mxu0 }
 0x189   : > { %2522 = vst.msk [vmem:[#allocation2 + $0xa0] sm:$0xff] %vm2152_vm3, %v2443_v26  ;;  %v2445_v41 = vpop.f32.mrb[9].mxu1  ;;  %2506 = vst.msk [vmem:[#allocation2 + $0x20] sm:$0xff] %vm2152_vm3, %v2363_v15  ;;  %v2365_v4 = vpop.f32.mrb[9].mxu0 }
 0x18c   : > { %v2448_v59 = vpop.f32.mrb[10].mxu1  ;;  %v2791_v4 = vld [vmem:[#allocation2 + $0x18] sm:$0xff] }
 0x18d   : > { %2523 = vst.msk [vmem:[#allocation2 + $0xa8] sm:$0xff] %vm2152_vm3, %v2448_v59  ;;  %v2450_v17 = vpop.f32.mrb[11].mxu1  ;;  %v2368_v40 = vpop.f32.mrb[10].mxu0 }
 0x18e   : > { %2507 = vst.msk [vmem:[#allocation2 + $0x28] sm:$0xff] %vm2152_vm3, %v2368_v40  ;;  %v2370_v46 = vpop.f32.mrb[11].mxu0 }
 0x190   : > { %v2453_v61 = vpop.f32.mrb[12].mxu1 }
 0x191   : > { %2524 = vst.msk [vmem:[#allocation2 + $0xb0] sm:$0xff] %vm2152_vm3, %v2453_v61  ;;  %v2455_v32 = vpop.f32.mrb[13].mxu1  ;;  %v2373_v14 = vpop.f32.mrb[12].mxu0 }
 0x192   : > { %2508 = vst.msk [vmem:[#allocation2 + $0x30] sm:$0xff] %vm2152_vm3, %v2373_v14  ;;  %v2375_v34 = vpop.f32.mrb[13].mxu0 }
 0x193   : > { %v2792_v34 = vld [vmem:[#allocation2 + $0x20] sm:$0xff] }
 0x194   : > { %v2458_v43 = vpop.f32.mrb[14].mxu1 }
 0x195   : > { %2525 = vst.msk [vmem:[#allocation2 + $0xb8] sm:$0xff] %vm2152_vm3, %v2458_v43  ;;  %v2460_v1 = vpop.f32.mrb[15].mxu1  ;;  %v2378_v57 = vpop.f32.mrb[14].mxu0 }
 0x196   : > { %2509 = vst.msk [vmem:[#allocation2 + $0x38] sm:$0xff] %vm2152_vm3, %v2378_v57  ;;  %v2380_v18 = vpop.f32.mrb[15].mxu0 }
 0x198   : > { %v2463_v0 = vpop.f32.mrb[16].mxu1 }
 0x199   : > { %2526 = vst.msk [vmem:[#allocation2 + $0xc0] sm:$0xff] %vm2152_vm3, %v2463_v0  ;;  %v2465_v12 = vpop.f32.mrb[17].mxu1  ;;  %v2383_v53 = vpop.f32.mrb[16].mxu0  ;;  %v5737_v0 = vld [vmem:[%s6028_s1] ss:$0 sm:$0xff] }
 0x19a   : > { %2510 = vst.msk [vmem:[#allocation2 + $0x40] sm:$0xff] %vm2152_vm3, %v2383_v53  ;;  %v2385_v48 = vpop.f32.mrb[17].mxu0 }
 0x19c   : > { %v2468_v8 = vpop.f32.mrb[18].mxu1 }
 0x19d   : > { %2527 = vst.msk [vmem:[#allocation2 + $0xc8] sm:$0xff] %vm2152_vm3, %v2468_v8  ;;  %v2470_v21 = vpop.f32.mrb[19].mxu1  ;;  %v2388_v7 = vpop.f32.mrb[18].mxu0 }
 0x19e   : > { %2511 = vst.msk [vmem:[#allocation2 + $0x48] sm:$0xff] %vm2152_vm3, %v2388_v7  ;;  %v2390_v50 = vpop.f32.mrb[19].mxu0  ;;  %v2793_v21 = vld [vmem:[#allocation2 + $0x28] sm:$0xff] }
 0x1a0   : > { %v2473_v55 = vpop.f32.mrb[20].mxu1 }
 0x1a1   : > { %2528 = vst.msk [vmem:[#allocation2 + $0xd0] sm:$0xff] %vm2152_vm3, %v2473_v55  ;;  %v2475_v28 = vpop.f32.mrb[21].mxu1  ;;  %v2393_v52 = vpop.f32.mrb[20].mxu0 }
 0x1a2   : > { %2512 = vst.msk [vmem:[#allocation2 + $0x50] sm:$0xff] %vm2152_vm3, %v2393_v52  ;;  %v2395_v31 = vpop.f32.mrb[21].mxu0 }
 0x1a4   : > { %v2478_v35 = vpop.f32.mrb[22].mxu1 }
 0x1a5   : > { %2529 = vst.msk [vmem:[#allocation2 + $0xd8] sm:$0xff] %vm2152_vm3, %v2478_v35  ;;  %v2480_v47 = vpop.f32.mrb[23].mxu1  ;;  %v2398_v30 = vpop.f32.mrb[22].mxu0 }
 0x1a6   : > { %2513 = vst.msk [vmem:[#allocation2 + $0x58] sm:$0xff] %vm2152_vm3, %v2398_v30  ;;  %v2400_v56 = vpop.f32.mrb[23].mxu0 }
 0x1a7   : > { %v2794_v56 = vld [vmem:[#allocation2 + $0x30] sm:$0xff] }
 0x1a8   : > { %v2483_v39 = vpop.f32.mrb[24].mxu1 }
 0x1a9   : > { %2530 = vst.msk [vmem:[#allocation2 + $0xe0] sm:$0xff] %vm2152_vm3, %v2483_v39  ;;  %v2485_v44 = vpop.f32.mrb[25].mxu1  ;;  %v2403_v22 = vpop.f32.mrb[24].mxu0 }
 0x1aa   : > { %2514 = vst.msk [vmem:[#allocation2 + $0x60] sm:$0xff] %vm2152_vm3, %v2403_v22  ;;  %v2405_v36 = vpop.f32.mrb[25].mxu0 }
 0x1ac   : > { %v2488_v29 = vpop.f32.mrb[26].mxu1 }
 0x1ad   : > { %2531 = vst.msk [vmem:[#allocation2 + $0xe8] sm:$0xff] %vm2152_vm3, %v2488_v29  ;;  %v2490_v24 = vpop.f32.mrb[27].mxu1  ;;  %v2408_v63 = vpop.f32.mrb[26].mxu0 }
 0x1ae   : > { %2515 = vst.msk [vmem:[#allocation2 + $0x68] sm:$0xff] %vm2152_vm3, %v2408_v63  ;;  %v2410_v5 = vpop.f32.mrb[27].mxu0 }
 0x1b0   : > { %v2493_v38 = vpop.f32.mrb[28].mxu1 }
 0x1b1   : > { %2532 = vst.msk [vmem:[#allocation2 + $0xf0] sm:$0xff] %vm2152_vm3, %v2493_v38  ;;  %v2495_v11 = vpop.f32.mrb[29].mxu1 }
 0x1b2   : > { %v2795_v11 = vld [vmem:[#allocation2 + $0x38] sm:$0xff] }
 0x1b4   : > { %v2498_v45 = vpop.f32.mrb[30].mxu1  ;;  %v2413_v42 = vpop.f32.mrb[28].mxu0 }
 0x1b5   : > { %2533 = vst.msk [vmem:[#allocation2 + $0xf8] sm:$0xff] %vm2152_vm3, %v2498_v45  ;;  %v2500_v27 = vpop.f32.mrb[31].mxu1  ;;  %2516 = vst.msk [vmem:[#allocation2 + $0x70] sm:$0xff] %vm2152_vm3, %v2413_v42  ;;  %v2415_v49 = vpop.f32.mrb[29].mxu0 }
 0x1b8   : > { %v2629_v6 = vpop.f32.mrb[32].mxu1  ;;  %v2418_v54 = vpop.f32.mrb[30].mxu0 }
 0x1b9   : > { %v2820_v60 = vadd.f32 %v2788_v2, %v2629_v6  ;;  %v2631_v25 = vpop.f32.mrb[33].mxu1  ;;  %2517 = vst.msk [vmem:[#allocation2 + $0x78] sm:$0xff] %vm2152_vm3, %v2418_v54  ;;  %v2420_v37 = vpop.f32.mrb[31].mxu0 }
 0x1bb   : > { %2852 = vst.msk [vmem:[#allocation2] sm:$0xff] %vm2152_vm3, %v2820_v60 }
 0x1bc   : > { %v2634_v33 = vpop.f32.mrb[34].mxu1  ;;  %v2979_v16 = vpop.f32.mrb[32].mxu0 }
 0x1bd   : > { %v2821_v62 = vadd.f32 %v2789_v51, %v2634_v33  ;;  %v2636_v58 = vpop.f32.mrb[35].mxu1  ;;  %v2981_v13 = vpop.f32.mrb[33].mxu0  ;;  %v2796_v33 = vld [vmem:[#allocation2 + $0x40] sm:$0xff] }
 0x1bf   : > { %2853 = vst.msk [vmem:[#allocation2 + $0x8] sm:$0xff] %vm2152_vm3, %v2821_v62 }
 0x1c0   : > { %v2639_v9 = vpop.f32.mrb[36].mxu1  ;;  %v2984_v3 = vpop.f32.mrb[34].mxu0 }
 0x1c1   : > { %v2822_v10 = vadd.f32 %v2790_v20, %v2639_v9  ;;  %v2641_v23 = vpop.f32.mrb[37].mxu1  ;;  %v2986_v19 = vpop.f32.mrb[35].mxu0 }
 0x1c2   : > { %v3138_v26 = vld [vmem:[#allocation2] sm:$0xff]  ;;  %v2797_v19 = vld [vmem:[#allocation2 + $0x48] sm:$0xff] }
 0x1c3   : > { %v3170_v15 = vadd.f32 %v3138_v26, %v2979_v16  ;;  %2854 = vst.msk [vmem:[#allocation2 + $0x10] sm:$0xff] %vm2152_vm3, %v2822_v10 }
 0x1c4   : > { %v2644_v41 = vpop.f32.mrb[38].mxu1  ;;  %v2989_v59 = vpop.f32.mrb[36].mxu0 }
 0x1c5   : > { %3202 = vst.msk [vmem:[#allocation2] sm:$0xff] %vm2152_vm3, %v3170_v15  ;;  %v2823_v17 = vadd.f32 %v2791_v4, %v2644_v41  ;;  %v2646_v40 = vpop.f32.mrb[39].mxu1  ;;  %v2991_v46 = vpop.f32.mrb[37].mxu0 }
 0x1c6   : > { %v3139_v61 = vld [vmem:[#allocation2 + $0x8] sm:$0xff] }
 0x1c7   : > { %v3171_v32 = vadd.f32 %v3139_v61, %v2984_v3  ;;  %2855 = vst.msk [vmem:[#allocation2 + $0x18] sm:$0xff] %vm2152_vm3, %v2823_v17 }
 0x1c8   : > { %v2649_v14 = vpop.f32.mrb[40].mxu1  ;;  %v2994_v43 = vpop.f32.mrb[38].mxu0 }
 0x1c9   : > { %3203 = vst.msk [vmem:[#allocation2 + $0x8] sm:$0xff] %vm2152_vm3, %v3171_v32  ;;  %v2824_v1 = vadd.f32 %v2792_v34, %v2649_v14  ;;  %v2651_v57 = vpop.f32.mrb[41].mxu1  ;;  %v2996_v18 = vpop.f32.mrb[39].mxu0 }
 0x1ca   : > { %v3140_v12 = vld [vmem:[#allocation2 + $0x10] sm:$0xff] }
 0x1cb   : > { %v3172_v53 = vadd.f32 %v3140_v12, %v2989_v59  ;;  %2856 = vst.msk [vmem:[#allocation2 + $0x20] sm:$0xff] %vm2152_vm3, %v2824_v1 }
 0x1cc   : > { %v3234_v48 = vld [vmem:[#allocation2] sm:$0xff]  ;;  %v2654_v8 = vpop.f32.mrb[42].mxu1  ;;  %v2999_v7 = vpop.f32.mrb[40].mxu0 }
 0x1cd   : > { %v3273_v50 = vadd.f32 %v5737_v0, %v3234_v48  ;;  %3204 = vst.msk [vmem:[#allocation2 + $0x10] sm:$0xff] %vm2152_vm3, %v3172_v53  ;;  %v2825_v55 = vadd.f32 %v2793_v21, %v2654_v8  ;;  %v2656_v28 = vpop.f32.mrb[43].mxu1  ;;  %v3001_v52 = vpop.f32.mrb[41].mxu0 }
 0x1ce   : > { %v3141_v31 = vld [vmem:[#allocation2 + $0x18] sm:$0xff] }
 0x1cf   : > { %3305 = vst.msk [vmem:[#allocation2] sm:$0xff] %vm2152_vm3, %v3273_v50  ;;  %v3173_v35 = vadd.f32 %v3141_v31, %v2994_v43  ;;  %2857 = vst.msk [vmem:[#allocation2 + $0x28] sm:$0xff] %vm2152_vm3, %v2825_v55  ;;  %v2798_v43 = vld [vmem:[#allocation2 + $0x50] sm:$0xff]  ;;  %v2799_v31 = vld [vmem:[#allocation2 + $0x58] sm:$0xff] }
 0x1d0   : > { %v3235_v47 = vld [vmem:[#allocation2 + $0x8] sm:$0xff]  ;;  %v2659_v30 = vpop.f32.mrb[44].mxu1  ;;  %v3004_v39 = vpop.f32.mrb[42].mxu0 }
 0x1d1   : > { %v3274_v44 = vadd.f32 %v5737_v0, %v3235_v47  ;;  %3205 = vst.msk [vmem:[#allocation2 + $0x18] sm:$0xff] %vm2152_vm3, %v3173_v35  ;;  %v2826_v22 = vadd.f32 %v2794_v56, %v2659_v30  ;;  %v2661_v36 = vpop.f32.mrb[45].mxu1  ;;  %v3006_v29 = vpop.f32.mrb[43].mxu0 }
 0x1d2   : > { %v3142_v24 = vld [vmem:[#allocation2 + $0x20] sm:$0xff] }
 0x1d3   : > { %3306 = vst.msk [vmem:[#allocation2 + $0x8] sm:$0xff] %vm2152_vm3, %v3274_v44  ;;  %v3174_v63 = vadd.f32 %v3142_v24, %v2999_v7  ;;  %2858 = vst.msk [vmem:[#allocation2 + $0x30] sm:$0xff] %vm2152_vm3, %v2826_v22 }
 0x1d4   : > { %v3236_v5 = vld [vmem:[#allocation2 + $0x10] sm:$0xff]  ;;  %v2664_v38 = vpop.f32.mrb[46].mxu1  ;;  %v3009_v45 = vpop.f32.mrb[44].mxu0 }
 0x1d5   : > { %v3275_v42 = vadd.f32 %v5737_v0, %v3236_v5  ;;  %3206 = vst.msk [vmem:[#allocation2 + $0x20] sm:$0xff] %vm2152_vm3, %v3174_v63  ;;  %v2827_v27 = vadd.f32 %v2795_v11, %v2664_v38  ;;  %v2666_v49 = vpop.f32.mrb[47].mxu1  ;;  %v3011_v6 = vpop.f32.mrb[45].mxu0 }
 0x1d6   : > { %v3337_v2 = vld [vmem:[#allocation2] sm:$0xff]  ;;  %v3143_v54 = vld [vmem:[#allocation2 + $0x28] sm:$0xff] }
 0x1d7   : > { %3369 = vst.msk [vmem:[%s5753_s19] sm:$0xff] %vm2152_vm3, %v3337_v2  ;;  %3307 = vst.msk [vmem:[#allocation2 + $0x10] sm:$0xff] %vm2152_vm3, %v3275_v42  ;;  %v3175_v60 = vadd.f32 %v3143_v54, %v3004_v39  ;;  %v2800_v42 = vld [vmem:[#allocation2 + $0x60] sm:$0xff] }
 0x1d8   : > { %2859 = vst.msk [vmem:[#allocation2 + $0x38] sm:$0xff] %vm2152_vm3, %v2827_v27  ;;  %v3237_v25 = vld [vmem:[#allocation2 + $0x18] sm:$0xff]  ;;  %v2669_v37 = vpop.f32.mrb[48].mxu1  ;;  %v3014_v51 = vpop.f32.mrb[46].mxu0 }
 0x1d9   : > { %v3276_v16 = vadd.f32 %v5737_v0, %v3237_v25  ;;  %3207 = vst.msk [vmem:[#allocation2 + $0x28] sm:$0xff] %vm2152_vm3, %v3175_v60  ;;  %v2828_v62 = vadd.f32 %v2796_v33, %v2669_v37  ;;  %v2671_v58 = vpop.f32.mrb[49].mxu1  ;;  %v3016_v13 = vpop.f32.mrb[47].mxu0 }
 0x1da   : > { %v3338_v9 = vld [vmem:[#allocation2 + $0x8] sm:$0xff]  ;;  %v3144_v20 = vld [vmem:[#allocation2 + $0x30] sm:$0xff] }
 0x1db   : > { %3370 = vst.msk [vmem:[%s5753_s19 + $0x8] sm:$0xff] %vm2152_vm3, %v3338_v9  ;;  %3308 = vst.msk [vmem:[#allocation2 + $0x18] sm:$0xff] %vm2152_vm3, %v3276_v16  ;;  %v3176_v10 = vadd.f32 %v3144_v20, %v3009_v45  ;;  %v3401_v15 = vld [vmem:[#allocation2] ss:$2 sm:$0xff]  ;;  %v3433_v40 = vld [vmem:[#allocation2 + $0x1] ss:$2 sm:$0xff] }
 0x1dc   : > { %2860 = vst.msk [vmem:[#allocation2 + $0x40] sm:$0xff] %vm2152_vm3, %v2828_v62  ;;  %v3238_v3 = vld [vmem:[#allocation2 + $0x20] sm:$0xff]  ;;  %v2674_v23 = vpop.f32.mrb[50].mxu1  ;;  %v3019_v26 = vpop.f32.mrb[48].mxu0  ;;  %v3464_v57 = vmax.f32 %v3401_v15, %v3433_v40 }
 0x1dd   : > { %v3277_v41 = vadd.f32 %v5737_v0, %v3238_v3  ;;  %v2829_v4 = vadd.f32 %v2797_v19, %v2674_v23  ;;  %v2676_v59 = vpop.f32.mrb[51].mxu1  ;;  %v3021_v17 = vpop.f32.mrb[49].mxu0  ;;  %3208 = vst.msk [vmem:[#allocation2 + $0x30] sm:$0xff] %vm2152_vm3, %v3176_v10 }
 0x1de   : > { %v3339_v46 = vld [vmem:[#allocation2 + $0x10] sm:$0xff]  ;;  %v3480_v47 = vsel %vm2152_vm3, %v3464_v57, -inf }
 0x1df   : > { %v3145_v61 = vld [vmem:[#allocation2 + $0x38] sm:$0xff]  ;;  %3371 = vst.msk [vmem:[%s5753_s19 + $0x10] sm:$0xff] %vm2152_vm3, %v3339_v46  ;;  %3309 = vst.msk [vmem:[#allocation2 + $0x20] sm:$0xff] %vm2152_vm3, %v3277_v41 }
 0x1e0   : > { %v3177_v32 = vadd.f32 %v3145_v61, %v3014_v51  ;;  %2861 = vst.msk [vmem:[#allocation2 + $0x48] sm:$0xff] %vm2152_vm3, %v2829_v4  ;;  %v3239_v14 = vld [vmem:[#allocation2 + $0x28] sm:$0xff]  ;;  %v2679_v34 = vpop.f32.mrb[52].mxu1  ;;  %v3024_v1 = vpop.f32.mrb[50].mxu0  ;;  %v2802_v4 = vld [vmem:[#allocation2 + $0x70] sm:$0xff] }
 0x1e1   : > { %v3278_v18 = vadd.f32 %v5737_v0, %v3239_v14  ;;  %v2830_v12 = vadd.f32 %v2798_v43, %v2679_v34  ;;  %v2681_v53 = vpop.f32.mrb[53].mxu1  ;;  %v3026_v48 = vpop.f32.mrb[51].mxu0  ;;  %v2801_v51 = vld [vmem:[#allocation2 + $0x68] sm:$0xff] }
 0x1e2   : > { %3209 = vst.msk [vmem:[#allocation2 + $0x38] sm:$0xff] %vm2152_vm3, %v3177_v32  ;;  %v3340_v8 = vld [vmem:[#allocation2 + $0x18] sm:$0xff] }
 0x1e3   : > { %v3403_v21 = vld [vmem:[#allocation2 + $0x10] ss:$2 sm:$0xff]  ;;  %v3435_v7 = vld [vmem:[#allocation2 + $0x11] ss:$2 sm:$0xff]  ;;  %3372 = vst.msk [vmem:[%s5753_s19 + $0x18] sm:$0xff] %vm2152_vm3, %v3340_v8  ;;  %3310 = vst.msk [vmem:[#allocation2 + $0x28] sm:$0xff] %vm2152_vm3, %v3278_v18 }
 0x1e4   : > { %v3465_v50 = vmax.f32 %v3403_v21, %v3435_v7  ;;  %v3146_v55 = vld [vmem:[#allocation2 + $0x40] sm:$0xff]  ;;  %2862 = vst.msk [vmem:[#allocation2 + $0x50] sm:$0xff] %vm2152_vm3, %v2830_v12  ;;  %v2684_v52 = vpop.f32.mrb[54].mxu1  ;;  %v3029_v35 = vpop.f32.mrb[52].mxu0  ;;  %v3240_v56 = vld [vmem:[#allocation2 + $0x30] sm:$0xff]  ;;  %v2803_v53 = vld [vmem:[#allocation2 + $0x78] sm:$0xff] }
 0x1e5   : > { %v3178_v28 = vadd.f32 %v3146_v55, %v3019_v26  ;;  %v2831_v39 = vadd.f32 %v2799_v31, %v2684_v52  ;;  %v2686_v44 = vpop.f32.mrb[55].mxu1  ;;  %v3031_v22 = vpop.f32.mrb[53].mxu0  ;;  %v3279_v24 = vadd.f32 %v5737_v0, %v3240_v56 }
 0x1e6   : > { %v3481_v30 = vsel %vm2152_vm3, %v3465_v50, -inf  ;;  %v3341_v29 = vld [vmem:[#allocation2 + $0x20] sm:$0xff] }
 0x1e7   : > { %v3482_v36 = vmax.f32 %v3480_v47, %v3481_v30  ;;  %3210 = vst.msk [vmem:[#allocation2 + $0x40] sm:$0xff] %vm2152_vm3, %v3178_v28  ;;  %v3147_v63 = vld [vmem:[#allocation2 + $0x48] sm:$0xff]  ;;  %3373 = vst.msk [vmem:[%s5753_s19 + $0x20] sm:$0xff] %vm2152_vm3, %v3341_v29  ;;  %v2804_v22 = vld [vmem:[#allocation2 + $0x80] sm:$0xff] }
 0x1e8   : > { %v3179_v5 = vadd.f32 %v3147_v63, %v3024_v1  ;;  %2863 = vst.msk [vmem:[#allocation2 + $0x58] sm:$0xff] %vm2152_vm3, %v2831_v39  ;;  %3311 = vst.msk [vmem:[#allocation2 + $0x30] sm:$0xff] %vm2152_vm3, %v3279_v24  ;;  %v2689_v45 = vpop.f32.mrb[56].mxu1  ;;  %v3034_v27 = vpop.f32.mrb[54].mxu0 }
 0x1e9   : > { %v3504_v38 = vmax.f32 %v3482_v36, 0.0  ;;  %v3241_v11 = vld [vmem:[#allocation2 + $0x38] sm:$0xff]  ;;  %v2832_v6 = vadd.f32 %v2800_v42, %v2689_v45  ;;  %v2691_v2 = vpop.f32.mrb[57].mxu1  ;;  %v3036_v54 = vpop.f32.mrb[55].mxu0 }
 0x1ea   : > { %v3280_v49 = vadd.f32 %v5737_v0, %v3241_v11  ;;  %3211 = vst.msk [vmem:[#allocation2 + $0x48] sm:$0xff] %vm2152_vm3, %v3179_v5  ;;  %v3342_v60 = vld [vmem:[#allocation2 + $0x28] sm:$0xff] }
 0x1eb   : > { %3512 = vst.msk [vmem:[%s5785_s28] sm:$0xff] %vm2152_vm3, %v3504_v38  ;;  %3374 = vst.msk [vmem:[%s5753_s19 + $0x28] sm:$0xff] %vm2152_vm3, %v3342_v60  ;;  %v3148_v25 = vld [vmem:[#allocation2 + $0x50] sm:$0xff]  ;;  %v3405_v20 = vld [vmem:[#allocation2 + $0x20] ss:$2 sm:$0xff] }
 0x1ec   : > { %3312 = vst.msk [vmem:[#allocation2 + $0x38] sm:$0xff] %vm2152_vm3, %v3280_v49  ;;  %2864 = vst.msk [vmem:[#allocation2 + $0x60] sm:$0xff] %vm2152_vm3, %v2832_v6  ;;  %v3180_v37 = vadd.f32 %v3148_v25, %v3029_v35  ;;  %v2694_v33 = vpop.f32.mrb[58].mxu1  ;;  %v3039_v16 = vpop.f32.mrb[56].mxu0  ;;  %v3437_v3 = vld [vmem:[#allocation2 + $0x21] ss:$2 sm:$0xff] }
 0x1ed   : > { %v2833_v58 = vadd.f32 %v2801_v51, %v2694_v33  ;;  %v2696_v13 = vpop.f32.mrb[59].mxu1  ;;  %v3041_v9 = vpop.f32.mrb[57].mxu0  ;;  %v3466_v17 = vmax.f32 %v3405_v20, %v3437_v3 }
 0x1ee   : > { %v3242_v62 = vld [vmem:[#allocation2 + $0x40] sm:$0xff]  ;;  %3212 = vst.msk [vmem:[#allocation2 + $0x50] sm:$0xff] %vm2152_vm3, %v3180_v37  ;;  %v2806_v9 = vld [vmem:[#allocation2 + $0x90] sm:$0xff] }
 0x1ef   : > { %v3281_v10 = vadd.f32 %v5737_v0, %v3242_v62  ;;  %v3149_v23 = vld [vmem:[#allocation2 + $0x58] sm:$0xff]  ;;  %v3343_v19 = vld [vmem:[#allocation2 + $0x30] sm:$0xff]  ;;  %2865 = vst.msk [vmem:[#allocation2 + $0x68] sm:$0xff] %vm2152_vm3, %v2833_v58  ;;  %v3483_v8 = vsel %vm2152_vm3, %v3466_v17, -inf }
 0x1f0   : > { %v3181_v26 = vadd.f32 %v3149_v23, %v3034_v27  ;;  %3375 = vst.msk [vmem:[%s5753_s19 + $0x30] sm:$0xff] %vm2152_vm3, %v3343_v19  ;;  %v2699_v41 = vpop.f32.mrb[60].mxu1  ;;  %v3044_v59 = vpop.f32.mrb[58].mxu0  ;;  %v2805_v27 = vld [vmem:[#allocation2 + $0x88] sm:$0xff] }
 0x1f1   : > { %3313 = vst.msk [vmem:[#allocation2 + $0x40] sm:$0xff] %vm2152_vm3, %v3281_v10  ;;  %v3243_v15 = vld [vmem:[#allocation2 + $0x48] sm:$0xff]  ;;  %v2834_v46 = vadd.f32 %v2802_v4, %v2699_v41  ;;  %v2701_v61 = vpop.f32.mrb[61].mxu1  ;;  %v3046_v32 = vpop.f32.mrb[59].mxu0 }
 0x1f2   : > { %v3282_v40 = vadd.f32 %v5737_v0, %v3243_v15  ;;  %3213 = vst.msk [vmem:[#allocation2 + $0x58] sm:$0xff] %vm2152_vm3, %v3181_v26  ;;  %v2807_v61 = vld [vmem:[#allocation2 + $0x98] sm:$0xff] }
 0x1f3   : > { %v3344_v14 = vld [vmem:[#allocation2 + $0x38] sm:$0xff]  ;;  %v3150_v57 = vld [vmem:[#allocation2 + $0x60] sm:$0xff]  ;;  %2866 = vst.msk [vmem:[#allocation2 + $0x70] sm:$0xff] %vm2152_vm3, %v2834_v46 }
 0x1f4   : > { %v3407_v34 = vld [vmem:[#allocation2 + $0x30] ss:$2 sm:$0xff]  ;;  %v3439_v43 = vld [vmem:[#allocation2 + $0x31] ss:$2 sm:$0xff]  ;;  %3376 = vst.msk [vmem:[%s5753_s19 + $0x38] sm:$0xff] %vm2152_vm3, %v3344_v14  ;;  %3314 = vst.msk [vmem:[#allocation2 + $0x48] sm:$0xff] %vm2152_vm3, %v3282_v40  ;;  %v3182_v18 = vadd.f32 %v3150_v57, %v3039_v16 }
 0x1f5   : > { %v3467_v1 = vmax.f32 %v3407_v34, %v3439_v43  ;;  %v2704_v12 = vpop.f32.mrb[62].mxu1  ;;  %v3049_v48 = vpop.f32.mrb[60].mxu0  ;;  %v3244_v7 = vld [vmem:[#allocation2 + $0x50] sm:$0xff] }
 0x1f6   : > { %v2835_v50 = vadd.f32 %v2803_v53, %v2704_v12  ;;  %v2706_v55 = vpop.f32.mrb[63].mxu1  ;;  %v3051_v28 = vpop.f32.mrb[61].mxu0  ;;  %v3283_v31 = vadd.f32 %v5737_v0, %v3244_v7  ;;  %3214 = vst.msk [vmem:[#allocation2 + $0x60] sm:$0xff] %vm2152_vm3, %v3182_v18  ;;  %v3151_v35 = vld [vmem:[#allocation2 + $0x68] sm:$0xff] }
 0x1f7   : > { %v3484_v21 = vsel %vm2152_vm3, %v3467_v1, -inf  ;;  %v3183_v30 = vadd.f32 %v3151_v35, %v3044_v59  ;;  %v2808_v28 = vld [vmem:[#allocation2 + $0xa0] sm:$0xff] }
 0x1f8   : > { %v3485_v52 = vmax.f32 %v3483_v8, %v3484_v21  ;;  %v3345_v47 = vld [vmem:[#allocation2 + $0x40] sm:$0xff]  ;;  %2867 = vst.msk [vmem:[#allocation2 + $0x78] sm:$0xff] %vm2152_vm3, %v2835_v50  ;;  %3315 = vst.msk [vmem:[#allocation2 + $0x50] sm:$0xff] %vm2152_vm3, %v3283_v31  ;;  %v2709_v44 = vpop.f32.mrb[64].mxu1  ;;  %v3054_v36 = vpop.f32.mrb[62].mxu0 }
 0x1f9   : > { %3377 = vst.msk [vmem:[%s5753_s19 + $0x40] sm:$0xff] %vm2152_vm3, %v3345_v47  ;;  %v3245_v39 = vld [vmem:[#allocation2 + $0x58] sm:$0xff]  ;;  %3215 = vst.msk [vmem:[#allocation2 + $0x68] sm:$0xff] %vm2152_vm3, %v3183_v30  ;;  %v2836_v24 = vadd.f32 %v2804_v22, %v2709_v44  ;;  %v2711_v63 = vpop.f32.mrb[65].mxu1  ;;  %v3056_v5 = vpop.f32.mrb[63].mxu0 }
 0x1fa   : > { %v3505_v56 = vmax.f32 %v3485_v52, 0.0  ;;  %v3284_v29 = vadd.f32 %v5737_v0, %v3245_v39  ;;  %v3152_v11 = vld [vmem:[#allocation2 + $0x70] sm:$0xff] }
 0x1fb   : > { %v3346_v38 = vld [vmem:[#allocation2 + $0x48] sm:$0xff]  ;;  %2868 = vst.msk [vmem:[#allocation2 + $0x80] sm:$0xff] %vm2152_vm3, %v2836_v24  ;;  %v3184_v45 = vadd.f32 %v3152_v11, %v3049_v48 }
 0x1fc   : > { %3513 = vst.msk [vmem:[%s5785_s28 + $0x8] sm:$0xff] %vm2152_vm3, %v3505_v56  ;;  %3378 = vst.msk [vmem:[%s5753_s19 + $0x48] sm:$0xff] %vm2152_vm3, %v3346_v38  ;;  %v2714_v42 = vpop.f32.mrb[66].mxu1  ;;  %v3059_v49 = vpop.f32.mrb[64].mxu0  ;;  %v3409_v25 = vld [vmem:[#allocation2 + $0x40] ss:$2 sm:$0xff] }
 0x1fd   : > { %3316 = vst.msk [vmem:[#allocation2 + $0x58] sm:$0xff] %vm2152_vm3, %v3284_v29  ;;  %v3246_v6 = vld [vmem:[#allocation2 + $0x60] sm:$0xff]  ;;  %v2837_v2 = vadd.f32 %v2805_v27, %v2714_v42  ;;  %v2716_v54 = vpop.f32.mrb[67].mxu1  ;;  %v3061_v60 = vpop.f32.mrb[65].mxu0  ;;  %3216 = vst.msk [vmem:[#allocation2 + $0x70] sm:$0xff] %vm2152_vm3, %v3184_v45 }
 0x1fe   : > { %v3441_v37 = vld [vmem:[#allocation2 + $0x41] ss:$2 sm:$0xff]  ;;  %v3285_v33 = vadd.f32 %v5737_v0, %v3246_v6  ;;  %v2810_v60 = vld [vmem:[#allocation2 + $0xb0] sm:$0xff] }
 0x1ff   : > { %v3153_v51 = vld [vmem:[#allocation2 + $0x78] sm:$0xff]  ;;  %v3347_v16 = vld [vmem:[#allocation2 + $0x50] sm:$0xff]  ;;  %2869 = vst.msk [vmem:[#allocation2 + $0x88] sm:$0xff] %vm2152_vm3, %v2837_v2  ;;  %v3468_v3 = vmax.f32 %v3409_v25, %v3441_v37 }
 0x200   : > { %v3185_v62 = vadd.f32 %v3153_v51, %v3054_v36  ;;  %3379 = vst.msk [vmem:[%s5753_s19 + $0x50] sm:$0xff] %vm2152_vm3, %v3347_v16  ;;  %3317 = vst.msk [vmem:[#allocation2 + $0x60] sm:$0xff] %vm2152_vm3, %v3285_v33  ;;  %v3247_v58 = vld [vmem:[#allocation2 + $0x68] sm:$0xff]  ;;  %v2719_v13 = vpop.f32.mrb[68].mxu1  ;;  %v3064_v20 = vpop.f32.mrb[66].mxu0 }
 0x201   : > { %v3286_v10 = vadd.f32 %v5737_v0, %v3247_v58  ;;  %v2838_v23 = vadd.f32 %v2806_v9, %v2719_v13  ;;  %v2721_v19 = vpop.f32.mrb[69].mxu1  ;;  %v3066_v26 = vpop.f32.mrb[67].mxu0  ;;  %v3486_v14 = vsel %vm2152_vm3, %v3468_v3, -inf  ;;  %v2809_v36 = vld [vmem:[#allocation2 + $0xa8] sm:$0xff] }
 0x202   : > { %3217 = vst.msk [vmem:[#allocation2 + $0x78] sm:$0xff] %vm2152_vm3, %v3185_v62  ;;  %v3154_v17 = vld [vmem:[#allocation2 + $0x80] sm:$0xff]  ;;  %v2811_v19 = vld [vmem:[#allocation2 + $0xb8] sm:$0xff] }
 0x203   : > { %3318 = vst.msk [vmem:[#allocation2 + $0x68] sm:$0xff] %vm2152_vm3, %v3286_v10  ;;  %2870 = vst.msk [vmem:[#allocation2 + $0x90] sm:$0xff] %vm2152_vm3, %v2838_v23  ;;  %v3186_v40 = vadd.f32 %v3154_v17, %v3059_v49 }
 0x204   : > { %v3348_v15 = vld [vmem:[#allocation2 + $0x58] sm:$0xff]  ;;  %v2724_v46 = vpop.f32.mrb[70].mxu1  ;;  %v3069_v32 = vpop.f32.mrb[68].mxu0  ;;  %v3248_v43 = vld [vmem:[#allocation2 + $0x70] sm:$0xff] }
 0x205   : > { %v3411_v41 = vld [vmem:[#allocation2 + $0x50] ss:$2 sm:$0xff]  ;;  %v3443_v4 = vld [vmem:[#allocation2 + $0x51] ss:$2 sm:$0xff]  ;;  %3380 = vst.msk [vmem:[%s5753_s19 + $0x58] sm:$0xff] %vm2152_vm3, %v3348_v15  ;;  %v2839_v1 = vadd.f32 %v2807_v61, %v2724_v46  ;;  %v2726_v57 = vpop.f32.mrb[71].mxu1  ;;  %v3287_v53 = vadd.f32 %v5737_v0, %v3248_v43 }
 0x206   : > { %v3469_v59 = vmax.f32 %v3411_v41, %v3443_v4  ;;  %v3071_v18 = vpop.f32.mrb[69].mxu0  ;;  %3218 = vst.msk [vmem:[#allocation2 + $0x80] sm:$0xff] %vm2152_vm3, %v3186_v40  ;;  %v3155_v48 = vld [vmem:[#allocation2 + $0x88] sm:$0xff] }
 0x207   : > { %v3349_v8 = vld [vmem:[#allocation2 + $0x60] sm:$0xff]  ;;  %v3187_v21 = vadd.f32 %v3155_v48, %v3064_v20  ;;  %2871 = vst.msk [vmem:[#allocation2 + $0x98] sm:$0xff] %vm2152_vm3, %v2839_v1  ;;  %3319 = vst.msk [vmem:[#allocation2 + $0x70] sm:$0xff] %vm2152_vm3, %v3287_v53 }
 0x208   : > { %v3487_v34 = vsel %vm2152_vm3, %v3469_v59, -inf  ;;  %3381 = vst.msk [vmem:[%s5753_s19 + $0x60] sm:$0xff] %vm2152_vm3, %v3349_v8  ;;  %v2729_v55 = vpop.f32.mrb[72].mxu1  ;;  %v3074_v52 = vpop.f32.mrb[70].mxu0  ;;  %v2812_v18 = vld [vmem:[#allocation2 + $0xc0] sm:$0xff] }
 0x209   : > { %v3488_v12 = vmax.f32 %v3486_v14, %v3487_v34  ;;  %v3249_v50 = vld [vmem:[#allocation2 + $0x78] sm:$0xff]  ;;  %3219 = vst.msk [vmem:[#allocation2 + $0x88] sm:$0xff] %vm2152_vm3, %v3187_v21  ;;  %v2840_v35 = vadd.f32 %v2808_v28, %v2729_v55  ;;  %v2731_v47 = vpop.f32.mrb[73].mxu1  ;;  %v3076_v30 = vpop.f32.mrb[71].mxu0 }
 0x20a   : > { %v3288_v31 = vadd.f32 %v5737_v0, %v3249_v50  ;;  %v3350_v56 = vld [vmem:[#allocation2 + $0x68] sm:$0xff]  ;;  %v3156_v39 = vld [vmem:[#allocation2 + $0x90] sm:$0xff] }
 0x20b   : > { %v3506_v7 = vmax.f32 %v3488_v12, 0.0  ;;  %3382 = vst.msk [vmem:[%s5753_s19 + $0x68] sm:$0xff] %vm2152_vm3, %v3350_v56  ;;  %2872 = vst.msk [vmem:[#allocation2 + $0xa0] sm:$0xff] %vm2152_vm3, %v2840_v35  ;;  %v3188_v44 = vadd.f32 %v3156_v39, %v3069_v32  ;;  %v3413_v11 = vld [vmem:[#allocation2 + $0x60] ss:$2 sm:$0xff] }
 0x20c   : > { %3320 = vst.msk [vmem:[#allocation2 + $0x78] sm:$0xff] %vm2152_vm3, %v3288_v31  ;;  %v2734_v22 = vpop.f32.mrb[74].mxu1  ;;  %v3079_v29 = vpop.f32.mrb[72].mxu0  ;;  %v3445_v45 = vld [vmem:[#allocation2 + $0x61] ss:$2 sm:$0xff] }
 0x20d   : > { %3514 = vst.msk [vmem:[%s5785_s28 + $0x10] sm:$0xff] %vm2152_vm3, %v3506_v7  ;;  %v3250_v24 = vld [vmem:[#allocation2 + $0x80] sm:$0xff]  ;;  %v2841_v63 = vadd.f32 %v2809_v36, %v2734_v22  ;;  %v2736_v5 = vpop.f32.mrb[75].mxu1  ;;  %v3081_v38 = vpop.f32.mrb[73].mxu0  ;;  %3220 = vst.msk [vmem:[#allocation2 + $0x90] sm:$0xff] %vm2152_vm3, %v3188_v44  ;;  %v3470_v37 = vmax.f32 %v3413_v11, %v3445_v45 }
 0x20e   : > { %v3289_v42 = vadd.f32 %v5737_v0, %v3250_v24  ;;  %v3157_v27 = vld [vmem:[#allocation2 + $0x98] sm:$0xff]  ;;  %v3351_v49 = vld [vmem:[#allocation2 + $0x70] sm:$0xff] }
 0x20f   : > { %v3189_v6 = vadd.f32 %v3157_v27, %v3074_v52  ;;  %2873 = vst.msk [vmem:[#allocation2 + $0xa8] sm:$0xff] %vm2152_vm3, %v2841_v63  ;;  %3383 = vst.msk [vmem:[%s5753_s19 + $0x70] sm:$0xff] %vm2152_vm3, %v3351_v49  ;;  %v3489_v15 = vsel %vm2152_vm3, %v3470_v37, -inf  ;;  %v2813_v52 = vld [vmem:[#allocation2 + $0xc8] sm:$0xff]  ;;  %v2814_v38 = vld [vmem:[#allocation2 + $0xd0] sm:$0xff] }
 0x210   : > { %3321 = vst.msk [vmem:[#allocation2 + $0x80] sm:$0xff] %vm2152_vm3, %v3289_v42  ;;  %v3251_v2 = vld [vmem:[#allocation2 + $0x88] sm:$0xff]  ;;  %v2739_v54 = vpop.f32.mrb[76].mxu1  ;;  %v3084_v25 = vpop.f32.mrb[74].mxu0 }
 0x211   : > { %v3290_v33 = vadd.f32 %v5737_v0, %v3251_v2  ;;  %3221 = vst.msk [vmem:[#allocation2 + $0x98] sm:$0xff] %vm2152_vm3, %v3189_v6  ;;  %v2842_v51 = vadd.f32 %v2810_v60, %v2739_v54  ;;  %v2741_v16 = vpop.f32.mrb[77].mxu1  ;;  %v3086_v62 = vpop.f32.mrb[75].mxu0 }
 0x212   : > { %v3158_v3 = vld [vmem:[#allocation2 + $0xa0] sm:$0xff]  ;;  %v2815_v16 = vld [vmem:[#allocation2 + $0xd8] sm:$0xff] }
 0x213   : > { %v3352_v58 = vld [vmem:[#allocation2 + $0x78] sm:$0xff]  ;;  %3322 = vst.msk [vmem:[#allocation2 + $0x88] sm:$0xff] %vm2152_vm3, %v3290_v33  ;;  %2874 = vst.msk [vmem:[#allocation2 + $0xb0] sm:$0xff] %vm2152_vm3, %v2842_v51  ;;  %v3190_v10 = vadd.f32 %v3158_v3, %v3079_v29 }
 0x214   : > { %v3415_v13 = vld [vmem:[#allocation2 + $0x70] ss:$2 sm:$0xff]  ;;  %v3447_v9 = vld [vmem:[#allocation2 + $0x71] ss:$2 sm:$0xff]  ;;  %3384 = vst.msk [vmem:[%s5753_s19 + $0x78] sm:$0xff] %vm2152_vm3, %v3352_v58  ;;  %v2744_v23 = vpop.f32.mrb[78].mxu1 }
 0x215   : > { %v3471_v20 = vmax.f32 %v3415_v13, %v3447_v9  ;;  %v3089_v26 = vpop.f32.mrb[76].mxu0  ;;  %v3252_v4 = vld [vmem:[#allocation2 + $0x90] sm:$0xff]  ;;  %v2843_v59 = vadd.f32 %v2811_v19, %v2744_v23  ;;  %v2746_v17 = vpop.f32.mrb[79].mxu1  ;;  %3222 = vst.msk [vmem:[#allocation2 + $0xa0] sm:$0xff] %vm2152_vm3, %v3190_v10 }
 0x216   : > { %v3091_v40 = vpop.f32.mrb[77].mxu0  ;;  %v3291_v61 = vadd.f32 %v5737_v0, %v3252_v4  ;;  %v3159_v32 = vld [vmem:[#allocation2 + $0xa8] sm:$0xff] }
 0x217   : > { %v3490_v41 = vsel %vm2152_vm3, %v3471_v20, -inf  ;;  %v3353_v14 = vld [vmem:[#allocation2 + $0x80] sm:$0xff]  ;;  %v3191_v34 = vadd.f32 %v3159_v32, %v3084_v25  ;;  %2875 = vst.msk [vmem:[#allocation2 + $0xb8] sm:$0xff] %vm2152_vm3, %v2843_v59 }
 0x218   : > { %v3491_v46 = vmax.f32 %v3489_v15, %v3490_v41  ;;  %3385 = vst.msk [vmem:[%s5753_s19 + $0x80] sm:$0xff] %vm2152_vm3, %v3353_v14  ;;  %3323 = vst.msk [vmem:[#allocation2 + $0x90] sm:$0xff] %vm2152_vm3, %v3291_v61  ;;  %v3253_v1 = vld [vmem:[#allocation2 + $0x98] sm:$0xff]  ;;  %v2749_v57 = vpop.f32.mrb[80].mxu1  ;;  %v3094_v12 = vpop.f32.mrb[78].mxu0  ;;  %v2816_v40 = vld [vmem:[#allocation2 + $0xe0] sm:$0xff] }
 0x219   : > { %v3292_v53 = vadd.f32 %v5737_v0, %v3253_v1  ;;  %3223 = vst.msk [vmem:[#allocation2 + $0xa8] sm:$0xff] %vm2152_vm3, %v3191_v34  ;;  %v2844_v48 = vadd.f32 %v2812_v18, %v2749_v57  ;;  %v2751_v8 = vpop.f32.mrb[81].mxu1  ;;  %v3096_v21 = vpop.f32.mrb[79].mxu0 }
 0x21a   : > { %v3507_v43 = vmax.f32 %v3491_v46, 0.0  ;;  %v3354_v7 = vld [vmem:[#allocation2 + $0x88] sm:$0xff]  ;;  %v3160_v50 = vld [vmem:[#allocation2 + $0xb0] sm:$0xff] }
 0x21b   : > { %3386 = vst.msk [vmem:[%s5753_s19 + $0x88] sm:$0xff] %vm2152_vm3, %v3354_v7  ;;  %3324 = vst.msk [vmem:[#allocation2 + $0x98] sm:$0xff] %vm2152_vm3, %v3292_v53  ;;  %v3192_v55 = vadd.f32 %v3160_v50, %v3089_v26  ;;  %v3417_v39 = vld [vmem:[#allocation2 + $0x80] ss:$2 sm:$0xff]  ;;  %v3449_v44 = vld [vmem:[#allocation2 + $0x81] ss:$2 sm:$0xff] }
 0x21c   : > { %3515 = vst.msk [vmem:[%s5785_s28 + $0x18] sm:$0xff] %vm2152_vm3, %v3507_v43  ;;  %2876 = vst.msk [vmem:[#allocation2 + $0xc0] sm:$0xff] %vm2152_vm3, %v2844_v48  ;;  %v2754_v28 = vpop.f32.mrb[82].mxu1  ;;  %v3099_v31 = vpop.f32.mrb[80].mxu0  ;;  %v3254_v35 = vld [vmem:[#allocation2 + $0xa0] sm:$0xff]  ;;  %v3472_v45 = vmax.f32 %v3417_v39, %v3449_v44 }
 0x21d   : > { %v2845_v47 = vadd.f32 %v2813_v52, %v2754_v28  ;;  %v2756_v30 = vpop.f32.mrb[83].mxu1  ;;  %v3101_v56 = vpop.f32.mrb[81].mxu0  ;;  %v3293_v22 = vadd.f32 %v5737_v0, %v3254_v35  ;;  %3224 = vst.msk [vmem:[#allocation2 + $0xb0] sm:$0xff] %vm2152_vm3, %v3192_v55 }
 0x21e   : > { %v3161_v36 = vld [vmem:[#allocation2 + $0xb8] sm:$0xff]  ;;  %v3492_v58 = vsel %vm2152_vm3, %v3472_v45, -inf  ;;  %v2818_v56 = vld [vmem:[#allocation2 + $0xf0] sm:$0xff] }
 0x21f   : > { %v3355_v29 = vld [vmem:[#allocation2 + $0x90] sm:$0xff]  ;;  %v3193_v24 = vadd.f32 %v3161_v36, %v3094_v12  ;;  %2877 = vst.msk [vmem:[#allocation2 + $0xc8] sm:$0xff] %vm2152_vm3, %v2845_v47  ;;  %3325 = vst.msk [vmem:[#allocation2 + $0xa0] sm:$0xff] %vm2152_vm3, %v3293_v22  ;;  %v2817_v12 = vld [vmem:[#allocation2 + $0xe8] sm:$0xff] }
 0x220   : > { %3387 = vst.msk [vmem:[%s5753_s19 + $0x90] sm:$0xff] %vm2152_vm3, %v3355_v29  ;;  %v3255_v63 = vld [vmem:[#allocation2 + $0xa8] sm:$0xff]  ;;  %v2759_v5 = vpop.f32.mrb[84].mxu1  ;;  %v3104_v11 = vpop.f32.mrb[82].mxu0 }
 0x221   : > { %v3294_v42 = vadd.f32 %v5737_v0, %v3255_v63  ;;  %3225 = vst.msk [vmem:[#allocation2 + $0xb8] sm:$0xff] %vm2152_vm3, %v3193_v24  ;;  %v2846_v27 = vadd.f32 %v2814_v38, %v2759_v5  ;;  %v2761_v49 = vpop.f32.mrb[85].mxu1  ;;  %v3106_v6 = vpop.f32.mrb[83].mxu0 }
 0x222   : > { %v3356_v2 = vld [vmem:[#allocation2 + $0x98] sm:$0xff] }
 0x223   : > { %v3419_v54 = vld [vmem:[#allocation2 + $0x90] ss:$2 sm:$0xff]  ;;  %v3451_v60 = vld [vmem:[#allocation2 + $0x91] ss:$2 sm:$0xff]  ;;  %3388 = vst.msk [vmem:[%s5753_s19 + $0x98] sm:$0xff] %vm2152_vm3, %v3356_v2  ;;  %3326 = vst.msk [vmem:[#allocation2 + $0xa8] sm:$0xff] %vm2152_vm3, %v3294_v42 }
 0x224   : > { %v3473_v25 = vmax.f32 %v3419_v54, %v3451_v60  ;;  %v3162_v37 = vld [vmem:[#allocation2 + $0xc0] sm:$0xff]  ;;  %2878 = vst.msk [vmem:[#allocation2 + $0xd0] sm:$0xff] %vm2152_vm3, %v2846_v27  ;;  %v2764_v51 = vpop.f32.mrb[86].mxu1  ;;  %v3109_v62 = vpop.f32.mrb[84].mxu0  ;;  %v3256_v9 = vld [vmem:[#allocation2 + $0xb0] sm:$0xff]  ;;  %v2819_v49 = vld [vmem:[#allocation2 + $0xf8] sm:$0xff] }
 0x225   : > { %v3194_v33 = vadd.f32 %v3162_v37, %v3099_v31  ;;  %v2847_v20 = vadd.f32 %v2815_v16, %v2764_v51  ;;  %v2766_v3 = vpop.f32.mrb[87].mxu1  ;;  %v3111_v10 = vpop.f32.mrb[85].mxu0  ;;  %v3295_v19 = vadd.f32 %v5737_v0, %v3256_v9 }
 0x226   : > { %v3493_v13 = vsel %vm2152_vm3, %v3473_v25, -inf  ;;  %v3163_v26 = vld [vmem:[#allocation2 + $0xc8] sm:$0xff]  ;;  %v3357_v15 = vld [vmem:[#allocation2 + $0xa0] sm:$0xff] }
 0x227   : > { %v3494_v23 = vmax.f32 %v3492_v58, %v3493_v13  ;;  %3226 = vst.msk [vmem:[#allocation2 + $0xc0] sm:$0xff] %vm2152_vm3, %v3194_v33  ;;  %v3195_v41 = vadd.f32 %v3163_v26, %v3104_v11  ;;  %2879 = vst.msk [vmem:[#allocation2 + $0xd8] sm:$0xff] %vm2152_vm3, %v2847_v20 }
 0x228   : > { %3389 = vst.msk [vmem:[%s5753_s19 + $0xa0] sm:$0xff] %vm2152_vm3, %v3357_v15  ;;  %3327 = vst.msk [vmem:[#allocation2 + $0xb0] sm:$0xff] %vm2152_vm3, %v3295_v19  ;;  %v3257_v59 = vld [vmem:[#allocation2 + $0xb8] sm:$0xff]  ;;  %v2769_v17 = vpop.f32.mrb[88].mxu1  ;;  %v3114_v46 = vpop.f32.mrb[86].mxu0 }
 0x229   : > { %v3508_v4 = vmax.f32 %v3494_v23, 0.0  ;;  %v3296_v61 = vadd.f32 %v5737_v0, %v3257_v59  ;;  %3227 = vst.msk [vmem:[#allocation2 + $0xc8] sm:$0xff] %vm2152_vm3, %v3195_v41  ;;  %v2848_v32 = vadd.f32 %v2816_v40, %v2769_v17  ;;  %v2771_v14 = vpop.f32.mrb[89].mxu1  ;;  %v3116_v34 = vpop.f32.mrb[87].mxu0 }
 0x22a   : > { %v3358_v43 = vld [vmem:[#allocation2 + $0xa8] sm:$0xff] }
 0x22b   : > { %3516 = vst.msk [vmem:[%s5785_s28 + $0x20] sm:$0xff] %vm2152_vm3, %v3508_v4  ;;  %3390 = vst.msk [vmem:[%s5753_s19 + $0xa8] sm:$0xff] %vm2152_vm3, %v3358_v43  ;;  %v3164_v1 = vld [vmem:[#allocation2 + $0xd0] sm:$0xff]  ;;  %v3421_v50 = vld [vmem:[#allocation2 + $0xa0] ss:$2 sm:$0xff] }
 0x22c   : > { %3328 = vst.msk [vmem:[#allocation2 + $0xb8] sm:$0xff] %vm2152_vm3, %v3296_v61  ;;  %2880 = vst.msk [vmem:[#allocation2 + $0xe0] sm:$0xff] %vm2152_vm3, %v2848_v32  ;;  %v3196_v57 = vadd.f32 %v3164_v1, %v3109_v62  ;;  %v2774_v18 = vpop.f32.mrb[90].mxu1  ;;  %v3119_v53 = vpop.f32.mrb[88].mxu0  ;;  %v3453_v55 = vld [vmem:[#allocation2 + $0xa1] ss:$2 sm:$0xff] }
 0x22d   : > { %v2849_v8 = vadd.f32 %v2817_v12, %v2774_v18  ;;  %v2776_v21 = vpop.f32.mrb[91].mxu1  ;;  %v3121_v7 = vpop.f32.mrb[89].mxu0  ;;  %v3474_v44 = vmax.f32 %v3421_v50, %v3453_v55 }
 0x22e   : > { %v3258_v48 = vld [vmem:[#allocation2 + $0xc0] sm:$0xff]  ;;  %3228 = vst.msk [vmem:[#allocation2 + $0xd0] sm:$0xff] %vm2152_vm3, %v3196_v57  ;;  %v3165_v52 = vld [vmem:[#allocation2 + $0xd8] sm:$0xff] }
 0x22f   : > { %v3297_v28 = vadd.f32 %v5737_v0, %v3258_v48  ;;  %v3359_v31 = vld [vmem:[#allocation2 + $0xb0] sm:$0xff]  ;;  %v3197_v35 = vadd.f32 %v3165_v52, %v3114_v46  ;;  %2881 = vst.msk [vmem:[#allocation2 + $0xe8] sm:$0xff] %vm2152_vm3, %v2849_v8  ;;  %v3495_v2 = vsel %vm2152_vm3, %v3474_v44, -inf }
 0x230   : > { %3391 = vst.msk [vmem:[%s5753_s19 + $0xb0] sm:$0xff] %vm2152_vm3, %v3359_v31  ;;  %v3259_v47 = vld [vmem:[#allocation2 + $0xc8] sm:$0xff]  ;;  %v2779_v30 = vpop.f32.mrb[92].mxu1  ;;  %v3124_v39 = vpop.f32.mrb[90].mxu0 }
 0x231   : > { %3329 = vst.msk [vmem:[#allocation2 + $0xc0] sm:$0xff] %vm2152_vm3, %v3297_v28  ;;  %v3298_v22 = vadd.f32 %v5737_v0, %v3259_v47  ;;  %3229 = vst.msk [vmem:[#allocation2 + $0xd8] sm:$0xff] %vm2152_vm3, %v3197_v35  ;;  %v2850_v36 = vadd.f32 %v2818_v56, %v2779_v30  ;;  %v2781_v29 = vpop.f32.mrb[93].mxu1  ;;  %v3126_v24 = vpop.f32.mrb[91].mxu0  ;;  %v4138_v28 = vld [vmem:[%s6028_s1] ss:$0 sm:$0xff] }
 0x233   : > { %v3360_v63 = vld [vmem:[#allocation2 + $0xb8] sm:$0xff]  ;;  %3330 = vst.msk [vmem:[#allocation2 + $0xc8] sm:$0xff] %vm2152_vm3, %v3298_v22  ;;  %v3166_v45 = vld [vmem:[#allocation2 + $0xe0] sm:$0xff]  ;;  %2882 = vst.msk [vmem:[#allocation2 + $0xf0] sm:$0xff] %vm2152_vm3, %v2850_v36 }
 0x234   : > { %v3423_v5 = vld [vmem:[#allocation2 + $0xb0] ss:$2 sm:$0xff]  ;;  %v3455_v38 = vld [vmem:[#allocation2 + $0xb1] ss:$2 sm:$0xff]  ;;  %3392 = vst.msk [vmem:[%s5753_s19 + $0xb8] sm:$0xff] %vm2152_vm3, %v3360_v63  ;;  %v3198_v42 = vadd.f32 %v3166_v45, %v3119_v53  ;;  %v2784_v27 = vpop.f32.mrb[94].mxu1 }
 0x235   : > { %v3475_v11 = vmax.f32 %v3423_v5, %v3455_v38  ;;  %v3129_v6 = vpop.f32.mrb[92].mxu0  ;;  %v3260_v60 = vld [vmem:[#allocation2 + $0xd0] sm:$0xff]  ;;  %v2851_v25 = vadd.f32 %v2819_v49, %v2784_v27  ;;  %v2786_v37 = vpop.f32.mrb[95].mxu1 }
 0x236   : > { %v3131_v33 = vpop.f32.mrb[93].mxu0  ;;  %v3299_v16 = vadd.f32 %v5737_v0, %v3260_v60  ;;  %3230 = vst.msk [vmem:[#allocation2 + $0xe0] sm:$0xff] %vm2152_vm3, %v3198_v42  ;;  %v3167_v62 = vld [vmem:[#allocation2 + $0xe8] sm:$0xff] }
 0x237   : > { %v3496_v54 = vsel %vm2152_vm3, %v3475_v11, -inf  ;;  %v3199_v13 = vadd.f32 %v3167_v62, %v3124_v39  ;;  %2883 = vst.msk [vmem:[#allocation2 + $0xf8] sm:$0xff] %vm2152_vm3, %v2851_v25 }
 0x238   : > { %v3497_v51 = vmax.f32 %v3495_v2, %v3496_v54  ;;  %v3361_v58 = vld [vmem:[#allocation2 + $0xc0] sm:$0xff]  ;;  %3331 = vst.msk [vmem:[#allocation2 + $0xd0] sm:$0xff] %vm2152_vm3, %v3299_v16  ;;  %v3261_v20 = vld [vmem:[#allocation2 + $0xd8] sm:$0xff]  ;;  %v3134_v3 = vpop.f32.mrb[94].mxu0 }
 0x239   : > { %3393 = vst.msk [vmem:[%s5753_s19 + $0xc0] sm:$0xff] %vm2152_vm3, %v3361_v58  ;;  %v3300_v10 = vadd.f32 %v5737_v0, %v3261_v20  ;;  %3231 = vst.msk [vmem:[#allocation2 + $0xe8] sm:$0xff] %vm2152_vm3, %v3199_v13  ;;  %v3136_v23 = vpop.f32.mrb[95].mxu0 }
 0x23a   : > { %v3509_v9 = vmax.f32 %v3497_v51, 0.0  ;;  %v3362_v19 = vld [vmem:[#allocation2 + $0xc8] sm:$0xff]  ;;  %v3168_v26 = vld [vmem:[#allocation2 + $0xf0] sm:$0xff] }
 0x23b   : > { %3394 = vst.msk [vmem:[%s5753_s19 + $0xc8] sm:$0xff] %vm2152_vm3, %v3362_v19  ;;  %3332 = vst.msk [vmem:[#allocation2 + $0xd8] sm:$0xff] %vm2152_vm3, %v3300_v10  ;;  %v3200_v15 = vadd.f32 %v3168_v26, %v3129_v6  ;;  %v3425_v4 = vld [vmem:[#allocation2 + $0xc0] ss:$2 sm:$0xff]  ;;  %v3457_v59 = vld [vmem:[#allocation2 + $0xc1] ss:$2 sm:$0xff] }
 0x23c   : > { %3517 = vst.msk [vmem:[%s5785_s28 + $0x28] sm:$0xff] %vm2152_vm3, %v3509_v9  ;;  %v3476_v14 = vmax.f32 %v3425_v4, %v3457_v59 }
 0x23d   : > { %v3262_v41 = vld [vmem:[#allocation2 + $0xe0] sm:$0xff]  ;;  %3232 = vst.msk [vmem:[#allocation2 + $0xf0] sm:$0xff] %vm2152_vm3, %v3200_v15 }
 0x23e   : > { %v3301_v17 = vadd.f32 %v5737_v0, %v3262_v41  ;;  %v3169_v40 = vld [vmem:[#allocation2 + $0xf8] sm:$0xff]  ;;  %v3498_v12 = vsel %vm2152_vm3, %v3476_v14, -inf }
 0x23f   : > { %v3363_v46 = vld [vmem:[#allocation2 + $0xd0] sm:$0xff]  ;;  %v3201_v61 = vadd.f32 %v3169_v40, %v3134_v3 }
 0x240   : > { %3395 = vst.msk [vmem:[%s5753_s19 + $0xd0] sm:$0xff] %vm2152_vm3, %v3363_v46  ;;  %3333 = vst.msk [vmem:[#allocation2 + $0xe0] sm:$0xff] %vm2152_vm3, %v3301_v17  ;;  %v3263_v32 = vld [vmem:[#allocation2 + $0xe8] sm:$0xff] }
 0x241   : > { %v3302_v34 = vadd.f32 %v5737_v0, %v3263_v32  ;;  %3233 = vst.msk [vmem:[#allocation2 + $0xf8] sm:$0xff] %vm2152_vm3, %v3201_v61 }
 0x242   : > { %v3364_v43 = vld [vmem:[#allocation2 + $0xd8] sm:$0xff] }
 0x243   : > { %v3427_v1 = vld [vmem:[#allocation2 + $0xd0] ss:$2 sm:$0xff]  ;;  %v3459_v57 = vld [vmem:[#allocation2 + $0xd1] ss:$2 sm:$0xff]  ;;  %3396 = vst.msk [vmem:[%s5753_s19 + $0xd8] sm:$0xff] %vm2152_vm3, %v3364_v43  ;;  %3334 = vst.msk [vmem:[#allocation2 + $0xe8] sm:$0xff] %vm2152_vm3, %v3302_v34 }
 0x244   : > { %v3477_v18 = vmax.f32 %v3427_v1, %v3459_v57  ;;  %v3264_v48 = vld [vmem:[#allocation2 + $0xf0] sm:$0xff] }
 0x245   : > { %v3303_v21 = vadd.f32 %v5737_v0, %v3264_v48 }
 0x246   : > { %v3499_v53 = vsel %vm2152_vm3, %v3477_v18, -inf }
 0x247   : > { %v3500_v8 = vmax.f32 %v3498_v12, %v3499_v53  ;;  %v3365_v7 = vld [vmem:[#allocation2 + $0xe0] sm:$0xff]  ;;  %3335 = vst.msk [vmem:[#allocation2 + $0xf0] sm:$0xff] %vm2152_vm3, %v3303_v21 }
 0x248   : > { %3397 = vst.msk [vmem:[%s5753_s19 + $0xe0] sm:$0xff] %vm2152_vm3, %v3365_v7  ;;  %v3265_v55 = vld [vmem:[#allocation2 + $0xf8] sm:$0xff] }
 0x249   : > { %v3510_v50 = vmax.f32 %v3500_v8, 0.0  ;;  %v3304_v52 = vadd.f32 %v4138_v28, %v3265_v55 }
 0x24a   : > { %v3366_v31 = vld [vmem:[#allocation2 + $0xe8] sm:$0xff] }
 0x24b   : > { %3518 = vst.msk [vmem:[%s5785_s28 + $0x30] sm:$0xff] %vm2152_vm3, %v3510_v50  ;;  %3398 = vst.msk [vmem:[%s5753_s19 + $0xe8] sm:$0xff] %vm2152_vm3, %v3366_v31  ;;  %v3429_v0 = vld [vmem:[#allocation2 + $0xe0] ss:$2 sm:$0xff]  ;;  %v3461_v35 = vld [vmem:[#allocation2 + $0xe1] ss:$2 sm:$0xff] }
 0x24c   : > { %3336 = vst.msk [vmem:[#allocation2 + $0xf8] sm:$0xff] %vm2152_vm3, %v3304_v52  ;;  %v3478_v30 = vmax.f32 %v3429_v0, %v3461_v35 }
 0x24e   : > { %v3367_v47 = vld [vmem:[#allocation2 + $0xf0] sm:$0xff] }
 0x24f   : > { %3399 = vst.msk [vmem:[%s5753_s19 + $0xf0] sm:$0xff] %vm2152_vm3, %v3367_v47 }
 0x253   : > { %v3368_v56 = vld [vmem:[#allocation2 + $0xf8] sm:$0xff] }
 0x254   : > { %v3431_v39 = vld [vmem:[#allocation2 + $0xf0] ss:$2 sm:$0xff]  ;;  %v3463_v44 = vld [vmem:[#allocation2 + $0xf1] ss:$2 sm:$0xff]  ;;  %3400 = vst.msk [vmem:[%s5753_s19 + $0xf8] sm:$0xff] %vm2152_vm3, %v3368_v56 }
 0x255   : > { %v3479_v22 = vmax.f32 %v3431_v39, %v3463_v44 }
 0x256   : > { %4152 = shalt.err (!%p4149_p5)
}
 0x257   : > { %s4153_s9 = scalar_lea.hbm %s5969_s14, 4096  ;;  %s4157_s26 = scalar_lea.hbm %s6031_s4, 8192 }
 0x258   : > { %p4154_p6 = scmp.ne.s32.totalorder %s5969_s14, %s4153_s9  ;;  %p4158_p10 = scmp.lt.u32.totalorder %s5969_s14, %s6031_s4 }
 0x259   : > { %p4159_p11 = scmp.lt.u32.totalorder %s4157_s26, %s4153_s9  ;;  %p4161_p13 = scmp.lt.u32.totalorder %s4153_s9, %s5969_s14 }
 0x25a   : > { %p4155_p7 = pnand %p4154_p6, %p4299_p4 }
 0x25b   : > { %p4160_p12 = por %p4159_p11, %p4158_p10 }
 0x25c   : > { %p4156_p9 = pneg %p4155_p7 }
 0x25d   : > { %p4162_p0 = por %p4161_p13, %p4160_p12 }
 0x25f   : > { %p4163_p1 = pnand %p4162_p0, %p4156_p9 }
 0x261   : > { %4166 = shalt.err (!%p4163_p1)
}
 0x262   : > { %s4222_s10 = smov 128   ;;  %s4223_s12 = smov 8   ;;  %v3501_v36 = vsel %vm2152_vm3, %v3478_v30, -inf  ;;  %v3502_v29 = vsel %vm2152_vm3, %v3479_v22, -inf }
 0x263   : > { %4079 = dma.vmem_to_hbm [thread:$0]  (%p4299_p4), %s5971_s11, 4096, %s5969_s14, %s5977_s23, %s4222_s10, %s4222_s10, %s4223_s12   ;;  %v3503_v24 = vmax.f32 %v3501_v36, %v3502_v29 }
 0x265   : > { %v3511_v63 = vmax.f32 %v3503_v24, 0.0 }
 0x267   : > { %3519 = vst.msk [vmem:[%s5785_s28 + $0x38] sm:$0xff] %vm2152_vm3, %v3511_v63 }
 0x268 PF: > { %p4085_p2 = scmp.ge.s32.totalorder %s4217_s25, 2  ;;  %s3565_s13 = sand.u32 1, %s4197_s20  }
 0x269   : > { %s3566_s15 = scalar_lea.sflag [#allocation14], %s3565_s13 }
 0x26a   : > { %p4082_p3 = pnand %p4085_p2, %p4306_p8 }
 0x26c   : > { %4192 = dma.done.wait (!%p4082_p3), %s3566_s15, 4096  }
 0x26d   : > { %4194 = vsyncadd (!%p4082_p3), %s3566_s15, 4294963200  ;;  %s21_s25 = sadd.s32 1, %s4217_s25   ;;  %s6137_s20 = smov %s4201_s21 }
 0x26e   : > { %p18_p4 = scmp.ge.s32.totalorder %s21_s25, 4   ;;  %s6138_s21 = smov %s4205_s22 }
 0x26f   : > { %s6139_s22 = smov %s4312_s7  ;;  %s6140_s23 = smov %s4213_s24 }
 0x270   : > { %s6141_s24 = smov %s6143_s27  ;;  %20 = sbr.rel (!%p18_p4) target bundleno = 7 (0x7), region = 223 }
 0x277   :  { %3583 = vsyncpa [#allocation14], 1 }
 0x278   :  { %3585 = vsyncpa [#allocation14 + $0x1], 1 }

// kernel: vgg19_features_forward.11
= control target key start
LH: loop header
LB: loop body
LE: loop exit
PB: predicated region body
PF: predicated region fallthrough
CT: control target
= control target key end

     0   :  { %s8388_s0 = inlined_call_operand.vmem [shape: f32[3,3,3,64], index: 0, kind: input, shape index: {}]   ;;  %s8389_s1 = inlined_call_operand.hbm [shape: f32[1,64], index: 1, kind: input, shape index: {}]   ;;  %s8390_s2 = inlined_call_operand.vmem [shape: f32[2,16,16,3], index: 2, kind: input, shape index: {}]   ;;  %s8391_s3 = inlined_call_operand.<no memory space> [shape: f32[], index: 3, kind: input, shape index: {}]   ;;  %s8392_s4 = inlined_call_operand.vmem [shape: f32[2,16,16,64], index: 4, kind: output, shape index: {}]  }
   0x1   :  { %v6642_v0 = vstv %s8391_s3 }
   0x2   :  { %8473 = vst [vmem:[#allocation18_spill] sm:$0xff] %v6642_v0 }
   0x3   :  { %11 = vsyncpa [#allocation14], 0  ;;  %s6644_s17 = smov 0   ;;  %s6646_s18 = smov 0  }
   0x4   :  { %s6648_s19 = smov 0  }
   0x5 LB: > { %s5404_s3 = sadd.s32 4294967295, %s6611_s19   ;;  %s29_s20 = sadd.s32 1, %s6607_s18  ;;  %s6603_s17 = sphi %s6644_s17, %s8570_s17   ;;  %s6611_s19 = sphi %s6648_s19, %s17_s19   ;;  %s6607_s18 = sphi %s6646_s18, %s8571_s18  }
   0x6   : > { %p31_p0 = scmp.ge.s32.totalorder %s29_s20, 2  ;;  %p5406_p1 = scmp.ge.s32.totalorder %s6611_s19, 1 }
   0x7   : > { %p164_p2 = scmp.lt.s32.totalorder %s6611_s19, 3  ;;  %p6669_p4 = scmp.eq.s32.totalorder %s5404_s3, 0 }
   0x8   : > { %s8573_s20 = smov (%p31_p0, %s29_s20), 0  ;;  %s6613_s23 = smov [#allocation13]  }
   0x9   : > { %v8474_v0 = vld [vmem:[#allocation18_spill] sm:$0xff]  ;;  %p6665_p3 = pnand %p5406_p1, %p164_p2  ;;  %s180_s24 = sshll.u32 %s6613_s23, 4  ;;  %s181_s24 = int_to_ptr.vmem [resolvable:$true] %s180_s24 }
   0xa   : > { %s8476_s22 = scalar_select %p6669_p4, 1, 0 }
   0xb   : > { %s8475_s21 = scalar_select %p6665_p3, 1, 0 }
   0xc   : > { %p6516_p5 = pneg %p6665_p3  ;;  %s6557_s28 = scalar_lea.hbm %s8389_s1, 16 }
   0xd   : > { %p6558_p7 = scmp.ne.s32.totalorder %s8389_s1, %s6557_s28  ;;  %p6564_p11 = scmp.lt.u32.totalorder %s6557_s28, %s8389_s1 }
   0xe   : > { %p6677_p6 = pnand %p6669_p4, %p6516_p5 }
  0x10   : > { %p6559_p8 = pneg %p6677_p6 }
  0x12   : > { %p6560_p9 = pnand %p6559_p8, %p6558_p7 }
  0x14   : > { %p6561_p10 = pneg %p6560_p9 }
  0x16   : > { %p6566_p12 = pnand %p6564_p11, %p6561_p10 }
  0x18   : > { %6569 = shalt.err (!%p6566_p12)
}
  0x19   : > { %s6570_s7 = scalar_lea.vmem %s181_s24, 16  ;;  %s6577_s8 = scalar_lea.vmem %s181_s24, 32 }
  0x1a   : > { %p6571_p13 = scmp.ne.s32.totalorder %s181_s24, %s6570_s7  ;;  %p6578_p2 = scmp.lt.s32.totalorder %s181_s24, %s181_s24 }
  0x1b   : > { %p6579_p5 = scmp.lt.s32.totalorder %s6577_s8, %s6570_s7 }
  0x1c   : > { %p6573_p0 = pnand %p6571_p13, %p6559_p8 }
  0x1d   : > { %p6580_p4 = por %p6579_p5, %p6578_p2 }
  0x1e   : > { %p6574_p1 = pneg %p6573_p0 }
  0x20   : > { %p6581_p3 = pnand %p6580_p4, %p6574_p1 }
  0x22   : > { %6584 = shalt.err (!%p6581_p3)
}
  0x23   : > { %6519 = dma.hbm_to_vmem [thread:$0]  (!%p6677_p6), %s8389_s1, 16, %s181_s24, [#allocation14]  }
  0x24   : > { %p8478_p7 = scmp.ne.s32.totalorder %s8475_s21, 0 }
  0x26   : > { %265 = sbr.rel (%p8478_p7) target bundleno = 590 (0x24e), region = 36 }
  0x2d   : > { %p8479_p9 = scmp.ne.s32.totalorder %s8476_s22, 0 }
  0x2f   : > { %6598 = dma.done.wait (%p8479_p9), [#allocation14], 16  }
  0x30   : > { %6600 = vsyncadd (%p8479_p9), [#allocation14], 4294967280  ;;  %p345_p8 = scmp.lt.s32.totalorder %s6603_s17, 1  ;;  %v501_v1 = vlaneseq  ;;  %v6705_v2 = vrot.slane %v8474_v0, 7  ;;  %vm1729_vm0 = vcmask 23552   ;;  %vm1826_vm1 = vcmask 1042432  }
  0x31   : > { %vm506_vm3 = vcmask 1046528   ;;  %v1728_v4 = vld [vmem:[%s8388_s0] sm:$0x7]  ;;  %v5484_v5 = vld [vmem:[%s8388_s0 + $0x4] sm:$0x7]  ;;  %vm2575_vm4 = vcmask 1045504  }
  0x32   : > { %s8575_s17 = smov (!%p345_p8, %s6603_s17), 1  ;;  %v6710_v3 = vand.u32 127, %v501_v1  ;;  %6062 = vmatprep.mubr.msk.f32.mxu0 %vm1729_vm0, %v6705_v2  ;;  %474 = vst [vmem:[#allocation15 + $0x10] sm:$0xff] %v6705_v2  ;;  %1639 = vst [vmem:[#allocation16 + $0x18] sm:$0xff] %v6705_v2  ;;  %v5518_v6 = vld [vmem:[%s8388_s0 + $0x8] sm:$0x7]  ;;  %6510 = vmatprep.subr.msk.mxu1 %vm1826_vm1, %v1728_v4 }
  0x33   : > { %1667 = vst [vmem:[#allocation16 + $0x20] sm:$0xff] %v6705_v2  ;;  %1673 = vst [vmem:[#allocation16 + $0x28] sm:$0xff] %v6705_v2  ;;  %s5411_s11 = sshll.u32 %s8575_s17, 5  ;;  %6060 = vmatprep.subr.msk.mxu0 %vm1826_vm1, %v1728_v4  ;;  %6511 = vmatpush3.msk.msra.mxu1 %vm1826_vm1, %v1728_v4  ;;  %v6853_v51 = vld [vmem:[%s8388_s0 + $0xc] sm:$0x7]  ;;  %s5762_s8 = sshll.u32 %s8575_s17, 8 }
  0x34   : > { %s5285_s12 = sadd.s32 4294967294, %s5411_s11  ;;  %vm504_vm2 = vcmp.lt.s32.totalorder %v6710_v3, 3  ;;  %6061 = vmatpush3.msk.msra.mxu0 %vm1826_vm1, %v1728_v4  ;;  %6110 = vmatprep.subr.msk.mxu1 %vm1826_vm1, %v5484_v5  ;;  %v6891_v1 = vld [vmem:[%s8388_s0 + $0x10] sm:$0x7]  ;;  %s5760_s9 = sadd.s32 240, %s5762_s8  ;;  %vm2055_vm5 = vcmask 523264  }
  0x35   : > { %s5412_s13 = sshll.u32 %s5285_s12, 3  ;;  %6063 = vmatmul.mubr.msk.f32.vlgmr.msra.gmra.mrb[0].mxu0 %vm1729_vm0, %v6705_v2  ;;  %6160 = vmatprep.subr.msk.mxu0 %vm1826_vm1, %v5518_v6  ;;  %s5293_s12 = scalar_lea.vmem %s8390_s2, %s5760_s9 }
  0x36   : > { %s6726_s21 = scalar_lea.vmem %s8390_s2, %s5412_s13  ;;  %6161 = vmatpush3.msk.msra.mxu0 %vm1826_vm1, %v5518_v6  ;;  %s8213_s22 = scalar_lea.vmem %s8392_s4, %s5762_s8 }
  0x37   : > { %v5432_v7 = vld [vmem:[%s6726_s21 + $0x80] sm:$0xff]  ;;  %v5433_v8 = vld [vmem:[%s6726_s21 + $0x88] sm:$0xff]  ;;  %v5434_v9 = vld [vmem:[%s6726_s21 + $0x90] sm:$0xff]  ;;  %6260 = vmatprep.subr.msk.mxu0 %vm1826_vm1, %v6891_v1 }
  0x38   : > { %v1002_v10 = vsel %vm504_vm2, %v5432_v7, %v8474_v0  ;;  %v6746_v11 = vsel %vm504_vm2, %v5433_v8, %v8474_v0  ;;  %v1073_v12 = vsel %vm504_vm2, %v5434_v9, %v8474_v0  ;;  %v5435_v13 = vld [vmem:[%s6726_s21 + $0x98] sm:$0xff]  ;;  %v5436_v14 = vld [vmem:[%s6726_s21 + $0xa0] sm:$0xff]  ;;  %v5437_v15 = vld [vmem:[%s6726_s21 + $0xa8] sm:$0xff] }
  0x39   : > { %v1004_v16 = vsel %vm506_vm3, %v1002_v10, %v8474_v0  ;;  %v1032_v17 = vsel %vm506_vm3, %v6746_v11, %v1002_v10  ;;  %v1075_v18 = vsel %vm506_vm3, %v1073_v12, %v8474_v0  ;;  %v6765_v19 = vsel %vm504_vm2, %v5435_v13, %v8474_v0  ;;  %v5438_v20 = vld [vmem:[%s6726_s21 + $0xb0] sm:$0xff]  ;;  %v5439_v30 = vld [vmem:[%s6726_s21 + $0xb8] sm:$0xff]  ;;  %v5440_v32 = vld [vmem:[%s6726_s21 + $0xc0] sm:$0xff] }
  0x3a   : > { %v5418_v21 = vld [vmem:[%s6726_s21 + $0x10] sm:$0xff]  ;;  %v6769_v22 = vrot.slane %v1004_v16, 7  ;;  %v6771_v23 = vrot.slane %v1032_v17, 7  ;;  %v6773_v24 = vrot.slane %v1075_v18, 7  ;;  %v1103_v25 = vsel %vm506_vm3, %v6765_v19, %v1073_v12  ;;  %v5419_v31 = vld [vmem:[%s6726_s21 + $0x18] sm:$0xff]  ;;  %v5420_v45 = vld [vmem:[%s6726_s21 + $0x20] sm:$0xff] }
  0x3b   : > { %v6780_v26 = vrot.slane %v1103_v25, 7  ;;  %v1144_v27 = vsel %vm504_vm2, %v5436_v14, %v8474_v0  ;;  %v6788_v28 = vsel %vm504_vm2, %v5437_v15, %v8474_v0  ;;  %v1215_v29 = vsel %vm504_vm2, %v5438_v20, %v8474_v0  ;;  %v5441_v46 = vld [vmem:[%s6726_s21 + $0xc8] sm:$0xff]  ;;  %v5442_v55 = vld [vmem:[%s6726_s21 + $0xd0] sm:$0xff]  ;;  %v5443_v61 = vld [vmem:[%s6726_s21 + $0xd8] sm:$0xff] }
  0x3c   : > { %8480 = vst [vmem:[#allocation19_spill] sm:$0xff] %v6769_v22  ;;  %8481 = vst [vmem:[#allocation20_spill] sm:$0xff] %v6771_v23  ;;  %6086 = vmatprep.mubr.msk.f32.mxu1 %vm1729_vm0, %v6769_v22  ;;  %v1146_v33 = vsel %vm506_vm3, %v1144_v27, %v8474_v0  ;;  %v1174_v34 = vsel %vm506_vm3, %v6788_v28, %v1144_v27  ;;  %v1217_v35 = vsel %vm506_vm3, %v1215_v29, %v8474_v0  ;;  %v5421_v54 = vld [vmem:[%s6726_s21 + $0x28] sm:$0xff]  ;;  %v5422_v60 = vld [vmem:[%s6726_s21 + $0x30] sm:$0xff] }
  0x3d   : > { %1008 = vst [vmem:[#allocation15 + $0xc0] sm:$0xff] %v6769_v22  ;;  %1036 = vst [vmem:[#allocation15 + $0xc8] sm:$0xff] %v6771_v23  ;;  %v505_v36 = vsel %vm504_vm2, %v5418_v21, %v8474_v0  ;;  %6087 = vmatmul.mubr.msk.f32.vlgmr.msra.gmra.mrb[0].mxu1 %vm1729_vm0, %v6771_v23  ;;  %v6814_v37 = vrot.slane %v1146_v33, 7  ;;  %v6816_v38 = vrot.slane %v1174_v34, 7  ;;  %v6818_v39 = vrot.slane %v1217_v35, 7  ;;  %v5423_v8 = vld [vmem:[%s6726_s21 + $0x38] sm:$0xff] }
  0x3e   : > { %1079 = vst [vmem:[#allocation15 + $0xd8] sm:$0xff] %v6773_v24  ;;  %1107 = vst [vmem:[#allocation15 + $0xe0] sm:$0xff] %v6780_v26  ;;  %v507_v40 = vsel %vm506_vm3, %v505_v36, %v8474_v0  ;;  %6111 = vmatpush3.msk.msra.mxu1 %vm1826_vm1, %v5484_v5  ;;  %6089 = vmatprep.mubr.msk.f32.mxu1 %vm1729_vm0, %v6773_v24  ;;  %v6830_v42 = vsel %vm504_vm2, %v5439_v30, %v8474_v0  ;;  %v5444_v9 = vld [vmem:[%s6726_s21 + $0xe0] sm:$0xff]  ;;  %v5445_v16 = vld [vmem:[%s6726_s21 + $0xe8] sm:$0xff] }
  0x3f   : > { %v6825_v41 = vrot.slane %v507_v40, 7  ;;  %v533_v43 = vsel %vm504_vm2, %v5419_v31, %v8474_v0  ;;  %v1286_v44 = vsel %vm504_vm2, %v5440_v32, %v8474_v0  ;;  %1150 = vst [vmem:[#allocation15 + $0xf0] sm:$0xff] %v6814_v37  ;;  %1178 = vst [vmem:[#allocation15 + $0xf8] sm:$0xff] %v6816_v38  ;;  %v1245_v47 = vsel %vm506_vm3, %v6830_v42, %v1215_v29  ;;  %v5424_v15 = vld [vmem:[%s6726_s21 + $0x40] sm:$0xff]  ;;  %v5425_v31 = vld [vmem:[%s6726_s21 + $0x48] sm:$0xff] }
  0x40   : > { %1221 = vst [vmem:[#allocation15 + $0x108] sm:$0xff] %v6818_v39  ;;  %v535_v48 = vsel %vm506_vm3, %v533_v43, %v505_v36  ;;  %v541_v49 = vsel %vm506_vm3, %v8474_v0, %v533_v43  ;;  %v1288_v50 = vsel %vm506_vm3, %v1286_v44, %v8474_v0  ;;  %v6857_v52 = vrot.slane %v1245_v47, 7  ;;  %6210 = vmatprep.subr.msk.mxu1 %vm1826_vm1, %v6853_v51  ;;  %v5446_v32 = vld [vmem:[%s6726_s21 + $0xf0] sm:$0xff]  ;;  %v5447_v43 = vld [vmem:[%s6726_s21 + $0xf8] sm:$0xff] }
  0x41   : > { %6065 = vmatprep.mubr.msk.f32.mxu0 %vm1729_vm0, %v6825_v41  ;;  %v6859_v53 = vrot.slane %v535_v48, 7  ;;  %6090 = vmatmul.mubr.msk.f32.gmra.mrb[2].mxu1 %vm1729_vm0, %v6780_v26  ;;  %v542_v56 = vrot.slane %v541_v49, 7  ;;  %v6867_v57 = vrot.slane %v1288_v50, 7  ;;  %v576_v58 = vsel %vm504_vm2, %v5420_v45, %v8474_v0  ;;  %v5426_v40 = vld [vmem:[%s6726_s21 + $0x50] sm:$0xff] }
  0x42   : > { %v6875_v59 = vsel %vm504_vm2, %v5441_v46, %v8474_v0  ;;  %6092 = vmatprep.mubr.msk.f32.mxu1 %vm1729_vm0, %v6814_v37  ;;  %1249 = vst [vmem:[#allocation15 + $0x110] sm:$0xff] %v6857_v52  ;;  %v578_v62 = vsel %vm506_vm3, %v576_v58, %v8474_v0  ;;  %v6901_v6 = vsel %vm504_vm2, %v5421_v54, %v8474_v0 }
  0x43   : > { %8482 = vst [vmem:[#allocation21_spill] sm:$0xff] %v6867_v57  ;;  %6066 = vmatmul.mubr.msk.f32.gmra.mrb[2].mxu0 %vm1729_vm0, %v6859_v53  ;;  %v1316_v63 = vsel %vm506_vm3, %v6875_v59, %v1286_v44  ;;  %545 = vst [vmem:[#allocation15 + $0x28] sm:$0xff] %v542_v56  ;;  %v6894_v4 = vrot.slane %v578_v62, 7  ;;  %v1357_v7 = vsel %vm504_vm2, %v5442_v55, %v8474_v0  ;;  %v5427_v55 = vld [vmem:[%s6726_s21 + $0x58] sm:$0xff]  ;;  %v5428_v56 = vld [vmem:[%s6726_s21 + $0x60] sm:$0xff] }
  0x44   : > { %1292 = vst [vmem:[#allocation15 + $0x120] sm:$0xff] %v6867_v57  ;;  %v6896_v5 = vrot.slane %v1316_v63, 7  ;;  %v606_v10 = vsel %vm506_vm3, %v6901_v6, %v576_v58  ;;  %v1359_v12 = vsel %vm506_vm3, %v1357_v7, %v8474_v0  ;;  %v647_v13 = vsel %vm504_vm2, %v5422_v60, %v8474_v0  ;;  %v5429_v63 = vld [vmem:[%s6726_s21 + $0x68] sm:$0xff] }
  0x45   : > { %v6920_v14 = vsel %vm504_vm2, %v5443_v61, %v8474_v0  ;;  %6093 = vmatmul.mubr.msk.f32.gmra.mrb[4].mxu1 %vm1729_vm0, %v6816_v38  ;;  %6068 = vmatprep.mubr.msk.f32.mxu0 %vm1729_vm0, %v6894_v4  ;;  %v6929_v17 = vrot.slane %v606_v10, 7  ;;  %v6931_v18 = vrot.slane %v1359_v12, 7  ;;  %v649_v20 = vsel %vm506_vm3, %v647_v13, %v8474_v0 }
  0x46   : > { %8483 = vst [vmem:[#allocation22_spill] sm:$0xff] %v6896_v5  ;;  %1320 = vst [vmem:[#allocation15 + $0x128] sm:$0xff] %v6896_v5  ;;  %v1387_v21 = vsel %vm506_vm3, %v6920_v14, %v1357_v7  ;;  %6095 = vmatprep.mubr.msk.f32.mxu1 %vm1729_vm0, %v6818_v39  ;;  %v6939_v25 = vrot.slane %v649_v20, 7  ;;  %v6946_v29 = vsel %vm504_vm2, %v5423_v8, %v8474_v0  ;;  %v5430_v20 = vld [vmem:[%s6726_s21 + $0x70] sm:$0xff] }
  0x47   : > { %8484 = vst [vmem:[#allocation23_spill] sm:$0xff] %v6931_v18  ;;  %v6941_v27 = vrot.slane %v1387_v21, 7  ;;  %v1428_v30 = vsel %vm504_vm2, %v5444_v9, %v8474_v0  ;;  %6069 = vmatmul.mubr.msk.f32.gmra.mrb[4].mxu0 %vm1729_vm0, %v6929_v17  ;;  %v677_v33 = vsel %vm506_vm3, %v6946_v29, %v647_v13  ;;  %v718_v35 = vsel %vm504_vm2, %v5424_v15, %v8474_v0 }
  0x48   : > { %v1430_v34 = vsel %vm506_vm3, %v1428_v30, %v8474_v0  ;;  %v6965_v36 = vsel %vm504_vm2, %v5445_v16, %v8474_v0  ;;  %6071 = vmatprep.mubr.msk.f32.mxu0 %vm1729_vm0, %v6939_v25  ;;  %v6971_v44 = vrot.slane %v677_v33, 7  ;;  %v720_v46 = vsel %vm506_vm3, %v718_v35, %v8474_v0 }
  0x49   : > { %8485 = vst [vmem:[#allocation24_spill] sm:$0xff] %v6941_v27  ;;  %v6973_v45 = vrot.slane %v1430_v34, 7  ;;  %v1458_v47 = vsel %vm506_vm3, %v6965_v36, %v1428_v30  ;;  %6096 = vmatmul.mubr.msk.f32.gmra.mrb[6].mxu1 %vm1729_vm0, %v6857_v52  ;;  %v6981_v48 = vrot.slane %v720_v46, 7  ;;  %v746_v50 = vsel %vm504_vm2, %v5425_v31, %v8474_v0 }
  0x4a   : > { %v6983_v49 = vrot.slane %v1458_v47, 7  ;;  %v1499_v54 = vsel %vm504_vm2, %v5446_v32, %v8474_v0  ;;  %6098 = vmatprep.mubr.msk.f32.mxu1 %vm1729_vm0, %v6867_v57  ;;  %v748_v58 = vsel %vm506_vm3, %v746_v50, %v718_v35  ;;  %v789_v61 = vsel %vm504_vm2, %v5426_v40, %v8474_v0  ;;  %v5431_v32 = vld [vmem:[%s6726_s21 + $0x78] sm:$0xff] }
  0x4b   : > { %8486 = vst [vmem:[#allocation25_spill] sm:$0xff] %v6973_v45  ;;  %v1501_v60 = vsel %vm506_vm3, %v1499_v54, %v8474_v0  ;;  %v7004_v62 = vsel %vm504_vm2, %v5447_v43, %v8474_v0  ;;  %6072 = vmatmul.mubr.msk.f32.gmra.mrb[6].mxu0 %vm1729_vm0, %v6971_v44  ;;  %v7009_v7 = vrot.slane %v748_v58, 7  ;;  %v791_v9 = vsel %vm506_vm3, %v789_v61, %v8474_v0 }
  0x4c   : > { %8487 = vst [vmem:[#allocation26_spill] sm:$0xff] %v6983_v49  ;;  %v7011_v8 = vrot.slane %v1501_v60, 7  ;;  %v1529_v10 = vsel %vm506_vm3, %v7004_v62, %v1499_v54  ;;  %6074 = vmatprep.mubr.msk.f32.mxu0 %vm1729_vm0, %v6981_v48  ;;  %v7019_v12 = vrot.slane %v791_v9, 7  ;;  %v817_v15 = vsel %vm504_vm2, %v5427_v55, %v8474_v0 }
  0x4d   : > { %8488 = vst [vmem:[#allocation27_spill] sm:$0xff] %v7009_v7  ;;  %v7021_v13 = vrot.slane %v1529_v10, 7  ;;  %v860_v16 = vsel %vm504_vm2, %v5428_v56, %v8474_v0  ;;  %6099 = vmatmul.mubr.msk.f32.gmra.mrb[8].mxu1 %vm1729_vm0, %v6896_v5  ;;  %v819_v21 = vsel %vm506_vm3, %v817_v15, %v789_v61  ;;  %v888_v31 = vsel %vm504_vm2, %v5429_v63, %v8474_v0  ;;  %v1676_v63 = vld [vmem:[#allocation15 + $0x10] sm:$0x3] }
  0x4e   : > { %v862_v30 = vsel %vm506_vm3, %v860_v16, %v8474_v0  ;;  %6101 = vmatprep.mubr.msk.f32.mxu1 %vm1729_vm0, %v6931_v18  ;;  %v7041_v33 = vrot.slane %v819_v21, 7  ;;  %v890_v35 = vsel %vm506_vm3, %v888_v31, %v860_v16  ;;  %v931_v43 = vsel %vm504_vm2, %v5430_v20, %v8474_v0 }
  0x4f   : > { %v7043_v34 = vrot.slane %v862_v30, 7  ;;  %6075 = vmatmul.mubr.msk.f32.gmra.mrb[8].mxu0 %vm1729_vm0, %v7009_v7  ;;  %v7048_v40 = vrot.slane %v890_v35, 7  ;;  %v933_v46 = vsel %vm506_vm3, %v931_v43, %v8474_v0  ;;  %v959_v47 = vsel %vm504_vm2, %v5431_v32, %v8474_v0 }
  0x50   : > { %6077 = vmatprep.mubr.msk.f32.mxu0 %vm1729_vm0, %v7019_v12  ;;  %v7062_v54 = vrot.slane %v933_v46, 7  ;;  %v961_v55 = vsel %vm506_vm3, %v959_v47, %v931_v43  ;;  %v612_v56 = vsel %vm506_vm3, %v8474_v0, %v6901_v6  ;;  %v2105_v61 = vrot.slane %v6705_v2, 1 }
  0x51   : > { %8489 = vst [vmem:[#allocation28_spill] sm:$0xff] %v7048_v40  ;;  %6102 = vmatmul.mubr.msk.f32.gmra.mrb[10].mxu1 %vm1729_vm0, %v6941_v27  ;;  %v7070_v58 = vrot.slane %v961_v55, 7  ;;  %v613_v60 = vrot.slane %v612_v56, 7  ;;  %v683_v9 = vsel %vm506_vm3, %v8474_v0, %v6946_v29  ;;  %v2576_v10 = vrot.slane %v6705_v2, 2  ;;  %v1679_v2 = vld [vmem:[#allocation15 + $0x28] sm:$0x3] }
  0x52   : > { %6104 = vmatprep.mubr.msk.f32.mxu1 %vm1729_vm0, %v6973_v45  ;;  %v684_v6 = vrot.slane %v683_v9, 7  ;;  %v754_v16 = vsel %vm506_vm3, %v8474_v0, %v746_v50  ;;  %v2108_v20 = vrot.slane %v1676_v63, 1  ;;  %v2110_v21 = vrot.slane %v6825_v41, 1 }
  0x53   : > { %8490 = vst [vmem:[#allocation29_spill] sm:$0xff] %v7070_v58  ;;  %6078 = vmatmul.mubr.msk.f32.gmra.mrb[10].mxu0 %vm1729_vm0, %v7041_v33  ;;  %616 = vst [vmem:[#allocation15 + $0x40] sm:$0xff] %v613_v60  ;;  %v755_v29 = vrot.slane %v754_v16, 7  ;;  %v2111_v30 = vrot.slane %v6859_v53, 1  ;;  %v825_v32 = vsel %vm506_vm3, %v8474_v0, %v817_v15  ;;  %v2579_v50 = vrot.slane %v1676_v63, 2 }
  0x54   : > { %6080 = vmatprep.mubr.msk.f32.mxu0 %vm1729_vm0, %v7043_v34  ;;  %687 = vst [vmem:[#allocation15 + $0x58] sm:$0xff] %v684_v6  ;;  %v826_v35 = vrot.slane %v825_v32, 7  ;;  %v2581_v43 = vrot.slane %v6825_v41, 2  ;;  %v2582_v46 = vrot.slane %v6859_v53, 2  ;;  %v896_v55 = vsel %vm506_vm3, %v8474_v0, %v888_v31 }
  0x55   : > { %6105 = vmatmul.mubr.msk.f32.gmra.mrb[12].mxu1 %vm1729_vm0, %v6983_v49  ;;  %758 = vst [vmem:[#allocation15 + $0x70] sm:$0xff] %v755_v29  ;;  %v2109_v15 = vsel %vm506_vm3, %v2105_v61, %v2108_v20  ;;  %v2113_v56 = vrot.slane %v1679_v2, 1  ;;  %v897_v60 = vrot.slane %v896_v55, 7  ;;  %v7104_v63 = vsel %vm506_vm3, %v2110_v21, %v2111_v30  ;;  %v7117_v21 = vld [vmem:[%s8388_s0 + $0x14] sm:$0x7] }
  0x56   : > { %6107 = vmatprep.mubr.msk.f32.mxu1 %vm1729_vm0, %v7011_v8  ;;  %829 = vst [vmem:[#allocation15 + $0x88] sm:$0xff] %v826_v35  ;;  %v2115_v9 = vrot.slane %v6894_v4, 1  ;;  %v2116_v6 = vrot.slane %v6929_v17, 1  ;;  %v967_v31 = vsel %vm506_vm3, %v8474_v0, %v959_v47  ;;  %v2584_v20 = vrot.slane %v1679_v2, 2 }
  0x57   : > { %6081 = vmatmul.mubr.msk.f32.gmra.mrb[12].mxu0 %vm1729_vm0, %v7048_v40  ;;  %900 = vst [vmem:[#allocation15 + $0xa0] sm:$0xff] %v897_v60  ;;  %v968_v29 = vrot.slane %v967_v31, 7  ;;  %v7121_v32 = vsel %vm2575_vm4, %v2581_v43, %v2582_v46  ;;  %v2586_v35 = vrot.slane %v6894_v4, 2  ;;  %v2587_v47 = vrot.slane %v6929_v17, 2 }
  0x58   : > { %6083 = vmatprep.mubr.msk.f32.mxu0 %vm1729_vm0, %v7062_v54  ;;  %8491 = vst [vmem:[#allocation30_spill] sm:$0xff] %v7121_v32  ;;  %v7138_v43 = vsel %vm506_vm3, %v2115_v9, %v2116_v6  ;;  %v2121_v55 = vrot.slane %v6971_v44, 1  ;;  %v2592_v31 = vrot.slane %v6971_v44, 2 }
  0x59   : > { %6108 = vmatmul.mubr.msk.f32.gmra.mrb[14].mxu1 %vm1729_vm0, %v7021_v13  ;;  %971 = vst [vmem:[#allocation15 + $0xb8] sm:$0xff] %v968_v29  ;;  %v7158_v9 = vsel %vm2575_vm4, %v2586_v35, %v2587_v47  ;;  %v2126_v29 = vrot.slane %v7009_v7, 1 }
  0x5a   : > { %6112 = vmatprep.mubr.msk.f32.mxu1 %vm1729_vm0, %v2105_v61  ;;  %v1682_v16 = vld [vmem:[#allocation15 + $0x40] sm:$0x3]  ;;  %v2580_v61 = vsel %vm2575_vm4, %v2576_v10, %v2579_v50  ;;  %v7135_v50 = vld [vmem:[%s8388_s0 + $0x18] sm:$0x7]  ;;  %8493 = vst [vmem:[#allocation32_spill] sm:$0xff] %v7158_v9 }
  0x5b   : > { %6084 = vmatmul.mubr.msk.f32.gmra.mrb[14].mxu0 %vm1729_vm0, %v7070_v58  ;;  %v2118_v2 = vrot.slane %v1682_v16, 1  ;;  %v2589_v60 = vrot.slane %v1682_v16, 2 }
  0x5c   : > { %6162 = vmatprep.mubr.msk.f32.mxu0 %vm1729_vm0, %v2576_v10  ;;  %v7130_v10 = vsel %vm506_vm3, %v2111_v30, %v2113_v56  ;;  %v1038_v30 = vsel %vm506_vm3, %v8474_v0, %v6746_v11  ;;  %v7153_v56 = vsel %vm2575_vm4, %v2582_v46, %v2584_v20  ;;  %v2591_v11 = vrot.slane %v6939_v25, 2  ;;  %v1688_v35 = vld [vmem:[#allocation15 + $0x70] sm:$0x3] }
  0x5d   : > { %6113 = vmatmul.mubr.msk.f32.vlgmr.msra.gmra.mrb[16].mxu1 %vm1729_vm0, %v2109_v15  ;;  %v1685_v15 = vld [vmem:[#allocation15 + $0x58] sm:$0x3]  ;;  %8492 = vst [vmem:[#allocation31_spill] sm:$0xff] %v7153_v56  ;;  %v2125_v20 = vrot.slane %v6981_v48, 1 }
  0x5e   : > { %6211 = vmatpush3.msk.msra.mxu1 %vm1826_vm1, %v6853_v51  ;;  %6115 = vmatprep.mubr.msk.f32.mxu1 %vm1729_vm0, %v7104_v63  ;;  %v2120_v51 = vrot.slane %v6939_v25, 1  ;;  %v2123_v46 = vrot.slane %v1685_v15, 1 }
  0x5f   : > { %6163 = vmatmul.mubr.msk.f32.vlgmr.msra.gmra.mrb[16].mxu0 %vm1729_vm0, %v2580_v61  ;;  %6310 = vmatprep.subr.msk.mxu1 %vm1826_vm1, %v7117_v21  ;;  %v1039_v61 = vrot.slane %v1038_v30, 7  ;;  %v1109_v30 = vsel %vm506_vm3, %v8474_v0, %v6765_v19 }
  0x60   : > { %6261 = vmatpush3.msk.msra.mxu0 %vm1826_vm1, %v6891_v1  ;;  %6165 = vmatprep.mubr.msk.f32.mxu0 %vm1729_vm0, %v7121_v32  ;;  %v7167_v1 = vsel %vm506_vm3, %v2116_v6, %v2118_v2  ;;  %v7170_v16 = vsel %vm506_vm3, %v2120_v51, %v2121_v55  ;;  %v7182_v6 = vsel %vm2575_vm4, %v2587_v47, %v2589_v60  ;;  %v2594_v2 = vrot.slane %v1685_v15, 2 }
  0x61   : > { %6116 = vmatmul.mubr.msk.f32.gmra.mrb[18].mxu1 %vm1729_vm0, %v7130_v10  ;;  %6360 = vmatprep.subr.msk.mxu0 %vm1826_vm1, %v7135_v50  ;;  %1042 = vst [vmem:[#allocation15 + $0xd0] sm:$0xff] %v1039_v61  ;;  %8494 = vst [vmem:[#allocation33_spill] sm:$0xff] %v7182_v6  ;;  %v7187_v51 = vsel %vm2575_vm4, %v2591_v11, %v2592_v31  ;;  %v2597_v61 = vrot.slane %v7009_v7, 2  ;;  %v1110_v32 = vrot.slane %v1109_v30, 7  ;;  %v2128_v47 = vrot.slane %v1688_v35, 1 }
  0x62   : > { %6118 = vmatprep.mubr.msk.f32.mxu1 %vm1729_vm0, %v7138_v43  ;;  %8495 = vst [vmem:[#allocation34_spill] sm:$0xff] %v7187_v51  ;;  %v7194_v19 = vsel %vm506_vm3, %v2121_v55, %v2123_v46  ;;  %v7197_v15 = vsel %vm506_vm3, %v2125_v20, %v2126_v29  ;;  %v2130_v60 = vrot.slane %v7019_v12, 1  ;;  %v2131_v11 = vrot.slane %v7041_v33, 1 }
  0x63   : > { %6166 = vmatmul.mubr.msk.f32.gmra.mrb[18].mxu0 %vm1729_vm0, %v7153_v56  ;;  %v2596_v56 = vrot.slane %v6981_v48, 2  ;;  %1113 = vst [vmem:[#allocation15 + $0xe8] sm:$0xff] %v1110_v32  ;;  %v1180_v30 = vsel %vm506_vm3, %v8474_v0, %v6788_v28  ;;  %v7209_v55 = vsel %vm2575_vm4, %v2592_v31, %v2594_v2  ;;  %v2599_v46 = vrot.slane %v1688_v35, 2 }
  0x64   : > { %6168 = vmatprep.mubr.msk.f32.mxu0 %vm1729_vm0, %v7158_v9  ;;  %v1691_v9 = vld [vmem:[#allocation15 + $0x88] sm:$0x3]  ;;  %8496 = vst [vmem:[#allocation35_spill] sm:$0xff] %v7209_v55  ;;  %v1181_v20 = vrot.slane %v1180_v30, 7  ;;  %v2601_v32 = vrot.slane %v7019_v12, 2  ;;  %v2602_v7 = vrot.slane %v7041_v33, 2  ;;  %v1251_v28 = vsel %vm506_vm3, %v8474_v0, %v6830_v42 }
  0x65   : > { %6119 = vmatmul.mubr.msk.f32.gmra.mrb[20].mxu1 %vm1729_vm0, %v7167_v1  ;;  %v7224_v31 = vsel %vm506_vm3, %v2126_v29, %v2128_v47  ;;  %v2133_v35 = vrot.slane %v1691_v9, 1  ;;  %v1252_v2 = vrot.slane %v1251_v28, 7  ;;  %v2135_v30 = vrot.slane %v7043_v34, 1 }
  0x66   : > { %6121 = vmatprep.mubr.msk.f32.mxu1 %vm1729_vm0, %v7170_v16  ;;  %1184 = vst [vmem:[#allocation15 + $0x100] sm:$0xff] %v1181_v20  ;;  %v2136_v42 = vrot.slane %v7048_v40, 1  ;;  %v7236_v29 = vsel %vm2575_vm4, %v2597_v61, %v2599_v46  ;;  %v2604_v47 = vrot.slane %v1691_v9, 2  ;;  %v7245_v20 = vsel %vm2575_vm4, %v2601_v32, %v2602_v7 }
  0x67   : > { %6169 = vmatmul.mubr.msk.f32.gmra.mrb[20].mxu0 %vm1729_vm0, %v7182_v6  ;;  %v7214_v6 = vsel %vm2575_vm4, %v2596_v56, %v2597_v61  ;;  %v7227_v56 = vsel %vm506_vm3, %v2130_v60, %v2131_v11  ;;  %8498 = vst [vmem:[#allocation37_spill] sm:$0xff] %v7236_v29  ;;  %1255 = vst [vmem:[#allocation15 + $0x118] sm:$0xff] %v1252_v2  ;;  %v1322_v60 = vsel %vm506_vm3, %v8474_v0, %v6875_v59 }
  0x68   : > { %6171 = vmatprep.mubr.msk.f32.mxu0 %vm1729_vm0, %v7187_v51  ;;  %8497 = vst [vmem:[#allocation36_spill] sm:$0xff] %v7214_v6  ;;  %v1694_v51 = vld [vmem:[#allocation15 + $0xa0] sm:$0x3]  ;;  %8499 = vst [vmem:[#allocation38_spill] sm:$0xff] %v7245_v20  ;;  %v2606_v28 = vrot.slane %v7043_v34, 2  ;;  %v1323_v61 = vrot.slane %v1322_v60, 7  ;;  %v7252_v9 = vsel %vm506_vm3, %v2131_v11, %v2133_v35  ;;  %v1393_v46 = vsel %vm506_vm3, %v8474_v0, %v6920_v14 }
  0x69   : > { %6122 = vmatmul.mubr.msk.f32.gmra.mrb[22].mxu1 %vm1729_vm0, %v7194_v19  ;;  %v2138_v59 = vrot.slane %v1694_v51, 1  ;;  %v7258_v2 = vsel %vm506_vm3, %v2135_v30, %v2136_v42  ;;  %v2140_v32 = vrot.slane %v7062_v54, 1  ;;  %v2141_v60 = vrot.slane %v7070_v58, 1 }
  0x6a   : > { %6124 = vmatprep.mubr.msk.f32.mxu1 %vm1729_vm0, %v7197_v15  ;;  %1326 = vst [vmem:[#allocation15 + $0x130] sm:$0xff] %v1323_v61  ;;  %v7269_v14 = vsel %vm2575_vm4, %v2602_v7, %v2604_v47  ;;  %v2609_v11 = vrot.slane %v1694_v51, 2  ;;  %v2611_v30 = vrot.slane %v7062_v54, 2  ;;  %v2612_v61 = vrot.slane %v7070_v58, 2 }
  0x6b   : > { %6172 = vmatmul.mubr.msk.f32.gmra.mrb[22].mxu0 %vm1729_vm0, %v7209_v55  ;;  %v1697_v55 = vld [vmem:[#allocation15 + $0xb8] sm:$0x3]  ;;  %8500 = vst [vmem:[#allocation39_spill] sm:$0xff] %v7269_v14  ;;  %v7284_v7 = vsel %vm506_vm3, %v2136_v42, %v2138_v59  ;;  %v7290_v47 = vsel %vm506_vm3, %v2140_v32, %v2141_v60  ;;  %v2150_v59 = vrot.slane %v6773_v24, 1  ;;  %v2151_v32 = vrot.slane %v6780_v26, 1 }
  0x6c   : > { %6174 = vmatprep.mubr.msk.f32.mxu0 %vm1729_vm0, %v7214_v6  ;;  %v2607_v6 = vrot.slane %v7048_v40, 2  ;;  %v1394_v40 = vrot.slane %v1393_v46, 7  ;;  %v1464_v46 = vsel %vm506_vm3, %v8474_v0, %v6965_v36  ;;  %8502 = vst [vmem:[#allocation41_spill] sm:$0xff] %v7284_v7  ;;  %v2143_v51 = vrot.slane %v1697_v55, 1 }
  0x6d   : > { %6125 = vmatmul.mubr.msk.f32.gmra.mrb[24].mxu1 %vm1729_vm0, %v7224_v31  ;;  %v2146_v36 = vrot.slane %v6771_v23, 1  ;;  %v2616_v58 = vrot.slane %v6769_v22, 2 }
  0x6e   : > { %6127 = vmatprep.mubr.msk.f32.mxu1 %vm1729_vm0, %v7227_v56  ;;  %v7274_v35 = vsel %vm2575_vm4, %v2606_v28, %v2607_v6  ;;  %1397 = vst [vmem:[#allocation15 + $0x148] sm:$0xff] %v1394_v40  ;;  %v2145_v40 = vrot.slane %v6769_v22, 1  ;;  %v1700_v28 = vld [vmem:[#allocation15 + $0xd0] sm:$0x3]  ;;  %v7299_v42 = vsel %vm2575_vm4, %v2607_v6, %v2609_v11  ;;  %v1535_v6 = vsel %vm506_vm3, %v8474_v0, %v7004_v62  ;;  %v5449_v11 = vld [vmem:[%s5293_s12] sm:$0xff] }
  0x6f   : > { %6175 = vmatmul.mubr.msk.f32.gmra.mrb[24].mxu0 %vm1729_vm0, %v7236_v29  ;;  %8501 = vst [vmem:[#allocation40_spill] sm:$0xff] %v7274_v35  ;;  %8503 = vst [vmem:[#allocation42_spill] sm:$0xff] %v7299_v42  ;;  %v2614_v29 = vrot.slane %v1697_v55, 2  ;;  %v7316_v55 = vsel %vm506_vm3, %v2141_v60, %v2143_v51  ;;  %v2619_v22 = vrot.slane %v1700_v28, 2  ;;  %v1565_v60 = vsel %vm504_vm2, %v5449_v11, %v8474_v0 }
  0x70   : > { %6177 = vmatprep.mubr.msk.f32.mxu0 %vm1729_vm0, %v7245_v20  ;;  %v1465_v20 = vrot.slane %v1464_v46, 7  ;;  %v2617_v46 = vrot.slane %v6771_v23, 2  ;;  %v5450_v23 = vld [vmem:[%s5293_s12 + $0x8] sm:$0xff]  ;;  %v7334_v51 = vsel %vm506_vm3, %v2150_v59, %v2151_v32  ;;  %v2156_v11 = vrot.slane %v6816_v38, 1 }
  0x71   : > { %6128 = vmatmul.mubr.msk.f32.gmra.mrb[26].mxu1 %vm1729_vm0, %v7252_v9  ;;  %v7326_v62 = vsel %vm2575_vm4, %v2612_v61, %v2614_v29  ;;  %v2622_v29 = vrot.slane %v6780_v26, 2  ;;  %v1590_v59 = vsel %vm504_vm2, %v5450_v23, %v8474_v0 }
  0x72   : > { %6130 = vmatprep.mubr.msk.f32.mxu1 %vm1729_vm0, %v7258_v2  ;;  %1468 = vst [vmem:[#allocation15 + $0x160] sm:$0xff] %v1465_v20  ;;  %v1703_v20 = vld [vmem:[#allocation15 + $0xe8] sm:$0x3]  ;;  %8505 = vst [vmem:[#allocation44_spill] sm:$0xff] %v7326_v62 }
  0x73   : > { %6178 = vmatmul.mubr.msk.f32.gmra.mrb[26].mxu0 %vm1729_vm0, %v7269_v14  ;;  %v7306_v14 = vsel %vm2575_vm4, %v2611_v30, %v2612_v61  ;;  %v7319_v30 = vsel %vm506_vm3, %v2145_v40, %v2146_v36  ;;  %v7337_v40 = vsel %vm2575_vm4, %v2616_v58, %v2617_v46  ;;  %v2155_v58 = vrot.slane %v6814_v37, 1 }
  0x74   : > { %6180 = vmatprep.mubr.msk.f32.mxu0 %vm1729_vm0, %v7274_v35  ;;  %8504 = vst [vmem:[#allocation43_spill] sm:$0xff] %v7306_v14  ;;  %v2148_v35 = vrot.slane %v1700_v28, 1  ;;  %8506 = vst [vmem:[#allocation45_spill] sm:$0xff] %v7337_v40  ;;  %v1567_v28 = vsel %vm506_vm3, %v1565_v60, %v8474_v0  ;;  %v2624_v3 = vrot.slane %v1703_v20, 2 }
  0x75   : > { %6131 = vmatmul.mubr.msk.f32.gmra.mrb[28].mxu1 %vm1729_vm0, %v7284_v7  ;;  %v1536_v7 = vrot.slane %v1535_v6, 7  ;;  %v2621_v6 = vrot.slane %v6773_v24, 2 }
  0x76   : > { %6133 = vmatprep.mubr.msk.f32.mxu1 %vm1729_vm0, %v7290_v47  ;;  %v7344_v61 = vsel %vm506_vm3, %v2146_v36, %v2148_v35  ;;  %v1592_v35 = vsel %vm506_vm3, %v1590_v59, %v1565_v60  ;;  %v7361_v36 = vsel %vm2575_vm4, %v2617_v46, %v2619_v22  ;;  %v2626_v60 = vrot.slane %v6814_v37, 2 }
  0x77   : > { %6181 = vmatmul.mubr.msk.f32.gmra.mrb[28].mxu0 %vm1729_vm0, %v7299_v42  ;;  %1539 = vst [vmem:[#allocation15 + $0x178] sm:$0xff] %v1536_v7  ;;  %v2153_v7 = vrot.slane %v1703_v20, 1  ;;  %v7355_v42 = vrot.slane %v1567_v28, 7  ;;  %8508 = vst [vmem:[#allocation47_spill] sm:$0xff] %v7361_v36  ;;  %v7363_v23 = vrot.slane %v1592_v35, 7  ;;  %v7370_v28 = vsel %vm2575_vm4, %v2621_v6, %v2622_v29 }
  0x78   : > { %6183 = vmatprep.mubr.msk.f32.mxu0 %vm1729_vm0, %v7306_v14  ;;  %v1706_v14 = vld [vmem:[#allocation15 + $0x100] sm:$0x3]  ;;  %8510 = vst [vmem:[#allocation49_spill] sm:$0xff] %v7370_v28  ;;  %v2160_v6 = vrot.slane %v6818_v39, 1  ;;  %v2161_v35 = vrot.slane %v6857_v52, 1 }
  0x79   : > { %6134 = vmatmul.mubr.msk.f32.gmra.mrb[30].mxu1 %vm1729_vm0, %v7316_v55  ;;  %8507 = vst [vmem:[#allocation46_spill] sm:$0xff] %v7355_v42  ;;  %8509 = vst [vmem:[#allocation48_spill] sm:$0xff] %v7363_v23  ;;  %v2627_v42 = vrot.slane %v6816_v38, 2  ;;  %v7377_v22 = vsel %vm506_vm3, %v2151_v32, %v2153_v7  ;;  %v2158_v46 = vrot.slane %v1706_v14, 1  ;;  %v2629_v32 = vrot.slane %v1706_v14, 2 }
  0x7a   : > { %6136 = vmatprep.mubr.msk.f32.mxu1 %vm1729_vm0, %v7319_v30  ;;  %v2631_v7 = vrot.slane %v6818_v39, 2  ;;  %v7404_v14 = vsel %vm506_vm3, %v2160_v6, %v2161_v35  ;;  %v2636_v6 = vrot.slane %v6867_v57, 2 }
  0x7b   : > { %6184 = vmatmul.mubr.msk.f32.gmra.mrb[30].mxu0 %vm1729_vm0, %v7326_v62  ;;  %v1598_v62 = vsel %vm506_vm3, %v8474_v0, %v1590_v59  ;;  %v7380_v59 = vsel %vm506_vm3, %v2155_v58, %v2156_v11  ;;  %v1709_v0 = vld [vmem:[#allocation15 + $0x118] sm:$0x3]  ;;  %v2632_v58 = vrot.slane %v6857_v52, 2 }
  0x7c   : > { %6186 = vmatprep.mubr.msk.f32.mxu0 %vm1729_vm0, %v7337_v40  ;;  %v1599_v20 = vrot.slane %v1598_v62, 7  ;;  %v7389_v40 = vsel %vm2575_vm4, %v2622_v29, %v2624_v3  ;;  %v7394_v62 = vsel %vm2575_vm4, %v2626_v60, %v2627_v42  ;;  %v2163_v29 = vrot.slane %v1709_v0, 1 }
  0x7d   : > { %6137 = vmatmul.mubr.msk.f32.gmra.mrb[32].mxu1 %vm1729_vm0, %v7344_v61  ;;  %8511 = vst [vmem:[#allocation50_spill] sm:$0xff] %v7389_v40  ;;  %8512 = vst [vmem:[#allocation51_spill] sm:$0xff] %v7394_v62  ;;  %v2165_v3 = vrot.slane %v6867_v57, 1  ;;  %v2166_v60 = vrot.slane %v6896_v5, 1 }
  0x7e   : > { %6139 = vmatprep.mubr.msk.f32.mxu1 %vm1729_vm0, %v7334_v51  ;;  %1602 = vst [vmem:[#allocation16 + $0x10] sm:$0xff] %v1599_v20  ;;  %v1712_v20 = vld [vmem:[#allocation15 + $0x130] sm:$0x3]  ;;  %v7425_v23 = vsel %vm506_vm3, %v2161_v35, %v2163_v29 }
  0x7f   : > { %6187 = vmatmul.mubr.msk.f32.gmra.mrb[32].mxu0 %vm1729_vm0, %v7361_v36  ;;  %v7413_v36 = vsel %vm2575_vm4, %v2627_v42, %v2629_v32  ;;  %v7428_v42 = vsel %vm506_vm3, %v2165_v3, %v2166_v60  ;;  %v2171_v32 = vrot.slane %v6941_v27, 1  ;;  %v2639_v35 = vrot.slane %v1712_v20, 2 }
  0x80   : > { %6189 = vmatprep.mubr.msk.f32.mxu0 %vm1729_vm0, %v7370_v28  ;;  %v7401_v28 = vsel %vm506_vm3, %v2156_v11, %v2158_v46  ;;  %8513 = vst [vmem:[#allocation52_spill] sm:$0xff] %v7413_v36  ;;  %v2634_v11 = vrot.slane %v1709_v0, 2  ;;  %v7418_v46 = vsel %vm2575_vm4, %v2631_v7, %v2632_v58  ;;  %v2170_v0 = vrot.slane %v6931_v18, 1  ;;  %v1715_v7 = vld [vmem:[#allocation15 + $0x148] sm:$0x3] }
  0x81   : > { %6140 = vmatmul.mubr.msk.f32.gmra.mrb[34].mxu1 %vm1729_vm0, %v7377_v22  ;;  %8514 = vst [vmem:[#allocation53_spill] sm:$0xff] %v7418_v46  ;;  %v2641_v3 = vrot.slane %v6931_v18, 2 }
  0x82   : > { %6142 = vmatprep.mubr.msk.f32.mxu1 %vm1729_vm0, %v7380_v59 }
  0x83   : > { %6190 = vmatmul.mubr.msk.f32.gmra.mrb[34].mxu0 %vm1729_vm0, %v7389_v40  ;;  %v2637_v40 = vrot.slane %v6896_v5, 2  ;;  %v7437_v5 = vsel %vm2575_vm4, %v2632_v58, %v2634_v11  ;;  %v7452_v58 = vsel %vm506_vm3, %v2170_v0, %v2171_v32  ;;  %v2176_v11 = vrot.slane %v6983_v49, 1 }
  0x84   : > { %6192 = vmatprep.mubr.msk.f32.mxu0 %vm1729_vm0, %v7394_v62  ;;  %v2168_v62 = vrot.slane %v1712_v20, 1  ;;  %8515 = vst [vmem:[#allocation54_spill] sm:$0xff] %v7437_v5  ;;  %v2175_v20 = vrot.slane %v6973_v45, 1  ;;  %v2646_v0 = vrot.slane %v6973_v45, 2 }
  0x85   : > { %6143 = vmatmul.mubr.msk.f32.gmra.mrb[36].mxu1 %vm1729_vm0, %v7401_v28  ;;  %v7442_v29 = vsel %vm2575_vm4, %v2636_v6, %v2637_v40  ;;  %v1718_v6 = vld [vmem:[#allocation15 + $0x160] sm:$0x3] }
  0x86   : > { %6145 = vmatprep.mubr.msk.f32.mxu1 %vm1729_vm0, %v7404_v14  ;;  %8516 = vst [vmem:[#allocation55_spill] sm:$0xff] %v7442_v29  ;;  %v7449_v57 = vsel %vm506_vm3, %v2166_v60, %v2168_v62  ;;  %v2644_v62 = vrot.slane %v1715_v7, 2 }
  0x87   : > { %6193 = vmatmul.mubr.msk.f32.gmra.mrb[36].mxu0 %vm1729_vm0, %v7413_v36  ;;  %v2642_v36 = vrot.slane %v6941_v27, 2  ;;  %v7461_v27 = vsel %vm2575_vm4, %v2637_v40, %v2639_v35  ;;  %v7476_v40 = vsel %vm506_vm3, %v2175_v20, %v2176_v11  ;;  %v2181_v35 = vrot.slane %v7021_v13, 1 }
  0x88   : > { %6195 = vmatprep.mubr.msk.f32.mxu0 %vm1729_vm0, %v7418_v46  ;;  %v2173_v46 = vrot.slane %v1715_v7, 1  ;;  %8517 = vst [vmem:[#allocation56_spill] sm:$0xff] %v7461_v27  ;;  %8519 = vst [vmem:[#allocation58_spill] sm:$0xff] %v7476_v40  ;;  %v2180_v7 = vrot.slane %v7011_v8, 1  ;;  %v2651_v20 = vrot.slane %v7011_v8, 2 }
  0x89   : > { %6146 = vmatmul.mubr.msk.f32.gmra.mrb[38].mxu1 %vm1729_vm0, %v7425_v23  ;;  %v7466_v60 = vsel %vm2575_vm4, %v2641_v3, %v2642_v36  ;;  %v1721_v3 = vld [vmem:[#allocation15 + $0x178] sm:$0x3] }
  0x8a   : > { %6148 = vmatprep.mubr.msk.f32.mxu1 %vm1729_vm0, %v7428_v42  ;;  %8518 = vst [vmem:[#allocation57_spill] sm:$0xff] %v7466_v60  ;;  %v7473_v18 = vsel %vm506_vm3, %v2171_v32, %v2173_v46  ;;  %v2649_v46 = vrot.slane %v1718_v6, 2 }
  0x8b   : > { %6196 = vmatmul.mubr.msk.f32.gmra.mrb[38].mxu0 %vm1729_vm0, %v7437_v5  ;;  %v2647_v5 = vrot.slane %v6983_v49, 2  ;;  %v7485_v49 = vsel %vm2575_vm4, %v2642_v36, %v2644_v62  ;;  %v7500_v36 = vsel %vm506_vm3, %v2180_v7, %v2181_v35  ;;  %v2654_v62 = vrot.slane %v1721_v3, 2 }
  0x8c   : > { %6198 = vmatprep.mubr.msk.f32.mxu0 %vm1729_vm0, %v7442_v29  ;;  %v2178_v29 = vrot.slane %v1718_v6, 1  ;;  %8521 = vst [vmem:[#allocation60_spill] sm:$0xff] %v7500_v36 }
  0x8d   : > { %6149 = vmatmul.mubr.msk.f32.gmra.mrb[40].mxu1 %vm1729_vm0, %v7449_v57  ;;  %v7490_v32 = vsel %vm2575_vm4, %v2646_v0, %v2647_v5  ;;  %v7507_v6 = vsel %vm2575_vm4, %v2647_v5, %v2649_v46  ;;  %v8535_v0 = vld [vmem:[#allocation46_spill] sm:$0xff]  ;;  %v7660_v46 = vld [vmem:[#allocation16 + $0x10] sm:$0x3] }
  0x8e   : > { %6151 = vmatprep.mubr.msk.f32.mxu1 %vm1729_vm0, %v7452_v58  ;;  %v7497_v45 = vsel %vm506_vm3, %v2176_v11, %v2178_v29  ;;  %v3379_v7 = vrot.slane %v8535_v0, 1 }
  0x8f   : > { %6199 = vmatmul.mubr.msk.f32.gmra.mrb[40].mxu0 %vm1729_vm0, %v7461_v27  ;;  %v2652_v27 = vrot.slane %v7021_v13, 2  ;;  %8520 = vst [vmem:[#allocation59_spill] sm:$0xff] %v7497_v45 }
  0x90   : > { %6201 = vmatprep.mubr.msk.f32.mxu0 %vm1729_vm0, %v7466_v60  ;;  %v2183_v60 = vrot.slane %v1721_v3, 1 }
  0x91   : > { %6152 = vmatmul.mubr.msk.f32.gmra.mrb[42].mxu1 %vm1729_vm0, %v7473_v18  ;;  %v7512_v29 = vsel %vm2575_vm4, %v2651_v20, %v2652_v27  ;;  %v7524_v5 = vsel %vm2575_vm4, %v2652_v27, %v2654_v62  ;;  %v8524_v27 = vld [vmem:[#allocation28_spill] sm:$0xff]  ;;  %v3382_v20 = vrot.slane %v7660_v46, 1 }
  0x92   : > { %6154 = vmatprep.mubr.msk.f32.mxu1 %vm1729_vm0, %v7476_v40  ;;  %v7517_v11 = vsel %vm506_vm3, %v2181_v35, %v2183_v60  ;;  %v7537_v60 = vld [vmem:[%s8388_s0 + $0x1c] sm:$0x7]  ;;  %v8536_v35 = vld [vmem:[#allocation48_spill] sm:$0xff] }
  0x93   : > { %6202 = vmatmul.mubr.msk.f32.gmra.mrb[42].mxu0 %vm1729_vm0, %v7485_v49  ;;  %8522 = vst [vmem:[#allocation61_spill] sm:$0xff] %v7517_v11  ;;  %v3380_v3 = vrot.slane %v8536_v35, 1 }
  0x94   : > { %6204 = vmatprep.mubr.msk.f32.mxu0 %vm1729_vm0, %v7490_v32 }
  0x95   : > { %6155 = vmatmul.mubr.msk.f32.gmra.mrb[44].mxu1 %vm1729_vm0, %v7497_v45  ;;  %v7672_v62 = vsel %vm506_vm3, %v3379_v7, %v3380_v3  ;;  %v8542_v7 = vld [vmem:[#allocation33_spill] sm:$0xff] }
  0x96   : > { %6157 = vmatprep.mubr.msk.f32.mxu1 %vm1729_vm0, %v7500_v36 }
  0x97   : > { %6205 = vmatmul.mubr.msk.f32.gmra.mrb[44].mxu0 %vm1729_vm0, %v7507_v6 }
  0x98   : > { %6207 = vmatprep.mubr.msk.f32.mxu0 %vm1729_vm0, %v7512_v29 }
  0x99   : > { %6158 = vmatmul.mubr.msk.f32.gmra.mrb[46].mxu1 %vm1729_vm0, %v7517_v11 }
  0x9a   : > { %6212 = vmatprep.mubr.msk.f32.mxu1 %vm1729_vm0, %v6825_v41  ;;  %v7548_v41 = vld [vmem:[%s8388_s0 + $0x20] sm:$0x7] }
  0x9b   : > { %6208 = vmatmul.mubr.msk.f32.gmra.mrb[46].mxu0 %vm1729_vm0, %v7524_v5 }
  0x9c   : > { %6262 = vmatprep.mubr.msk.f32.mxu0 %vm1729_vm0, %v7104_v63  ;;  %v8525_v63 = vld [vmem:[#allocation41_spill] sm:$0xff] }
  0x9d   : > { %6213 = vmatmul.mubr.msk.f32.vlgmr.msra.gmra.mrb[48].mxu1 %vm1729_vm0, %v6859_v53  ;;  %v8523_v53 = vld [vmem:[#allocation27_spill] sm:$0xff] }
  0x9e   : > { %6311 = vmatpush3.msk.msra.mxu1 %vm1826_vm1, %v7117_v21  ;;  %6215 = vmatprep.mubr.msk.f32.mxu1 %vm1729_vm0, %v6894_v4  ;;  %v8526_v21 = vld [vmem:[#allocation29_spill] sm:$0xff]  ;;  %8537 = vst [vmem:[#allocation27_spill] sm:$0xff] %v7672_v62 }
  0x9f   : > { %6263 = vmatmul.mubr.msk.f32.vlgmr.msra.gmra.mrb[48].mxu0 %vm1729_vm0, %v7130_v10  ;;  %6410 = vmatprep.subr.msk.mxu1 %vm1826_vm1, %v7537_v60  ;;  %v8527_v10 = vld [vmem:[#allocation19_spill] sm:$0xff] }
  0xa0   : > { %6361 = vmatpush3.msk.msra.mxu0 %vm1826_vm1, %v7135_v50  ;;  %6265 = vmatprep.mubr.msk.f32.mxu0 %vm1729_vm0, %v7138_v43  ;;  %v8528_v50 = vld [vmem:[#allocation20_spill] sm:$0xff] }
  0xa1   : > { %6216 = vmatmul.mubr.msk.f32.gmra.mrb[50].mxu1 %vm1729_vm0, %v6929_v17  ;;  %6460 = vmatprep.subr.msk.mxu0 %vm1826_vm1, %v7548_v41 }
  0xa2   : > { %6218 = vmatprep.mubr.msk.f32.mxu1 %vm1729_vm0, %v6939_v25 }
  0xa3   : > { %6266 = vmatmul.mubr.msk.f32.gmra.mrb[50].mxu0 %vm1729_vm0, %v7167_v1 }
  0xa4   : > { %6268 = vmatprep.mubr.msk.f32.mxu0 %vm1729_vm0, %v7170_v16 }
  0xa5   : > { %6219 = vmatmul.mubr.msk.f32.gmra.mrb[52].mxu1 %vm1729_vm0, %v6971_v44 }
  0xa6   : > { %6221 = vmatprep.mubr.msk.f32.mxu1 %vm1729_vm0, %v6981_v48 }
  0xa7   : > { %6269 = vmatmul.mubr.msk.f32.gmra.mrb[52].mxu0 %vm1729_vm0, %v7194_v19 }
  0xa8   : > { %6271 = vmatprep.mubr.msk.f32.mxu0 %vm1729_vm0, %v7197_v15 }
  0xa9   : > { %6222 = vmatmul.mubr.msk.f32.gmra.mrb[54].mxu1 %vm1729_vm0, %v8523_v53 }
  0xaa   : > { %6224 = vmatprep.mubr.msk.f32.mxu1 %vm1729_vm0, %v7019_v12 }
  0xab   : > { %6272 = vmatmul.mubr.msk.f32.gmra.mrb[54].mxu0 %vm1729_vm0, %v7224_v31 }
  0xac   : > { %6274 = vmatprep.mubr.msk.f32.mxu0 %vm1729_vm0, %v7227_v56 }
  0xad   : > { %6225 = vmatmul.mubr.msk.f32.gmra.mrb[56].mxu1 %vm1729_vm0, %v7041_v33 }
  0xae   : > { %6227 = vmatprep.mubr.msk.f32.mxu1 %vm1729_vm0, %v7043_v34 }
  0xaf   : > { %6275 = vmatmul.mubr.msk.f32.gmra.mrb[56].mxu0 %vm1729_vm0, %v7252_v9 }
  0xb0   : > { %6277 = vmatprep.mubr.msk.f32.mxu0 %vm1729_vm0, %v7258_v2 }
  0xb1   : > { %6228 = vmatmul.mubr.msk.f32.gmra.mrb[58].mxu1 %vm1729_vm0, %v8524_v27 }
  0xb2   : > { %6230 = vmatprep.mubr.msk.f32.mxu1 %vm1729_vm0, %v7062_v54 }
  0xb3   : > { %6278 = vmatmul.mubr.msk.f32.gmra.mrb[58].mxu0 %vm1729_vm0, %v8525_v63 }
  0xb4   : > { %6280 = vmatprep.mubr.msk.f32.mxu0 %vm1729_vm0, %v7290_v47 }
  0xb5   : > { %6231 = vmatmul.mubr.msk.f32.gmra.mrb[60].mxu1 %vm1729_vm0, %v8526_v21 }
  0xb6   : > { %6233 = vmatprep.mubr.msk.f32.mxu1 %vm1729_vm0, %v8527_v10  ;;  %v7681_v10 = vsel %vm506_vm3, %v3380_v3, %v3382_v20  ;;  %v8553_v3 = vld [vmem:[#allocation45_spill] sm:$0xff]  ;;  %v8554_v20 = vld [vmem:[#allocation47_spill] sm:$0xff] }
  0xb7   : > { %6281 = vmatmul.mubr.msk.f32.gmra.mrb[60].mxu0 %vm1729_vm0, %v7316_v55  ;;  %8538 = vst [vmem:[#allocation28_spill] sm:$0xff] %v7681_v10 }
  0xb8   : > { %6283 = vmatprep.mubr.msk.f32.mxu0 %vm1729_vm0, %v7319_v30 }
  0xb9   : > { %6234 = vmatmul.mubr.msk.f32.gmra.mrb[62].mxu1 %vm1729_vm0, %v8528_v50  ;;  %v8539_v50 = vld [vmem:[#allocation30_spill] sm:$0xff] }
  0xba   : > { %6236 = vmatprep.mubr.msk.f32.mxu1 %vm1729_vm0, %v6773_v24  ;;  %v8529_v24 = vld [vmem:[#allocation21_spill] sm:$0xff] }
  0xbb   : > { %6284 = vmatmul.mubr.msk.f32.gmra.mrb[62].mxu0 %vm1729_vm0, %v7344_v61 }
  0xbc   : > { %6286 = vmatprep.mubr.msk.f32.mxu0 %vm1729_vm0, %v7334_v51 }
  0xbd   : > { %6237 = vmatmul.mubr.msk.f32.gmra.mrb[64].mxu1 %vm1729_vm0, %v6780_v26  ;;  %v8530_v26 = vld [vmem:[#allocation22_spill] sm:$0xff] }
  0xbe   : > { %6239 = vmatprep.mubr.msk.f32.mxu1 %vm1729_vm0, %v6814_v37  ;;  %v8531_v37 = vld [vmem:[#allocation23_spill] sm:$0xff] }
  0xbf   : > { %6287 = vmatmul.mubr.msk.f32.gmra.mrb[64].mxu0 %vm1729_vm0, %v7377_v22 }
  0xc0   : > { %6289 = vmatprep.mubr.msk.f32.mxu0 %vm1729_vm0, %v7380_v59 }
  0xc1   : > { %6240 = vmatmul.mubr.msk.f32.gmra.mrb[66].mxu1 %vm1729_vm0, %v6816_v38  ;;  %v8532_v38 = vld [vmem:[#allocation24_spill] sm:$0xff] }
  0xc2   : > { %6242 = vmatprep.mubr.msk.f32.mxu1 %vm1729_vm0, %v6818_v39  ;;  %v8533_v39 = vld [vmem:[#allocation25_spill] sm:$0xff] }
  0xc3   : > { %6290 = vmatmul.mubr.msk.f32.gmra.mrb[66].mxu0 %vm1729_vm0, %v7401_v28 }
  0xc4   : > { %6292 = vmatprep.mubr.msk.f32.mxu0 %vm1729_vm0, %v7404_v14 }
  0xc5   : > { %6243 = vmatmul.mubr.msk.f32.gmra.mrb[68].mxu1 %vm1729_vm0, %v6857_v52  ;;  %v8534_v52 = vld [vmem:[#allocation26_spill] sm:$0xff] }
  0xc6   : > { %6245 = vmatprep.mubr.msk.f32.mxu1 %vm1729_vm0, %v8529_v24  ;;  %v8540_v24 = vld [vmem:[#allocation31_spill] sm:$0xff] }
  0xc7   : > { %6293 = vmatmul.mubr.msk.f32.gmra.mrb[68].mxu0 %vm1729_vm0, %v7425_v23 }
  0xc8   : > { %6295 = vmatprep.mubr.msk.f32.mxu0 %vm1729_vm0, %v7428_v42 }
  0xc9   : > { %6246 = vmatmul.mubr.msk.f32.gmra.mrb[70].mxu1 %vm1729_vm0, %v8530_v26  ;;  %v8541_v26 = vld [vmem:[#allocation32_spill] sm:$0xff] }
  0xca   : > { %6248 = vmatprep.mubr.msk.f32.mxu1 %vm1729_vm0, %v8531_v37 }
  0xcb   : > { %6296 = vmatmul.mubr.msk.f32.gmra.mrb[70].mxu0 %vm1729_vm0, %v7449_v57 }
  0xcc   : > { %6298 = vmatprep.mubr.msk.f32.mxu0 %vm1729_vm0, %v7452_v58 }
  0xcd   : > { %6249 = vmatmul.mubr.msk.f32.gmra.mrb[72].mxu1 %vm1729_vm0, %v8532_v38 }
  0xce   : > { %6251 = vmatprep.mubr.msk.f32.mxu1 %vm1729_vm0, %v8533_v39 }
  0xcf   : > { %6299 = vmatmul.mubr.msk.f32.gmra.mrb[72].mxu0 %vm1729_vm0, %v7473_v18 }
  0xd0   : > { %6301 = vmatprep.mubr.msk.f32.mxu0 %vm1729_vm0, %v7476_v40  ;;  %v8563_v40 = vld [vmem:[#allocation57_spill] sm:$0xff] }
  0xd1   : > { %6252 = vmatmul.mubr.msk.f32.gmra.mrb[74].mxu1 %vm1729_vm0, %v8534_v52 }
  0xd2   : > { %6254 = vmatprep.mubr.msk.f32.mxu1 %vm1729_vm0, %v7011_v8 }
  0xd3   : > { %6302 = vmatmul.mubr.msk.f32.gmra.mrb[74].mxu0 %vm1729_vm0, %v7497_v45  ;;  %v8561_v45 = vld [vmem:[#allocation55_spill] sm:$0xff] }
  0xd4   : > { %6304 = vmatprep.mubr.msk.f32.mxu0 %vm1729_vm0, %v7500_v36  ;;  %v8560_v36 = vld [vmem:[#allocation54_spill] sm:$0xff] }
  0xd5   : > { %6255 = vmatmul.mubr.msk.f32.gmra.mrb[76].mxu1 %vm1729_vm0, %v7021_v13 }
  0xd6   : > { %6257 = vmatprep.mubr.msk.f32.mxu1 %vm1729_vm0, %v8535_v0 }
  0xd7   : > { %6305 = vmatmul.mubr.msk.f32.gmra.mrb[76].mxu0 %vm1729_vm0, %v7517_v11  ;;  %v8559_v11 = vld [vmem:[#allocation53_spill] sm:$0xff] }
  0xd8   : > { %6307 = vmatprep.mubr.msk.f32.mxu0 %vm1729_vm0, %v7672_v62  ;;  %v8558_v62 = vld [vmem:[#allocation52_spill] sm:$0xff] }
  0xd9   : > { %6258 = vmatmul.mubr.msk.f32.gmra.mrb[78].mxu1 %vm1729_vm0, %v8536_v35 }
  0xda   : > { %6312 = vmatprep.mubr.msk.f32.mxu1 %vm1729_vm0, %v8539_v50  ;;  %v8555_v50 = vld [vmem:[#allocation49_spill] sm:$0xff] }
  0xdb   : > { %6308 = vmatmul.mubr.msk.f32.gmra.mrb[78].mxu0 %vm1729_vm0, %v7681_v10  ;;  %v8557_v10 = vld [vmem:[#allocation51_spill] sm:$0xff] }
  0xdc   : > { %6362 = vmatprep.mubr.msk.f32.mxu0 %vm1729_vm0, %v6894_v4  ;;  %v8543_v4 = vld [vmem:[#allocation34_spill] sm:$0xff] }
  0xdd   : > { %6313 = vmatmul.mubr.msk.f32.vlgmr.msra.gmra.mrb[80].mxu1 %vm1729_vm0, %v8540_v24  ;;  %v6551_v24 = vld [vmem:[#allocation15 + $0xf0] sm:$0xff] }
  0xde   : > { %6411 = vmatpush3.msk.msra.mxu1 %vm1826_vm1, %v7537_v60  ;;  %6315 = vmatprep.mubr.msk.f32.mxu1 %vm1729_vm0, %v8541_v26  ;;  %v8544_v60 = vld [vmem:[#allocation35_spill] sm:$0xff] }
  0xdf   : > { %6363 = vmatmul.mubr.msk.f32.vlgmr.msra.gmra.mrb[80].mxu0 %vm1729_vm0, %v6929_v17  ;;  %v8545_v17 = vld [vmem:[#allocation36_spill] sm:$0xff] }
  0xe0   : > { %6461 = vmatpush3.msk.msra.mxu0 %vm1826_vm1, %v7548_v41  ;;  %6365 = vmatprep.mubr.msk.f32.mxu0 %vm1729_vm0, %v6939_v25  ;;  %v8546_v25 = vld [vmem:[#allocation37_spill] sm:$0xff]  ;;  %v8547_v41 = vld [vmem:[#allocation38_spill] sm:$0xff] }
  0xe1   : > { %6316 = vmatmul.mubr.msk.f32.gmra.mrb[82].mxu1 %vm1729_vm0, %v8542_v7 }
  0xe2   : > { %6318 = vmatprep.mubr.msk.f32.mxu1 %vm1729_vm0, %v8543_v4 }
  0xe3   : > { %6366 = vmatmul.mubr.msk.f32.gmra.mrb[82].mxu0 %vm1729_vm0, %v6971_v44  ;;  %v8548_v44 = vld [vmem:[#allocation39_spill] sm:$0xff] }
  0xe4   : > { %6368 = vmatprep.mubr.msk.f32.mxu0 %vm1729_vm0, %v6981_v48  ;;  %v8549_v48 = vld [vmem:[#allocation40_spill] sm:$0xff] }
  0xe5   : > { %6319 = vmatmul.mubr.msk.f32.gmra.mrb[84].mxu1 %vm1729_vm0, %v8544_v60 }
  0xe6   : > { %6321 = vmatprep.mubr.msk.f32.mxu1 %vm1729_vm0, %v8545_v17 }
  0xe7   : > { %6369 = vmatmul.mubr.msk.f32.gmra.mrb[84].mxu0 %vm1729_vm0, %v8523_v53  ;;  %v8551_v53 = vld [vmem:[#allocation43_spill] sm:$0xff] }
  0xe8   : > { %6371 = vmatprep.mubr.msk.f32.mxu0 %vm1729_vm0, %v7019_v12  ;;  %v8550_v12 = vld [vmem:[#allocation42_spill] sm:$0xff] }
  0xe9   : > { %6322 = vmatmul.mubr.msk.f32.gmra.mrb[86].mxu1 %vm1729_vm0, %v8546_v25 }
  0xea   : > { %6324 = vmatprep.mubr.msk.f32.mxu1 %vm1729_vm0, %v8547_v41 }
  0xeb   : > { %6372 = vmatmul.mubr.msk.f32.gmra.mrb[86].mxu0 %vm1729_vm0, %v7041_v33  ;;  %v6547_v33 = vld [vmem:[#allocation15 + $0xc0] sm:$0xff] }
  0xec   : > { %6374 = vmatprep.mubr.msk.f32.mxu0 %vm1729_vm0, %v7043_v34  ;;  %v8552_v34 = vld [vmem:[#allocation44_spill] sm:$0xff] }
  0xed   : > { %6325 = vmatmul.mubr.msk.f32.gmra.mrb[88].mxu1 %vm1729_vm0, %v8548_v44 }
  0xee   : > { %6327 = vmatprep.mubr.msk.f32.mxu1 %vm1729_vm0, %v8549_v48 }
  0xef   : > { %6375 = vmatmul.mubr.msk.f32.gmra.mrb[88].mxu0 %vm1729_vm0, %v8524_v27  ;;  %v6548_v27 = vld [vmem:[#allocation15 + $0xc8] sm:$0xff] }
  0xf0   : > { %6377 = vmatprep.mubr.msk.f32.mxu0 %vm1729_vm0, %v7062_v54  ;;  %v6549_v54 = vld [vmem:[#allocation15 + $0xd8] sm:$0xff] }
  0xf1   : > { %6328 = vmatmul.mubr.msk.f32.gmra.mrb[90].mxu1 %vm1729_vm0, %v8550_v12 }
  0xf2   : > { %6330 = vmatprep.mubr.msk.f32.mxu1 %vm1729_vm0, %v8551_v53 }
  0xf3   : > { %6378 = vmatmul.mubr.msk.f32.gmra.mrb[90].mxu0 %vm1729_vm0, %v8526_v21  ;;  %v6550_v21 = vld [vmem:[#allocation15 + $0xe0] sm:$0xff] }
  0xf4   : > { %6380 = vmatprep.mubr.msk.f32.mxu0 %vm1729_vm0, %v6547_v33  ;;  %v8556_v33 = vld [vmem:[#allocation50_spill] sm:$0xff] }
  0xf5   : > { %6331 = vmatmul.mubr.msk.f32.gmra.mrb[92].mxu1 %vm1729_vm0, %v8552_v34 }
  0xf6   : > { %6333 = vmatprep.mubr.msk.f32.mxu1 %vm1729_vm0, %v8553_v3 }
  0xf7   : > { %6381 = vmatmul.mubr.msk.f32.gmra.mrb[92].mxu0 %vm1729_vm0, %v6548_v27  ;;  %v6552_v27 = vld [vmem:[#allocation15 + $0xf8] sm:$0xff] }
  0xf8   : > { %6383 = vmatprep.mubr.msk.f32.mxu0 %vm1729_vm0, %v6549_v54  ;;  %v6553_v54 = vld [vmem:[#allocation15 + $0x108] sm:$0xff] }
  0xf9   : > { %6334 = vmatmul.mubr.msk.f32.gmra.mrb[94].mxu1 %vm1729_vm0, %v8554_v20 }
  0xfa   : > { %6336 = vmatprep.mubr.msk.f32.mxu1 %vm1729_vm0, %v8555_v50 }
  0xfb   : > { %6384 = vmatmul.mubr.msk.f32.gmra.mrb[94].mxu0 %vm1729_vm0, %v6550_v21  ;;  %v6554_v21 = vld [vmem:[#allocation15 + $0x110] sm:$0xff] }
  0xfc   : > { %6386 = vmatprep.mubr.msk.f32.mxu0 %vm1729_vm0, %v6551_v24  ;;  %v6555_v24 = vld [vmem:[#allocation15 + $0x120] sm:$0xff] }
  0xfd   : > { %6337 = vmatmul.mubr.msk.f32.gmra.mrb[96].mxu1 %vm1729_vm0, %v8556_v33 }
  0xfe   : > { %6339 = vmatprep.mubr.msk.f32.mxu1 %vm1729_vm0, %v8557_v10 }
  0xff   : > { %6387 = vmatmul.mubr.msk.f32.gmra.mrb[96].mxu0 %vm1729_vm0, %v6552_v27  ;;  %v6556_v27 = vld [vmem:[#allocation15 + $0x128] sm:$0xff] }
 0x100   : > { %6389 = vmatprep.mubr.msk.f32.mxu0 %vm1729_vm0, %v6553_v54  ;;  %v8562_v54 = vld [vmem:[#allocation56_spill] sm:$0xff] }
 0x101   : > { %6340 = vmatmul.mubr.msk.f32.gmra.mrb[98].mxu1 %vm1729_vm0, %v8558_v62 }
 0x102   : > { %6342 = vmatprep.mubr.msk.f32.mxu1 %vm1729_vm0, %v8559_v11 }
 0x103   : > { %6390 = vmatmul.mubr.msk.f32.gmra.mrb[98].mxu0 %vm1729_vm0, %v6554_v21 }
 0x104   : > { %6392 = vmatprep.mubr.msk.f32.mxu0 %vm1729_vm0, %v6555_v24  ;;  %v3714_v24 = vrot.slane %v8535_v0, 2 }
 0x105   : > { %6343 = vmatmul.mubr.msk.f32.gmra.mrb[100].mxu1 %vm1729_vm0, %v8560_v36 }
 0x106   : > { %6345 = vmatprep.mubr.msk.f32.mxu1 %vm1729_vm0, %v8561_v45 }
 0x107   : > { %6393 = vmatmul.mubr.msk.f32.gmra.mrb[100].mxu0 %vm1729_vm0, %v6556_v27  ;;  %v3715_v27 = vrot.slane %v8536_v35, 2 }
 0x108   : > { %6395 = vmatprep.mubr.msk.f32.mxu0 %vm1729_vm0, %v8531_v37  ;;  %v6064_v21 = vpop.f32.mrb[0].mxu0 }
 0x109   : > { %6346 = vmatmul.mubr.msk.f32.gmra.mrb[102].mxu1 %vm1729_vm0, %v8562_v54  ;;  %2057 = vst.msk [vmem:[#allocation2 + $0x8] sm:$0xff] %vm2055_vm5, %v6064_v21  ;;  %v1896_v37 = vpop.f32.mrb[1].mxu0  ;;  %v3717_v21 = vrot.slane %v7660_v46, 2 }
 0x10a   : > { %6348 = vmatprep.mubr.msk.f32.mxu1 %vm1729_vm0, %v8563_v40  ;;  %2056 = vst.msk [vmem:[#allocation2] sm:$0xff] %vm2055_vm5, %v1896_v37 }
 0x10b   : > { %6396 = vmatmul.mubr.msk.f32.gmra.mrb[102].mxu0 %vm1729_vm0, %v8532_v38 }
 0x10c   : > { %6398 = vmatprep.mubr.msk.f32.mxu0 %vm1729_vm0, %v8533_v39 }
 0x10d   : > { %6349 = vmatmul.mubr.msk.f32.gmra.mrb[104].mxu1 %vm1729_vm0, %v7485_v49 }
 0x10e   : > { %6351 = vmatprep.mubr.msk.f32.mxu1 %vm1729_vm0, %v7490_v32 }
 0x10f   : > { %6399 = vmatmul.mubr.msk.f32.gmra.mrb[104].mxu0 %vm1729_vm0, %v8534_v52  ;;  %v7801_v52 = vsel %vm2575_vm4, %v3714_v24, %v3715_v27  ;;  %v7824_v24 = vld [vmem:[#allocation16 + $0x20] sm:$0xff] }
 0x110   : > { %v6088_v38 = vpop.f32.mrb[0].mxu1  ;;  %6401 = vmatprep.mubr.msk.f32.mxu0 %vm1729_vm0, %v7011_v8 }
 0x111   : > { %2073 = vst.msk [vmem:[#allocation2 + $0x88] sm:$0xff] %vm2055_vm5, %v6088_v38  ;;  %v1976_v39 = vpop.f32.mrb[1].mxu1  ;;  %6352 = vmatmul.mubr.msk.f32.gmra.mrb[106].mxu1 %vm1729_vm0, %v7507_v6 }
 0x112   : > { %2072 = vst.msk [vmem:[#allocation2 + $0x80] sm:$0xff] %vm2055_vm5, %v1976_v39  ;;  %6354 = vmatprep.mubr.msk.f32.mxu1 %vm1729_vm0, %v7512_v29  ;;  %v7810_v39 = vld [vmem:[#allocation16 + $0x18] sm:$0xff] }
 0x113   : > { %6402 = vmatmul.mubr.msk.f32.gmra.mrb[106].mxu0 %vm1729_vm0, %v7021_v13  ;;  %v7816_v13 = vsel %vm2575_vm4, %v3715_v27, %v3717_v21 }
 0x114   : > { %v6091_v8 = vpop.f32.mrb[2].mxu1  ;;  %6404 = vmatprep.mubr.msk.f32.mxu0 %vm1729_vm0, %v8535_v0 }
 0x115   : > { %2075 = vst.msk [vmem:[#allocation2 + $0x98] sm:$0xff] %vm2055_vm5, %v6091_v8  ;;  %v1986_v37 = vpop.f32.mrb[3].mxu1  ;;  %6355 = vmatmul.mubr.msk.f32.gmra.mrb[108].mxu1 %vm1729_vm0, %v7524_v5 }
 0x116   : > { %v6067_v38 = vpop.f32.mrb[2].mxu0  ;;  %2074 = vst.msk [vmem:[#allocation2 + $0x90] sm:$0xff] %vm2055_vm5, %v1986_v37  ;;  %6357 = vmatprep.mubr.msk.f32.mxu1 %vm1729_vm0, %v7801_v52 }
 0x117   : > { %2059 = vst.msk [vmem:[#allocation2 + $0x18] sm:$0xff] %vm2055_vm5, %v6067_v38  ;;  %v1906_v0 = vpop.f32.mrb[3].mxu0  ;;  %6405 = vmatmul.mubr.msk.f32.gmra.mrb[108].mxu0 %vm1729_vm0, %v8536_v35 }
 0x118   : > { %2058 = vst.msk [vmem:[#allocation2 + $0x10] sm:$0xff] %vm2055_vm5, %v1906_v0  ;;  %v6094_v46 = vpop.f32.mrb[4].mxu1  ;;  %6407 = vmatprep.mubr.msk.f32.mxu0 %vm1729_vm0, %v7810_v39 }
 0x119   : > { %2077 = vst.msk [vmem:[#allocation2 + $0xa8] sm:$0xff] %vm2055_vm5, %v6094_v46  ;;  %v1996_v8 = vpop.f32.mrb[5].mxu1  ;;  %6358 = vmatmul.mubr.msk.f32.gmra.mrb[110].mxu1 %vm1729_vm0, %v7816_v13 }
 0x11a   : > { %2076 = vst.msk [vmem:[#allocation2 + $0xa0] sm:$0xff] %vm2055_vm5, %v1996_v8  ;;  %6412 = vmatprep.mubr.msk.f32.mxu1 %vm1729_vm0, %v7138_v43  ;;  %v6070_v27 = vpop.f32.mrb[4].mxu0  ;;  %v2479_v8 = vld [vmem:[#allocation2] sm:$0xff] }
 0x11b   : > { %2061 = vst.msk [vmem:[#allocation2 + $0x28] sm:$0xff] %vm2055_vm5, %v6070_v27  ;;  %v1916_v35 = vpop.f32.mrb[5].mxu0  ;;  %6408 = vmatmul.mubr.msk.f32.gmra.mrb[110].mxu0 %vm1729_vm0, %v7824_v24 }
 0x11c   : > { %v6097_v21 = vpop.f32.mrb[6].mxu1  ;;  %2060 = vst.msk [vmem:[#allocation2 + $0x20] sm:$0xff] %vm2055_vm5, %v1916_v35  ;;  %6462 = vmatprep.mubr.msk.f32.mxu0 %vm1729_vm0, %v8541_v26 }
 0x11d   : > { %2079 = vst.msk [vmem:[#allocation2 + $0xb8] sm:$0xff] %vm2055_vm5, %v6097_v21  ;;  %v2006_v37 = vpop.f32.mrb[7].mxu1  ;;  %6413 = vmatmul.mubr.msk.f32.vlgmr.msra.gmra.mrb[112].mxu1 %vm1729_vm0, %v7167_v1 }
 0x11e   : > { %2078 = vst.msk [vmem:[#allocation2 + $0xb0] sm:$0xff] %vm2055_vm5, %v2006_v37  ;;  %6415 = vmatprep.mubr.msk.f32.mxu1 %vm1729_vm0, %v7170_v16  ;;  %v6073_v43 = vpop.f32.mrb[6].mxu0  ;;  %v2482_v35 = vld [vmem:[#allocation2 + $0x18] sm:$0xff] }
 0x11f   : > { %2063 = vst.msk [vmem:[#allocation2 + $0x38] sm:$0xff] %vm2055_vm5, %v6073_v43  ;;  %v1926_v38 = vpop.f32.mrb[7].mxu0  ;;  %6463 = vmatmul.mubr.msk.f32.vlgmr.msra.gmra.mrb[112].mxu0 %vm1729_vm0, %v8542_v7  ;;  %v2481_v37 = vld [vmem:[#allocation2 + $0x10] sm:$0xff] }
 0x120   : > { %v6100_v0 = vpop.f32.mrb[8].mxu1  ;;  %2062 = vst.msk [vmem:[#allocation2 + $0x30] sm:$0xff] %vm2055_vm5, %v1926_v38  ;;  %6465 = vmatprep.mubr.msk.f32.mxu0 %vm1729_vm0, %v8543_v4 }
 0x121   : > { %2081 = vst.msk [vmem:[#allocation2 + $0xc8] sm:$0xff] %vm2055_vm5, %v6100_v0  ;;  %v2016_v1 = vpop.f32.mrb[9].mxu1  ;;  %6416 = vmatmul.mubr.msk.f32.gmra.mrb[114].mxu1 %vm1729_vm0, %v7194_v19 }
 0x122   : > { %2080 = vst.msk [vmem:[#allocation2 + $0xc0] sm:$0xff] %vm2055_vm5, %v2016_v1  ;;  %6418 = vmatprep.mubr.msk.f32.mxu1 %vm1729_vm0, %v7197_v15  ;;  %v6076_v16 = vpop.f32.mrb[8].mxu0  ;;  %v2484_v38 = vld [vmem:[#allocation2 + $0x28] sm:$0xff] }
 0x123   : > { %2065 = vst.msk [vmem:[#allocation2 + $0x48] sm:$0xff] %vm2055_vm5, %v6076_v16  ;;  %v1936_v26 = vpop.f32.mrb[9].mxu0  ;;  %6466 = vmatmul.mubr.msk.f32.gmra.mrb[114].mxu0 %vm1729_vm0, %v8544_v60  ;;  %v2483_v1 = vld [vmem:[#allocation2 + $0x20] sm:$0xff] }
 0x124   : > { %v6103_v7 = vpop.f32.mrb[10].mxu1  ;;  %2064 = vst.msk [vmem:[#allocation2 + $0x40] sm:$0xff] %vm2055_vm5, %v1936_v26  ;;  %6468 = vmatprep.mubr.msk.f32.mxu0 %vm1729_vm0, %v8545_v17 }
 0x125   : > { %2083 = vst.msk [vmem:[#allocation2 + $0xd8] sm:$0xff] %vm2055_vm5, %v6103_v7  ;;  %v2026_v19 = vpop.f32.mrb[11].mxu1  ;;  %6419 = vmatmul.mubr.msk.f32.gmra.mrb[116].mxu1 %vm1729_vm0, %v7224_v31 }
 0x126   : > { %2082 = vst.msk [vmem:[#allocation2 + $0xd0] sm:$0xff] %vm2055_vm5, %v2026_v19  ;;  %6421 = vmatprep.mubr.msk.f32.mxu1 %vm1729_vm0, %v7227_v56  ;;  %v6079_v15 = vpop.f32.mrb[10].mxu0 }
 0x127   : > { %2067 = vst.msk [vmem:[#allocation2 + $0x58] sm:$0xff] %vm2055_vm5, %v6079_v15  ;;  %v1946_v4 = vpop.f32.mrb[11].mxu0  ;;  %6469 = vmatmul.mubr.msk.f32.gmra.mrb[116].mxu0 %vm1729_vm0, %v8546_v25 }
 0x128   : > { %v6106_v60 = vpop.f32.mrb[12].mxu1  ;;  %2066 = vst.msk [vmem:[#allocation2 + $0x50] sm:$0xff] %vm2055_vm5, %v1946_v4  ;;  %6471 = vmatprep.mubr.msk.f32.mxu0 %vm1729_vm0, %v8547_v41  ;;  %v2486_v4 = vld [vmem:[#allocation2 + $0x38] sm:$0xff] }
 0x129   : > { %2085 = vst.msk [vmem:[#allocation2 + $0xe8] sm:$0xff] %vm2055_vm5, %v6106_v60  ;;  %v2036_v31 = vpop.f32.mrb[13].mxu1  ;;  %6422 = vmatmul.mubr.msk.f32.gmra.mrb[118].mxu1 %vm1729_vm0, %v7252_v9  ;;  %v2485_v60 = vld [vmem:[#allocation2 + $0x30] sm:$0xff] }
 0x12a   : > { %2084 = vst.msk [vmem:[#allocation2 + $0xe0] sm:$0xff] %vm2055_vm5, %v2036_v31  ;;  %6424 = vmatprep.mubr.msk.f32.mxu1 %vm1729_vm0, %v7258_v2  ;;  %v6082_v56 = vpop.f32.mrb[12].mxu0 }
 0x12b   : > { %2069 = vst.msk [vmem:[#allocation2 + $0x68] sm:$0xff] %vm2055_vm5, %v6082_v56  ;;  %v1956_v17 = vpop.f32.mrb[13].mxu0  ;;  %6472 = vmatmul.mubr.msk.f32.gmra.mrb[118].mxu0 %vm1729_vm0, %v8548_v44 }
 0x12c   : > { %v6109_v25 = vpop.f32.mrb[14].mxu1  ;;  %2068 = vst.msk [vmem:[#allocation2 + $0x60] sm:$0xff] %vm2055_vm5, %v1956_v17  ;;  %6474 = vmatprep.mubr.msk.f32.mxu0 %vm1729_vm0, %v8549_v48  ;;  %v2480_v48 = vld [vmem:[#allocation2 + $0x8] sm:$0xff] }
 0x12d   : > { %2087 = vst.msk [vmem:[#allocation2 + $0xf8] sm:$0xff] %vm2055_vm5, %v6109_v25  ;;  %v2046_v9 = vpop.f32.mrb[15].mxu1  ;;  %6425 = vmatmul.mubr.msk.f32.gmra.mrb[120].mxu1 %vm1729_vm0, %v8525_v63 }
 0x12e   : > { %2086 = vst.msk [vmem:[#allocation2 + $0xf0] sm:$0xff] %vm2055_vm5, %v2046_v9  ;;  %6427 = vmatprep.mubr.msk.f32.mxu1 %vm1729_vm0, %v7290_v47  ;;  %v6085_v2 = vpop.f32.mrb[14].mxu0 }
 0x12f   : > { %2071 = vst.msk [vmem:[#allocation2 + $0x78] sm:$0xff] %vm2055_vm5, %v6085_v2  ;;  %v1966_v41 = vpop.f32.mrb[15].mxu0  ;;  %6475 = vmatmul.mubr.msk.f32.gmra.mrb[120].mxu0 %vm1729_vm0, %v8550_v12  ;;  %v2488_v2 = vld [vmem:[#allocation2 + $0x48] sm:$0xff] }
 0x130   : > { %v6114_v44 = vpop.f32.mrb[16].mxu1  ;;  %2070 = vst.msk [vmem:[#allocation2 + $0x70] sm:$0xff] %vm2055_vm5, %v1966_v41  ;;  %6477 = vmatprep.mubr.msk.f32.mxu0 %vm1729_vm0, %v8551_v53 }
 0x131   : > { %v2512_v63 = vadd.f32 %v6114_v44, %v2480_v48  ;;  %v2320_v46 = vpop.f32.mrb[17].mxu1  ;;  %6428 = vmatmul.mubr.msk.f32.gmra.mrb[122].mxu1 %vm1729_vm0, %v7316_v55  ;;  %v2487_v44 = vld [vmem:[#allocation2 + $0x40] sm:$0xff] }
 0x132   : > { %v2511_v47 = vadd.f32 %v2479_v8, %v2320_v46  ;;  %6430 = vmatprep.mubr.msk.f32.mxu1 %vm1729_vm0, %v7319_v30  ;;  %v6164_v27 = vpop.f32.mrb[16].mxu0 }
 0x133   : > { %2544 = vst.msk [vmem:[#allocation2 + $0x8] sm:$0xff] %vm2055_vm5, %v2512_v63  ;;  %v2791_v12 = vpop.f32.mrb[17].mxu0  ;;  %6478 = vmatmul.mubr.msk.f32.gmra.mrb[122].mxu0 %vm1729_vm0, %v8552_v34 }
 0x134   : > { %2543 = vst.msk [vmem:[#allocation2] sm:$0xff] %vm2055_vm5, %v2511_v47  ;;  %v6117_v53 = vpop.f32.mrb[18].mxu1  ;;  %6480 = vmatprep.mubr.msk.f32.mxu0 %vm1729_vm0, %v8553_v3 }
 0x135   : > { %v2514_v21 = vadd.f32 %v6117_v53, %v2482_v35  ;;  %v2330_v55 = vpop.f32.mrb[19].mxu1  ;;  %6431 = vmatmul.mubr.msk.f32.gmra.mrb[124].mxu1 %vm1729_vm0, %v7344_v61  ;;  %v2489_v53 = vld [vmem:[#allocation2 + $0x50] sm:$0xff] }
 0x136   : > { %v2513_v30 = vadd.f32 %v2481_v37, %v2330_v55  ;;  %6433 = vmatprep.mubr.msk.f32.mxu1 %vm1729_vm0, %v7334_v51  ;;  %v6167_v43 = vpop.f32.mrb[18].mxu0 }
 0x137   : > { %2546 = vst.msk [vmem:[#allocation2 + $0x18] sm:$0xff] %vm2055_vm5, %v2514_v21  ;;  %v2801_v34 = vpop.f32.mrb[19].mxu0  ;;  %6481 = vmatmul.mubr.msk.f32.gmra.mrb[124].mxu0 %vm1729_vm0, %v8554_v20 }
 0x138   : > { %2545 = vst.msk [vmem:[#allocation2 + $0x10] sm:$0xff] %vm2055_vm5, %v2513_v30  ;;  %v6120_v3 = vpop.f32.mrb[20].mxu1  ;;  %6483 = vmatprep.mubr.msk.f32.mxu0 %vm1729_vm0, %v8555_v50 }
 0x139   : > { %v2516_v0 = vadd.f32 %v6120_v3, %v2484_v38  ;;  %v2340_v61 = vpop.f32.mrb[21].mxu1  ;;  %6434 = vmatmul.mubr.msk.f32.gmra.mrb[126].mxu1 %vm1729_vm0, %v7377_v22  ;;  %v2491_v3 = vld [vmem:[#allocation2 + $0x60] sm:$0xff] }
 0x13a   : > { %v2515_v51 = vadd.f32 %v2483_v1, %v2340_v61  ;;  %v2951_v16 = vld [vmem:[#allocation2 + $0x8] sm:$0xff]  ;;  %6436 = vmatprep.mubr.msk.f32.mxu1 %vm1729_vm0, %v7380_v59  ;;  %v6170_v26 = vpop.f32.mrb[20].mxu0 }
 0x13b   : > { %2548 = vst.msk [vmem:[#allocation2 + $0x28] sm:$0xff] %vm2055_vm5, %v2516_v0  ;;  %v2983_v20 = vadd.f32 %v6164_v27, %v2951_v16  ;;  %v2950_v7 = vld [vmem:[#allocation2] sm:$0xff]  ;;  %v2811_v19 = vpop.f32.mrb[21].mxu0  ;;  %6484 = vmatmul.mubr.msk.f32.gmra.mrb[126].mxu0 %vm1729_vm0, %v8556_v33  ;;  %v2490_v27 = vld [vmem:[#allocation2 + $0x58] sm:$0xff] }
 0x13c   : > { %2547 = vst.msk [vmem:[#allocation2 + $0x20] sm:$0xff] %vm2055_vm5, %v2515_v51  ;;  %v2982_v50 = vadd.f32 %v2950_v7, %v2791_v12  ;;  %v6123_v15 = vpop.f32.mrb[22].mxu1  ;;  %6486 = vmatprep.mubr.msk.f32.mxu0 %vm1729_vm0, %v8557_v10  ;;  %v8564_v0 = vld [vmem:[#allocation58_spill] sm:$0xff] }
 0x13d   : > { %3015 = vst.msk [vmem:[#allocation2 + $0x8] sm:$0xff] %vm2055_vm5, %v2983_v20  ;;  %v2518_v22 = vadd.f32 %v6123_v15, %v2486_v4  ;;  %v2350_v59 = vpop.f32.mrb[23].mxu1  ;;  %6437 = vmatmul.mubr.msk.f32.gmra.mrb[128].mxu1 %vm1729_vm0, %v7401_v28  ;;  %v8566_v4 = vld [vmem:[#allocation60_spill] sm:$0xff] }
 0x13e   : > { %3014 = vst.msk [vmem:[#allocation2] sm:$0xff] %vm2055_vm5, %v2982_v50  ;;  %v2517_v31 = vadd.f32 %v2485_v60, %v2350_v59  ;;  %v2953_v33 = vld [vmem:[#allocation2 + $0x18] sm:$0xff]  ;;  %6439 = vmatprep.mubr.msk.f32.mxu1 %vm1729_vm0, %v7404_v14  ;;  %v6173_v56 = vpop.f32.mrb[22].mxu0  ;;  %v4382_v59 = vrot.slane %v7810_v39, 1 }
 0x13f   : > { %2550 = vst.msk [vmem:[#allocation2 + $0x38] sm:$0xff] %vm2055_vm5, %v2518_v22  ;;  %v2985_v17 = vadd.f32 %v6167_v43, %v2953_v33  ;;  %v2952_v10 = vld [vmem:[#allocation2 + $0x10] sm:$0xff]  ;;  %v2821_v25 = vpop.f32.mrb[23].mxu0  ;;  %6487 = vmatmul.mubr.msk.f32.gmra.mrb[128].mxu0 %vm1729_vm0, %v8558_v62  ;;  %v2492_v43 = vld [vmem:[#allocation2 + $0x68] sm:$0xff]  ;;  %v8565_v50 = vld [vmem:[#allocation59_spill] sm:$0xff] }
 0x140   : > { %2549 = vst.msk [vmem:[#allocation2 + $0x30] sm:$0xff] %vm2055_vm5, %v2517_v31  ;;  %v2984_v9 = vadd.f32 %v2952_v10, %v2801_v34  ;;  %v6126_v28 = vpop.f32.mrb[24].mxu1  ;;  %6489 = vmatprep.mubr.msk.f32.mxu0 %vm1729_vm0, %v8559_v11 }
 0x141   : > { %3017 = vst.msk [vmem:[#allocation2 + $0x18] sm:$0xff] %vm2055_vm5, %v2985_v17  ;;  %v2520_v14 = vadd.f32 %v6126_v28, %v2488_v2  ;;  %v2360_v41 = vpop.f32.mrb[25].mxu1  ;;  %6440 = vmatmul.mubr.msk.f32.gmra.mrb[130].mxu1 %vm1729_vm0, %v7425_v23  ;;  %v4718_v28 = vrot.slane %v7824_v24, 2 }
 0x142   : > { %3016 = vst.msk [vmem:[#allocation2 + $0x10] sm:$0xff] %vm2055_vm5, %v2984_v9  ;;  %v2519_v48 = vadd.f32 %v2487_v44, %v2360_v41  ;;  %v2955_v62 = vld [vmem:[#allocation2 + $0x28] sm:$0xff]  ;;  %6442 = vmatprep.mubr.msk.f32.mxu1 %vm1729_vm0, %v7428_v42  ;;  %v6176_v63 = vpop.f32.mrb[24].mxu0  ;;  %v4717_v9 = vrot.slane %v7810_v39, 2  ;;  %v2495_v41 = vld [vmem:[#allocation2 + $0x80] sm:$0xff] }
 0x143   : > { %2552 = vst.msk [vmem:[#allocation2 + $0x48] sm:$0xff] %vm2055_vm5, %v2520_v14  ;;  %v2987_v46 = vadd.f32 %v6170_v26, %v2955_v62  ;;  %v2954_v11 = vld [vmem:[#allocation2 + $0x20] sm:$0xff]  ;;  %v2831_v8 = vpop.f32.mrb[25].mxu0  ;;  %6490 = vmatmul.mubr.msk.f32.gmra.mrb[130].mxu0 %vm1729_vm0, %v8560_v36  ;;  %v2494_v26 = vld [vmem:[#allocation2 + $0x78] sm:$0xff]  ;;  %v8567_v44 = vld [vmem:[#allocation61_spill] sm:$0xff] }
 0x144   : > { %2551 = vst.msk [vmem:[#allocation2 + $0x40] sm:$0xff] %vm2055_vm5, %v2519_v48  ;;  %v2986_v47 = vadd.f32 %v2954_v11, %v2811_v19  ;;  %v6129_v23 = vpop.f32.mrb[26].mxu1  ;;  %6492 = vmatprep.mubr.msk.f32.mxu0 %vm1729_vm0, %v8561_v45  ;;  %v2493_v19 = vld [vmem:[#allocation2 + $0x70] sm:$0xff]  ;;  %v8568_v62 = vld [vmem:[#allocation27_spill] sm:$0xff] }
 0x145   : > { %3019 = vst.msk [vmem:[#allocation2 + $0x28] sm:$0xff] %vm2055_vm5, %v2987_v46  ;;  %v2522_v42 = vadd.f32 %v6129_v23, %v2490_v27  ;;  %v2370_v12 = vpop.f32.mrb[27].mxu1  ;;  %6443 = vmatmul.mubr.msk.f32.gmra.mrb[132].mxu1 %vm1729_vm0, %v7449_v57  ;;  %v2498_v23 = vld [vmem:[#allocation2 + $0x98] sm:$0xff] }
 0x146   : > { %3018 = vst.msk [vmem:[#allocation2 + $0x20] sm:$0xff] %vm2055_vm5, %v2986_v47  ;;  %v2521_v35 = vadd.f32 %v2489_v53, %v2370_v12  ;;  %v2957_v36 = vld [vmem:[#allocation2 + $0x38] sm:$0xff]  ;;  %6445 = vmatprep.mubr.msk.f32.mxu1 %vm1729_vm0, %v7452_v58  ;;  %v6179_v21 = vpop.f32.mrb[26].mxu0  ;;  %v2497_v53 = vld [vmem:[#allocation2 + $0x90] sm:$0xff] }
 0x147   : > { %2554 = vst.msk [vmem:[#allocation2 + $0x58] sm:$0xff] %vm2055_vm5, %v2522_v42  ;;  %v2989_v55 = vadd.f32 %v6173_v56, %v2957_v36  ;;  %v2956_v45 = vld [vmem:[#allocation2 + $0x30] sm:$0xff]  ;;  %v2841_v37 = vpop.f32.mrb[27].mxu0  ;;  %6493 = vmatmul.mubr.msk.f32.gmra.mrb[132].mxu0 %vm1729_vm0, %v8562_v54  ;;  %v4719_v36 = vsel %vm2575_vm4, %v4717_v9, %v4718_v28 }
 0x148   : > { %2553 = vst.msk [vmem:[#allocation2 + $0x50] sm:$0xff] %vm2055_vm5, %v2521_v35  ;;  %v2988_v30 = vadd.f32 %v2956_v45, %v2821_v25  ;;  %v6132_v57 = vpop.f32.mrb[28].mxu1  ;;  %6495 = vmatprep.mubr.msk.f32.mxu0 %vm1729_vm0, %v8563_v40  ;;  %v1727_v56 = vld [vmem:[#allocation16 + $0x28] sm:$0x3]  ;;  %v2496_v25 = vld [vmem:[#allocation2 + $0x88] sm:$0xff] }
 0x149   : > { %3021 = vst.msk [vmem:[#allocation2 + $0x38] sm:$0xff] %vm2055_vm5, %v2989_v55  ;;  %v2524_v58 = vadd.f32 %v6132_v57, %v2492_v43  ;;  %v2380_v34 = vpop.f32.mrb[29].mxu1  ;;  %6446 = vmatmul.mubr.msk.f32.gmra.mrb[134].mxu1 %vm1729_vm0, %v7473_v18  ;;  %v4720_v27 = vrot.slane %v1727_v56, 2  ;;  %v8569_v35 = vld [vmem:[#allocation28_spill] sm:$0xff] }
 0x14a   : > { %3020 = vst.msk [vmem:[#allocation2 + $0x30] sm:$0xff] %vm2055_vm5, %v2988_v30  ;;  %v2523_v38 = vadd.f32 %v2491_v3, %v2380_v34  ;;  %v2959_v54 = vld [vmem:[#allocation2 + $0x48] sm:$0xff]  ;;  %6448 = vmatprep.mubr.msk.f32.mxu1 %vm1729_vm0, %v8564_v0  ;;  %v6182_v61 = vpop.f32.mrb[28].mxu0 }
 0x14b   : > { %2556 = vst.msk [vmem:[#allocation2 + $0x68] sm:$0xff] %vm2055_vm5, %v2524_v58  ;;  %v2991_v1 = vadd.f32 %v6176_v63, %v2959_v54  ;;  %v2958_v40 = vld [vmem:[#allocation2 + $0x40] sm:$0xff]  ;;  %v2851_v51 = vpop.f32.mrb[29].mxu0  ;;  %6496 = vmatmul.mubr.msk.f32.gmra.mrb[134].mxu0 %vm1729_vm0, %v7485_v49  ;;  %v4385_v63 = vrot.slane %v1727_v56, 1  ;;  %v2500_v58 = vld [vmem:[#allocation2 + $0xa8] sm:$0xff]  ;;  %v4721_v34 = vsel %vm2575_vm4, %v4718_v28, %v4720_v27 }
 0x14c   : > { %2555 = vst.msk [vmem:[#allocation2 + $0x60] sm:$0xff] %vm2055_vm5, %v2523_v38  ;;  %v2990_v16 = vadd.f32 %v2958_v40, %v2831_v8  ;;  %v6135_v18 = vpop.f32.mrb[30].mxu1  ;;  %6498 = vmatprep.mubr.msk.f32.mxu0 %vm1729_vm0, %v7490_v32  ;;  %v4383_v32 = vrot.slane %v7824_v24, 1  ;;  %v2499_v54 = vld [vmem:[#allocation2 + $0xa0] sm:$0xff]  ;;  %v2508_v27 = vld [vmem:[#allocation2 + $0xe8] sm:$0xff] }
 0x14d   : > { %3023 = vst.msk [vmem:[#allocation2 + $0x48] sm:$0xff] %vm2055_vm5, %v2991_v1  ;;  %v2526_v20 = vadd.f32 %v6135_v18, %v2494_v26  ;;  %v2390_v7 = vpop.f32.mrb[31].mxu1  ;;  %6449 = vmatmul.mubr.msk.f32.gmra.mrb[136].mxu1 %vm1729_vm0, %v8565_v50  ;;  %v2502_v26 = vld [vmem:[#allocation2 + $0xb8] sm:$0xff] }
 0x14e   : > { %3022 = vst.msk [vmem:[#allocation2 + $0x40] sm:$0xff] %vm2055_vm5, %v2990_v16  ;;  %v2525_v15 = vadd.f32 %v2493_v19, %v2390_v7  ;;  %v2961_v49 = vld [vmem:[#allocation2 + $0x58] sm:$0xff]  ;;  %6451 = vmatprep.mubr.msk.f32.mxu1 %vm1729_vm0, %v8566_v4  ;;  %v6185_v22 = vpop.f32.mrb[30].mxu0  ;;  %v4384_v46 = vsel %vm506_vm3, %v4382_v59, %v4383_v32  ;;  %v4386_v55 = vsel %vm506_vm3, %v4383_v32, %v4385_v63  ;;  %v2501_v19 = vld [vmem:[#allocation2 + $0xb0] sm:$0xff] }
 0x14f   : > { %2558 = vst.msk [vmem:[#allocation2 + $0x78] sm:$0xff] %vm2055_vm5, %v2526_v20  ;;  %v2993_v60 = vadd.f32 %v6179_v21, %v2961_v49  ;;  %v2960_v31 = vld [vmem:[#allocation2 + $0x50] sm:$0xff]  ;;  %v2861_v33 = vpop.f32.mrb[31].mxu0  ;;  %6499 = vmatmul.mubr.msk.f32.gmra.mrb[136].mxu0 %vm1729_vm0, %v7507_v6 }
 0x150   : > { %2557 = vst.msk [vmem:[#allocation2 + $0x70] sm:$0xff] %vm2055_vm5, %v2525_v15  ;;  %v2992_v17 = vadd.f32 %v2960_v31, %v2841_v37  ;;  %v6138_v10 = vpop.f32.mrb[32].mxu1  ;;  %6501 = vmatprep.mubr.msk.f32.mxu0 %vm1729_vm0, %v7512_v29  ;;  %v2504_v31 = vld [vmem:[#allocation2 + $0xc8] sm:$0xff] }
 0x151   : > { %3025 = vst.msk [vmem:[#allocation2 + $0x58] sm:$0xff] %vm2055_vm5, %v2993_v60  ;;  %v2528_v2 = vadd.f32 %v6138_v10, %v2496_v25  ;;  %v2400_v14 = vpop.f32.mrb[33].mxu1  ;;  %6452 = vmatmul.mubr.msk.f32.gmra.mrb[138].mxu1 %vm1729_vm0, %v8567_v44 }
 0x152   : > { %3024 = vst.msk [vmem:[#allocation2 + $0x50] sm:$0xff] %vm2055_vm5, %v2992_v17  ;;  %v2527_v6 = vadd.f32 %v2495_v41, %v2400_v14  ;;  %v2963_v48 = vld [vmem:[#allocation2 + $0x68] sm:$0xff]  ;;  %6454 = vmatprep.mubr.msk.f32.mxu1 %vm1729_vm0, %v8568_v62  ;;  %v6188_v29 = vpop.f32.mrb[32].mxu0  ;;  %v2503_v17 = vld [vmem:[#allocation2 + $0xc0] sm:$0xff] }
 0x153   : > { %2560 = vst.msk [vmem:[#allocation2 + $0x88] sm:$0xff] %vm2055_vm5, %v2528_v2  ;;  %v2995_v39 = vadd.f32 %v6182_v61, %v2963_v48  ;;  %v2962_v24 = vld [vmem:[#allocation2 + $0x60] sm:$0xff]  ;;  %v2871_v11 = vpop.f32.mrb[33].mxu0  ;;  %6502 = vmatmul.mubr.msk.f32.gmra.mrb[138].mxu0 %vm1729_vm0, %v7524_v5 }
 0x154   : > { %2559 = vst.msk [vmem:[#allocation2 + $0x80] sm:$0xff] %vm2055_vm5, %v2527_v6  ;;  %v2994_v8 = vadd.f32 %v2962_v24, %v2851_v51  ;;  %v6141_v47 = vpop.f32.mrb[34].mxu1  ;;  %6504 = vmatprep.mubr.msk.f32.mxu0 %vm1729_vm0, %v7801_v52  ;;  %v2506_v6 = vld [vmem:[#allocation2 + $0xd8] sm:$0xff] }
 0x155   : > { %3027 = vst.msk [vmem:[#allocation2 + $0x68] sm:$0xff] %vm2055_vm5, %v2995_v39  ;;  %v2530_v42 = vadd.f32 %v6141_v47, %v2498_v23  ;;  %v2410_v12 = vpop.f32.mrb[35].mxu1  ;;  %6455 = vmatmul.mubr.msk.f32.gmra.mrb[140].mxu1 %vm1729_vm0, %v8569_v35 }
 0x156   : > { %3026 = vst.msk [vmem:[#allocation2 + $0x60] sm:$0xff] %vm2055_vm5, %v2994_v8  ;;  %v2529_v5 = vadd.f32 %v2497_v53, %v2410_v12  ;;  %v2965_v21 = vld [vmem:[#allocation2 + $0x78] sm:$0xff]  ;;  %6457 = vmatprep.mubr.msk.f32.mxu1 %vm1729_vm0, %v4384_v46  ;;  %v6191_v52 = vpop.f32.mrb[34].mxu0  ;;  %v2507_v53 = vld [vmem:[#allocation2 + $0xe0] sm:$0xff] }
 0x157   : > { %2562 = vst.msk [vmem:[#allocation2 + $0x98] sm:$0xff] %vm2055_vm5, %v2530_v42  ;;  %v2997_v45 = vadd.f32 %v6185_v22, %v2965_v21  ;;  %v2964_v37 = vld [vmem:[#allocation2 + $0x70] sm:$0xff]  ;;  %v2881_v30 = vpop.f32.mrb[35].mxu0  ;;  %6505 = vmatmul.mubr.msk.f32.gmra.mrb[140].mxu0 %vm1729_vm0, %v7816_v13 }
 0x158   : > { %2561 = vst.msk [vmem:[#allocation2 + $0x90] sm:$0xff] %vm2055_vm5, %v2529_v5  ;;  %v2996_v57 = vadd.f32 %v2964_v37, %v2861_v33  ;;  %v6144_v43 = vpop.f32.mrb[36].mxu1  ;;  %6507 = vmatprep.mubr.msk.f32.mxu0 %vm1729_vm0, %v4719_v36 }
 0x159   : > { %3029 = vst.msk [vmem:[#allocation2 + $0x78] sm:$0xff] %vm2055_vm5, %v2997_v45  ;;  %v2532_v3 = vadd.f32 %v6144_v43, %v2500_v58  ;;  %v2420_v38 = vpop.f32.mrb[37].mxu1  ;;  %6458 = vmatmul.mubr.msk.f32.gmra.mrb[142].mxu1 %vm1729_vm0, %v4386_v55  ;;  %v2509_v58 = vld [vmem:[#allocation2 + $0xf0] sm:$0xff] }
 0x15a   : > { %3028 = vst.msk [vmem:[#allocation2 + $0x70] sm:$0xff] %vm2055_vm5, %v2996_v57  ;;  %v2531_v0 = vadd.f32 %v2499_v54, %v2420_v38  ;;  %v2967_v13 = vld [vmem:[#allocation2 + $0x88] sm:$0xff]  ;;  %v6194_v61 = vpop.f32.mrb[36].mxu0 }
 0x15b   : > { %2564 = vst.msk [vmem:[#allocation2 + $0xa8] sm:$0xff] %vm2055_vm5, %v2532_v3  ;;  %v2999_v1 = vadd.f32 %v6188_v29, %v2967_v13  ;;  %v2966_v40 = vld [vmem:[#allocation2 + $0x80] sm:$0xff]  ;;  %v2891_v51 = vpop.f32.mrb[37].mxu0  ;;  %6508 = vmatmul.mubr.msk.f32.gmra.mrb[142].mxu0 %vm1729_vm0, %v4721_v34  ;;  %v2505_v29 = vld [vmem:[#allocation2 + $0xd0] sm:$0xff] }
 0x15c   : > { %2563 = vst.msk [vmem:[#allocation2 + $0xa0] sm:$0xff] %vm2055_vm5, %v2531_v0  ;;  %v2998_v16 = vadd.f32 %v2966_v40, %v2871_v11  ;;  %v6147_v18 = vpop.f32.mrb[38].mxu1  ;;  %v3283_v40 = vld [vmem:[#allocation2 + $0x8] sm:$0xff] }
 0x15d   : > { %3031 = vst.msk [vmem:[#allocation2 + $0x88] sm:$0xff] %vm2055_vm5, %v2999_v1  ;;  %v2534_v20 = vadd.f32 %v6147_v18, %v2502_v26  ;;  %v2430_v7 = vpop.f32.mrb[39].mxu1  ;;  %v3282_v18 = vld [vmem:[#allocation2] sm:$0xff] }
 0x15e   : > { %3030 = vst.msk [vmem:[#allocation2 + $0x80] sm:$0xff] %vm2055_vm5, %v2998_v16  ;;  %v2533_v50 = vadd.f32 %v2501_v19, %v2430_v7  ;;  %v2969_v15 = vld [vmem:[#allocation2 + $0x98] sm:$0xff]  ;;  %v6197_v49 = vpop.f32.mrb[38].mxu0 }
 0x15f   : > { %2566 = vst.msk [vmem:[#allocation2 + $0xb8] sm:$0xff] %vm2055_vm5, %v2534_v20  ;;  %v3001_v4 = vadd.f32 %v6191_v52, %v2969_v15  ;;  %v2968_v22 = vld [vmem:[#allocation2 + $0x90] sm:$0xff]  ;;  %v2901_v59 = vpop.f32.mrb[39].mxu0 }
 0x160   : > { %2565 = vst.msk [vmem:[#allocation2 + $0xb0] sm:$0xff] %vm2055_vm5, %v2533_v50  ;;  %v3000_v32 = vadd.f32 %v2968_v22, %v2881_v30  ;;  %v6150_v60 = vpop.f32.mrb[40].mxu1  ;;  %v2510_v30 = vld [vmem:[#allocation2 + $0xf8] sm:$0xff] }
 0x161   : > { %3033 = vst.msk [vmem:[#allocation2 + $0x98] sm:$0xff] %vm2055_vm5, %v3001_v4  ;;  %v2536_v33 = vadd.f32 %v6150_v60, %v2504_v31  ;;  %v2440_v56 = vpop.f32.mrb[41].mxu1  ;;  %v3285_v22 = vld [vmem:[#allocation2 + $0x18] sm:$0xff]  ;;  %v3284_v60 = vld [vmem:[#allocation2 + $0x10] sm:$0xff] }
 0x162   : > { %3032 = vst.msk [vmem:[#allocation2 + $0x90] sm:$0xff] %vm2055_vm5, %v3000_v32  ;;  %v2535_v10 = vadd.f32 %v2503_v17, %v2440_v56  ;;  %v2971_v25 = vld [vmem:[#allocation2 + $0xa8] sm:$0xff]  ;;  %v6200_v9 = vpop.f32.mrb[40].mxu0 }
 0x163   : > { %2568 = vst.msk [vmem:[#allocation2 + $0xc8] sm:$0xff] %vm2055_vm5, %v2536_v33  ;;  %v3003_v28 = vadd.f32 %v6194_v61, %v2971_v25  ;;  %v2970_v2 = vld [vmem:[#allocation2 + $0xa0] sm:$0xff]  ;;  %v2911_v14 = vpop.f32.mrb[41].mxu0 }
 0x164   : > { %2567 = vst.msk [vmem:[#allocation2 + $0xc0] sm:$0xff] %vm2055_vm5, %v2535_v10  ;;  %v3002_v41 = vadd.f32 %v2970_v2, %v2891_v51  ;;  %v6153_v44 = vpop.f32.mrb[42].mxu1  ;;  %v3287_v2 = vld [vmem:[#allocation2 + $0x28] sm:$0xff] }
 0x165   : > { %3035 = vst.msk [vmem:[#allocation2 + $0xa8] sm:$0xff] %vm2055_vm5, %v3003_v28  ;;  %v2538_v48 = vadd.f32 %v6153_v44, %v2506_v6  ;;  %v2450_v62 = vpop.f32.mrb[43].mxu1  ;;  %v3286_v44 = vld [vmem:[#allocation2 + $0x20] sm:$0xff] }
 0x166   : > { %3034 = vst.msk [vmem:[#allocation2 + $0xa0] sm:$0xff] %vm2055_vm5, %v3002_v41  ;;  %v2537_v63 = vadd.f32 %v2505_v29, %v2450_v62  ;;  %v2973_v39 = vld [vmem:[#allocation2 + $0xb8] sm:$0xff]  ;;  %v6203_v24 = vpop.f32.mrb[42].mxu0 }
 0x167   : > { %2570 = vst.msk [vmem:[#allocation2 + $0xd8] sm:$0xff] %vm2055_vm5, %v2538_v48  ;;  %v3005_v46 = vadd.f32 %v6197_v49, %v2973_v39  ;;  %v2972_v11 = vld [vmem:[#allocation2 + $0xb0] sm:$0xff]  ;;  %v2921_v8 = vpop.f32.mrb[43].mxu0 }
 0x168   : > { %2569 = vst.msk [vmem:[#allocation2 + $0xd0] sm:$0xff] %vm2055_vm5, %v2537_v63  ;;  %v3004_v47 = vadd.f32 %v2972_v11, %v2901_v59  ;;  %v6156_v23 = vpop.f32.mrb[44].mxu1  ;;  %v3289_v11 = vld [vmem:[#allocation2 + $0x38] sm:$0xff] }
 0x169   : > { %3037 = vst.msk [vmem:[#allocation2 + $0xb8] sm:$0xff] %vm2055_vm5, %v3005_v46  ;;  %v2540_v42 = vadd.f32 %v6156_v23, %v2508_v27  ;;  %v2460_v12 = vpop.f32.mrb[45].mxu1  ;;  %v3288_v23 = vld [vmem:[#allocation2 + $0x30] sm:$0xff] }
 0x16a   : > { %3036 = vst.msk [vmem:[#allocation2 + $0xb0] sm:$0xff] %vm2055_vm5, %v3004_v47  ;;  %v2539_v35 = vadd.f32 %v2507_v53, %v2460_v12  ;;  %v2975_v36 = vld [vmem:[#allocation2 + $0xc8] sm:$0xff]  ;;  %v6206_v5 = vpop.f32.mrb[44].mxu0 }
 0x16b   : > { %2572 = vst.msk [vmem:[#allocation2 + $0xe8] sm:$0xff] %vm2055_vm5, %v2540_v42  ;;  %v3007_v21 = vadd.f32 %v6200_v9, %v2975_v36  ;;  %v2974_v55 = vld [vmem:[#allocation2 + $0xc0] sm:$0xff]  ;;  %v2931_v52 = vpop.f32.mrb[45].mxu0 }
 0x16c   : > { %2571 = vst.msk [vmem:[#allocation2 + $0xe0] sm:$0xff] %vm2055_vm5, %v2539_v35  ;;  %v3006_v45 = vadd.f32 %v2974_v55, %v2911_v14  ;;  %v6159_v37 = vpop.f32.mrb[46].mxu1  ;;  %v3291_v55 = vld [vmem:[#allocation2 + $0x48] sm:$0xff] }
 0x16d   : > { %3039 = vst.msk [vmem:[#allocation2 + $0xc8] sm:$0xff] %vm2055_vm5, %v3007_v21  ;;  %v2542_v57 = vadd.f32 %v6159_v37, %v2510_v30  ;;  %v2470_v43 = vpop.f32.mrb[47].mxu1  ;;  %v3290_v37 = vld [vmem:[#allocation2 + $0x40] sm:$0xff] }
 0x16e   : > { %3038 = vst.msk [vmem:[#allocation2 + $0xc0] sm:$0xff] %vm2055_vm5, %v3006_v45  ;;  %v2541_v34 = vadd.f32 %v2509_v58, %v2470_v43  ;;  %v2977_v3 = vld [vmem:[#allocation2 + $0xd8] sm:$0xff]  ;;  %v6209_v38 = vpop.f32.mrb[46].mxu0 }
 0x16f   : > { %2574 = vst.msk [vmem:[#allocation2 + $0xf8] sm:$0xff] %vm2055_vm5, %v2542_v57  ;;  %v3009_v54 = vadd.f32 %v6203_v24, %v2977_v3  ;;  %v2976_v0 = vld [vmem:[#allocation2 + $0xd0] sm:$0xff]  ;;  %v2941_v13 = vpop.f32.mrb[47].mxu0 }
 0x170   : > { %2573 = vst.msk [vmem:[#allocation2 + $0xf0] sm:$0xff] %vm2055_vm5, %v2541_v34  ;;  %v3008_v61 = vadd.f32 %v2976_v0, %v2921_v8  ;;  %v6214_v1 = vpop.f32.mrb[48].mxu1  ;;  %v3293_v0 = vld [vmem:[#allocation2 + $0x58] sm:$0xff] }
 0x171   : > { %3041 = vst.msk [vmem:[#allocation2 + $0xd8] sm:$0xff] %vm2055_vm5, %v3009_v54  ;;  %v3315_v51 = vadd.f32 %v6214_v1, %v3283_v40  ;;  %v3123_v16 = vpop.f32.mrb[49].mxu1  ;;  %v3292_v1 = vld [vmem:[#allocation2 + $0x50] sm:$0xff] }
 0x172   : > { %3040 = vst.msk [vmem:[#allocation2 + $0xd0] sm:$0xff] %vm2055_vm5, %v3008_v61  ;;  %v2979_v26 = vld [vmem:[#allocation2 + $0xe8] sm:$0xff]  ;;  %v3314_v20 = vadd.f32 %v3282_v18, %v3123_v16  ;;  %v6264_v7 = vpop.f32.mrb[48].mxu0 }
 0x173   : > { %3347 = vst.msk [vmem:[#allocation2 + $0x8] sm:$0xff] %vm2055_vm5, %v3315_v51  ;;  %v3011_v19 = vadd.f32 %v6206_v5, %v2979_v26  ;;  %v2978_v50 = vld [vmem:[#allocation2 + $0xe0] sm:$0xff]  ;;  %v3459_v15 = vpop.f32.mrb[49].mxu0 }
 0x174   : > { %3346 = vst.msk [vmem:[#allocation2] sm:$0xff] %vm2055_vm5, %v3314_v20  ;;  %v3010_v49 = vadd.f32 %v2978_v50, %v2931_v52  ;;  %v6217_v4 = vpop.f32.mrb[50].mxu1  ;;  %v3295_v50 = vld [vmem:[#allocation2 + $0x68] sm:$0xff] }
 0x175   : > { %3043 = vst.msk [vmem:[#allocation2 + $0xe8] sm:$0xff] %vm2055_vm5, %v3011_v19  ;;  %v3317_v59 = vadd.f32 %v6217_v4, %v3285_v22  ;;  %v3133_v32 = vpop.f32.mrb[51].mxu1  ;;  %v3294_v4 = vld [vmem:[#allocation2 + $0x60] sm:$0xff] }
 0x176   : > { %3042 = vst.msk [vmem:[#allocation2 + $0xe0] sm:$0xff] %vm2055_vm5, %v3010_v49  ;;  %v2981_v31 = vld [vmem:[#allocation2 + $0xf8] sm:$0xff]  ;;  %v3316_v33 = vadd.f32 %v3284_v60, %v3133_v32  ;;  %v6267_v56 = vpop.f32.mrb[50].mxu0 }
 0x177   : > { %3349 = vst.msk [vmem:[#allocation2 + $0x18] sm:$0xff] %vm2055_vm5, %v3317_v59  ;;  %v3013_v17 = vadd.f32 %v6209_v38, %v2981_v31  ;;  %v2980_v10 = vld [vmem:[#allocation2 + $0xf0] sm:$0xff]  ;;  %v3469_v25 = vpop.f32.mrb[51].mxu0 }
 0x178   : > { %3348 = vst.msk [vmem:[#allocation2 + $0x10] sm:$0xff] %vm2055_vm5, %v3316_v33  ;;  %v3012_v9 = vadd.f32 %v2980_v10, %v2941_v13  ;;  %v6220_v28 = vpop.f32.mrb[52].mxu1  ;;  %v3297_v10 = vld [vmem:[#allocation2 + $0x78] sm:$0xff] }
 0x179   : > { %3045 = vst.msk [vmem:[#allocation2 + $0xf8] sm:$0xff] %vm2055_vm5, %v3013_v17  ;;  %v3319_v14 = vadd.f32 %v6220_v28, %v3287_v2  ;;  %v3143_v41 = vpop.f32.mrb[53].mxu1  ;;  %v3296_v28 = vld [vmem:[#allocation2 + $0x70] sm:$0xff] }
 0x17a   : > { %3044 = vst.msk [vmem:[#allocation2 + $0xf0] sm:$0xff] %vm2055_vm5, %v3012_v9  ;;  %v3318_v6 = vadd.f32 %v3286_v44, %v3143_v41  ;;  %v3619_v48 = vld [vmem:[#allocation2 + $0x8] sm:$0xff]  ;;  %v6270_v62 = vpop.f32.mrb[52].mxu0 }
 0x17b   : > { %3351 = vst.msk [vmem:[#allocation2 + $0x28] sm:$0xff] %vm2055_vm5, %v3319_v14  ;;  %v3651_v29 = vadd.f32 %v6264_v7, %v3619_v48  ;;  %v3618_v63 = vld [vmem:[#allocation2] sm:$0xff]  ;;  %v3479_v39 = vpop.f32.mrb[53].mxu0 }
 0x17c   : > { %3350 = vst.msk [vmem:[#allocation2 + $0x20] sm:$0xff] %vm2055_vm5, %v3318_v6  ;;  %v3650_v24 = vadd.f32 %v3618_v63, %v3459_v15  ;;  %v6223_v46 = vpop.f32.mrb[54].mxu1  ;;  %v3299_v63 = vld [vmem:[#allocation2 + $0x88] sm:$0xff] }
 0x17d   : > { %3683 = vst.msk [vmem:[#allocation2 + $0x8] sm:$0xff] %vm2055_vm5, %v3651_v29  ;;  %v3321_v8 = vadd.f32 %v6223_v46, %v3289_v11  ;;  %v3153_v47 = vpop.f32.mrb[55].mxu1  ;;  %v3298_v46 = vld [vmem:[#allocation2 + $0x80] sm:$0xff] }
 0x17e   : > { %3682 = vst.msk [vmem:[#allocation2] sm:$0xff] %vm2055_vm5, %v3650_v24  ;;  %v3320_v27 = vadd.f32 %v3288_v23, %v3153_v47  ;;  %v3621_v42 = vld [vmem:[#allocation2 + $0x18] sm:$0xff]  ;;  %v6273_v12 = vpop.f32.mrb[54].mxu0 }
 0x17f   : > { %3353 = vst.msk [vmem:[#allocation2 + $0x38] sm:$0xff] %vm2055_vm5, %v3321_v8  ;;  %v3653_v53 = vadd.f32 %v6267_v56, %v3621_v42  ;;  %v3620_v35 = vld [vmem:[#allocation2 + $0x10] sm:$0xff]  ;;  %v3489_v36 = vpop.f32.mrb[55].mxu0 }
 0x180   : > { %3352 = vst.msk [vmem:[#allocation2 + $0x30] sm:$0xff] %vm2055_vm5, %v3320_v27  ;;  %v3652_v5 = vadd.f32 %v3620_v35, %v3469_v25  ;;  %v6226_v21 = vpop.f32.mrb[56].mxu1  ;;  %v3301_v35 = vld [vmem:[#allocation2 + $0x98] sm:$0xff] }
 0x181   : > { %3685 = vst.msk [vmem:[#allocation2 + $0x18] sm:$0xff] %vm2055_vm5, %v3653_v53  ;;  %v3323_v52 = vadd.f32 %v6226_v21, %v3291_v55  ;;  %v3163_v45 = vpop.f32.mrb[57].mxu1  ;;  %v3300_v21 = vld [vmem:[#allocation2 + $0x90] sm:$0xff] }
 0x182   : > { %3684 = vst.msk [vmem:[#allocation2 + $0x10] sm:$0xff] %vm2055_vm5, %v3652_v5  ;;  %v3322_v30 = vadd.f32 %v3290_v37, %v3163_v45  ;;  %v3623_v57 = vld [vmem:[#allocation2 + $0x28] sm:$0xff]  ;;  %v6276_v43 = vpop.f32.mrb[56].mxu0 }
 0x183   : > { %3355 = vst.msk [vmem:[#allocation2 + $0x48] sm:$0xff] %vm2055_vm5, %v3323_v52  ;;  %v3655_v58 = vadd.f32 %v6270_v62, %v3623_v57  ;;  %v3622_v34 = vld [vmem:[#allocation2 + $0x20] sm:$0xff]  ;;  %v3499_v3 = vpop.f32.mrb[57].mxu0 }
 0x184   : > { %3354 = vst.msk [vmem:[#allocation2 + $0x40] sm:$0xff] %vm2055_vm5, %v3322_v30  ;;  %v3654_v38 = vadd.f32 %v3622_v34, %v3479_v39  ;;  %v6229_v54 = vpop.f32.mrb[58].mxu1  ;;  %v3303_v34 = vld [vmem:[#allocation2 + $0xa8] sm:$0xff] }
 0x185   : > { %3687 = vst.msk [vmem:[#allocation2 + $0x28] sm:$0xff] %vm2055_vm5, %v3655_v58  ;;  %v3325_v13 = vadd.f32 %v6229_v54, %v3293_v0  ;;  %v3173_v61 = vpop.f32.mrb[59].mxu1  ;;  %v3302_v54 = vld [vmem:[#allocation2 + $0xa0] sm:$0xff] }
 0x186   : > { %3686 = vst.msk [vmem:[#allocation2 + $0x20] sm:$0xff] %vm2055_vm5, %v3654_v38  ;;  %v3324_v40 = vadd.f32 %v3292_v1, %v3173_v61  ;;  %v3625_v51 = vld [vmem:[#allocation2 + $0x38] sm:$0xff]  ;;  %v6279_v16 = vpop.f32.mrb[58].mxu0 }
 0x187   : > { %3357 = vst.msk [vmem:[#allocation2 + $0x58] sm:$0xff] %vm2055_vm5, %v3325_v13  ;;  %v3657_v18 = vadd.f32 %v6273_v12, %v3625_v51  ;;  %v3624_v26 = vld [vmem:[#allocation2 + $0x30] sm:$0xff]  ;;  %v3509_v20 = vpop.f32.mrb[59].mxu0 }
 0x188   : > { %3356 = vst.msk [vmem:[#allocation2 + $0x50] sm:$0xff] %vm2055_vm5, %v3324_v40  ;;  %v3656_v7 = vadd.f32 %v3624_v26, %v3489_v36  ;;  %v6232_v19 = vpop.f32.mrb[60].mxu1  ;;  %v3305_v26 = vld [vmem:[#allocation2 + $0xb8] sm:$0xff] }
 0x189   : > { %3689 = vst.msk [vmem:[#allocation2 + $0x38] sm:$0xff] %vm2055_vm5, %v3657_v18  ;;  %v3327_v15 = vadd.f32 %v6232_v19, %v3295_v50  ;;  %v3183_v49 = vpop.f32.mrb[61].mxu1  ;;  %v3304_v19 = vld [vmem:[#allocation2 + $0xb0] sm:$0xff] }
 0x18a   : > { %3688 = vst.msk [vmem:[#allocation2 + $0x30] sm:$0xff] %vm2055_vm5, %v3656_v7  ;;  %v3326_v22 = vadd.f32 %v3294_v4, %v3183_v49  ;;  %v3627_v59 = vld [vmem:[#allocation2 + $0x48] sm:$0xff]  ;;  %v6282_v32 = vpop.f32.mrb[60].mxu0 }
 0x18b   : > { %3359 = vst.msk [vmem:[#allocation2 + $0x68] sm:$0xff] %vm2055_vm5, %v3327_v15  ;;  %v3659_v60 = vadd.f32 %v6276_v43, %v3627_v59  ;;  %v3626_v31 = vld [vmem:[#allocation2 + $0x40] sm:$0xff]  ;;  %v3519_v33 = vpop.f32.mrb[61].mxu0 }
 0x18c   : > { %3358 = vst.msk [vmem:[#allocation2 + $0x60] sm:$0xff] %vm2055_vm5, %v3326_v22  ;;  %v3658_v56 = vadd.f32 %v3626_v31, %v3499_v3  ;;  %v6235_v17 = vpop.f32.mrb[62].mxu1  ;;  %v3307_v31 = vld [vmem:[#allocation2 + $0xc8] sm:$0xff] }
 0x18d   : > { %3691 = vst.msk [vmem:[#allocation2 + $0x48] sm:$0xff] %vm2055_vm5, %v3659_v60  ;;  %v3329_v25 = vadd.f32 %v6235_v17, %v3297_v10  ;;  %v3193_v9 = vpop.f32.mrb[63].mxu1  ;;  %v3306_v17 = vld [vmem:[#allocation2 + $0xc0] sm:$0xff] }
 0x18e   : > { %3690 = vst.msk [vmem:[#allocation2 + $0x40] sm:$0xff] %vm2055_vm5, %v3658_v56  ;;  %v3328_v2 = vadd.f32 %v3296_v28, %v3193_v9  ;;  %v3629_v14 = vld [vmem:[#allocation2 + $0x58] sm:$0xff]  ;;  %v6285_v41 = vpop.f32.mrb[62].mxu0 }
 0x18f   : > { %3361 = vst.msk [vmem:[#allocation2 + $0x78] sm:$0xff] %vm2055_vm5, %v3329_v25  ;;  %v3661_v44 = vadd.f32 %v6279_v16, %v3629_v14  ;;  %v3628_v6 = vld [vmem:[#allocation2 + $0x50] sm:$0xff]  ;;  %v3529_v48 = vpop.f32.mrb[63].mxu0 }
 0x190   : > { %3360 = vst.msk [vmem:[#allocation2 + $0x70] sm:$0xff] %vm2055_vm5, %v3328_v2  ;;  %v3660_v62 = vadd.f32 %v3628_v6, %v3509_v20  ;;  %v6238_v29 = vpop.f32.mrb[64].mxu1  ;;  %v3309_v6 = vld [vmem:[#allocation2 + $0xd8] sm:$0xff] }
 0x191   : > { %3693 = vst.msk [vmem:[#allocation2 + $0x58] sm:$0xff] %vm2055_vm5, %v3661_v44  ;;  %v3331_v39 = vadd.f32 %v6238_v29, %v3299_v63  ;;  %v3203_v24 = vpop.f32.mrb[65].mxu1  ;;  %v3308_v29 = vld [vmem:[#allocation2 + $0xd0] sm:$0xff] }
 0x192   : > { %3692 = vst.msk [vmem:[#allocation2 + $0x50] sm:$0xff] %vm2055_vm5, %v3660_v62  ;;  %v3330_v11 = vadd.f32 %v3298_v46, %v3203_v24  ;;  %v3631_v8 = vld [vmem:[#allocation2 + $0x68] sm:$0xff]  ;;  %v6288_v47 = vpop.f32.mrb[64].mxu0 }
 0x193   : > { %3363 = vst.msk [vmem:[#allocation2 + $0x88] sm:$0xff] %vm2055_vm5, %v3331_v39  ;;  %v3663_v23 = vadd.f32 %v6282_v32, %v3631_v8  ;;  %v3630_v27 = vld [vmem:[#allocation2 + $0x60] sm:$0xff]  ;;  %v3539_v42 = vpop.f32.mrb[65].mxu0 }
 0x194   : > { %3362 = vst.msk [vmem:[#allocation2 + $0x80] sm:$0xff] %vm2055_vm5, %v3330_v11  ;;  %v3662_v12 = vadd.f32 %v3630_v27, %v3519_v33  ;;  %v6241_v53 = vpop.f32.mrb[66].mxu1  ;;  %v3311_v27 = vld [vmem:[#allocation2 + $0xe8] sm:$0xff] }
 0x195   : > { %3695 = vst.msk [vmem:[#allocation2 + $0x68] sm:$0xff] %vm2055_vm5, %v3663_v23  ;;  %v3333_v36 = vadd.f32 %v6241_v53, %v3301_v35  ;;  %v3213_v5 = vpop.f32.mrb[67].mxu1  ;;  %v3310_v53 = vld [vmem:[#allocation2 + $0xe0] sm:$0xff] }
 0x196   : > { %3694 = vst.msk [vmem:[#allocation2 + $0x60] sm:$0xff] %vm2055_vm5, %v3662_v12  ;;  %v3332_v55 = vadd.f32 %v3300_v21, %v3213_v5  ;;  %v3633_v52 = vld [vmem:[#allocation2 + $0x78] sm:$0xff]  ;;  %v6291_v45 = vpop.f32.mrb[66].mxu0 }
 0x197   : > { %3365 = vst.msk [vmem:[#allocation2 + $0x98] sm:$0xff] %vm2055_vm5, %v3333_v36  ;;  %v3665_v37 = vadd.f32 %v6285_v41, %v3633_v52  ;;  %v3632_v30 = vld [vmem:[#allocation2 + $0x70] sm:$0xff]  ;;  %v3549_v57 = vpop.f32.mrb[67].mxu0 }
 0x198   : > { %3364 = vst.msk [vmem:[#allocation2 + $0x90] sm:$0xff] %vm2055_vm5, %v3332_v55  ;;  %v3664_v43 = vadd.f32 %v3632_v30, %v3529_v48  ;;  %v6244_v58 = vpop.f32.mrb[68].mxu1  ;;  %v3313_v30 = vld [vmem:[#allocation2 + $0xf8] sm:$0xff] }
 0x199   : > { %3697 = vst.msk [vmem:[#allocation2 + $0x78] sm:$0xff] %vm2055_vm5, %v3665_v37  ;;  %v3335_v3 = vadd.f32 %v6244_v58, %v3303_v34  ;;  %v3223_v38 = vpop.f32.mrb[69].mxu1  ;;  %v3312_v58 = vld [vmem:[#allocation2 + $0xf0] sm:$0xff] }
 0x19a   : > { %3696 = vst.msk [vmem:[#allocation2 + $0x70] sm:$0xff] %vm2055_vm5, %v3664_v43  ;;  %v3334_v0 = vadd.f32 %v3302_v54, %v3223_v38  ;;  %v3635_v13 = vld [vmem:[#allocation2 + $0x88] sm:$0xff]  ;;  %v6294_v61 = vpop.f32.mrb[68].mxu0 }
 0x19b   : > { %3367 = vst.msk [vmem:[#allocation2 + $0xa8] sm:$0xff] %vm2055_vm5, %v3335_v3  ;;  %v3667_v1 = vadd.f32 %v6288_v47, %v3635_v13  ;;  %v3634_v40 = vld [vmem:[#allocation2 + $0x80] sm:$0xff]  ;;  %v3559_v51 = vpop.f32.mrb[69].mxu0 }
 0x19c   : > { %3366 = vst.msk [vmem:[#allocation2 + $0xa0] sm:$0xff] %vm2055_vm5, %v3334_v0  ;;  %v3666_v16 = vadd.f32 %v3634_v40, %v3539_v42  ;;  %v6247_v18 = vpop.f32.mrb[70].mxu1  ;;  %v3954_v40 = vld [vmem:[#allocation2 + $0x8] sm:$0xff] }
 0x19d   : > { %3699 = vst.msk [vmem:[#allocation2 + $0x88] sm:$0xff] %vm2055_vm5, %v3667_v1  ;;  %v3337_v20 = vadd.f32 %v6247_v18, %v3305_v26  ;;  %v3233_v7 = vpop.f32.mrb[71].mxu1  ;;  %v3953_v18 = vld [vmem:[#allocation2] sm:$0xff] }
 0x19e   : > { %3698 = vst.msk [vmem:[#allocation2 + $0x80] sm:$0xff] %vm2055_vm5, %v3666_v16  ;;  %v3336_v50 = vadd.f32 %v3304_v19, %v3233_v7  ;;  %v3637_v15 = vld [vmem:[#allocation2 + $0x98] sm:$0xff]  ;;  %v6297_v49 = vpop.f32.mrb[70].mxu0 }
 0x19f   : > { %3369 = vst.msk [vmem:[#allocation2 + $0xb8] sm:$0xff] %vm2055_vm5, %v3337_v20  ;;  %v3669_v4 = vadd.f32 %v6291_v45, %v3637_v15  ;;  %v3636_v22 = vld [vmem:[#allocation2 + $0x90] sm:$0xff]  ;;  %v3569_v59 = vpop.f32.mrb[71].mxu0 }
 0x1a0   : > { %3368 = vst.msk [vmem:[#allocation2 + $0xb0] sm:$0xff] %vm2055_vm5, %v3336_v50  ;;  %v3668_v32 = vadd.f32 %v3636_v22, %v3549_v57  ;;  %v6250_v60 = vpop.f32.mrb[72].mxu1  ;;  %v3956_v22 = vld [vmem:[#allocation2 + $0x18] sm:$0xff] }
 0x1a1   : > { %3701 = vst.msk [vmem:[#allocation2 + $0x98] sm:$0xff] %vm2055_vm5, %v3669_v4  ;;  %v3339_v33 = vadd.f32 %v6250_v60, %v3307_v31  ;;  %v3243_v56 = vpop.f32.mrb[73].mxu1  ;;  %v3955_v60 = vld [vmem:[#allocation2 + $0x10] sm:$0xff] }
 0x1a2   : > { %3700 = vst.msk [vmem:[#allocation2 + $0x90] sm:$0xff] %vm2055_vm5, %v3668_v32  ;;  %v3338_v10 = vadd.f32 %v3306_v17, %v3243_v56  ;;  %v3639_v25 = vld [vmem:[#allocation2 + $0xa8] sm:$0xff]  ;;  %v6300_v9 = vpop.f32.mrb[72].mxu0 }
 0x1a3   : > { %3371 = vst.msk [vmem:[#allocation2 + $0xc8] sm:$0xff] %vm2055_vm5, %v3339_v33  ;;  %v3671_v28 = vadd.f32 %v6294_v61, %v3639_v25  ;;  %v3638_v2 = vld [vmem:[#allocation2 + $0xa0] sm:$0xff]  ;;  %v3579_v14 = vpop.f32.mrb[73].mxu0 }
 0x1a4   : > { %3370 = vst.msk [vmem:[#allocation2 + $0xc0] sm:$0xff] %vm2055_vm5, %v3338_v10  ;;  %v3670_v41 = vadd.f32 %v3638_v2, %v3559_v51  ;;  %v6253_v44 = vpop.f32.mrb[74].mxu1  ;;  %v3958_v2 = vld [vmem:[#allocation2 + $0x28] sm:$0xff] }
 0x1a5   : > { %3703 = vst.msk [vmem:[#allocation2 + $0xa8] sm:$0xff] %vm2055_vm5, %v3671_v28  ;;  %v3341_v48 = vadd.f32 %v6253_v44, %v3309_v6  ;;  %v3253_v62 = vpop.f32.mrb[75].mxu1  ;;  %v3957_v44 = vld [vmem:[#allocation2 + $0x20] sm:$0xff] }
 0x1a6   : > { %3702 = vst.msk [vmem:[#allocation2 + $0xa0] sm:$0xff] %vm2055_vm5, %v3670_v41  ;;  %v3340_v63 = vadd.f32 %v3308_v29, %v3253_v62  ;;  %v3641_v39 = vld [vmem:[#allocation2 + $0xb8] sm:$0xff]  ;;  %v6303_v24 = vpop.f32.mrb[74].mxu0 }
 0x1a7   : > { %3373 = vst.msk [vmem:[#allocation2 + $0xd8] sm:$0xff] %vm2055_vm5, %v3341_v48  ;;  %v3673_v46 = vadd.f32 %v6297_v49, %v3641_v39  ;;  %v3640_v11 = vld [vmem:[#allocation2 + $0xb0] sm:$0xff]  ;;  %v3589_v8 = vpop.f32.mrb[75].mxu0 }
 0x1a8   : > { %3372 = vst.msk [vmem:[#allocation2 + $0xd0] sm:$0xff] %vm2055_vm5, %v3340_v63  ;;  %v3672_v47 = vadd.f32 %v3640_v11, %v3569_v59  ;;  %v6256_v23 = vpop.f32.mrb[76].mxu1  ;;  %v3960_v11 = vld [vmem:[#allocation2 + $0x38] sm:$0xff] }
 0x1a9   : > { %3705 = vst.msk [vmem:[#allocation2 + $0xb8] sm:$0xff] %vm2055_vm5, %v3673_v46  ;;  %v3343_v42 = vadd.f32 %v6256_v23, %v3311_v27  ;;  %v3263_v12 = vpop.f32.mrb[77].mxu1  ;;  %v3959_v23 = vld [vmem:[#allocation2 + $0x30] sm:$0xff] }
 0x1aa   : > { %3704 = vst.msk [vmem:[#allocation2 + $0xb0] sm:$0xff] %vm2055_vm5, %v3672_v47  ;;  %v3342_v35 = vadd.f32 %v3310_v53, %v3263_v12  ;;  %v3643_v36 = vld [vmem:[#allocation2 + $0xc8] sm:$0xff]  ;;  %v6306_v5 = vpop.f32.mrb[76].mxu0 }
 0x1ab   : > { %3375 = vst.msk [vmem:[#allocation2 + $0xe8] sm:$0xff] %vm2055_vm5, %v3343_v42  ;;  %v3675_v21 = vadd.f32 %v6300_v9, %v3643_v36  ;;  %v3642_v55 = vld [vmem:[#allocation2 + $0xc0] sm:$0xff]  ;;  %v3599_v52 = vpop.f32.mrb[77].mxu0 }
 0x1ac   : > { %3374 = vst.msk [vmem:[#allocation2 + $0xe0] sm:$0xff] %vm2055_vm5, %v3342_v35  ;;  %v3674_v45 = vadd.f32 %v3642_v55, %v3579_v14  ;;  %v6259_v37 = vpop.f32.mrb[78].mxu1  ;;  %v3962_v55 = vld [vmem:[#allocation2 + $0x48] sm:$0xff] }
 0x1ad   : > { %3707 = vst.msk [vmem:[#allocation2 + $0xc8] sm:$0xff] %vm2055_vm5, %v3675_v21  ;;  %v3345_v57 = vadd.f32 %v6259_v37, %v3313_v30  ;;  %v3273_v43 = vpop.f32.mrb[79].mxu1  ;;  %v3961_v37 = vld [vmem:[#allocation2 + $0x40] sm:$0xff] }
 0x1ae   : > { %3706 = vst.msk [vmem:[#allocation2 + $0xc0] sm:$0xff] %vm2055_vm5, %v3674_v45  ;;  %v3344_v34 = vadd.f32 %v3312_v58, %v3273_v43  ;;  %v3645_v3 = vld [vmem:[#allocation2 + $0xd8] sm:$0xff]  ;;  %v6309_v38 = vpop.f32.mrb[78].mxu0 }
 0x1af   : > { %3377 = vst.msk [vmem:[#allocation2 + $0xf8] sm:$0xff] %vm2055_vm5, %v3345_v57  ;;  %v3677_v54 = vadd.f32 %v6303_v24, %v3645_v3  ;;  %v3644_v0 = vld [vmem:[#allocation2 + $0xd0] sm:$0xff]  ;;  %v3609_v13 = vpop.f32.mrb[79].mxu0 }
 0x1b0   : > { %3376 = vst.msk [vmem:[#allocation2 + $0xf0] sm:$0xff] %vm2055_vm5, %v3344_v34  ;;  %v3676_v61 = vadd.f32 %v3644_v0, %v3589_v8  ;;  %v6314_v1 = vpop.f32.mrb[80].mxu1  ;;  %v3964_v0 = vld [vmem:[#allocation2 + $0x58] sm:$0xff] }
 0x1b1   : > { %3709 = vst.msk [vmem:[#allocation2 + $0xd8] sm:$0xff] %vm2055_vm5, %v3677_v54  ;;  %v3986_v51 = vadd.f32 %v6314_v1, %v3954_v40  ;;  %v3794_v16 = vpop.f32.mrb[81].mxu1  ;;  %v3963_v1 = vld [vmem:[#allocation2 + $0x50] sm:$0xff] }
 0x1b2   : > { %3708 = vst.msk [vmem:[#allocation2 + $0xd0] sm:$0xff] %vm2055_vm5, %v3676_v61  ;;  %v3647_v26 = vld [vmem:[#allocation2 + $0xe8] sm:$0xff]  ;;  %v3985_v20 = vadd.f32 %v3953_v18, %v3794_v16  ;;  %v6364_v7 = vpop.f32.mrb[80].mxu0 }
 0x1b3   : > { %4018 = vst.msk [vmem:[#allocation2 + $0x8] sm:$0xff] %vm2055_vm5, %v3986_v51  ;;  %v3679_v19 = vadd.f32 %v6306_v5, %v3647_v26  ;;  %v3646_v50 = vld [vmem:[#allocation2 + $0xe0] sm:$0xff]  ;;  %v4126_v15 = vpop.f32.mrb[81].mxu0 }
 0x1b4   : > { %4017 = vst.msk [vmem:[#allocation2] sm:$0xff] %vm2055_vm5, %v3985_v20  ;;  %v3678_v49 = vadd.f32 %v3646_v50, %v3599_v52  ;;  %v6317_v4 = vpop.f32.mrb[82].mxu1  ;;  %v3966_v50 = vld [vmem:[#allocation2 + $0x68] sm:$0xff] }
 0x1b5   : > { %3711 = vst.msk [vmem:[#allocation2 + $0xe8] sm:$0xff] %vm2055_vm5, %v3679_v19  ;;  %v3988_v59 = vadd.f32 %v6317_v4, %v3956_v22  ;;  %v3804_v32 = vpop.f32.mrb[83].mxu1  ;;  %v3965_v4 = vld [vmem:[#allocation2 + $0x60] sm:$0xff] }
 0x1b6   : > { %3710 = vst.msk [vmem:[#allocation2 + $0xe0] sm:$0xff] %vm2055_vm5, %v3678_v49  ;;  %v3649_v31 = vld [vmem:[#allocation2 + $0xf8] sm:$0xff]  ;;  %v3987_v33 = vadd.f32 %v3955_v60, %v3804_v32  ;;  %v6367_v56 = vpop.f32.mrb[82].mxu0 }
 0x1b7   : > { %4020 = vst.msk [vmem:[#allocation2 + $0x18] sm:$0xff] %vm2055_vm5, %v3988_v59  ;;  %v3681_v17 = vadd.f32 %v6309_v38, %v3649_v31  ;;  %v3648_v10 = vld [vmem:[#allocation2 + $0xf0] sm:$0xff]  ;;  %v4136_v25 = vpop.f32.mrb[83].mxu0 }
 0x1b8   : > { %4019 = vst.msk [vmem:[#allocation2 + $0x10] sm:$0xff] %vm2055_vm5, %v3987_v33  ;;  %v3680_v9 = vadd.f32 %v3648_v10, %v3609_v13  ;;  %v6320_v28 = vpop.f32.mrb[84].mxu1  ;;  %v3968_v10 = vld [vmem:[#allocation2 + $0x78] sm:$0xff] }
 0x1b9   : > { %3713 = vst.msk [vmem:[#allocation2 + $0xf8] sm:$0xff] %vm2055_vm5, %v3681_v17  ;;  %v3990_v14 = vadd.f32 %v6320_v28, %v3958_v2  ;;  %v3814_v41 = vpop.f32.mrb[85].mxu1  ;;  %v3967_v28 = vld [vmem:[#allocation2 + $0x70] sm:$0xff] }
 0x1ba   : > { %3712 = vst.msk [vmem:[#allocation2 + $0xf0] sm:$0xff] %vm2055_vm5, %v3680_v9  ;;  %v3989_v6 = vadd.f32 %v3957_v44, %v3814_v41  ;;  %v4286_v48 = vld [vmem:[#allocation2 + $0x8] sm:$0xff]  ;;  %v6370_v62 = vpop.f32.mrb[84].mxu0 }
 0x1bb   : > { %4022 = vst.msk [vmem:[#allocation2 + $0x28] sm:$0xff] %vm2055_vm5, %v3990_v14  ;;  %v4318_v29 = vadd.f32 %v6364_v7, %v4286_v48  ;;  %v4285_v63 = vld [vmem:[#allocation2] sm:$0xff]  ;;  %v4146_v39 = vpop.f32.mrb[85].mxu0 }
 0x1bc   : > { %4021 = vst.msk [vmem:[#allocation2 + $0x20] sm:$0xff] %vm2055_vm5, %v3989_v6  ;;  %v4317_v24 = vadd.f32 %v4285_v63, %v4126_v15  ;;  %v6323_v46 = vpop.f32.mrb[86].mxu1  ;;  %v3970_v63 = vld [vmem:[#allocation2 + $0x88] sm:$0xff] }
 0x1bd   : > { %4350 = vst.msk [vmem:[#allocation2 + $0x8] sm:$0xff] %vm2055_vm5, %v4318_v29  ;;  %v3992_v8 = vadd.f32 %v6323_v46, %v3960_v11  ;;  %v3824_v47 = vpop.f32.mrb[87].mxu1  ;;  %v3969_v46 = vld [vmem:[#allocation2 + $0x80] sm:$0xff] }
 0x1be   : > { %4349 = vst.msk [vmem:[#allocation2] sm:$0xff] %vm2055_vm5, %v4317_v24  ;;  %v3991_v27 = vadd.f32 %v3959_v23, %v3824_v47  ;;  %v4288_v42 = vld [vmem:[#allocation2 + $0x18] sm:$0xff]  ;;  %v6373_v12 = vpop.f32.mrb[86].mxu0 }
 0x1bf   : > { %4024 = vst.msk [vmem:[#allocation2 + $0x38] sm:$0xff] %vm2055_vm5, %v3992_v8  ;;  %v4320_v53 = vadd.f32 %v6367_v56, %v4288_v42  ;;  %v4287_v35 = vld [vmem:[#allocation2 + $0x10] sm:$0xff]  ;;  %v4156_v36 = vpop.f32.mrb[87].mxu0 }
 0x1c0   : > { %4023 = vst.msk [vmem:[#allocation2 + $0x30] sm:$0xff] %vm2055_vm5, %v3991_v27  ;;  %v4319_v5 = vadd.f32 %v4287_v35, %v4136_v25  ;;  %v6326_v21 = vpop.f32.mrb[88].mxu1  ;;  %v3972_v35 = vld [vmem:[#allocation2 + $0x98] sm:$0xff] }
 0x1c1   : > { %4352 = vst.msk [vmem:[#allocation2 + $0x18] sm:$0xff] %vm2055_vm5, %v4320_v53  ;;  %v3994_v52 = vadd.f32 %v6326_v21, %v3962_v55  ;;  %v3834_v45 = vpop.f32.mrb[89].mxu1  ;;  %v3971_v21 = vld [vmem:[#allocation2 + $0x90] sm:$0xff] }
 0x1c2   : > { %4351 = vst.msk [vmem:[#allocation2 + $0x10] sm:$0xff] %vm2055_vm5, %v4319_v5  ;;  %v3993_v30 = vadd.f32 %v3961_v37, %v3834_v45  ;;  %v4290_v57 = vld [vmem:[#allocation2 + $0x28] sm:$0xff]  ;;  %v6376_v43 = vpop.f32.mrb[88].mxu0 }
 0x1c3   : > { %4026 = vst.msk [vmem:[#allocation2 + $0x48] sm:$0xff] %vm2055_vm5, %v3994_v52  ;;  %v4322_v58 = vadd.f32 %v6370_v62, %v4290_v57  ;;  %v4289_v34 = vld [vmem:[#allocation2 + $0x20] sm:$0xff]  ;;  %v4166_v3 = vpop.f32.mrb[89].mxu0 }
 0x1c4   : > { %4025 = vst.msk [vmem:[#allocation2 + $0x40] sm:$0xff] %vm2055_vm5, %v3993_v30  ;;  %v4321_v38 = vadd.f32 %v4289_v34, %v4146_v39  ;;  %v6329_v54 = vpop.f32.mrb[90].mxu1  ;;  %v3974_v34 = vld [vmem:[#allocation2 + $0xa8] sm:$0xff] }
 0x1c5   : > { %4354 = vst.msk [vmem:[#allocation2 + $0x28] sm:$0xff] %vm2055_vm5, %v4322_v58  ;;  %v3996_v13 = vadd.f32 %v6329_v54, %v3964_v0  ;;  %v3844_v61 = vpop.f32.mrb[91].mxu1  ;;  %v3973_v54 = vld [vmem:[#allocation2 + $0xa0] sm:$0xff] }
 0x1c6   : > { %4353 = vst.msk [vmem:[#allocation2 + $0x20] sm:$0xff] %vm2055_vm5, %v4321_v38  ;;  %v3995_v40 = vadd.f32 %v3963_v1, %v3844_v61  ;;  %v4292_v51 = vld [vmem:[#allocation2 + $0x38] sm:$0xff]  ;;  %v6379_v16 = vpop.f32.mrb[90].mxu0 }
 0x1c7   : > { %4028 = vst.msk [vmem:[#allocation2 + $0x58] sm:$0xff] %vm2055_vm5, %v3996_v13  ;;  %v4324_v18 = vadd.f32 %v6373_v12, %v4292_v51  ;;  %v4291_v26 = vld [vmem:[#allocation2 + $0x30] sm:$0xff]  ;;  %v4176_v20 = vpop.f32.mrb[91].mxu0 }
 0x1c8   : > { %4027 = vst.msk [vmem:[#allocation2 + $0x50] sm:$0xff] %vm2055_vm5, %v3995_v40  ;;  %v4323_v7 = vadd.f32 %v4291_v26, %v4156_v36  ;;  %v6332_v19 = vpop.f32.mrb[92].mxu1  ;;  %v3976_v26 = vld [vmem:[#allocation2 + $0xb8] sm:$0xff] }
 0x1c9   : > { %4356 = vst.msk [vmem:[#allocation2 + $0x38] sm:$0xff] %vm2055_vm5, %v4324_v18  ;;  %v3998_v15 = vadd.f32 %v6332_v19, %v3966_v50  ;;  %v3854_v49 = vpop.f32.mrb[93].mxu1  ;;  %v3975_v19 = vld [vmem:[#allocation2 + $0xb0] sm:$0xff] }
 0x1ca   : > { %4355 = vst.msk [vmem:[#allocation2 + $0x30] sm:$0xff] %vm2055_vm5, %v4323_v7  ;;  %v3997_v22 = vadd.f32 %v3965_v4, %v3854_v49  ;;  %v4294_v59 = vld [vmem:[#allocation2 + $0x48] sm:$0xff]  ;;  %v6382_v32 = vpop.f32.mrb[92].mxu0 }
 0x1cb   : > { %4030 = vst.msk [vmem:[#allocation2 + $0x68] sm:$0xff] %vm2055_vm5, %v3998_v15  ;;  %v4326_v60 = vadd.f32 %v6376_v43, %v4294_v59  ;;  %v4293_v31 = vld [vmem:[#allocation2 + $0x40] sm:$0xff]  ;;  %v4186_v33 = vpop.f32.mrb[93].mxu0 }
 0x1cc   : > { %4029 = vst.msk [vmem:[#allocation2 + $0x60] sm:$0xff] %vm2055_vm5, %v3997_v22  ;;  %v4325_v56 = vadd.f32 %v4293_v31, %v4166_v3  ;;  %v6335_v17 = vpop.f32.mrb[94].mxu1  ;;  %v3978_v31 = vld [vmem:[#allocation2 + $0xc8] sm:$0xff] }
 0x1cd   : > { %4358 = vst.msk [vmem:[#allocation2 + $0x48] sm:$0xff] %vm2055_vm5, %v4326_v60  ;;  %v4000_v25 = vadd.f32 %v6335_v17, %v3968_v10  ;;  %v3864_v9 = vpop.f32.mrb[95].mxu1  ;;  %v3977_v17 = vld [vmem:[#allocation2 + $0xc0] sm:$0xff] }
 0x1ce   : > { %4357 = vst.msk [vmem:[#allocation2 + $0x40] sm:$0xff] %vm2055_vm5, %v4325_v56  ;;  %v3999_v2 = vadd.f32 %v3967_v28, %v3864_v9  ;;  %v4296_v14 = vld [vmem:[#allocation2 + $0x58] sm:$0xff]  ;;  %v6385_v41 = vpop.f32.mrb[94].mxu0 }
 0x1cf   : > { %4032 = vst.msk [vmem:[#allocation2 + $0x78] sm:$0xff] %vm2055_vm5, %v4000_v25  ;;  %v4328_v44 = vadd.f32 %v6379_v16, %v4296_v14  ;;  %v4295_v6 = vld [vmem:[#allocation2 + $0x50] sm:$0xff]  ;;  %v4196_v48 = vpop.f32.mrb[95].mxu0 }
 0x1d0   : > { %4031 = vst.msk [vmem:[#allocation2 + $0x70] sm:$0xff] %vm2055_vm5, %v3999_v2  ;;  %v4327_v62 = vadd.f32 %v4295_v6, %v4176_v20  ;;  %v6338_v29 = vpop.f32.mrb[96].mxu1  ;;  %v3980_v6 = vld [vmem:[#allocation2 + $0xd8] sm:$0xff] }
 0x1d1   : > { %4360 = vst.msk [vmem:[#allocation2 + $0x58] sm:$0xff] %vm2055_vm5, %v4328_v44  ;;  %v4002_v39 = vadd.f32 %v6338_v29, %v3970_v63  ;;  %v3874_v24 = vpop.f32.mrb[97].mxu1  ;;  %v3979_v29 = vld [vmem:[#allocation2 + $0xd0] sm:$0xff] }
 0x1d2   : > { %4359 = vst.msk [vmem:[#allocation2 + $0x50] sm:$0xff] %vm2055_vm5, %v4327_v62  ;;  %v4001_v11 = vadd.f32 %v3969_v46, %v3874_v24  ;;  %v4298_v8 = vld [vmem:[#allocation2 + $0x68] sm:$0xff]  ;;  %v6388_v47 = vpop.f32.mrb[96].mxu0 }
 0x1d3   : > { %4034 = vst.msk [vmem:[#allocation2 + $0x88] sm:$0xff] %vm2055_vm5, %v4002_v39  ;;  %v4330_v23 = vadd.f32 %v6382_v32, %v4298_v8  ;;  %v4297_v27 = vld [vmem:[#allocation2 + $0x60] sm:$0xff]  ;;  %v4206_v42 = vpop.f32.mrb[97].mxu0 }
 0x1d4   : > { %4033 = vst.msk [vmem:[#allocation2 + $0x80] sm:$0xff] %vm2055_vm5, %v4001_v11  ;;  %v4329_v12 = vadd.f32 %v4297_v27, %v4186_v33  ;;  %v6341_v53 = vpop.f32.mrb[98].mxu1  ;;  %v3982_v27 = vld [vmem:[#allocation2 + $0xe8] sm:$0xff] }
 0x1d5   : > { %4362 = vst.msk [vmem:[#allocation2 + $0x68] sm:$0xff] %vm2055_vm5, %v4330_v23  ;;  %v4004_v36 = vadd.f32 %v6341_v53, %v3972_v35  ;;  %v3884_v5 = vpop.f32.mrb[99].mxu1  ;;  %v3981_v53 = vld [vmem:[#allocation2 + $0xe0] sm:$0xff] }
 0x1d6   : > { %4361 = vst.msk [vmem:[#allocation2 + $0x60] sm:$0xff] %vm2055_vm5, %v4329_v12  ;;  %v4003_v55 = vadd.f32 %v3971_v21, %v3884_v5  ;;  %v4300_v52 = vld [vmem:[#allocation2 + $0x78] sm:$0xff]  ;;  %v6391_v45 = vpop.f32.mrb[98].mxu0 }
 0x1d7   : > { %4036 = vst.msk [vmem:[#allocation2 + $0x98] sm:$0xff] %vm2055_vm5, %v4004_v36  ;;  %v4332_v37 = vadd.f32 %v6385_v41, %v4300_v52  ;;  %v4299_v30 = vld [vmem:[#allocation2 + $0x70] sm:$0xff]  ;;  %v4216_v57 = vpop.f32.mrb[99].mxu0 }
 0x1d8   : > { %4035 = vst.msk [vmem:[#allocation2 + $0x90] sm:$0xff] %vm2055_vm5, %v4003_v55  ;;  %v4331_v43 = vadd.f32 %v4299_v30, %v4196_v48  ;;  %v6344_v58 = vpop.f32.mrb[100].mxu1  ;;  %v3984_v30 = vld [vmem:[#allocation2 + $0xf8] sm:$0xff] }
 0x1d9   : > { %4364 = vst.msk [vmem:[#allocation2 + $0x78] sm:$0xff] %vm2055_vm5, %v4332_v37  ;;  %v4006_v3 = vadd.f32 %v6344_v58, %v3974_v34  ;;  %v3894_v38 = vpop.f32.mrb[101].mxu1  ;;  %v3983_v58 = vld [vmem:[#allocation2 + $0xf0] sm:$0xff] }
 0x1da   : > { %4363 = vst.msk [vmem:[#allocation2 + $0x70] sm:$0xff] %vm2055_vm5, %v4331_v43  ;;  %v4005_v0 = vadd.f32 %v3973_v54, %v3894_v38  ;;  %v4302_v13 = vld [vmem:[#allocation2 + $0x88] sm:$0xff]  ;;  %v6394_v61 = vpop.f32.mrb[100].mxu0 }
 0x1db   : > { %4038 = vst.msk [vmem:[#allocation2 + $0xa8] sm:$0xff] %vm2055_vm5, %v4006_v3  ;;  %v4334_v1 = vadd.f32 %v6388_v47, %v4302_v13  ;;  %v4301_v40 = vld [vmem:[#allocation2 + $0x80] sm:$0xff]  ;;  %v4226_v51 = vpop.f32.mrb[101].mxu0 }
 0x1dc   : > { %4037 = vst.msk [vmem:[#allocation2 + $0xa0] sm:$0xff] %vm2055_vm5, %v4005_v0  ;;  %v4333_v16 = vadd.f32 %v4301_v40, %v4206_v42  ;;  %v6347_v18 = vpop.f32.mrb[102].mxu1  ;;  %v4622_v40 = vld [vmem:[#allocation2 + $0x8] sm:$0xff] }
 0x1dd   : > { %4366 = vst.msk [vmem:[#allocation2 + $0x88] sm:$0xff] %vm2055_vm5, %v4334_v1  ;;  %v4008_v20 = vadd.f32 %v6347_v18, %v3976_v26  ;;  %v3904_v7 = vpop.f32.mrb[103].mxu1  ;;  %v4621_v18 = vld [vmem:[#allocation2] sm:$0xff] }
 0x1de   : > { %4365 = vst.msk [vmem:[#allocation2 + $0x80] sm:$0xff] %vm2055_vm5, %v4333_v16  ;;  %v4007_v50 = vadd.f32 %v3975_v19, %v3904_v7  ;;  %v4304_v15 = vld [vmem:[#allocation2 + $0x98] sm:$0xff]  ;;  %v6397_v49 = vpop.f32.mrb[102].mxu0 }
 0x1df   : > { %4040 = vst.msk [vmem:[#allocation2 + $0xb8] sm:$0xff] %vm2055_vm5, %v4008_v20  ;;  %v4336_v4 = vadd.f32 %v6391_v45, %v4304_v15  ;;  %v4303_v22 = vld [vmem:[#allocation2 + $0x90] sm:$0xff]  ;;  %v4236_v59 = vpop.f32.mrb[103].mxu0 }
 0x1e0   : > { %4039 = vst.msk [vmem:[#allocation2 + $0xb0] sm:$0xff] %vm2055_vm5, %v4007_v50  ;;  %v4335_v32 = vadd.f32 %v4303_v22, %v4216_v57  ;;  %v6350_v60 = vpop.f32.mrb[104].mxu1  ;;  %v4624_v22 = vld [vmem:[#allocation2 + $0x18] sm:$0xff] }
 0x1e1   : > { %4368 = vst.msk [vmem:[#allocation2 + $0x98] sm:$0xff] %vm2055_vm5, %v4336_v4  ;;  %v4010_v33 = vadd.f32 %v6350_v60, %v3978_v31  ;;  %v3914_v56 = vpop.f32.mrb[105].mxu1  ;;  %v4623_v60 = vld [vmem:[#allocation2 + $0x10] sm:$0xff] }
 0x1e2   : > { %4367 = vst.msk [vmem:[#allocation2 + $0x90] sm:$0xff] %vm2055_vm5, %v4335_v32  ;;  %v4009_v10 = vadd.f32 %v3977_v17, %v3914_v56  ;;  %v4306_v25 = vld [vmem:[#allocation2 + $0xa8] sm:$0xff]  ;;  %v6400_v9 = vpop.f32.mrb[104].mxu0 }
 0x1e3   : > { %4042 = vst.msk [vmem:[#allocation2 + $0xc8] sm:$0xff] %vm2055_vm5, %v4010_v33  ;;  %v4338_v28 = vadd.f32 %v6394_v61, %v4306_v25  ;;  %v4305_v2 = vld [vmem:[#allocation2 + $0xa0] sm:$0xff]  ;;  %v4246_v14 = vpop.f32.mrb[105].mxu0 }
 0x1e4   : > { %4041 = vst.msk [vmem:[#allocation2 + $0xc0] sm:$0xff] %vm2055_vm5, %v4009_v10  ;;  %v4337_v41 = vadd.f32 %v4305_v2, %v4226_v51  ;;  %v6353_v44 = vpop.f32.mrb[106].mxu1  ;;  %v4626_v2 = vld [vmem:[#allocation2 + $0x28] sm:$0xff] }
 0x1e5   : > { %4370 = vst.msk [vmem:[#allocation2 + $0xa8] sm:$0xff] %vm2055_vm5, %v4338_v28  ;;  %v4012_v48 = vadd.f32 %v6353_v44, %v3980_v6  ;;  %v3924_v62 = vpop.f32.mrb[107].mxu1  ;;  %v4625_v44 = vld [vmem:[#allocation2 + $0x20] sm:$0xff] }
 0x1e6   : > { %4369 = vst.msk [vmem:[#allocation2 + $0xa0] sm:$0xff] %vm2055_vm5, %v4337_v41  ;;  %v4011_v63 = vadd.f32 %v3979_v29, %v3924_v62  ;;  %v4308_v39 = vld [vmem:[#allocation2 + $0xb8] sm:$0xff]  ;;  %v6403_v24 = vpop.f32.mrb[106].mxu0 }
 0x1e7   : > { %4044 = vst.msk [vmem:[#allocation2 + $0xd8] sm:$0xff] %vm2055_vm5, %v4012_v48  ;;  %v4340_v46 = vadd.f32 %v6397_v49, %v4308_v39  ;;  %v4307_v11 = vld [vmem:[#allocation2 + $0xb0] sm:$0xff]  ;;  %v4256_v8 = vpop.f32.mrb[107].mxu0 }
 0x1e8   : > { %4043 = vst.msk [vmem:[#allocation2 + $0xd0] sm:$0xff] %vm2055_vm5, %v4011_v63  ;;  %v4339_v47 = vadd.f32 %v4307_v11, %v4236_v59  ;;  %v6356_v23 = vpop.f32.mrb[108].mxu1  ;;  %v4628_v11 = vld [vmem:[#allocation2 + $0x38] sm:$0xff] }
 0x1e9   : > { %4372 = vst.msk [vmem:[#allocation2 + $0xb8] sm:$0xff] %vm2055_vm5, %v4340_v46  ;;  %v4014_v42 = vadd.f32 %v6356_v23, %v3982_v27  ;;  %v3934_v12 = vpop.f32.mrb[109].mxu1  ;;  %v4627_v23 = vld [vmem:[#allocation2 + $0x30] sm:$0xff] }
 0x1ea   : > { %4371 = vst.msk [vmem:[#allocation2 + $0xb0] sm:$0xff] %vm2055_vm5, %v4339_v47  ;;  %v4013_v35 = vadd.f32 %v3981_v53, %v3934_v12  ;;  %v4310_v36 = vld [vmem:[#allocation2 + $0xc8] sm:$0xff]  ;;  %v6406_v5 = vpop.f32.mrb[108].mxu0 }
 0x1eb   : > { %4046 = vst.msk [vmem:[#allocation2 + $0xe8] sm:$0xff] %vm2055_vm5, %v4014_v42  ;;  %v4342_v21 = vadd.f32 %v6400_v9, %v4310_v36  ;;  %v4309_v55 = vld [vmem:[#allocation2 + $0xc0] sm:$0xff]  ;;  %v4266_v52 = vpop.f32.mrb[109].mxu0 }
 0x1ec   : > { %4045 = vst.msk [vmem:[#allocation2 + $0xe0] sm:$0xff] %vm2055_vm5, %v4013_v35  ;;  %v4341_v45 = vadd.f32 %v4309_v55, %v4246_v14  ;;  %v6359_v37 = vpop.f32.mrb[110].mxu1  ;;  %v4630_v55 = vld [vmem:[#allocation2 + $0x48] sm:$0xff] }
 0x1ed   : > { %4374 = vst.msk [vmem:[#allocation2 + $0xc8] sm:$0xff] %vm2055_vm5, %v4342_v21  ;;  %v4016_v57 = vadd.f32 %v6359_v37, %v3984_v30  ;;  %v3944_v43 = vpop.f32.mrb[111].mxu1  ;;  %v4629_v37 = vld [vmem:[#allocation2 + $0x40] sm:$0xff]  ;;  %v8189_v30 = vld [vmem:[#allocation13] ss:$0 sm:$0xff] }
 0x1ee   : > { %4373 = vst.msk [vmem:[#allocation2 + $0xc0] sm:$0xff] %vm2055_vm5, %v4341_v45  ;;  %v4015_v34 = vadd.f32 %v3983_v58, %v3944_v43  ;;  %v4312_v3 = vld [vmem:[#allocation2 + $0xd8] sm:$0xff]  ;;  %v6409_v38 = vpop.f32.mrb[110].mxu0 }
 0x1ef   : > { %4048 = vst.msk [vmem:[#allocation2 + $0xf8] sm:$0xff] %vm2055_vm5, %v4016_v57  ;;  %v4344_v54 = vadd.f32 %v6403_v24, %v4312_v3  ;;  %v4311_v0 = vld [vmem:[#allocation2 + $0xd0] sm:$0xff]  ;;  %v4276_v13 = vpop.f32.mrb[111].mxu0 }
 0x1f0   : > { %4047 = vst.msk [vmem:[#allocation2 + $0xf0] sm:$0xff] %vm2055_vm5, %v4015_v34  ;;  %v4343_v61 = vadd.f32 %v4311_v0, %v4256_v8  ;;  %v6414_v1 = vpop.f32.mrb[112].mxu1 }
 0x1f1   : > { %4376 = vst.msk [vmem:[#allocation2 + $0xd8] sm:$0xff] %vm2055_vm5, %v4344_v54  ;;  %v4654_v51 = vadd.f32 %v6414_v1, %v4622_v40  ;;  %v4462_v16 = vpop.f32.mrb[113].mxu1 }
 0x1f2   : > { %4375 = vst.msk [vmem:[#allocation2 + $0xd0] sm:$0xff] %vm2055_vm5, %v4343_v61  ;;  %v4314_v26 = vld [vmem:[#allocation2 + $0xe8] sm:$0xff]  ;;  %v4653_v20 = vadd.f32 %v4621_v18, %v4462_v16  ;;  %v6464_v7 = vpop.f32.mrb[112].mxu0  ;;  %v4632_v61 = vld [vmem:[#allocation2 + $0x58] sm:$0xff]  ;;  %v4631_v18 = vld [vmem:[#allocation2 + $0x50] sm:$0xff] }
 0x1f3   : > { %4686 = vst.msk [vmem:[#allocation2 + $0x8] sm:$0xff] %vm2055_vm5, %v4654_v51  ;;  %v4346_v19 = vadd.f32 %v6406_v5, %v4314_v26  ;;  %v4313_v50 = vld [vmem:[#allocation2 + $0xe0] sm:$0xff]  ;;  %v4797_v15 = vpop.f32.mrb[113].mxu0 }
 0x1f4   : > { %4685 = vst.msk [vmem:[#allocation2] sm:$0xff] %vm2055_vm5, %v4653_v20  ;;  %v4345_v49 = vadd.f32 %v4313_v50, %v4266_v52  ;;  %v6417_v4 = vpop.f32.mrb[114].mxu1 }
 0x1f5   : > { %4378 = vst.msk [vmem:[#allocation2 + $0xe8] sm:$0xff] %vm2055_vm5, %v4346_v19  ;;  %v4656_v59 = vadd.f32 %v6417_v4, %v4624_v22  ;;  %v4472_v32 = vpop.f32.mrb[115].mxu1 }
 0x1f6   : > { %4377 = vst.msk [vmem:[#allocation2 + $0xe0] sm:$0xff] %vm2055_vm5, %v4345_v49  ;;  %v4316_v31 = vld [vmem:[#allocation2 + $0xf8] sm:$0xff]  ;;  %v4655_v33 = vadd.f32 %v4623_v60, %v4472_v32  ;;  %v6467_v56 = vpop.f32.mrb[114].mxu0  ;;  %v4634_v32 = vld [vmem:[#allocation2 + $0x68] sm:$0xff] }
 0x1f7   : > { %4688 = vst.msk [vmem:[#allocation2 + $0x18] sm:$0xff] %vm2055_vm5, %v4656_v59  ;;  %v4348_v17 = vadd.f32 %v6409_v38, %v4316_v31  ;;  %v4315_v10 = vld [vmem:[#allocation2 + $0xf0] sm:$0xff]  ;;  %v4807_v25 = vpop.f32.mrb[115].mxu0 }
 0x1f8   : > { %4687 = vst.msk [vmem:[#allocation2 + $0x10] sm:$0xff] %vm2055_vm5, %v4655_v33  ;;  %v4347_v9 = vadd.f32 %v4315_v10, %v4276_v13  ;;  %v6420_v28 = vpop.f32.mrb[116].mxu1 }
 0x1f9   : > { %4380 = vst.msk [vmem:[#allocation2 + $0xf8] sm:$0xff] %vm2055_vm5, %v4348_v17  ;;  %v4658_v14 = vadd.f32 %v6420_v28, %v4626_v2  ;;  %v4482_v41 = vpop.f32.mrb[117].mxu1  ;;  %v4633_v17 = vld [vmem:[#allocation2 + $0x60] sm:$0xff] }
 0x1fa   : > { %4379 = vst.msk [vmem:[#allocation2 + $0xf0] sm:$0xff] %vm2055_vm5, %v4347_v9  ;;  %v4657_v6 = vadd.f32 %v4625_v44, %v4482_v41  ;;  %v4957_v48 = vld [vmem:[#allocation2 + $0x8] sm:$0xff]  ;;  %v6470_v62 = vpop.f32.mrb[116].mxu0 }
 0x1fb   : > { %4690 = vst.msk [vmem:[#allocation2 + $0x28] sm:$0xff] %vm2055_vm5, %v4658_v14  ;;  %v4989_v29 = vadd.f32 %v6464_v7, %v4957_v48  ;;  %v4956_v63 = vld [vmem:[#allocation2] sm:$0xff]  ;;  %v4817_v39 = vpop.f32.mrb[117].mxu0 }
 0x1fc   : > { %4689 = vst.msk [vmem:[#allocation2 + $0x20] sm:$0xff] %vm2055_vm5, %v4657_v6  ;;  %v4988_v24 = vadd.f32 %v4956_v63, %v4797_v15  ;;  %v6423_v46 = vpop.f32.mrb[118].mxu1 }
 0x1fd   : > { %5021 = vst.msk [vmem:[#allocation2 + $0x8] sm:$0xff] %vm2055_vm5, %v4989_v29  ;;  %v4660_v8 = vadd.f32 %v6423_v46, %v4628_v11  ;;  %v4492_v47 = vpop.f32.mrb[119].mxu1  ;;  %v4635_v46 = vld [vmem:[#allocation2 + $0x70] sm:$0xff] }
 0x1fe   : > { %5020 = vst.msk [vmem:[#allocation2] sm:$0xff] %vm2055_vm5, %v4988_v24  ;;  %v4659_v27 = vadd.f32 %v4627_v23, %v4492_v47  ;;  %v4959_v42 = vld [vmem:[#allocation2 + $0x18] sm:$0xff]  ;;  %v6473_v12 = vpop.f32.mrb[118].mxu0 }
 0x1ff   : > { %4692 = vst.msk [vmem:[#allocation2 + $0x38] sm:$0xff] %vm2055_vm5, %v4660_v8  ;;  %v4991_v53 = vadd.f32 %v6467_v56, %v4959_v42  ;;  %v4958_v35 = vld [vmem:[#allocation2 + $0x10] sm:$0xff]  ;;  %v4827_v36 = vpop.f32.mrb[119].mxu0 }
 0x200   : > { %4691 = vst.msk [vmem:[#allocation2 + $0x30] sm:$0xff] %vm2055_vm5, %v4659_v27  ;;  %v4990_v5 = vadd.f32 %v4958_v35, %v4807_v25  ;;  %v6426_v21 = vpop.f32.mrb[120].mxu1 }
 0x201   : > { %5023 = vst.msk [vmem:[#allocation2 + $0x18] sm:$0xff] %vm2055_vm5, %v4991_v53  ;;  %v4662_v52 = vadd.f32 %v6426_v21, %v4630_v55  ;;  %v4502_v45 = vpop.f32.mrb[121].mxu1  ;;  %v4638_v55 = vld [vmem:[#allocation2 + $0x88] sm:$0xff] }
 0x202   : > { %5022 = vst.msk [vmem:[#allocation2 + $0x10] sm:$0xff] %vm2055_vm5, %v4990_v5  ;;  %v4661_v57 = vadd.f32 %v4629_v37, %v4502_v45  ;;  %v4961_v43 = vld [vmem:[#allocation2 + $0x28] sm:$0xff]  ;;  %v6476_v58 = vpop.f32.mrb[120].mxu0 }
 0x203   : > { %4694 = vst.msk [vmem:[#allocation2 + $0x48] sm:$0xff] %vm2055_vm5, %v4662_v52  ;;  %v4993_v34 = vadd.f32 %v6470_v62, %v4961_v43  ;;  %v4960_v3 = vld [vmem:[#allocation2 + $0x20] sm:$0xff]  ;;  %v4837_v38 = vpop.f32.mrb[121].mxu0  ;;  %v4636_v62 = vld [vmem:[#allocation2 + $0x78] sm:$0xff] }
 0x204   : > { %v5053_v54 = vld [vmem:[#allocation2 + $0x8] sm:$0xff]  ;;  %4693 = vst.msk [vmem:[#allocation2 + $0x40] sm:$0xff] %vm2055_vm5, %v4661_v57  ;;  %v4992_v0 = vadd.f32 %v4960_v3, %v4817_v39  ;;  %v6429_v13 = vpop.f32.mrb[122].mxu1  ;;  %v4637_v43 = vld [vmem:[#allocation2 + $0x80] sm:$0xff] }
 0x205   : > { %v5092_v1 = vadd.f32 %v8189_v30, %v5053_v54  ;;  %v5052_v40 = vld [vmem:[#allocation2] sm:$0xff]  ;;  %5025 = vst.msk [vmem:[#allocation2 + $0x28] sm:$0xff] %vm2055_vm5, %v4993_v34  ;;  %v4664_v51 = vadd.f32 %v6429_v13, %v4632_v61  ;;  %v4512_v16 = vpop.f32.mrb[123].mxu1 }
 0x206   : > { %v5091_v26 = vadd.f32 %v8189_v30, %v5052_v40  ;;  %5024 = vst.msk [vmem:[#allocation2 + $0x20] sm:$0xff] %vm2055_vm5, %v4992_v0  ;;  %v4663_v20 = vadd.f32 %v4631_v18, %v4512_v16  ;;  %v4963_v7 = vld [vmem:[#allocation2 + $0x38] sm:$0xff]  ;;  %v6479_v19 = vpop.f32.mrb[122].mxu0 }
 0x207   : > { %5124 = vst.msk [vmem:[#allocation2 + $0x8] sm:$0xff] %vm2055_vm5, %v5092_v1  ;;  %4696 = vst.msk [vmem:[#allocation2 + $0x58] sm:$0xff] %vm2055_vm5, %v4664_v51  ;;  %v4995_v50 = vadd.f32 %v6473_v12, %v4963_v7  ;;  %v4962_v15 = vld [vmem:[#allocation2 + $0x30] sm:$0xff]  ;;  %v4847_v49 = vpop.f32.mrb[123].mxu0  ;;  %v4640_v18 = vld [vmem:[#allocation2 + $0x98] sm:$0xff] }
 0x208   : > { %5123 = vst.msk [vmem:[#allocation2] sm:$0xff] %vm2055_vm5, %v5091_v26  ;;  %v5055_v4 = vld [vmem:[#allocation2 + $0x18] sm:$0xff]  ;;  %4695 = vst.msk [vmem:[#allocation2 + $0x50] sm:$0xff] %vm2055_vm5, %v4663_v20  ;;  %v4994_v22 = vadd.f32 %v4962_v15, %v4827_v36  ;;  %v6432_v59 = vpop.f32.mrb[124].mxu1 }
 0x209   : > { %v5094_v60 = vadd.f32 %v8189_v30, %v5055_v4  ;;  %v5054_v31 = vld [vmem:[#allocation2 + $0x10] sm:$0xff]  ;;  %5027 = vst.msk [vmem:[#allocation2 + $0x38] sm:$0xff] %vm2055_vm5, %v4995_v50  ;;  %v4666_v33 = vadd.f32 %v6432_v59, %v4634_v32  ;;  %v4522_v56 = vpop.f32.mrb[125].mxu1 }
 0x20a   : > { %v5093_v10 = vadd.f32 %v8189_v30, %v5054_v31  ;;  %5026 = vst.msk [vmem:[#allocation2 + $0x30] sm:$0xff] %vm2055_vm5, %v4994_v22  ;;  %v4665_v25 = vadd.f32 %v4633_v17, %v4522_v56  ;;  %v4965_v9 = vld [vmem:[#allocation2 + $0x48] sm:$0xff]  ;;  %v6482_v28 = vpop.f32.mrb[124].mxu0  ;;  %v4639_v50 = vld [vmem:[#allocation2 + $0x90] sm:$0xff] }
 0x20b   : > { %5126 = vst.msk [vmem:[#allocation2 + $0x18] sm:$0xff] %vm2055_vm5, %v5094_v60  ;;  %4698 = vst.msk [vmem:[#allocation2 + $0x68] sm:$0xff] %vm2055_vm5, %v4666_v33  ;;  %v4997_v2 = vadd.f32 %v6476_v58, %v4965_v9  ;;  %v4964_v14 = vld [vmem:[#allocation2 + $0x40] sm:$0xff]  ;;  %v4857_v41 = vpop.f32.mrb[125].mxu0 }
 0x20c   : > { %5125 = vst.msk [vmem:[#allocation2 + $0x10] sm:$0xff] %vm2055_vm5, %v5093_v10  ;;  %v5057_v44 = vld [vmem:[#allocation2 + $0x28] sm:$0xff]  ;;  %4697 = vst.msk [vmem:[#allocation2 + $0x60] sm:$0xff] %vm2055_vm5, %v4665_v25  ;;  %v4996_v6 = vadd.f32 %v4964_v14, %v4837_v38  ;;  %v6435_v48 = vpop.f32.mrb[126].mxu1 }
 0x20d   : > { %v5096_v29 = vadd.f32 %v8189_v30, %v5057_v44  ;;  %v5056_v63 = vld [vmem:[#allocation2 + $0x20] sm:$0xff]  ;;  %5029 = vst.msk [vmem:[#allocation2 + $0x48] sm:$0xff] %vm2055_vm5, %v4997_v2  ;;  %v4668_v39 = vadd.f32 %v6435_v48, %v4636_v62  ;;  %v4532_v24 = vpop.f32.mrb[127].mxu1  ;;  %v4642_v25 = vld [vmem:[#allocation2 + $0xa8] sm:$0xff] }
 0x20e   : > { %v5156_v11 = vld [vmem:[#allocation2 + $0x8] sm:$0xff]  ;;  %v5095_v8 = vadd.f32 %v8189_v30, %v5056_v63  ;;  %5028 = vst.msk [vmem:[#allocation2 + $0x40] sm:$0xff] %vm2055_vm5, %v4996_v6  ;;  %v4667_v47 = vadd.f32 %v4635_v46, %v4532_v24  ;;  %v4967_v23 = vld [vmem:[#allocation2 + $0x58] sm:$0xff]  ;;  %v6485_v27 = vpop.f32.mrb[126].mxu0 }
 0x20f   : > { %5188 = vst.msk [vmem:[%s8213_s22 + $0x8] sm:$0xff] %vm2055_vm5, %v5156_v11  ;;  %v5155_v42 = vld [vmem:[#allocation2] sm:$0xff]  ;;  %5128 = vst.msk [vmem:[#allocation2 + $0x28] sm:$0xff] %vm2055_vm5, %v5096_v29  ;;  %v4999_v12 = vadd.f32 %v6479_v19, %v4967_v23  ;;  %v4966_v53 = vld [vmem:[#allocation2 + $0x50] sm:$0xff]  ;;  %v4867_v35 = vpop.f32.mrb[127].mxu0 }
 0x210   : > { %4700 = vst.msk [vmem:[#allocation2 + $0x78] sm:$0xff] %vm2055_vm5, %v4668_v39  ;;  %5187 = vst.msk [vmem:[%s8213_s22] sm:$0xff] %vm2055_vm5, %v5155_v42  ;;  %v5059_v36 = vld [vmem:[#allocation2 + $0x38] sm:$0xff]  ;;  %v4998_v5 = vadd.f32 %v4966_v53, %v4847_v49  ;;  %v6438_v21 = vpop.f32.mrb[128].mxu1 }
 0x211   : > { %5127 = vst.msk [vmem:[#allocation2 + $0x20] sm:$0xff] %vm2055_vm5, %v5095_v8  ;;  %4699 = vst.msk [vmem:[#allocation2 + $0x70] sm:$0xff] %vm2055_vm5, %v4667_v47  ;;  %v5098_v52 = vadd.f32 %v8189_v30, %v5059_v36  ;;  %v5058_v45 = vld [vmem:[#allocation2 + $0x30] sm:$0xff]  ;;  %v4670_v37 = vadd.f32 %v6438_v21, %v4638_v55  ;;  %v4542_v57 = vpop.f32.mrb[129].mxu1  ;;  %v4644_v23 = vld [vmem:[#allocation2 + $0xb8] sm:$0xff] }
 0x212   : > { %5031 = vst.msk [vmem:[#allocation2 + $0x58] sm:$0xff] %vm2055_vm5, %v4999_v12  ;;  %v5158_v58 = vld [vmem:[#allocation2 + $0x18] sm:$0xff]  ;;  %v5097_v34 = vadd.f32 %v8189_v30, %v5058_v45  ;;  %5030 = vst.msk [vmem:[#allocation2 + $0x50] sm:$0xff] %vm2055_vm5, %v4998_v5  ;;  %v4669_v3 = vadd.f32 %v4637_v43, %v4542_v57  ;;  %v4969_v38 = vld [vmem:[#allocation2 + $0x68] sm:$0xff]  ;;  %v6488_v54 = vpop.f32.mrb[128].mxu0 }
 0x213   : > { %5190 = vst.msk [vmem:[%s8213_s22 + $0x18] sm:$0xff] %vm2055_vm5, %v5158_v58  ;;  %v5157_v0 = vld [vmem:[#allocation2 + $0x10] sm:$0xff]  ;;  %5130 = vst.msk [vmem:[#allocation2 + $0x38] sm:$0xff] %vm2055_vm5, %v5098_v52  ;;  %v5001_v13 = vadd.f32 %v6482_v28, %v4969_v38  ;;  %v4968_v61 = vld [vmem:[#allocation2 + $0x60] sm:$0xff]  ;;  %v4877_v1 = vpop.f32.mrb[129].mxu0 }
 0x214   : > { %4702 = vst.msk [vmem:[#allocation2 + $0x88] sm:$0xff] %vm2055_vm5, %v4670_v37  ;;  %5189 = vst.msk [vmem:[%s8213_s22 + $0x10] sm:$0xff] %vm2055_vm5, %v5157_v0  ;;  %v5061_v40 = vld [vmem:[#allocation2 + $0x48] sm:$0xff]  ;;  %v5000_v51 = vadd.f32 %v4968_v61, %v4857_v41  ;;  %v6441_v16 = vpop.f32.mrb[130].mxu1  ;;  %v4641_v41 = vld [vmem:[#allocation2 + $0xa0] sm:$0xff] }
 0x215   : > { %5129 = vst.msk [vmem:[#allocation2 + $0x30] sm:$0xff] %vm2055_vm5, %v5097_v34  ;;  %4701 = vst.msk [vmem:[#allocation2 + $0x80] sm:$0xff] %vm2055_vm5, %v4669_v3  ;;  %v5100_v26 = vadd.f32 %v8189_v30, %v5061_v40  ;;  %v5060_v20 = vld [vmem:[#allocation2 + $0x40] sm:$0xff]  ;;  %v4672_v7 = vadd.f32 %v6441_v16, %v4640_v18  ;;  %v4552_v19 = vpop.f32.mrb[131].mxu1  ;;  %v4646_v38 = vld [vmem:[#allocation2 + $0xc8] sm:$0xff] }
 0x216   : > { %5033 = vst.msk [vmem:[#allocation2 + $0x68] sm:$0xff] %vm2055_vm5, %v5001_v13  ;;  %v5160_v15 = vld [vmem:[#allocation2 + $0x28] sm:$0xff]  ;;  %v5099_v49 = vadd.f32 %v8189_v30, %v5060_v20  ;;  %5032 = vst.msk [vmem:[#allocation2 + $0x60] sm:$0xff] %vm2055_vm5, %v5000_v51  ;;  %v4671_v4 = vadd.f32 %v4639_v50, %v4552_v19  ;;  %v6491_v59 = vpop.f32.mrb[130].mxu0 }
 0x217   : > { %v4971_v22 = vld [vmem:[#allocation2 + $0x78] sm:$0xff]  ;;  %5192 = vst.msk [vmem:[%s8213_s22 + $0x28] sm:$0xff] %vm2055_vm5, %v5160_v15  ;;  %5132 = vst.msk [vmem:[#allocation2 + $0x48] sm:$0xff] %vm2055_vm5, %v5100_v26  ;;  %v4887_v33 = vpop.f32.mrb[131].mxu0 }
 0x218   : > { %v5159_v32 = vld [vmem:[#allocation2 + $0x20] sm:$0xff]  ;;  %4704 = vst.msk [vmem:[#allocation2 + $0x98] sm:$0xff] %vm2055_vm5, %v4672_v7  ;;  %v5003_v60 = vadd.f32 %v6485_v27, %v4971_v22  ;;  %v4970_v31 = vld [vmem:[#allocation2 + $0x70] sm:$0xff]  ;;  %5131 = vst.msk [vmem:[#allocation2 + $0x40] sm:$0xff] %vm2055_vm5, %v5099_v49  ;;  %v6444_v10 = vpop.f32.mrb[132].mxu1 }
 0x219   : > { %5191 = vst.msk [vmem:[%s8213_s22 + $0x20] sm:$0xff] %vm2055_vm5, %v5159_v32  ;;  %v5063_v56 = vld [vmem:[#allocation2 + $0x58] sm:$0xff]  ;;  %4703 = vst.msk [vmem:[#allocation2 + $0x90] sm:$0xff] %vm2055_vm5, %v4671_v4  ;;  %v5002_v17 = vadd.f32 %v4970_v31, %v4867_v35  ;;  %v5062_v28 = vld [vmem:[#allocation2 + $0x50] sm:$0xff]  ;;  %v4674_v2 = vadd.f32 %v6444_v10, %v4642_v25  ;;  %v4562_v14 = vpop.f32.mrb[133].mxu1 }
 0x21a   : > { %v5102_v9 = vadd.f32 %v8189_v30, %v5063_v56  ;;  %5035 = vst.msk [vmem:[#allocation2 + $0x78] sm:$0xff] %vm2055_vm5, %v5003_v60  ;;  %v5162_v44 = vld [vmem:[#allocation2 + $0x38] sm:$0xff]  ;;  %v5101_v6 = vadd.f32 %v8189_v30, %v5062_v28  ;;  %v4673_v48 = vadd.f32 %v4641_v41, %v4562_v14  ;;  %v6494_v29 = vpop.f32.mrb[132].mxu0  ;;  %v4643_v35 = vld [vmem:[#allocation2 + $0xb0] sm:$0xff] }
 0x21b   : > { %5034 = vst.msk [vmem:[#allocation2 + $0x70] sm:$0xff] %vm2055_vm5, %v5002_v17  ;;  %v4973_v62 = vld [vmem:[#allocation2 + $0x88] sm:$0xff]  ;;  %5194 = vst.msk [vmem:[%s8213_s22 + $0x38] sm:$0xff] %vm2055_vm5, %v5162_v44  ;;  %v4897_v46 = vpop.f32.mrb[133].mxu0  ;;  %v4648_v22 = vld [vmem:[#allocation2 + $0xd8] sm:$0xff] }
 0x21c   : > { %v5161_v63 = vld [vmem:[#allocation2 + $0x30] sm:$0xff]  ;;  %5134 = vst.msk [vmem:[#allocation2 + $0x58] sm:$0xff] %vm2055_vm5, %v5102_v9  ;;  %4706 = vst.msk [vmem:[#allocation2 + $0xa8] sm:$0xff] %vm2055_vm5, %v4674_v2  ;;  %v5005_v39 = vadd.f32 %v6488_v54, %v4973_v62  ;;  %v4972_v24 = vld [vmem:[#allocation2 + $0x80] sm:$0xff]  ;;  %v6447_v47 = vpop.f32.mrb[134].mxu1 }
 0x21d   : > { %5193 = vst.msk [vmem:[%s8213_s22 + $0x30] sm:$0xff] %vm2055_vm5, %v5161_v63  ;;  %5133 = vst.msk [vmem:[#allocation2 + $0x50] sm:$0xff] %vm2055_vm5, %v5101_v6  ;;  %v5065_v11 = vld [vmem:[#allocation2 + $0x68] sm:$0xff]  ;;  %v5004_v8 = vadd.f32 %v4972_v24, %v4877_v1  ;;  %v5064_v42 = vld [vmem:[#allocation2 + $0x60] sm:$0xff]  ;;  %v4676_v12 = vadd.f32 %v6447_v47, %v4644_v23  ;;  %v4572_v53 = vpop.f32.mrb[135].mxu1 }
 0x21e   : > { %4705 = vst.msk [vmem:[#allocation2 + $0xa0] sm:$0xff] %vm2055_vm5, %v4673_v48  ;;  %v5104_v27 = vadd.f32 %v8189_v30, %v5065_v11  ;;  %5037 = vst.msk [vmem:[#allocation2 + $0x88] sm:$0xff] %vm2055_vm5, %v5005_v39  ;;  %v5164_v36 = vld [vmem:[#allocation2 + $0x48] sm:$0xff]  ;;  %v5103_v5 = vadd.f32 %v8189_v30, %v5064_v42  ;;  %v4675_v21 = vadd.f32 %v4643_v35, %v4572_v53  ;;  %v6497_v52 = vpop.f32.mrb[134].mxu0  ;;  %v4645_v1 = vld [vmem:[#allocation2 + $0xc0] sm:$0xff] }
 0x21f   : > { %5036 = vst.msk [vmem:[#allocation2 + $0x80] sm:$0xff] %vm2055_vm5, %v5004_v8  ;;  %v4975_v55 = vld [vmem:[#allocation2 + $0x98] sm:$0xff]  ;;  %5196 = vst.msk [vmem:[%s8213_s22 + $0x48] sm:$0xff] %vm2055_vm5, %v5164_v36  ;;  %v5163_v45 = vld [vmem:[#allocation2 + $0x40] sm:$0xff]  ;;  %v4907_v43 = vpop.f32.mrb[135].mxu0 }
 0x220   : > { %5136 = vst.msk [vmem:[#allocation2 + $0x68] sm:$0xff] %vm2055_vm5, %v5104_v27  ;;  %4708 = vst.msk [vmem:[#allocation2 + $0xb8] sm:$0xff] %vm2055_vm5, %v4676_v12  ;;  %v5007_v37 = vadd.f32 %v6491_v59, %v4975_v55  ;;  %v4974_v57 = vld [vmem:[#allocation2 + $0x90] sm:$0xff]  ;;  %v6450_v3 = vpop.f32.mrb[136].mxu1  ;;  %v4650_v62 = vld [vmem:[#allocation2 + $0xe8] sm:$0xff] }
 0x221   : > { %5195 = vst.msk [vmem:[%s8213_s22 + $0x40] sm:$0xff] %vm2055_vm5, %v5163_v45  ;;  %5135 = vst.msk [vmem:[#allocation2 + $0x60] sm:$0xff] %vm2055_vm5, %v5103_v5  ;;  %v5067_v58 = vld [vmem:[#allocation2 + $0x78] sm:$0xff]  ;;  %v5006_v34 = vadd.f32 %v4974_v57, %v4887_v33  ;;  %v4678_v13 = vadd.f32 %v6450_v3, %v4646_v38  ;;  %v4582_v61 = vpop.f32.mrb[137].mxu1  ;;  %v4647_v33 = vld [vmem:[#allocation2 + $0xd0] sm:$0xff] }
 0x222   : > { %4707 = vst.msk [vmem:[#allocation2 + $0xb0] sm:$0xff] %vm2055_vm5, %v4675_v21  ;;  %v5106_v54 = vadd.f32 %v8189_v30, %v5067_v58  ;;  %v5066_v0 = vld [vmem:[#allocation2 + $0x70] sm:$0xff]  ;;  %5039 = vst.msk [vmem:[#allocation2 + $0x98] sm:$0xff] %vm2055_vm5, %v5007_v37  ;;  %v4677_v16 = vadd.f32 %v4645_v1, %v4582_v61  ;;  %v6500_v26 = vpop.f32.mrb[136].mxu0  ;;  %v4652_v55 = vld [vmem:[#allocation2 + $0xf8] sm:$0xff] }
 0x223   : > { %v5166_v40 = vld [vmem:[#allocation2 + $0x58] sm:$0xff]  ;;  %v5105_v51 = vadd.f32 %v8189_v30, %v5066_v0  ;;  %5038 = vst.msk [vmem:[#allocation2 + $0x90] sm:$0xff] %vm2055_vm5, %v5006_v34  ;;  %v4977_v18 = vld [vmem:[#allocation2 + $0xa8] sm:$0xff]  ;;  %4710 = vst.msk [vmem:[#allocation2 + $0xc8] sm:$0xff] %vm2055_vm5, %v4678_v13  ;;  %v4917_v50 = vpop.f32.mrb[137].mxu0 }
 0x224   : > { %5198 = vst.msk [vmem:[%s8213_s22 + $0x58] sm:$0xff] %vm2055_vm5, %v5166_v40  ;;  %v5165_v20 = vld [vmem:[#allocation2 + $0x50] sm:$0xff]  ;;  %5138 = vst.msk [vmem:[#allocation2 + $0x78] sm:$0xff] %vm2055_vm5, %v5106_v54  ;;  %v5009_v7 = vadd.f32 %v6494_v29, %v4977_v18  ;;  %v6453_v4 = vpop.f32.mrb[138].mxu1 }
 0x225   : > { %v4976_v19 = vld [vmem:[#allocation2 + $0xa0] sm:$0xff]  ;;  %5197 = vst.msk [vmem:[%s8213_s22 + $0x50] sm:$0xff] %vm2055_vm5, %v5165_v20  ;;  %5137 = vst.msk [vmem:[#allocation2 + $0x70] sm:$0xff] %vm2055_vm5, %v5105_v51  ;;  %v5069_v15 = vld [vmem:[#allocation2 + $0x88] sm:$0xff]  ;;  %v4680_v60 = vadd.f32 %v6453_v4, %v4648_v22  ;;  %v4592_v31 = vpop.f32.mrb[139].mxu1 }
 0x226   : > { %4709 = vst.msk [vmem:[#allocation2 + $0xc0] sm:$0xff] %vm2055_vm5, %v4677_v16  ;;  %v5008_v49 = vadd.f32 %v4976_v19, %v4897_v46  ;;  %v5108_v59 = vadd.f32 %v8189_v30, %v5069_v15  ;;  %v5068_v32 = vld [vmem:[#allocation2 + $0x80] sm:$0xff]  ;;  %5041 = vst.msk [vmem:[#allocation2 + $0xa8] sm:$0xff] %vm2055_vm5, %v5009_v7  ;;  %v4679_v10 = vadd.f32 %v4647_v33, %v4592_v31  ;;  %v6503_v9 = vpop.f32.mrb[138].mxu0 }
 0x227   : > { %v5168_v56 = vld [vmem:[#allocation2 + $0x68] sm:$0xff]  ;;  %v5107_v17 = vadd.f32 %v8189_v30, %v5068_v32  ;;  %v4979_v25 = vld [vmem:[#allocation2 + $0xb8] sm:$0xff]  ;;  %4712 = vst.msk [vmem:[#allocation2 + $0xd8] sm:$0xff] %vm2055_vm5, %v4680_v60  ;;  %v4927_v41 = vpop.f32.mrb[139].mxu0  ;;  %v4649_v46 = vld [vmem:[#allocation2 + $0xe0] sm:$0xff] }
 0x228   : > { %5040 = vst.msk [vmem:[#allocation2 + $0xa0] sm:$0xff] %vm2055_vm5, %v5008_v49  ;;  %5200 = vst.msk [vmem:[%s8213_s22 + $0x68] sm:$0xff] %vm2055_vm5, %v5168_v56  ;;  %v5167_v28 = vld [vmem:[#allocation2 + $0x60] sm:$0xff]  ;;  %v5011_v2 = vadd.f32 %v6497_v52, %v4979_v25  ;;  %v6456_v48 = vpop.f32.mrb[140].mxu1 }
 0x229   : > { %5140 = vst.msk [vmem:[#allocation2 + $0x88] sm:$0xff] %vm2055_vm5, %v5108_v59  ;;  %v4978_v14 = vld [vmem:[#allocation2 + $0xb0] sm:$0xff]  ;;  %5199 = vst.msk [vmem:[%s8213_s22 + $0x60] sm:$0xff] %vm2055_vm5, %v5167_v28  ;;  %v5071_v44 = vld [vmem:[#allocation2 + $0x98] sm:$0xff]  ;;  %v4682_v39 = vadd.f32 %v6456_v48, %v4650_v62  ;;  %v4602_v24 = vpop.f32.mrb[141].mxu1 }
 0x22a   : > { %5139 = vst.msk [vmem:[#allocation2 + $0x80] sm:$0xff] %vm2055_vm5, %v5107_v17  ;;  %4711 = vst.msk [vmem:[#allocation2 + $0xd0] sm:$0xff] %vm2055_vm5, %v4679_v10  ;;  %v5010_v6 = vadd.f32 %v4978_v14, %v4907_v43  ;;  %v5110_v29 = vadd.f32 %v8189_v30, %v5071_v44  ;;  %v5070_v63 = vld [vmem:[#allocation2 + $0x90] sm:$0xff]  ;;  %v4681_v47 = vadd.f32 %v4649_v46, %v4602_v24  ;;  %v4981_v23 = vld [vmem:[#allocation2 + $0xc8] sm:$0xff]  ;;  %v6506_v27 = vpop.f32.mrb[140].mxu0 }
 0x22b   : > { %5043 = vst.msk [vmem:[#allocation2 + $0xb8] sm:$0xff] %vm2055_vm5, %v5011_v2  ;;  %v5170_v11 = vld [vmem:[#allocation2 + $0x78] sm:$0xff]  ;;  %v5109_v8 = vadd.f32 %v8189_v30, %v5070_v63  ;;  %4714 = vst.msk [vmem:[#allocation2 + $0xe8] sm:$0xff] %vm2055_vm5, %v4682_v39  ;;  %v5013_v12 = vadd.f32 %v6500_v26, %v4981_v23  ;;  %v4937_v35 = vpop.f32.mrb[141].mxu0  ;;  %v4651_v43 = vld [vmem:[#allocation2 + $0xf0] sm:$0xff] }
 0x22c   : > { %5042 = vst.msk [vmem:[#allocation2 + $0xb0] sm:$0xff] %vm2055_vm5, %v5010_v6  ;;  %5202 = vst.msk [vmem:[%s8213_s22 + $0x78] sm:$0xff] %vm2055_vm5, %v5170_v11  ;;  %v5169_v42 = vld [vmem:[#allocation2 + $0x70] sm:$0xff]  ;;  %v6459_v21 = vpop.f32.mrb[142].mxu1 }
 0x22d   : > { %5142 = vst.msk [vmem:[#allocation2 + $0x98] sm:$0xff] %vm2055_vm5, %v5110_v29  ;;  %v4980_v53 = vld [vmem:[#allocation2 + $0xc0] sm:$0xff]  ;;  %5201 = vst.msk [vmem:[%s8213_s22 + $0x70] sm:$0xff] %vm2055_vm5, %v5169_v42  ;;  %v5073_v36 = vld [vmem:[#allocation2 + $0xa8] sm:$0xff]  ;;  %v4684_v37 = vadd.f32 %v6459_v21, %v4652_v55  ;;  %v4612_v57 = vpop.f32.mrb[143].mxu1 }
 0x22e   : > { %5141 = vst.msk [vmem:[#allocation2 + $0x90] sm:$0xff] %vm2055_vm5, %v5109_v8  ;;  %4713 = vst.msk [vmem:[#allocation2 + $0xe0] sm:$0xff] %vm2055_vm5, %v4681_v47  ;;  %v5012_v5 = vadd.f32 %v4980_v53, %v4917_v50  ;;  %v5112_v52 = vadd.f32 %v8189_v30, %v5073_v36  ;;  %v4683_v3 = vadd.f32 %v4651_v43, %v4612_v57  ;;  %v4983_v38 = vld [vmem:[#allocation2 + $0xd8] sm:$0xff]  ;;  %v6509_v54 = vpop.f32.mrb[142].mxu0 }
 0x22f   : > { %v5072_v45 = vld [vmem:[#allocation2 + $0xa0] sm:$0xff]  ;;  %5045 = vst.msk [vmem:[#allocation2 + $0xc8] sm:$0xff] %vm2055_vm5, %v5013_v12  ;;  %4716 = vst.msk [vmem:[#allocation2 + $0xf8] sm:$0xff] %vm2055_vm5, %v4684_v37  ;;  %v5015_v13 = vadd.f32 %v6503_v9, %v4983_v38  ;;  %v4947_v1 = vpop.f32.mrb[143].mxu0 }
 0x230   : > { %v5172_v58 = vld [vmem:[#allocation2 + $0x88] sm:$0xff]  ;;  %v5111_v34 = vadd.f32 %v8189_v30, %v5072_v45  ;;  %5044 = vst.msk [vmem:[#allocation2 + $0xc0] sm:$0xff] %vm2055_vm5, %v5012_v5  ;;  %5144 = vst.msk [vmem:[#allocation2 + $0xa8] sm:$0xff] %vm2055_vm5, %v5112_v52 }
 0x231   : > { %5204 = vst.msk [vmem:[%s8213_s22 + $0x88] sm:$0xff] %vm2055_vm5, %v5172_v58  ;;  %v5171_v0 = vld [vmem:[#allocation2 + $0x80] sm:$0xff]  ;;  %v4982_v61 = vld [vmem:[#allocation2 + $0xd0] sm:$0xff]  ;;  %4715 = vst.msk [vmem:[#allocation2 + $0xf0] sm:$0xff] %vm2055_vm5, %v4683_v3 }
 0x232   : > { %5203 = vst.msk [vmem:[%s8213_s22 + $0x80] sm:$0xff] %vm2055_vm5, %v5171_v0  ;;  %5143 = vst.msk [vmem:[#allocation2 + $0xa0] sm:$0xff] %vm2055_vm5, %v5111_v34  ;;  %v5075_v40 = vld [vmem:[#allocation2 + $0xb8] sm:$0xff]  ;;  %v5014_v51 = vadd.f32 %v4982_v61, %v4927_v41  ;;  %v4985_v7 = vld [vmem:[#allocation2 + $0xe8] sm:$0xff] }
 0x233   : > { %v5114_v16 = vadd.f32 %v8189_v30, %v5075_v40  ;;  %v5074_v18 = vld [vmem:[#allocation2 + $0xb0] sm:$0xff]  ;;  %5047 = vst.msk [vmem:[#allocation2 + $0xd8] sm:$0xff] %vm2055_vm5, %v5015_v13  ;;  %v5017_v50 = vadd.f32 %v6506_v27, %v4985_v7 }
 0x234   : > { %v5174_v26 = vld [vmem:[#allocation2 + $0x98] sm:$0xff]  ;;  %v5113_v20 = vadd.f32 %v8189_v30, %v5074_v18  ;;  %5046 = vst.msk [vmem:[#allocation2 + $0xd0] sm:$0xff] %vm2055_vm5, %v5014_v51 }
 0x235   : > { %5206 = vst.msk [vmem:[%s8213_s22 + $0x98] sm:$0xff] %vm2055_vm5, %v5174_v26  ;;  %v5173_v19 = vld [vmem:[#allocation2 + $0x90] sm:$0xff]  ;;  %5146 = vst.msk [vmem:[#allocation2 + $0xb8] sm:$0xff] %vm2055_vm5, %v5114_v16  ;;  %v4984_v15 = vld [vmem:[#allocation2 + $0xe0] sm:$0xff] }
 0x236   : > { %5205 = vst.msk [vmem:[%s8213_s22 + $0x90] sm:$0xff] %vm2055_vm5, %v5173_v19  ;;  %5145 = vst.msk [vmem:[#allocation2 + $0xb0] sm:$0xff] %vm2055_vm5, %v5113_v20  ;;  %v5077_v49 = vld [vmem:[#allocation2 + $0xc8] sm:$0xff]  ;;  %v5016_v4 = vadd.f32 %v4984_v15, %v4937_v35  ;;  %v4987_v31 = vld [vmem:[#allocation2 + $0xf8] sm:$0xff] }
 0x237   : > { %v5116_v22 = vadd.f32 %v8189_v30, %v5077_v49  ;;  %v5076_v59 = vld [vmem:[#allocation2 + $0xc0] sm:$0xff]  ;;  %5049 = vst.msk [vmem:[#allocation2 + $0xe8] sm:$0xff] %vm2055_vm5, %v5017_v50  ;;  %v5176_v32 = vld [vmem:[#allocation2 + $0xa8] sm:$0xff]  ;;  %v5019_v56 = vadd.f32 %v6509_v54, %v4987_v31 }
 0x238   : > { %v5115_v60 = vadd.f32 %v8189_v30, %v5076_v59  ;;  %5048 = vst.msk [vmem:[#allocation2 + $0xe0] sm:$0xff] %vm2055_vm5, %v5016_v4  ;;  %5208 = vst.msk [vmem:[%s8213_s22 + $0xa8] sm:$0xff] %vm2055_vm5, %v5176_v32  ;;  %v4986_v17 = vld [vmem:[#allocation2 + $0xf0] sm:$0xff] }
 0x239   : > { %v5175_v33 = vld [vmem:[#allocation2 + $0xa0] sm:$0xff]  ;;  %5148 = vst.msk [vmem:[#allocation2 + $0xc8] sm:$0xff] %vm2055_vm5, %v5116_v22  ;;  %v5018_v25 = vadd.f32 %v4986_v17, %v4947_v1  ;;  %5051 = vst.msk [vmem:[#allocation2 + $0xf8] sm:$0xff] %vm2055_vm5, %v5019_v56 }
 0x23a   : > { %5207 = vst.msk [vmem:[%s8213_s22 + $0xa0] sm:$0xff] %vm2055_vm5, %v5175_v33  ;;  %5147 = vst.msk [vmem:[#allocation2 + $0xc0] sm:$0xff] %vm2055_vm5, %v5115_v60  ;;  %v5079_v10 = vld [vmem:[#allocation2 + $0xd8] sm:$0xff] }
 0x23b   : > { %v5118_v9 = vadd.f32 %v8189_v30, %v5079_v10  ;;  %v5078_v28 = vld [vmem:[#allocation2 + $0xd0] sm:$0xff]  ;;  %5050 = vst.msk [vmem:[#allocation2 + $0xf0] sm:$0xff] %vm2055_vm5, %v5018_v25 }
 0x23c   : > { %v5178_v2 = vld [vmem:[#allocation2 + $0xb8] sm:$0xff]  ;;  %v5117_v14 = vadd.f32 %v8189_v30, %v5078_v28 }
 0x23d   : > { %5210 = vst.msk [vmem:[%s8213_s22 + $0xb8] sm:$0xff] %vm2055_vm5, %v5178_v2  ;;  %v5177_v41 = vld [vmem:[#allocation2 + $0xb0] sm:$0xff]  ;;  %5150 = vst.msk [vmem:[#allocation2 + $0xd8] sm:$0xff] %vm2055_vm5, %v5118_v9 }
 0x23e   : > { %5209 = vst.msk [vmem:[%s8213_s22 + $0xb0] sm:$0xff] %vm2055_vm5, %v5177_v41  ;;  %5149 = vst.msk [vmem:[#allocation2 + $0xd0] sm:$0xff] %vm2055_vm5, %v5117_v14  ;;  %v5081_v44 = vld [vmem:[#allocation2 + $0xe8] sm:$0xff] }
 0x23f   : > { %v5120_v6 = vadd.f32 %v8189_v30, %v5081_v44  ;;  %v5080_v48 = vld [vmem:[#allocation2 + $0xe0] sm:$0xff] }
 0x240   : > { %v5180_v62 = vld [vmem:[#allocation2 + $0xc8] sm:$0xff]  ;;  %v5119_v29 = vadd.f32 %v8189_v30, %v5080_v48  ;;  %v5083_v39 = vld [vmem:[#allocation2 + $0xf8] sm:$0xff] }
 0x241   : > { %5212 = vst.msk [vmem:[%s8213_s22 + $0xc8] sm:$0xff] %vm2055_vm5, %v5180_v62  ;;  %v5179_v63 = vld [vmem:[#allocation2 + $0xc0] sm:$0xff]  ;;  %5152 = vst.msk [vmem:[#allocation2 + $0xe8] sm:$0xff] %vm2055_vm5, %v5120_v6  ;;  %v5122_v24 = vadd.f32 %v8189_v30, %v5083_v39 }
 0x242   : > { %5211 = vst.msk [vmem:[%s8213_s22 + $0xc0] sm:$0xff] %vm2055_vm5, %v5179_v63  ;;  %5151 = vst.msk [vmem:[#allocation2 + $0xe0] sm:$0xff] %vm2055_vm5, %v5119_v29  ;;  %v5082_v46 = vld [vmem:[#allocation2 + $0xf0] sm:$0xff] }
 0x243   : > { %v5121_v8 = vadd.f32 %v8189_v30, %v5082_v46  ;;  %5154 = vst.msk [vmem:[#allocation2 + $0xf8] sm:$0xff] %vm2055_vm5, %v5122_v24 }
 0x244   : > { %v5182_v11 = vld [vmem:[#allocation2 + $0xd8] sm:$0xff] }
 0x245   : > { %5214 = vst.msk [vmem:[%s8213_s22 + $0xd8] sm:$0xff] %vm2055_vm5, %v5182_v11  ;;  %v5181_v47 = vld [vmem:[#allocation2 + $0xd0] sm:$0xff]  ;;  %5153 = vst.msk [vmem:[#allocation2 + $0xf0] sm:$0xff] %vm2055_vm5, %v5121_v8 }
 0x246   : > { %5213 = vst.msk [vmem:[%s8213_s22 + $0xd0] sm:$0xff] %vm2055_vm5, %v5181_v47 }
 0x248   : > { %v5184_v23 = vld [vmem:[#allocation2 + $0xe8] sm:$0xff] }
 0x249   : > { %5216 = vst.msk [vmem:[%s8213_s22 + $0xe8] sm:$0xff] %vm2055_vm5, %v5184_v23  ;;  %v5183_v27 = vld [vmem:[#allocation2 + $0xe0] sm:$0xff] }
 0x24a   : > { %5215 = vst.msk [vmem:[%s8213_s22 + $0xe0] sm:$0xff] %vm2055_vm5, %v5183_v27  ;;  %v5186_v42 = vld [vmem:[#allocation2 + $0xf8] sm:$0xff] }
 0x24b   : > { %5218 = vst.msk [vmem:[%s8213_s22 + $0xf8] sm:$0xff] %vm2055_vm5, %v5186_v42 }
 0x24c   : > { %v5185_v12 = vld [vmem:[#allocation2 + $0xf0] sm:$0xff] }
 0x24d   : > { %5217 = vst.msk [vmem:[%s8213_s22 + $0xf0] sm:$0xff] %vm2055_vm5, %v5185_v12 }
 0x24e PF: > { %s17_s19 = sadd.s32 1, %s6611_s19   ;;  %s8570_s17 = smov %s6607_s18 }
 0x24f   : > { %p14_p3 = scmp.ge.s32.totalorder %s17_s19, 4   ;;  %s8571_s18 = smov %s8573_s20 }
 0x251   :  { %16 = sbr.rel (!%p14_p3) target bundleno = 5 (0x5), region = 186 }
 0x258   :  { %5251 = vsyncpa [#allocation14], 1 }
 0x259   :  { %5253 = vsyncpa [#allocation14 + $0x1], 1 }

// kernel: vgg19_features_forward.14
= control target key start
LH: loop header
LB: loop body
LE: loop exit
PB: predicated region body
PF: predicated region fallthrough
CT: control target
= control target key end

     0   :  { %s3457_s0 = inlined_call_operand.vmem [shape: f32[3,384,256], index: 0, kind: input, shape index: {}]   ;;  %s3458_s1 = inlined_call_operand.vmem [shape: f32[1,256], index: 1, kind: input, shape index: {}]   ;;  %s3459_s2 = inlined_call_operand.vmem [shape: f32[2,4,4,128], index: 2, kind: input, shape index: {}]   ;;  %s3460_s3 = inlined_call_operand.<no memory space> [shape: f32[], index: 3, kind: input, shape index: {}]   ;;  %s3461_s4 = inlined_call_operand.hbm [shape: f32[2,4,4,256], index: 4, kind: output, shape index: {}]  }
   0x1   :  { %v2348_v0 = vstv %s3460_s3 }
   0x2   :  { %11 = vsyncpa [#allocation14], 0 }
   0x3   :  { %13 = vsyncpa [#allocation14 + $0x1], 0  ;;  %s2350_s17 = smov 0   ;;  %s2352_s18 = smov 0  }
   0x4   :  { %s2354_s19 = smov 0   ;;  %s2356_s20 = smov 0  }
   0x5   :  { %s2358_s21 = smov 0   ;;  %s2360_s22 = smov 0  }
   0x6 LB: > { %s1627_s3 = sadd.s32 4294967295, %s2314_s22   ;;  %s1628_s23 = sadd.s32 4294967294, %s2314_s22   ;;  %s2314_s22 = sphi %s2360_s22, %s19_s22   ;;  %s2310_s21 = sphi %s2358_s21, %s3468_s21   ;;  %s2306_s20 = sphi %s2356_s20, %s3467_s20   ;;  %s2302_s19 = sphi %s2354_s19, %s3466_s19   ;;  %s2298_s18 = sphi %s2352_s18, %s3465_s18   ;;  %s2294_s17 = sphi %s2350_s17, %s3464_s17  }
   0x7   : > { %s31_s24 = sadd.s32 1, %s2310_s21  ;;  %s150_s25 = sadd.s32 1, %s2302_s19 }
   0x8   : > { %p33_p0 = scmp.ge.s32.totalorder %s31_s24, 2  ;;  %p160_p1 = scmp.ne.s32.totalorder %s2302_s19, %s2298_s18 }
   0x9   : > { %p161_p2 = scmp.eq.s32.totalorder %s1627_s3, 1  ;;  %p166_p3 = scmp.ne.s32.totalorder %s2298_s18, %s2294_s17 }
   0xa   : > { %s3470_s24 = smov (%p33_p0, %s31_s24), 0  ;;  %p167_p5 = scmp.eq.s32.totalorder %s1628_s23, 1 }
   0xb   : > { %p2390_p4 = por %p161_p2, %p160_p1  ;;  %s145_s27 = ssub.s32 %s2310_s21, %s3470_s24 }
   0xc   : > { %p1631_p6 = scmp.ge.s32.totalorder %s2314_s22, 1  ;;  %p148_p7 = scmp.eq.s32.totalorder %s145_s27, 0 }
   0xd   : > { %p2397_p8 = por %p167_p5, %p166_p3  ;;  %p273_p9 = scmp.lt.s32.totalorder %s2314_s22, 3 }
   0xe   : > { %s2403_s29 = scalar_select %p148_p7, %s2302_s19, %s150_s25  }
   0xf   : > { %p274_p10 = pnand %p1631_p6, %p273_p9 }
  0x11   : > { %277 = sbr.rel (%p274_p10) target bundleno = 423 (0x1a7), region = 36 }
  0x18   : > { %v652_v1 = vld [vmem:[%s3457_s0 + $0x8] sm:$0xff]  ;;  %v654_v2 = vld [vmem:[%s3457_s0 + $0x18] sm:$0xff]  ;;  %v448_v4 = vrot.slane %v2348_v0, 7  ;;  %v651_v7 = vld [vmem:[%s3457_s0] sm:$0xff]  ;;  %v2316_v9 = vmov 0.0   ;;  %p356_p11 = scmp.lt.s32.totalorder %s2306_s20, 1  ;;  %v475_v41 = vlaneseq }
  0x19   : > { %v716_v3 = vld [vmem:[%s3457_s0 + $0x208] sm:$0xff]  ;;  %v1851_v5 = vpack.c.bf16 %v654_v2, %v652_v1  ;;  %v718_v6 = vld [vmem:[%s3457_s0 + $0x218] sm:$0xff]  ;;  %v653_v8 = vld [vmem:[%s3457_s0 + $0x10] sm:$0xff]  ;;  %900 = vmatprep.mubr.f32.mxu0 %v2316_v9  ;;  %vm480_vm1 = vcmask 1046528   ;;  %s341_s7 = sand.u32 1, %s2298_s18   ;;  %s1849_s10 = sshll.u32 %s2306_s20, 9 }
  0x1a   : > { %v1915_v10 = vpack.c.bf16 %v718_v6, %v716_v3  ;;  %v1853_v11 = vpack.c.bf16 %v653_v8, %v651_v7  ;;  %v715_v12 = vld [vmem:[%s3457_s0 + $0x200] sm:$0xff]  ;;  %v717_v13 = vld [vmem:[%s3457_s0 + $0x210] sm:$0xff]  ;;  %v656_v14 = vld [vmem:[%s3457_s0 + $0x28] sm:$0xff]  ;;  %450 = vst [vmem:[#allocation15] sm:$0xff] %v448_v4  ;;  %s2474_s12 = scalar_select %p356_p11, %s2306_s20, 1  ;;  %v2522_v55 = vshrl.u32 %v475_v41, 7 }
  0x1b   : > { %622 = vst [vmem:[#allocation16 + $0x8] sm:$0xff] %v448_v4  ;;  %1852 = vmatprep.subr.bf16.mxu1 %v1851_v5  ;;  %v1917_v15 = vpack.c.bf16 %v717_v13, %v715_v12  ;;  %v658_v16 = vld [vmem:[%s3457_s0 + $0x38] sm:$0xff]  ;;  %v720_v17 = vld [vmem:[%s3457_s0 + $0x228] sm:$0xff]  ;;  %v655_v21 = vld [vmem:[%s3457_s0 + $0x20] sm:$0xff]  ;;  %s3411_s20 = scalar_lea.sflag [#allocation14], %s341_s7  ;;  %s2317_s16 = smov [#allocation13]  }
  0x1c   : > { %v722_v18 = vld [vmem:[%s3457_s0 + $0x238] sm:$0xff]  ;;  %1916 = vmatprep.subr.bf16.mxu0 %v1915_v10  ;;  %1854 = vmatpush1.bf16.msra.mxu1 %v1853_v11  ;;  %v1855_v19 = vpack.c.bf16 %v658_v16, %v656_v14  ;;  %v657_v22 = vld [vmem:[%s3457_s0 + $0x30] sm:$0xff]  ;;  %v719_v23 = vld [vmem:[%s3457_s0 + $0x220] sm:$0xff]  ;;  %s1633_s30 = sshll.u32 %s2474_s12, 2  ;;  %v2549_v5 = vadd.s32 8, %v2522_v55  ;;  %s2240_s25 = sshll.u32 %s2317_s16, 4  ;;  %s2241_s25 = int_to_ptr.vmem [resolvable:$false] %s2240_s25 }
  0x1d   : > { %v1919_v20 = vpack.c.bf16 %v722_v18, %v720_v17  ;;  %1918 = vmatpush1.bf16.msra.mxu0 %v1917_v15  ;;  %v1857_v24 = vpack.c.bf16 %v657_v22, %v655_v21  ;;  %v721_v25 = vld [vmem:[%s3457_s0 + $0x230] sm:$0xff]  ;;  %v660_v26 = vld [vmem:[%s3457_s0 + $0x48] sm:$0xff]  ;;  %v662_v27 = vld [vmem:[%s3457_s0 + $0x58] sm:$0xff]  ;;  %s365_s23 = sadd.s32 4294967295, %s1633_s30  ;;  %s3407_s30 = scalar_lea.hbm %s3461_s4, %s1849_s10 }
  0x1e   : > { %1856 = vmatprep.subr.bf16.mxu1 %v1855_v19  ;;  %v1921_v28 = vpack.c.bf16 %v721_v25, %v719_v23  ;;  %v1859_v29 = vpack.c.bf16 %v662_v27, %v660_v26  ;;  %v724_v30 = vld [vmem:[%s3457_s0 + $0x248] sm:$0xff]  ;;  %v726_v31 = vld [vmem:[%s3457_s0 + $0x258] sm:$0xff]  ;;  %v659_v32 = vld [vmem:[%s3457_s0 + $0x40] sm:$0xff]  ;;  %s1634_s13 = sshll.u32 %s365_s23, 2  ;;  %vm478_vm0 = vcmp.lt.s32.totalorder %v2549_v5, 12 }
  0x1f   : > { %1920 = vmatprep.subr.bf16.mxu0 %v1919_v20  ;;  %v1923_v33 = vpack.c.bf16 %v726_v31, %v724_v30  ;;  %v661_v34 = vld [vmem:[%s3457_s0 + $0x50] sm:$0xff]  ;;  %v723_v35 = vld [vmem:[%s3457_s0 + $0x240] sm:$0xff]  ;;  %v664_v38 = vld [vmem:[%s3457_s0 + $0x68] sm:$0xff]  ;;  %s2578_s3 = scalar_lea.vmem %s3459_s2, %s1634_s13 }
  0x20   : > { %v725_v36 = vld [vmem:[%s3457_s0 + $0x250] sm:$0xff]  ;;  %1858 = vmatpush1.bf16.msra.mxu1 %v1857_v24  ;;  %v1861_v37 = vpack.c.bf16 %v661_v34, %v659_v32  ;;  %v666_v39 = vld [vmem:[%s3457_s0 + $0x78] sm:$0xff]  ;;  %v728_v40 = vld [vmem:[%s3457_s0 + $0x268] sm:$0xff] }
  0x21   : > { %1922 = vmatpush1.bf16.msra.mxu0 %v1921_v28  ;;  %1860 = vmatprep.subr.bf16.mxu1 %v1859_v29  ;;  %v1925_v42 = vpack.c.bf16 %v725_v36, %v723_v35  ;;  %v1863_v43 = vpack.c.bf16 %v666_v39, %v664_v38  ;;  %v730_v44 = vld [vmem:[%s3457_s0 + $0x278] sm:$0xff]  ;;  %v663_v45 = vld [vmem:[%s3457_s0 + $0x60] sm:$0xff]  ;;  %v665_v46 = vld [vmem:[%s3457_s0 + $0x70] sm:$0xff] }
  0x22   : > { %1924 = vmatprep.subr.bf16.mxu0 %v1923_v33  ;;  %v1927_v47 = vpack.c.bf16 %v730_v44, %v728_v40  ;;  %v727_v48 = vld [vmem:[%s3457_s0 + $0x260] sm:$0xff]  ;;  %v729_v49 = vld [vmem:[%s3457_s0 + $0x270] sm:$0xff]  ;;  %v668_v50 = vld [vmem:[%s3457_s0 + $0x88] sm:$0xff]  ;;  %v1865_v54 = vpack.c.bf16 %v665_v46, %v663_v45 }
  0x23   : > { %v670_v51 = vld [vmem:[%s3457_s0 + $0x98] sm:$0xff]  ;;  %v732_v52 = vld [vmem:[%s3457_s0 + $0x288] sm:$0xff]  ;;  %v1929_v56 = vpack.c.bf16 %v729_v49, %v727_v48  ;;  %v667_v58 = vld [vmem:[%s3457_s0 + $0x80] sm:$0xff] }
  0x24   : > { %v734_v53 = vld [vmem:[%s3457_s0 + $0x298] sm:$0xff]  ;;  %1862 = vmatpush1.bf16.msra.mxu1 %v1861_v37  ;;  %v1867_v57 = vpack.c.bf16 %v670_v51, %v668_v50  ;;  %v669_v59 = vld [vmem:[%s3457_s0 + $0x90] sm:$0xff]  ;;  %v731_v60 = vld [vmem:[%s3457_s0 + $0x280] sm:$0xff] }
  0x25   : > { %1926 = vmatpush1.bf16.msra.mxu0 %v1925_v42  ;;  %1864 = vmatprep.subr.bf16.mxu1 %v1863_v43  ;;  %v1931_v61 = vpack.c.bf16 %v734_v53, %v732_v52  ;;  %v733_v62 = vld [vmem:[%s3457_s0 + $0x290] sm:$0xff]  ;;  %v672_v63 = vld [vmem:[%s3457_s0 + $0xa8] sm:$0xff]  ;;  %v674_v1 = vld [vmem:[%s3457_s0 + $0xb8] sm:$0xff]  ;;  %v1869_v4 = vpack.c.bf16 %v669_v59, %v667_v58 }
  0x26   : > { %1928 = vmatprep.subr.bf16.mxu0 %v1927_v47  ;;  %v736_v2 = vld [vmem:[%s3457_s0 + $0x2a8] sm:$0xff]  ;;  %v738_v3 = vld [vmem:[%s3457_s0 + $0x2b8] sm:$0xff]  ;;  %v1933_v6 = vpack.c.bf16 %v733_v62, %v731_v60  ;;  %v1871_v7 = vpack.c.bf16 %v674_v1, %v672_v63  ;;  %v671_v8 = vld [vmem:[%s3457_s0 + $0xa0] sm:$0xff] }
  0x27   : > { %v673_v10 = vld [vmem:[%s3457_s0 + $0xb0] sm:$0xff]  ;;  %v735_v11 = vld [vmem:[%s3457_s0 + $0x2a0] sm:$0xff]  ;;  %v1935_v12 = vpack.c.bf16 %v738_v3, %v736_v2  ;;  %v676_v14 = vld [vmem:[%s3457_s0 + $0xc8] sm:$0xff] }
  0x28   : > { %1866 = vmatpush1.bf16.msra.mxu1 %v1865_v54  ;;  %v737_v13 = vld [vmem:[%s3457_s0 + $0x2b0] sm:$0xff]  ;;  %v678_v15 = vld [vmem:[%s3457_s0 + $0xd8] sm:$0xff]  ;;  %v740_v16 = vld [vmem:[%s3457_s0 + $0x2c8] sm:$0xff]  ;;  %v1873_v18 = vpack.c.bf16 %v673_v10, %v671_v8 }
  0x29   : > { %1930 = vmatpush1.bf16.msra.mxu0 %v1929_v56  ;;  %1868 = vmatprep.subr.bf16.mxu1 %v1867_v57  ;;  %v742_v17 = vld [vmem:[%s3457_s0 + $0x2d8] sm:$0xff]  ;;  %v675_v19 = vld [vmem:[%s3457_s0 + $0xc0] sm:$0xff]  ;;  %v1937_v20 = vpack.c.bf16 %v737_v13, %v735_v11  ;;  %v1875_v21 = vpack.c.bf16 %v678_v15, %v676_v14  ;;  %v677_v22 = vld [vmem:[%s3457_s0 + $0xd0] sm:$0xff] }
  0x2a   : > { %1932 = vmatprep.subr.bf16.mxu0 %v1931_v61  ;;  %v739_v23 = vld [vmem:[%s3457_s0 + $0x2c0] sm:$0xff]  ;;  %v741_v24 = vld [vmem:[%s3457_s0 + $0x2d0] sm:$0xff]  ;;  %v1939_v25 = vpack.c.bf16 %v742_v17, %v740_v16  ;;  %v680_v26 = vld [vmem:[%s3457_s0 + $0xe8] sm:$0xff]  ;;  %v1877_v32 = vpack.c.bf16 %v677_v22, %v675_v19 }
  0x2b   : > { %v682_v27 = vld [vmem:[%s3457_s0 + $0xf8] sm:$0xff]  ;;  %v1637_v28 = vld [vmem:[%s2578_s3 + $0x4] sm:$0xf]  ;;  %v744_v29 = vld [vmem:[%s3457_s0 + $0x2e8] sm:$0xff]  ;;  %v1941_v34 = vpack.c.bf16 %v741_v24, %v739_v23 }
  0x2c   : > { %1870 = vmatpush1.bf16.msra.mxu1 %v1869_v4  ;;  %v746_v30 = vld [vmem:[%s3457_s0 + $0x2f8] sm:$0xff]  ;;  %v479_v31 = vsel %vm478_vm0, %v1637_v28, %v2348_v0  ;;  %v1879_v35 = vpack.c.bf16 %v682_v27, %v680_v26  ;;  %v679_v36 = vld [vmem:[%s3457_s0 + $0xe0] sm:$0xff]  ;;  %v681_v37 = vld [vmem:[%s3457_s0 + $0xf0] sm:$0xff] }
  0x2d   : > { %1934 = vmatpush1.bf16.msra.mxu0 %v1933_v6  ;;  %1872 = vmatprep.subr.bf16.mxu1 %v1871_v7  ;;  %v481_v33 = vsel %vm480_vm1, %v479_v31, %v2348_v0  ;;  %v743_v38 = vld [vmem:[%s3457_s0 + $0x2e0] sm:$0xff]  ;;  %v1943_v40 = vpack.c.bf16 %v746_v30, %v744_v29  ;;  %v745_v41 = vld [vmem:[%s3457_s0 + $0x2f0] sm:$0xff]  ;;  %v684_v42 = vld [vmem:[%s3457_s0 + $0x108] sm:$0xff]  ;;  %v1881_v46 = vpack.c.bf16 %v681_v37, %v679_v36 }
  0x2e   : > { %1936 = vmatprep.subr.bf16.mxu0 %v1935_v12  ;;  %v482_v39 = vrot.slane %v481_v33, 7  ;;  %v686_v43 = vld [vmem:[%s3457_s0 + $0x118] sm:$0xff]  ;;  %v1709_v44 = vld [vmem:[%s3457_s0 + $0x508] sm:$0xff]  ;;  %v1945_v47 = vpack.c.bf16 %v745_v41, %v743_v38  ;;  %v683_v49 = vld [vmem:[%s3457_s0 + $0x100] sm:$0xff] }
  0x2f   : > { %v1711_v45 = vld [vmem:[%s3457_s0 + $0x518] sm:$0xff]  ;;  %v1883_v48 = vpack.c.bf16 %v686_v43, %v684_v42  ;;  %v685_v50 = vld [vmem:[%s3457_s0 + $0x110] sm:$0xff]  ;;  %v2641_v51 = vld [vmem:[#allocation15] sm:$0x3f] }
  0x30   : > { %1874 = vmatpush1.bf16.msra.mxu1 %v1873_v18  ;;  %485 = vst [vmem:[#allocation15 + $0x8] sm:$0xff] %v482_v39  ;;  %v2011_v52 = vpack.c.bf16 %v1711_v45, %v1709_v44  ;;  %v688_v53 = vld [vmem:[%s3457_s0 + $0x128] sm:$0xff]  ;;  %v690_v54 = vld [vmem:[%s3457_s0 + $0x138] sm:$0xff]  ;;  %v1885_v56 = vpack.c.bf16 %v685_v50, %v683_v49  ;;  %v1708_v57 = vld [vmem:[%s3457_s0 + $0x500] sm:$0xff]  ;;  %v641_v60 = vrot.slane %v2641_v51, 2  ;;  %v635_v2 = vrot.slane %v2641_v51, 1 }
  0x31   : > { %1938 = vmatpush1.bf16.msra.mxu0 %v1937_v20  ;;  %1876 = vmatprep.subr.bf16.mxu1 %v1875_v21  ;;  %v1710_v58 = vld [vmem:[%s3457_s0 + $0x510] sm:$0xff]  ;;  %v1713_v59 = vld [vmem:[%s3457_s0 + $0x528] sm:$0xff]  ;;  %v1887_v61 = vpack.c.bf16 %v690_v54, %v688_v53  ;;  %v1715_v62 = vld [vmem:[%s3457_s0 + $0x538] sm:$0xff] }
  0x32   : > { %1940 = vmatprep.subr.bf16.mxu0 %v1939_v25  ;;  %v687_v63 = vld [vmem:[%s3457_s0 + $0x120] sm:$0xff]  ;;  %v689_v1 = vld [vmem:[%s3457_s0 + $0x130] sm:$0xff]  ;;  %v692_v4 = vld [vmem:[%s3457_s0 + $0x148] sm:$0xff]  ;;  %v2013_v10 = vpack.c.bf16 %v1710_v58, %v1708_v57  ;;  %v2015_v15 = vpack.c.bf16 %v1715_v62, %v1713_v59 }
  0x33   : > { %v694_v6 = vld [vmem:[%s3457_s0 + $0x158] sm:$0xff]  ;;  %v1889_v11 = vpack.c.bf16 %v689_v1, %v687_v63  ;;  %v1712_v12 = vld [vmem:[%s3457_s0 + $0x520] sm:$0xff]  ;;  %v1714_v13 = vld [vmem:[%s3457_s0 + $0x530] sm:$0xff] }
  0x34   : > { %1878 = vmatpush1.bf16.msra.mxu1 %v1877_v32  ;;  %v1891_v16 = vpack.c.bf16 %v694_v6, %v692_v4  ;;  %v1717_v17 = vld [vmem:[%s3457_s0 + $0x548] sm:$0xff]  ;;  %v691_v18 = vld [vmem:[%s3457_s0 + $0x140] sm:$0xff]  ;;  %v693_v19 = vld [vmem:[%s3457_s0 + $0x150] sm:$0xff]  ;;  %v2017_v25 = vpack.c.bf16 %v1714_v13, %v1712_v12 }
  0x35   : > { %1942 = vmatpush1.bf16.msra.mxu0 %v1941_v34  ;;  %1880 = vmatprep.subr.bf16.mxu1 %v1879_v35  ;;  %v1719_v21 = vld [vmem:[%s3457_s0 + $0x558] sm:$0xff]  ;;  %v696_v22 = vld [vmem:[%s3457_s0 + $0x168] sm:$0xff]  ;;  %v1716_v24 = vld [vmem:[%s3457_s0 + $0x540] sm:$0xff]  ;;  %v1893_v26 = vpack.c.bf16 %v693_v19, %v691_v18 }
  0x36   : > { %1944 = vmatprep.subr.bf16.mxu0 %v1943_v40  ;;  %v698_v23 = vld [vmem:[%s3457_s0 + $0x178] sm:$0xff]  ;;  %v1718_v27 = vld [vmem:[%s3457_s0 + $0x550] sm:$0xff]  ;;  %v1721_v28 = vld [vmem:[%s3457_s0 + $0x568] sm:$0xff]  ;;  %v2019_v30 = vpack.c.bf16 %v1719_v21, %v1717_v17 }
  0x37   : > { %v2669_v3 = vld [vmem:[#allocation15 + $0x8] sm:$0x3f]  ;;  %v1723_v29 = vld [vmem:[%s3457_s0 + $0x578] sm:$0xff]  ;;  %v1895_v31 = vpack.c.bf16 %v698_v23, %v696_v22  ;;  %v695_v32 = vld [vmem:[%s3457_s0 + $0x160] sm:$0xff]  ;;  %v2021_v41 = vpack.c.bf16 %v1718_v27, %v1716_v24 }
  0x38   : > { %1882 = vmatpush1.bf16.msra.mxu1 %v1881_v46  ;;  %v642_v7 = vrot.slane %v2669_v3, 2  ;;  %v636_v8 = vrot.slane %v2669_v3, 1  ;;  %v697_v33 = vld [vmem:[%s3457_s0 + $0x170] sm:$0xff]  ;;  %v1638_v34 = vld [vmem:[%s2578_s3 + $0x8] sm:$0xf]  ;;  %v702_v36 = vld [vmem:[%s3457_s0 + $0x198] sm:$0xff] }
  0x39   : > { %1946 = vmatpush1.bf16.msra.mxu0 %v1945_v47  ;;  %1884 = vmatprep.subr.bf16.mxu1 %v1883_v48  ;;  %v700_v35 = vld [vmem:[%s3457_s0 + $0x188] sm:$0xff]  ;;  %v514_v37 = vsel %vm478_vm0, %v1638_v34, %v2348_v0  ;;  %v1897_v42 = vpack.c.bf16 %v697_v33, %v695_v32  ;;  %v1720_v43 = vld [vmem:[%s3457_s0 + $0x560] sm:$0xff]  ;;  %v1722_v44 = vld [vmem:[%s3457_s0 + $0x570] sm:$0xff]  ;;  %v2023_v47 = vpack.c.bf16 %v1723_v29, %v1721_v28 }
  0x3a   : > { %2012 = vmatprep.subr.bf16.mxu0 %v2011_v52  ;;  %v749_v14 = vcombine.low %v641_v60, %v642_v7  ;;  %v1641_v20 = vcombine.low %v635_v2, %v636_v8  ;;  %v1639_v38 = vld [vmem:[%s2578_s3 + $0xc] sm:$0xf]  ;;  %v516_v39 = vsel %vm480_vm1, %v514_v37, %v2348_v0  ;;  %v1899_v48 = vpack.c.bf16 %v702_v36, %v700_v35  ;;  %v699_v50 = vld [vmem:[%s3457_s0 + $0x180] sm:$0xff]  ;;  %v701_v52 = vld [vmem:[%s3457_s0 + $0x190] sm:$0xff]  ;;  %s1850_s3 = sshll.u32 %s2474_s12, 4 }
  0x3b   : > { %v549_v40 = vsel %vm478_vm0, %v1639_v38, %v2348_v0  ;;  %v517_v45 = vrot.slane %v516_v39, 7  ;;  %v1725_v49 = vld [vmem:[%s3457_s0 + $0x588] sm:$0xff]  ;;  %v1727_v54 = vld [vmem:[%s3457_s0 + $0x598] sm:$0xff]  ;;  %v2025_v58 = vpack.c.bf16 %v1722_v44, %v1720_v43  ;;  %v1901_v59 = vpack.c.bf16 %v701_v52, %v699_v50  ;;  %v1724_v60 = vld [vmem:[%s3457_s0 + $0x580] sm:$0xff]  ;;  %s2994_s15 = sadd.s32 12, %s1850_s3 }
  0x3c   : > { %1886 = vmatpush1.bf16.msra.mxu1 %v1885_v56  ;;  %901 = vmatmul.mubr.f32.vlgmr.msra.gmra.mrb[0].mxu0 %v749_v14  ;;  %v551_v46 = vsel %vm480_vm1, %v549_v40, %v2348_v0  ;;  %v704_v56 = vld [vmem:[%s3457_s0 + $0x1a8] sm:$0xff]  ;;  %v706_v57 = vld [vmem:[%s3457_s0 + $0x1b8] sm:$0xff]  ;;  %v2027_v62 = vpack.c.bf16 %v1727_v54, %v1725_v49  ;;  %v703_v2 = vld [vmem:[%s3457_s0 + $0x1a0] sm:$0xff]  ;;  %s405_s27 = scalar_lea.vmem %s3459_s2, %s2994_s15  ;;  %s1632_s15 = sshll.u32 %s341_s7, 5 }
  0x3d   : > { %1888 = vmatprep.subr.bf16.mxu1 %v1887_v61  ;;  %823 = vmatprep.mubr.f32.mxu1 %v1641_v20  ;;  %v552_v53 = vrot.slane %v551_v46, 7  ;;  %520 = vst [vmem:[#allocation15 + $0x10] sm:$0xff] %v517_v45  ;;  %v1726_v61 = vld [vmem:[%s3457_s0 + $0x590] sm:$0xff]  ;;  %v1903_v63 = vpack.c.bf16 %v706_v57, %v704_v56  ;;  %v1729_v1 = vld [vmem:[%s3457_s0 + $0x5a8] sm:$0xff]  ;;  %v1731_v6 = vld [vmem:[%s3457_s0 + $0x5b8] sm:$0xff]  ;;  %v1640_v56 = vcombine.low %v2641_v51, %v2669_v3  ;;  %s343_s8 = scalar_lea.vmem [#allocation13], %s1632_s15 }
  0x3e   : > { %2014 = vmatpush1.bf16.msra.mxu0 %v2013_v10  ;;  %906 = vmatprep.mubr.f32.mxu0 %v2316_v9  ;;  %v705_v4 = vld [vmem:[%s3457_s0 + $0x1b0] sm:$0xff]  ;;  %v708_v10 = vld [vmem:[%s3457_s0 + $0x1c8] sm:$0xff]  ;;  %v1728_v12 = vld [vmem:[%s3457_s0 + $0x5a0] sm:$0xff]  ;;  %v2029_v13 = vpack.c.bf16 %v1726_v61, %v1724_v60  ;;  %v2031_v18 = vpack.c.bf16 %v1731_v6, %v1729_v1  ;;  %s1524_s9 = sshll.u32 %s343_s8, 4  ;;  %s3402_s9 = int_to_ptr.vmem [resolvable:$true] %s1524_s9 }
  0x3f   : > { %2016 = vmatprep.subr.bf16.mxu0 %v2015_v15  ;;  %555 = vst [vmem:[#allocation15 + $0x18] sm:$0xff] %v552_v53  ;;  %v1905_v14 = vpack.c.bf16 %v705_v4, %v703_v2  ;;  %v1730_v15 = vld [vmem:[%s3457_s0 + $0x5b0] sm:$0xff]  ;;  %v1735_v17 = vld [vmem:[%s3457_s0 + $0x5d8] sm:$0xff]  ;;  %v707_v20 = vld [vmem:[%s3457_s0 + $0x1c0] sm:$0xff]  ;;  %s2236_s14 = scalar_lea.vmem %s3402_s9, 512  ;;  %p2243_p1 = scmp.lt.s32.totalorder %s3402_s9, %s2241_s25 }
  0x40   : > { %1890 = vmatpush1.bf16.msra.mxu1 %v1889_v11  ;;  %v710_v11 = vld [vmem:[%s3457_s0 + $0x1d8] sm:$0xff]  ;;  %v709_v21 = vld [vmem:[%s3457_s0 + $0x1d0] sm:$0xff]  ;;  %v712_v23 = vld [vmem:[%s3457_s0 + $0x1e8] sm:$0xff]  ;;  %v2033_v29 = vpack.c.bf16 %v1730_v15, %v1728_v12  ;;  %p2237_p12 = scmp.ne.s32.totalorder %s3402_s9, %s2236_s14 }
  0x41   : > { %1892 = vmatprep.subr.bf16.mxu1 %v1891_v16  ;;  %v1733_v16 = vld [vmem:[%s3457_s0 + $0x5c8] sm:$0xff]  ;;  %v1907_v19 = vpack.c.bf16 %v710_v11, %v708_v10  ;;  %v714_v24 = vld [vmem:[%s3457_s0 + $0x1f8] sm:$0xff]  ;;  %v1734_v32 = vld [vmem:[%s3457_s0 + $0x5d0] sm:$0xff] }
  0x42   : > { %2018 = vmatpush1.bf16.msra.mxu0 %v2017_v25  ;;  %v2035_v33 = vpack.c.bf16 %v1735_v17, %v1733_v16  ;;  %v1911_v34 = vpack.c.bf16 %v714_v24, %v712_v23  ;;  %v1737_v36 = vld [vmem:[%s3457_s0 + $0x5e8] sm:$0xff]  ;;  %v711_v37 = vld [vmem:[%s3457_s0 + $0x1e0] sm:$0xff]  ;;  %v713_v38 = vld [vmem:[%s3457_s0 + $0x1f0] sm:$0xff]  ;;  %p2238_p13 = pnand %p2237_p12, %p2390_p4 }
  0x43   : > { %2020 = vmatprep.subr.bf16.mxu0 %v2019_v30  ;;  %v1909_v30 = vpack.c.bf16 %v709_v21, %v707_v20  ;;  %v1739_v39 = vld [vmem:[%s3457_s0 + $0x5f8] sm:$0xff]  ;;  %v1645_v40 = vld [vmem:[%s3457_s0 + $0x308] sm:$0xff]  ;;  %v1913_v43 = vpack.c.bf16 %v713_v38, %v711_v37  ;;  %v1736_v44 = vld [vmem:[%s3457_s0 + $0x5e0] sm:$0xff] }
  0x44   : > { %1894 = vmatpush1.bf16.msra.mxu1 %v1893_v26  ;;  %v2810_v22 = vld [vmem:[#allocation15 + $0x10] sm:$0x3f]  ;;  %v2039_v45 = vpack.c.bf16 %v1739_v39, %v1737_v36  ;;  %v1745_v53 = vld [vmem:[%s3457_s0 + $0x608] sm:$0xff]  ;;  %v1747_v54 = vld [vmem:[%s3457_s0 + $0x618] sm:$0xff]  ;;  %p2239_p0 = pneg %p2238_p13 }
  0x45   : > { %1896 = vmatprep.subr.bf16.mxu1 %v1895_v31  ;;  %v643_v26 = vrot.slane %v2810_v22, 2  ;;  %v1740_v27 = vcombine.low %v2669_v3, %v2810_v22  ;;  %v1732_v31 = vld [vmem:[%s3457_s0 + $0x5c0] sm:$0xff]  ;;  %v1738_v46 = vld [vmem:[%s3457_s0 + $0x5f0] sm:$0xff]  ;;  %v637_v50 = vrot.slane %v2810_v22, 1  ;;  %v1649_v57 = vld [vmem:[%s3457_s0 + $0x328] sm:$0xff] }
  0x46   : > { %2022 = vmatpush1.bf16.msra.mxu0 %v2021_v41  ;;  %v2818_v25 = vld [vmem:[#allocation15 + $0x18] sm:$0x3f]  ;;  %v1646_v49 = vld [vmem:[%s3457_s0 + $0x310] sm:$0xff]  ;;  %v1744_v61 = vld [vmem:[%s3457_s0 + $0x600] sm:$0xff] }
  0x47   : > { %2024 = vmatprep.subr.bf16.mxu0 %v2023_v47  ;;  %v644_v28 = vrot.slane %v2818_v25, 2  ;;  %v1647_v41 = vld [vmem:[%s3457_s0 + $0x318] sm:$0xff]  ;;  %v638_v52 = vrot.slane %v2818_v25, 1  ;;  %v1746_v51 = vld [vmem:[%s3457_s0 + $0x610] sm:$0xff]  ;;  %v1749_v1 = vld [vmem:[%s3457_s0 + $0x628] sm:$0xff] }
  0x48   : > { %1898 = vmatpush1.bf16.msra.mxu1 %v1897_v42  ;;  %v2037_v42 = vpack.c.bf16 %v1734_v32, %v1732_v31  ;;  %v1947_v47 = vpack.c.bf16 %v1647_v41, %v1645_v40  ;;  %v1648_v2 = vld [vmem:[%s3457_s0 + $0x320] sm:$0xff]  ;;  %v1650_v4 = vld [vmem:[%s3457_s0 + $0x330] sm:$0xff]  ;;  %v1751_v10 = vld [vmem:[%s3457_s0 + $0x638] sm:$0xff]  ;;  %v2045_v15 = vpack.c.bf16 %v1746_v51, %v1744_v61 }
  0x49   : > { %1900 = vmatprep.subr.bf16.mxu1 %v1899_v48  ;;  %v2832_v35 = vcombine.low %v643_v26, %v644_v28  ;;  %v1644_v48 = vld [vmem:[%s3457_s0 + $0x300] sm:$0xff]  ;;  %v1653_v11 = vld [vmem:[%s3457_s0 + $0x348] sm:$0xff]  ;;  %v1655_v12 = vld [vmem:[%s3457_s0 + $0x358] sm:$0xff]  ;;  %v1953_v16 = vpack.c.bf16 %v1650_v4, %v1648_v2 }
  0x4a   : > { %2026 = vmatpush1.bf16.msra.mxu0 %v2025_v58  ;;  %v1651_v58 = vld [vmem:[%s3457_s0 + $0x338] sm:$0xff]  ;;  %v1949_v60 = vpack.c.bf16 %v1646_v49, %v1644_v48  ;;  %v1748_v17 = vld [vmem:[%s3457_s0 + $0x620] sm:$0xff]  ;;  %v1753_v20 = vld [vmem:[%s3457_s0 + $0x648] sm:$0xff] }
  0x4b   : > { %2028 = vmatprep.subr.bf16.mxu0 %v2027_v62  ;;  %907 = vmatmul.mubr.f32.gmra.mrb[2].mxu0 %v2832_v35  ;;  %v2043_v62 = vpack.c.bf16 %v1747_v54, %v1745_v53  ;;  %v1951_v6 = vpack.c.bf16 %v1651_v58, %v1649_v57  ;;  %v1652_v21 = vld [vmem:[%s3457_s0 + $0x340] sm:$0xff]  ;;  %v1654_v23 = vld [vmem:[%s3457_s0 + $0x350] sm:$0xff]  ;;  %v1755_v24 = vld [vmem:[%s3457_s0 + $0x658] sm:$0xff] }
  0x4c   : > { %1902 = vmatpush1.bf16.msra.mxu1 %v1901_v59  ;;  %1168 = vmatprep.mubr.f32.mxu0 %v2316_v9  ;;  %v2041_v59 = vpack.c.bf16 %v1738_v46, %v1736_v44  ;;  %v1957_v32 = vpack.c.bf16 %v1654_v23, %v1652_v21  ;;  %v2051_v36 = vpack.c.bf16 %v1755_v24, %v1753_v20  ;;  %v1757_v37 = vld [vmem:[%s3457_s0 + $0x668] sm:$0xff]  ;;  %v1656_v38 = vld [vmem:[%s3457_s0 + $0x360] sm:$0xff]  ;;  %v1658_v39 = vld [vmem:[%s3457_s0 + $0x370] sm:$0xff] }
  0x4d   : > { %1904 = vmatprep.subr.bf16.mxu1 %v1903_v63  ;;  %v2890_v63 = vcombine.low %v637_v50, %v638_v52  ;;  %v1759_v40 = vld [vmem:[%s3457_s0 + $0x678] sm:$0xff]  ;;  %v1661_v41 = vld [vmem:[%s3457_s0 + $0x388] sm:$0xff]  ;;  %v1961_v44 = vpack.c.bf16 %v1658_v39, %v1656_v38  ;;  %v1758_v46 = vld [vmem:[%s3457_s0 + $0x670] sm:$0xff] }
  0x4e   : > { %2030 = vmatpush1.bf16.msra.mxu0 %v2029_v13  ;;  %v1017_v13 = vcombine.low %v642_v7, %v643_v26  ;;  %v2047_v7 = vpack.c.bf16 %v1751_v10, %v1749_v1  ;;  %v1657_v26 = vld [vmem:[%s3457_s0 + $0x368] sm:$0xff]  ;;  %v1662_v53 = vld [vmem:[%s3457_s0 + $0x390] sm:$0xff]  ;;  %v1763_v54 = vld [vmem:[%s3457_s0 + $0x698] sm:$0xff] }
  0x4f   : > { %2032 = vmatprep.subr.bf16.mxu0 %v2031_v18  ;;  %v1750_v18 = vld [vmem:[%s3457_s0 + $0x630] sm:$0xff]  ;;  %v1761_v49 = vld [vmem:[%s3457_s0 + $0x688] sm:$0xff]  ;;  %v1667_v57 = vld [vmem:[%s3457_s0 + $0x3b8] sm:$0xff] }
  0x50   : > { %1906 = vmatpush1.bf16.msra.mxu1 %v1905_v14  ;;  %v2914_v14 = vcombine.low %v2810_v22, %v2818_v25  ;;  %v2049_v31 = vpack.c.bf16 %v1750_v18, %v1748_v17  ;;  %v1762_v61 = vld [vmem:[%s3457_s0 + $0x690] sm:$0xff]  ;;  %v2059_v51 = vpack.c.bf16 %v1763_v54, %v1761_v49  ;;  %v1765_v1 = vld [vmem:[%s3457_s0 + $0x6a8] sm:$0xff]  ;;  %v1664_v2 = vld [vmem:[%s3457_s0 + $0x3a0] sm:$0xff] }
  0x51   : > { %1908 = vmatprep.subr.bf16.mxu1 %v1907_v19  ;;  %v1955_v19 = vpack.c.bf16 %v1655_v12, %v1653_v11  ;;  %v1666_v4 = vld [vmem:[%s3457_s0 + $0x3b0] sm:$0xff]  ;;  %v1669_v10 = vld [vmem:[%s3457_s0 + $0x3c8] sm:$0xff]  ;;  %v1671_v11 = vld [vmem:[%s3457_s0 + $0x3d8] sm:$0xff] }
  0x52   : > { %2034 = vmatpush1.bf16.msra.mxu0 %v2033_v29  ;;  %v1659_v29 = vld [vmem:[%s3457_s0 + $0x378] sm:$0xff]  ;;  %v1769_v17 = vld [vmem:[%s3457_s0 + $0x6c8] sm:$0xff]  ;;  %v1670_v20 = vld [vmem:[%s3457_s0 + $0x3d0] sm:$0xff] }
  0x53   : > { %2036 = vmatprep.subr.bf16.mxu0 %v2035_v33  ;;  %v1752_v33 = vld [vmem:[%s3457_s0 + $0x640] sm:$0xff]  ;;  %v1771_v23 = vld [vmem:[%s3457_s0 + $0x6d8] sm:$0xff]  ;;  %v1673_v24 = vld [vmem:[%s3457_s0 + $0x3e8] sm:$0xff] }
  0x54   : > { %1910 = vmatpush1.bf16.msra.mxu1 %v1909_v30  ;;  %v1741_v30 = vcombine.low %v636_v8, %v637_v50  ;;  %v1959_v8 = vpack.c.bf16 %v1659_v29, %v1657_v26  ;;  %v1660_v50 = vld [vmem:[%s3457_s0 + $0x380] sm:$0xff]  ;;  %v1675_v26 = vld [vmem:[%s3457_s0 + $0x3f8] sm:$0xff]  ;;  %v2067_v5 = vpack.c.bf16 %v1771_v23, %v1769_v17  ;;  %v1674_v39 = vld [vmem:[%s3457_s0 + $0x3f0] sm:$0xff] }
  0x55   : > { %1912 = vmatprep.subr.bf16.mxu1 %v1911_v34  ;;  %v1754_v34 = vld [vmem:[%s3457_s0 + $0x650] sm:$0xff]  ;;  %v565_v21 = vld [vmem:[%s405_s27] sm:$0xf]  ;;  %v1777_v49 = vld [vmem:[%s3457_s0 + $0x708] sm:$0xff]  ;;  %s2242_s27 = scalar_lea.vmem %s2241_s25, 1024 }
  0x56   : > { %2038 = vmatpush1.bf16.msra.mxu0 %v2037_v42  ;;  %v1663_v42 = vld [vmem:[%s3457_s0 + $0x398] sm:$0xff]  ;;  %v582_v29 = vsel %vm478_vm0, %v565_v21, %v2348_v0  ;;  %v1672_v38 = vld [vmem:[%s3457_s0 + $0x3e0] sm:$0xff]  ;;  %v1785_v21 = vld [vmem:[%s3457_s0 + $0x748] sm:$0xff]  ;;  %p2244_p2 = scmp.lt.s32.totalorder %s2242_s27, %s2236_s14 }
  0x57   : > { %2040 = vmatprep.subr.bf16.mxu0 %v2039_v45  ;;  %v1756_v45 = vld [vmem:[%s3457_s0 + $0x660] sm:$0xff]  ;;  %v1963_v48 = vpack.c.bf16 %v1663_v42, %v1661_v41  ;;  %v1677_v41 = vld [vmem:[%s3457_s0 + $0x408] sm:$0xff]  ;;  %v1679_v42 = vld [vmem:[%s3457_s0 + $0x418] sm:$0xff] }
  0x58   : > { %1914 = vmatpush1.bf16.msra.mxu1 %v1913_v43  ;;  %v2053_v43 = vpack.c.bf16 %v1754_v34, %v1752_v33  ;;  %v2057_v58 = vpack.c.bf16 %v1758_v46, %v1756_v45  ;;  %v1768_v33 = vld [vmem:[%s3457_s0 + $0x6c0] sm:$0xff]  ;;  %v1770_v34 = vld [vmem:[%s3457_s0 + $0x6d0] sm:$0xff]  ;;  %v1779_v54 = vld [vmem:[%s3457_s0 + $0x718] sm:$0xff]  ;;  %p2245_p3 = por %p2244_p2, %p2243_p1 }
  0x59   : > { %1948 = vmatprep.subr.bf16.mxu1 %v1947_v47  ;;  %v2055_v47 = vpack.c.bf16 %v1759_v40, %v1757_v37  ;;  %v1773_v37 = vld [vmem:[%s3457_s0 + $0x6e8] sm:$0xff]  ;;  %v1775_v40 = vld [vmem:[%s3457_s0 + $0x6f8] sm:$0xff]  ;;  %v1772_v45 = vld [vmem:[%s3457_s0 + $0x6e0] sm:$0xff] }
  0x5a   : > { %2042 = vmatpush1.bf16.msra.mxu0 %v2041_v59  ;;  %v1965_v59 = vpack.c.bf16 %v1662_v53, %v1660_v50  ;;  %v1774_v46 = vld [vmem:[%s3457_s0 + $0x6f0] sm:$0xff]  ;;  %v1676_v50 = vld [vmem:[%s3457_s0 + $0x400] sm:$0xff]  ;;  %p2246_p5 = pnand %p2245_p3, %p2239_p0 }
  0x5b   : > { %824 = vmatmul.mubr.f32.vlgmr.msra.gmra.mrb[0].mxu1 %v1640_v56  ;;  %2044 = vmatprep.subr.bf16.mxu0 %v2043_v62  ;;  %v1665_v56 = vld [vmem:[%s3457_s0 + $0x3a8] sm:$0xff]  ;;  %v1678_v53 = vld [vmem:[%s3457_s0 + $0x410] sm:$0xff]  ;;  %v1780_v17 = vld [vmem:[%s3457_s0 + $0x720] sm:$0xff] }
  0x5c   : > { %1950 = vmatpush1.bf16.msra.mxu1 %v1949_v60  ;;  %829 = vmatprep.mubr.f32.mxu1 %v2890_v63  ;;  %v1760_v60 = vld [vmem:[%s3457_s0 + $0x680] sm:$0xff]  ;;  %v1967_v62 = vpack.c.bf16 %v1667_v57, %v1665_v56  ;;  %v1681_v56 = vld [vmem:[%s3457_s0 + $0x428] sm:$0xff]  ;;  %v1683_v57 = vld [vmem:[%s3457_s0 + $0x438] sm:$0xff] }
  0x5d   : > { %1952 = vmatprep.subr.bf16.mxu1 %v1951_v6  ;;  %1169 = vmatmul.mubr.f32.vlgmr.msra.gmra.mrb[4].mxu0 %v1017_v13  ;;  %v1767_v6 = vld [vmem:[%s3457_s0 + $0x6b8] sm:$0xff]  ;;  %v2061_v12 = vpack.c.bf16 %v1762_v61, %v1760_v60  ;;  %v1969_v13 = vpack.c.bf16 %v1666_v4, %v1664_v2  ;;  %v1776_v60 = vld [vmem:[%s3457_s0 + $0x700] sm:$0xff]  ;;  %v1778_v61 = vld [vmem:[%s3457_s0 + $0x710] sm:$0xff] }
  0x5e   : > { %2046 = vmatpush1.bf16.msra.mxu0 %v2045_v15  ;;  %1174 = vmatprep.mubr.f32.mxu0 %v2316_v9  ;;  %v1764_v15 = vld [vmem:[%s3457_s0 + $0x6a0] sm:$0xff]  ;;  %v2063_v18 = vpack.c.bf16 %v1767_v6, %v1765_v1  ;;  %v1983_v1 = vpack.c.bf16 %v1683_v57, %v1681_v56  ;;  %v1682_v4 = vld [vmem:[%s3457_s0 + $0x430] sm:$0xff] }
  0x5f   : > { %830 = vmatmul.mubr.f32.gmra.mrb[2].mxu1 %v2914_v14  ;;  %2048 = vmatprep.subr.bf16.mxu0 %v2047_v7  ;;  %v1971_v7 = vpack.c.bf16 %v1671_v11, %v1669_v10  ;;  %v1680_v2 = vld [vmem:[%s3457_s0 + $0x420] sm:$0xff]  ;;  %v1783_v10 = vld [vmem:[%s3457_s0 + $0x738] sm:$0xff]  ;;  %v1685_v11 = vld [vmem:[%s3457_s0 + $0x448] sm:$0xff] }
  0x60   : > { %1954 = vmatpush1.bf16.msra.mxu1 %v1953_v16  ;;  %1091 = vmatprep.mubr.f32.mxu1 %v1741_v30  ;;  %v1766_v16 = vld [vmem:[%s3457_s0 + $0x6b0] sm:$0xff]  ;;  %v584_v30 = vsel %vm480_vm1, %v582_v29, %v2348_v0  ;;  %v1684_v23 = vld [vmem:[%s3457_s0 + $0x440] sm:$0xff]  ;;  %v1691_v29 = vld [vmem:[%s3457_s0 + $0x478] sm:$0xff] }
  0x61   : > { %1956 = vmatprep.subr.bf16.mxu1 %v1955_v19  ;;  %v1668_v19 = vld [vmem:[%s3457_s0 + $0x3c0] sm:$0xff] }
  0x62   : > { %2050 = vmatpush1.bf16.msra.mxu0 %v2049_v31  ;;  %v2065_v31 = vpack.c.bf16 %v1766_v16, %v1764_v15  ;;  %v2077_v15 = vpack.c.bf16 %v1778_v61, %v1776_v60  ;;  %v1985_v16 = vpack.c.bf16 %v1682_v4, %v1680_v2  ;;  %v1792_v57 = vld [vmem:[%s3457_s0 + $0x780] sm:$0xff]  ;;  %v1797_v61 = vld [vmem:[%s3457_s0 + $0x7a8] sm:$0xff]  ;;  %v1703_v4 = vld [vmem:[%s3457_s0 + $0x4d8] sm:$0xff] }
  0x63   : > { %2052 = vmatprep.subr.bf16.mxu0 %v2051_v36  ;;  %v585_v36 = vrot.slane %v584_v30, 7  ;;  %v1701_v2 = vld [vmem:[%s3457_s0 + $0x4c8] sm:$0xff]  ;;  %v1816_v22 = vld [vmem:[%s3457_s0 + $0x840] sm:$0xff] }
  0x64   : > { %1958 = vmatpush1.bf16.msra.mxu1 %v1957_v32  ;;  %v1973_v32 = vpack.c.bf16 %v1670_v20, %v1668_v19 }
  0x65   : > { %1960 = vmatprep.subr.bf16.mxu1 %v1959_v8  ;;  %v1975_v8 = vpack.c.bf16 %v1675_v26, %v1673_v24  ;;  %587 = vst [vmem:[#allocation16] sm:$0xff] %v585_v36  ;;  %v1686_v24 = vld [vmem:[%s3457_s0 + $0x450] sm:$0xff]  ;;  %v1689_v26 = vld [vmem:[%s3457_s0 + $0x468] sm:$0xff] }
  0x66   : > { %2054 = vmatpush1.bf16.msra.mxu0 %v2053_v43  ;;  %v2069_v43 = vpack.c.bf16 %v1770_v34, %v1768_v33  ;;  %v1786_v33 = vld [vmem:[%s3457_s0 + $0x750] sm:$0xff]  ;;  %v1991_v36 = vpack.c.bf16 %v1691_v29, %v1689_v26  ;;  %v1800_v26 = vld [vmem:[%s3457_s0 + $0x7c0] sm:$0xff] }
  0x67   : > { %2056 = vmatprep.subr.bf16.mxu0 %v2055_v47  ;;  %v2071_v47 = vpack.c.bf16 %v1775_v40, %v1773_v37  ;;  %v1791_v37 = vld [vmem:[%s3457_s0 + $0x778] sm:$0xff]  ;;  %v1802_v29 = vld [vmem:[%s3457_s0 + $0x7d0] sm:$0xff] }
  0x68   : > { %1962 = vmatpush1.bf16.msra.mxu1 %v1961_v44  ;;  %v1977_v44 = vpack.c.bf16 %v1674_v39, %v1672_v38  ;;  %v1693_v38 = vld [vmem:[%s3457_s0 + $0x488] sm:$0xff]  ;;  %v1695_v39 = vld [vmem:[%s3457_s0 + $0x498] sm:$0xff] }
  0x69   : > { %1964 = vmatprep.subr.bf16.mxu1 %v1963_v48  ;;  %v1979_v48 = vpack.c.bf16 %v1679_v42, %v1677_v41  ;;  %v1788_v42 = vld [vmem:[%s3457_s0 + $0x760] sm:$0xff] }
  0x6a   : > { %2058 = vmatpush1.bf16.msra.mxu0 %v2057_v58  ;;  %v2073_v58 = vpack.c.bf16 %v1774_v46, %v1772_v45  ;;  %v1995_v45 = vpack.c.bf16 %v1695_v39, %v1693_v38  ;;  %v1793_v46 = vld [vmem:[%s3457_s0 + $0x788] sm:$0xff]  ;;  %v1804_v39 = vld [vmem:[%s3457_s0 + $0x7e0] sm:$0xff] }
  0x6b   : > { %2060 = vmatprep.subr.bf16.mxu0 %v2059_v51  ;;  %v1781_v51 = vld [vmem:[%s3457_s0 + $0x728] sm:$0xff] }
  0x6c   : > { %1966 = vmatpush1.bf16.msra.mxu1 %v1965_v59  ;;  %v1981_v59 = vpack.c.bf16 %v1678_v53, %v1676_v50  ;;  %v3116_v6 = vld [vmem:[#allocation16] sm:$0x3f]  ;;  %v2079_v19 = vpack.c.bf16 %v1783_v10, %v1781_v51  ;;  %v1697_v50 = vld [vmem:[%s3457_s0 + $0x4a8] sm:$0xff]  ;;  %v1699_v53 = vld [vmem:[%s3457_s0 + $0x4b8] sm:$0xff] }
  0x6d   : > { %1968 = vmatprep.subr.bf16.mxu1 %v1967_v62  ;;  %v2075_v62 = vpack.c.bf16 %v1779_v54, %v1777_v49  ;;  %v1795_v49 = vld [vmem:[%s3457_s0 + $0x798] sm:$0xff]  ;;  %v1999_v60 = vpack.c.bf16 %v1699_v53, %v1697_v50  ;;  %v1696_v51 = vld [vmem:[%s3457_s0 + $0x4a0] sm:$0xff] }
  0x6e   : > { %2062 = vmatpush1.bf16.msra.mxu0 %v2061_v12  ;;  %v1687_v12 = vld [vmem:[%s3457_s0 + $0x458] sm:$0xff] }
  0x6f   : > { %2064 = vmatprep.subr.bf16.mxu0 %v2063_v18  ;;  %v1782_v18 = vld [vmem:[%s3457_s0 + $0x730] sm:$0xff]  ;;  %v1987_v20 = vpack.c.bf16 %v1687_v12, %v1685_v11  ;;  %v1796_v12 = vld [vmem:[%s3457_s0 + $0x7a0] sm:$0xff] }
  0x70   : > { %1970 = vmatpush1.bf16.msra.mxu1 %v1969_v13  ;;  %v645_v13 = vrot.slane %v3116_v6, 2  ;;  %v2081_v30 = vpack.c.bf16 %v1782_v18, %v1780_v17  ;;  %v2003_v17 = vpack.c.bf16 %v1703_v4, %v1701_v2  ;;  %v1801_v18 = vld [vmem:[%s3457_s0 + $0x7c8] sm:$0xff]  ;;  %v1822_v4 = vld [vmem:[%s3457_s0 + $0x870] sm:$0xff] }
  0x71   : > { %1972 = vmatprep.subr.bf16.mxu1 %v1971_v7 }
  0x72   : > { %2066 = vmatpush1.bf16.msra.mxu0 %v2065_v31  ;;  %v1020_v7 = vcombine.low %v644_v28, %v645_v13  ;;  %v1787_v28 = vld [vmem:[%s3457_s0 + $0x758] sm:$0xff]  ;;  %v1989_v31 = vpack.c.bf16 %v1686_v24, %v1684_v23 }
  0x73   : > { %2068 = vmatprep.subr.bf16.mxu0 %v2067_v5  ;;  %v2083_v34 = vpack.c.bf16 %v1787_v28, %v1785_v21  ;;  %v1688_v5 = vld [vmem:[%s3457_s0 + $0x460] sm:$0xff]  ;;  %v1705_v21 = vld [vmem:[%s3457_s0 + $0x4e8] sm:$0xff]  ;;  %v1707_v23 = vld [vmem:[%s3457_s0 + $0x4f8] sm:$0xff] }
  0x74   : > { %1974 = vmatpush1.bf16.msra.mxu1 %v1973_v32  ;;  %1175 = vmatmul.mubr.f32.gmra.mrb[6].mxu0 %v1020_v7  ;;  %v1784_v32 = vld [vmem:[%s3457_s0 + $0x740] sm:$0xff] }
  0x75   : > { %1976 = vmatprep.subr.bf16.mxu1 %v1975_v8  ;;  %1361 = vmatprep.mubr.f32.mxu0 %v2890_v63  ;;  %v1789_v63 = vld [vmem:[%s3457_s0 + $0x768] sm:$0xff]  ;;  %v1690_v8 = vld [vmem:[%s3457_s0 + $0x470] sm:$0xff]  ;;  %v2085_v40 = vpack.c.bf16 %v1786_v33, %v1784_v32  ;;  %v1700_v7 = vld [vmem:[%s3457_s0 + $0x4c0] sm:$0xff] }
  0x76   : > { %2070 = vmatpush1.bf16.msra.mxu0 %v2069_v43  ;;  %v1993_v41 = vpack.c.bf16 %v1690_v8, %v1688_v5  ;;  %v1790_v43 = vld [vmem:[%s3457_s0 + $0x770] sm:$0xff]  ;;  %v1805_v32 = vld [vmem:[%s3457_s0 + $0x7e8] sm:$0xff]  ;;  %v1704_v33 = vld [vmem:[%s3457_s0 + $0x4e0] sm:$0xff]  ;;  %v2101_v8 = vpack.c.bf16 %v1802_v29, %v1800_v26 }
  0x77   : > { %2072 = vmatprep.subr.bf16.mxu0 %v2071_v47  ;;  %v1692_v47 = vld [vmem:[%s3457_s0 + $0x480] sm:$0xff]  ;;  %v2089_v54 = vpack.c.bf16 %v1790_v43, %v1788_v42  ;;  %v1811_v5 = vld [vmem:[%s3457_s0 + $0x818] sm:$0xff] }
  0x78   : > { %1978 = vmatpush1.bf16.msra.mxu1 %v1977_v44  ;;  %v2087_v44 = vpack.c.bf16 %v1791_v37, %v1789_v63  ;;  %v1809_v63 = vld [vmem:[%s3457_s0 + $0x808] sm:$0xff]  ;;  %v1808_v43 = vld [vmem:[%s3457_s0 + $0x800] sm:$0xff] }
  0x79   : > { %1980 = vmatprep.subr.bf16.mxu1 %v1979_v48  ;;  %v1694_v48 = vld [vmem:[%s3457_s0 + $0x490] sm:$0xff]  ;;  %v3277_v37 = vld [vmem:[#allocation16 + $0x8] sm:$0x3f]  ;;  %v2107_v42 = vpack.c.bf16 %v1811_v5, %v1809_v63  ;;  %v1832_v29 = vld [vmem:[%s3457_s0 + $0x8c0] sm:$0xff] }
  0x7a   : > { %2074 = vmatpush1.bf16.msra.mxu0 %v2073_v58  ;;  %v1997_v56 = vpack.c.bf16 %v1694_v48, %v1692_v47  ;;  %v1794_v58 = vld [vmem:[%s3457_s0 + $0x790] sm:$0xff]  ;;  %v1815_v47 = vld [vmem:[%s3457_s0 + $0x838] sm:$0xff]  ;;  %v640_v50 = vrot.slane %v3277_v37, 1  ;;  %v646_v5 = vrot.slane %v3277_v37, 2 }
  0x7b   : > { %2076 = vmatprep.subr.bf16.mxu0 %v2075_v62  ;;  %v1698_v62 = vld [vmem:[%s3457_s0 + $0x4b0] sm:$0xff]  ;;  %v2093_v10 = vpack.c.bf16 %v1794_v58, %v1792_v57  ;;  %v1742_v58 = vcombine.low %v2818_v25, %v3116_v6 }
  0x7c   : > { %1982 = vmatpush1.bf16.msra.mxu1 %v1981_v59  ;;  %v2091_v59 = vpack.c.bf16 %v1795_v49, %v1793_v46  ;;  %v2001_v11 = vpack.c.bf16 %v1698_v62, %v1696_v51  ;;  %v1813_v46 = vld [vmem:[%s3457_s0 + $0x828] sm:$0xff]  ;;  %v1814_v57 = vld [vmem:[%s3457_s0 + $0x830] sm:$0xff]  ;;  %v1823_v62 = vld [vmem:[%s3457_s0 + $0x878] sm:$0xff] }
  0x7d   : > { %1984 = vmatprep.subr.bf16.mxu1 %v1983_v1  ;;  %v1799_v1 = vld [vmem:[%s3457_s0 + $0x7b8] sm:$0xff]  ;;  %v1818_v25 = vld [vmem:[%s3457_s0 + $0x850] sm:$0xff]  ;;  %v1821_v51 = vld [vmem:[%s3457_s0 + $0x868] sm:$0xff] }
  0x7e   : > { %2078 = vmatpush1.bf16.msra.mxu0 %v2077_v15  ;;  %v1798_v15 = vld [vmem:[%s3457_s0 + $0x7b0] sm:$0xff]  ;;  %v2119_v2 = vpack.c.bf16 %v1823_v62, %v1821_v51 }
  0x7f   : > { %2080 = vmatprep.subr.bf16.mxu0 %v2079_v19  ;;  %v1702_v19 = vld [vmem:[%s3457_s0 + $0x4d0] sm:$0xff]  ;;  %v2097_v24 = vpack.c.bf16 %v1798_v15, %v1796_v12 }
  0x80   : > { %1986 = vmatpush1.bf16.msra.mxu1 %v1985_v16  ;;  %v2095_v16 = vpack.c.bf16 %v1799_v1, %v1797_v61  ;;  %v2005_v28 = vpack.c.bf16 %v1702_v19, %v1700_v7  ;;  %v2117_v1 = vpack.c.bf16 %v1818_v25, %v1816_v22  ;;  %v1838_v63 = vld [vmem:[%s3457_s0 + $0x8f0] sm:$0xff]  ;;  %v1475_v22 = vsub.s32 1, %v2522_v55 }
  0x81   : > { %1988 = vmatprep.subr.bf16.mxu1 %v1987_v20  ;;  %v1803_v20 = vld [vmem:[%s3457_s0 + $0x7d8] sm:$0xff] }
  0x82   : > { %2082 = vmatpush1.bf16.msra.mxu0 %v2081_v30  ;;  %v2099_v30 = vpack.c.bf16 %v1803_v20, %v1801_v18  ;;  %v1829_v18 = vld [vmem:[%s3457_s0 + $0x8a8] sm:$0xff]  ;;  %v1828_v20 = vld [vmem:[%s3457_s0 + $0x8a0] sm:$0xff] }
  0x83   : > { %2084 = vmatprep.subr.bf16.mxu0 %v2083_v34  ;;  %v1706_v34 = vld [vmem:[%s3457_s0 + $0x4f0] sm:$0xff] }
  0x84   : > { %1990 = vmatpush1.bf16.msra.mxu1 %v1989_v31  ;;  %v2007_v31 = vpack.c.bf16 %v1707_v23, %v1705_v21  ;;  %v2009_v38 = vpack.c.bf16 %v1706_v34, %v1704_v33  ;;  %v1830_v21 = vld [vmem:[%s3457_s0 + $0x8b0] sm:$0xff]  ;;  %v1833_v23 = vld [vmem:[%s3457_s0 + $0x8c8] sm:$0xff] }
  0x85   : > { %1992 = vmatprep.subr.bf16.mxu1 %v1991_v36  ;;  %v1807_v36 = vld [vmem:[%s3457_s0 + $0x7f8] sm:$0xff] }
  0x86   : > { %2086 = vmatpush1.bf16.msra.mxu0 %v2085_v40  ;;  %v2103_v40 = vpack.c.bf16 %v1807_v36, %v1805_v32  ;;  %v1839_v32 = vld [vmem:[%s3457_s0 + $0x8f8] sm:$0xff]  ;;  %v1836_v36 = vld [vmem:[%s3457_s0 + $0x8e0] sm:$0xff] }
  0x87   : > { %2088 = vmatprep.subr.bf16.mxu0 %v2087_v44  ;;  %v1810_v44 = vld [vmem:[%s3457_s0 + $0x810] sm:$0xff] }
  0x88   : > { %1994 = vmatpush1.bf16.msra.mxu1 %v1993_v41  ;;  %v1806_v41 = vld [vmem:[%s3457_s0 + $0x7f0] sm:$0xff]  ;;  %v2109_v49 = vpack.c.bf16 %v1810_v44, %v1808_v43 }
  0x89   : > { %1996 = vmatprep.subr.bf16.mxu1 %v1995_v45  ;;  %v639_v45 = vrot.slane %v3116_v6, 1  ;;  %v2105_v48 = vpack.c.bf16 %v1806_v41, %v1804_v39 }
  0x8a   : > { %2090 = vmatpush1.bf16.msra.mxu0 %v2089_v54  ;;  %v2111_v54 = vpack.c.bf16 %v1815_v47, %v1813_v46 }
  0x8b   : > { %2092 = vmatprep.subr.bf16.mxu0 %v2091_v59  ;;  %v1743_v53 = vcombine.low %v638_v52, %v639_v45  ;;  %v1817_v52 = vld [vmem:[%s3457_s0 + $0x848] sm:$0xff]  ;;  %v1819_v59 = vld [vmem:[%s3457_s0 + $0x858] sm:$0xff] }
  0x8c   : > { %1998 = vmatpush1.bf16.msra.mxu1 %v1997_v56  ;;  %v1812_v56 = vld [vmem:[%s3457_s0 + $0x820] sm:$0xff]  ;;  %v2115_v3 = vpack.c.bf16 %v1819_v59, %v1817_v52 }
  0x8d   : > { %2000 = vmatprep.subr.bf16.mxu1 %v1999_v60  ;;  %v1841_v60 = vcombine.low %v639_v45, %v640_v50  ;;  %v2113_v61 = vpack.c.bf16 %v1814_v57, %v1812_v56 }
  0x8e   : > { %2094 = vmatpush1.bf16.msra.mxu0 %v2093_v10  ;;  %v1825_v10 = vld [vmem:[%s3457_s0 + $0x888] sm:$0xff] }
  0x8f   : > { %2096 = vmatprep.subr.bf16.mxu0 %v2095_v16  ;;  %v1824_v16 = vld [vmem:[%s3457_s0 + $0x880] sm:$0xff] }
  0x90   : > { %2002 = vmatpush1.bf16.msra.mxu1 %v2001_v11  ;;  %v1827_v11 = vld [vmem:[%s3457_s0 + $0x898] sm:$0xff] }
  0x91   : > { %2004 = vmatprep.subr.bf16.mxu1 %v2003_v17  ;;  %v2123_v15 = vpack.c.bf16 %v1827_v11, %v1825_v10  ;;  %v1826_v17 = vld [vmem:[%s3457_s0 + $0x890] sm:$0xff] }
  0x92   : > { %2098 = vmatpush1.bf16.msra.mxu0 %v2097_v24  ;;  %v2125_v7 = vpack.c.bf16 %v1826_v17, %v1824_v16  ;;  %v1835_v24 = vld [vmem:[%s3457_s0 + $0x8d8] sm:$0xff] }
  0x93   : > { %2100 = vmatprep.subr.bf16.mxu0 %v2099_v30  ;;  %v2131_v26 = vpack.c.bf16 %v1835_v24, %v1833_v23  ;;  %v1834_v30 = vld [vmem:[%s3457_s0 + $0x8d0] sm:$0xff] }
  0x94   : > { %2006 = vmatpush1.bf16.msra.mxu1 %v2005_v28  ;;  %v2129_v28 = vpack.c.bf16 %v1830_v21, %v1828_v20  ;;  %v2133_v33 = vpack.c.bf16 %v1834_v30, %v1832_v29 }
  0x95   : > { %2008 = vmatprep.subr.bf16.mxu1 %v2007_v31  ;;  %v1837_v31 = vld [vmem:[%s3457_s0 + $0x8e8] sm:$0xff] }
  0x96   : > { %2102 = vmatpush1.bf16.msra.mxu0 %v2101_v8  ;;  %v2135_v34 = vpack.c.bf16 %v1839_v32, %v1837_v31  ;;  %v2137_v8 = vpack.c.bf16 %v1838_v63, %v1836_v36 }
  0x97   : > { %2104 = vmatprep.subr.bf16.mxu0 %v2103_v40 }
  0x98   : > { %2010 = vmatpush1.bf16.msra.mxu1 %v2009_v38  ;;  %v1293_v38 = vcombine.low %v645_v13, %v646_v5 }
  0x99   : > { %2139 = vmatprep.subr.bf16.mxu1 %v2107_v42 }
  0x9a   : > { %2106 = vmatpush1.bf16.msra.mxu0 %v2105_v48 }
  0x9b   : > { %1092 = vmatmul.mubr.f32.vlgmr.msra.gmra.mrb[4].mxu1 %v1740_v27  ;;  %2108 = vmatprep.subr.bf16.mxu0 %v2107_v42  ;;  %v1840_v27 = vcombine.low %v3116_v6, %v3277_v37 }
  0x9c   : > { %2147 = vmatpush1.bf16.msra.mxu1 %v2109_v49  ;;  %1097 = vmatprep.mubr.f32.mxu1 %v1743_v53 }
  0x9d   : > { %2140 = vmatprep.subr.bf16.mxu1 %v2111_v54  ;;  %1362 = vmatmul.mubr.f32.vlgmr.msra.gmra.mrb[4].mxu0 %v2914_v14  ;;  %v1820_v14 = vld [vmem:[%s3457_s0 + $0x860] sm:$0xff] }
  0x9e   : > { %2110 = vmatpush1.bf16.msra.mxu0 %v2109_v49  ;;  %1367 = vmatprep.mubr.f32.mxu0 %v1841_v60  ;;  %v2121_v12 = vpack.c.bf16 %v1822_v4, %v1820_v14 }
  0x9f   : > { %1098 = vmatmul.mubr.f32.gmra.mrb[6].mxu1 %v1742_v58  ;;  %2112 = vmatprep.subr.bf16.mxu0 %v2111_v54 }
  0xa0   : > { %2148 = vmatpush1.bf16.msra.mxu1 %v2113_v61  ;;  %1444 = vmatprep.mubr.f32.mxu1 %v2316_v9 }
  0xa1   : > { %2141 = vmatprep.subr.bf16.mxu1 %v2115_v3  ;;  %1368 = vmatmul.mubr.f32.gmra.mrb[6].mxu0 %v1840_v27 }
  0xa2   : > { %2114 = vmatpush1.bf16.msra.mxu0 %v2113_v61  ;;  %1438 = vmatprep.mubr.f32.mxu0 %v2316_v9  ;;  %v1831_v9 = vld [vmem:[%s3457_s0 + $0x8b8] sm:$0xff]  ;;  %v1471_v61 = vsub.s32 0, %v2522_v55 }
  0xa3   : > { %2116 = vmatprep.subr.bf16.mxu0 %v2115_v3  ;;  %v2127_v19 = vpack.c.bf16 %v1831_v9, %v1829_v18  ;;  %v1467_v3 = vld [vmem:[%s3458_s1] sm:$0x3] }
  0xa4   : > { %2149 = vmatpush1.bf16.msra.mxu1 %v2117_v1  ;;  %v1472_v25 = vrot.slane %v1467_v3, %v1471_v61  ;;  %v1476_v51 = vrot.slane %v1467_v3, %v1475_v22 }
  0xa5   : > { %2142 = vmatprep.subr.bf16.mxu1 %v2119_v2 }
  0xa6   : > { %2118 = vmatpush1.bf16.msra.mxu0 %v2117_v1 }
  0xa7   : > { %2120 = vmatprep.subr.bf16.mxu0 %v2119_v2 }
  0xa8   : > { %2150 = vmatpush1.bf16.msra.mxu1 %v2121_v12 }
  0xa9   : > { %2143 = vmatprep.subr.bf16.mxu1 %v2123_v15 }
  0xaa   : > { %2122 = vmatpush1.bf16.msra.mxu0 %v2121_v12 }
  0xab   : > { %2124 = vmatprep.subr.bf16.mxu0 %v2123_v15 }
  0xac   : > { %2151 = vmatpush1.bf16.msra.mxu1 %v2125_v7 }
  0xad   : > { %2144 = vmatprep.subr.bf16.mxu1 %v2127_v19 }
  0xae   : > { %2126 = vmatpush1.bf16.msra.mxu0 %v2125_v7 }
  0xaf   : > { %2128 = vmatprep.subr.bf16.mxu0 %v2127_v19 }
  0xb0   : > { %2152 = vmatpush1.bf16.msra.mxu1 %v2129_v28 }
  0xb1   : > { %2145 = vmatprep.subr.bf16.mxu1 %v2131_v26 }
  0xb2   : > { %2130 = vmatpush1.bf16.msra.mxu0 %v2129_v28 }
  0xb3   : > { %2132 = vmatprep.subr.bf16.mxu0 %v2131_v26 }
  0xb4   : > { %2153 = vmatpush1.bf16.msra.mxu1 %v2133_v33 }
  0xb5   : > { %2146 = vmatprep.subr.bf16.mxu1 %v2135_v34 }
  0xb6   : > { %2134 = vmatpush1.bf16.msra.mxu0 %v2133_v33 }
  0xb7   : > { %2136 = vmatprep.subr.bf16.mxu0 %v2135_v34 }
  0xb8   : > { %2154 = vmatpush1.bf16.msra.mxu1 %v2137_v8 }
  0xba   : > { %2138 = vmatpush1.bf16.msra.mxu0 %v2137_v8 }
  0xbb   : > { %1445 = vmatmul.mubr.f32.vlgmr.msra.gmra.mrb[8].mxu1 %v1293_v38 }
  0xbd   : > { %1439 = vmatmul.mubr.f32.vlgmr.msra.gmra.mrb[4].mxu0 %v2832_v35 }
 0x10f   : > { %v902_v39 = vpop.f32.mrb[0].mxu0 }
 0x110   : > { %v904_v40 = vpop.f32.mrb[1].mxu0 }
 0x11e   : > { %v908_v41 = vpop.f32.mrb[2].mxu0 }
 0x11f   : > { %v910_v42 = vpop.f32.mrb[3].mxu0 }
 0x12e   : > { %v825_v37 = vpop.f32.mrb[0].mxu1 }
 0x12f   : > { %v903_v43 = vadd.f32 %v902_v39, %v825_v37  ;;  %v827_v44 = vpop.f32.mrb[1].mxu1 }
 0x130   : > { %v905_v45 = vadd.f32 %v904_v40, %v827_v44 }
 0x132   : > { %v831_v46 = vpop.f32.mrb[2].mxu1 }
 0x133   : > { %v909_v47 = vadd.f32 %v908_v41, %v831_v46  ;;  %v833_v48 = vpop.f32.mrb[3].mxu1 }
 0x134   : > { %v911_v6 = vadd.f32 %v910_v42, %v833_v48 }
 0x16e   : > { %v1093_v13 = vpop.f32.mrb[4].mxu1 }
 0x16f   : > { %v2156_v49 = vadd.f32 %v1093_v13, %v903_v43  ;;  %v1095_v50 = vpop.f32.mrb[5].mxu1 }
 0x170   : > { %v2159_v53 = vadd.f32 %v1095_v50, %v905_v45 }
 0x172   : > { %v1099_v54 = vpop.f32.mrb[6].mxu1 }
 0x173   : > { %v2162_v35 = vadd.f32 %v1099_v54, %v909_v47  ;;  %v1101_v56 = vpop.f32.mrb[7].mxu1 }
 0x174   : > { %v2166_v57 = vadd.f32 %v1101_v56, %v911_v6  ;;  %v1369_v58 = vpop.f32.mrb[6].mxu0 }
 0x175   : > { %v2163_v52 = vadd.f32 %v2162_v35, %v1369_v58  ;;  %v1371_v59 = vpop.f32.mrb[7].mxu0 }
 0x176   : > { %v2167_v60 = vadd.f32 %v2166_v57, %v1371_v59 }
 0x18e   : > { %v1446_v27 = vpop.f32.mrb[8].mxu1 }
 0x18f   : > { %v2164_v62 = vadd.f32 %v2163_v52, %v1446_v27  ;;  %v1448_v1 = vpop.f32.mrb[9].mxu1 }
 0x190   : > { %v2168_v2 = vadd.f32 %v2167_v60, %v1448_v1  ;;  %v1440_v14 = vpop.f32.mrb[4].mxu0 }
 0x191   : > { %v1481_v4 = vadd.f32 %v2164_v62, %v1472_v25  ;;  %v2157_v10 = vadd.f32 %v2156_v49, %v1440_v14  ;;  %v1442_v11 = vpop.f32.mrb[5].mxu0 }
 0x192   : > { %v1482_v12 = vadd.f32 %v2168_v2, %v1476_v51  ;;  %v2160_v15 = vadd.f32 %v2159_v53, %v1442_v11 }
 0x193   : > { %v1479_v55 = vadd.f32 %v2157_v10, %v1472_v25 }
 0x194   : > { %v1497_v16 = vcombine.low %v1481_v4, %v1482_v12  ;;  %v1498_v17 = vcombine.high %v1481_v4, %v1482_v12  ;;  %v1480_v18 = vadd.f32 %v2160_v15, %v1476_v51 }
 0x196   : > { %1505 = vst [vmem:[%s343_s8 + $0x10] sm:$0xff] %v1497_v16  ;;  %1506 = vst [vmem:[%s343_s8 + $0x18] sm:$0xff] %v1498_v17  ;;  %v1495_v9 = vcombine.low %v1479_v55, %v1480_v18  ;;  %v1496_v7 = vcombine.high %v1479_v55, %v1480_v18 }
 0x198   : > { %1503 = vst [vmem:[%s343_s8] sm:$0xff] %v1495_v9  ;;  %1504 = vst [vmem:[%s343_s8 + $0x8] sm:$0xff] %v1496_v7 }
 0x199   : > { %2249 = shalt.err (!%p2246_p5)
}
 0x19a   : > { %s2250_s23 = scalar_lea.hbm %s3407_s30, 512  ;;  %s2254_s6 = scalar_lea.hbm %s3461_s4, 1024 }
 0x19b   : > { %p2251_p6 = scmp.ne.s32.totalorder %s3407_s30, %s2250_s23  ;;  %p2255_p10 = scmp.lt.u32.totalorder %s3407_s30, %s3461_s4 }
 0x19c   : > { %p2256_p11 = scmp.lt.u32.totalorder %s2254_s6, %s2250_s23  ;;  %p2258_p13 = scmp.lt.u32.totalorder %s2250_s23, %s3407_s30 }
 0x19d   : > { %p2252_p7 = pnand %p2251_p6, %p2390_p4 }
 0x19e   : > { %p2257_p12 = por %p2256_p11, %p2255_p10 }
 0x19f   : > { %p2253_p9 = pneg %p2252_p7 }
 0x1a0   : > { %p2259_p0 = por %p2258_p13, %p2257_p12 }
 0x1a2   : > { %p2260_p1 = pnand %p2259_p0, %p2253_p9 }
 0x1a4   : > { %2263 = shalt.err (!%p2260_p1)
}
 0x1a5   : > { %s2318_s15 = smov 128   ;;  %s2319_s8 = smov 8  }
 0x1a6   : > { %2175 = dma.vmem_to_hbm [thread:$0]  (%p2390_p4), %s3402_s9, 512, %s3407_s30, %s3411_s20, %s2318_s15, %s2318_s15, %s2319_s8  }
 0x1a7 PF: > { %p2181_p2 = scmp.ge.s32.totalorder %s2314_s22, 2  ;;  %s1539_s10 = sand.u32 1, %s2294_s17  }
 0x1a8   : > { %s1540_s12 = scalar_lea.sflag [#allocation14], %s1539_s10 }
 0x1a9   : > { %p2178_p3 = pnand %p2181_p2, %p2397_p8 }
 0x1ab   : > { %2289 = dma.done.wait (!%p2178_p3), %s1540_s12, 512  }
 0x1ac   : > { %2291 = vsyncadd (!%p2178_p3), %s1540_s12, 4294966784  ;;  %s19_s22 = sadd.s32 1, %s2314_s22   ;;  %s3464_s17 = smov %s2298_s18 }
 0x1ad   : > { %p16_p5 = scmp.ge.s32.totalorder %s19_s22, 4   ;;  %s3465_s18 = smov %s2302_s19 }
 0x1ae   : > { %s3466_s19 = smov %s2403_s29  ;;  %s3467_s20 = smov %s2310_s21 }
 0x1af   : > { %s3468_s21 = smov %s3470_s24  ;;  %18 = sbr.rel (!%p16_p5) target bundleno = 6 (0x6), region = 88 }
 0x1b6   :  { %1545 = vsyncpa [#allocation14], 1 }
 0x1b7   :  { %1547 = vsyncpa [#allocation14 + $0x1], 1 }

</bundles_post_ra>
